<compile_context>
chip_gen: v7x
topology: tpu7x:2x2x1
jax: 0.10.0
libtpu: 0.0.40
codegen_flags: <defaults>
</compile_context>

<pallas_src>
import functools

import jax
import jax.numpy as jnp
from jax import lax
from jax.experimental import pallas as pl
from jax.experimental.pallas import tpu as pltpu


# ----------------------------------------------------------------------------
# Fused conv stack: 3x (3x3 conv, padding=1, ReLU).  One grid step per batch
# element; all intermediates stay in VMEM.  Each conv is computed as 9 shifted
# matmuls accumulated in f32 (PyTorch cross-correlation convention).
# ----------------------------------------------------------------------------
# The padded scratch puts the interior at sublane offset 8 along the W axis so
# the interior store is sublane-aligned; halo columns live at 7 and 8+W.
_SUB_OFF = 8


def conv_stack_kernel(x_ref, cw1_ref, cb1_ref, cw2_ref, cb2_ref,
                      cw3_ref, cb3_ref, o_ref, pad1, pad2, pad3, *, H, W):
    # x_ref : (1, H, W, C0)          NHWC input tile (one batch element)
    # cw*   : (9, Cin, Cout)         3x3 taps flattened row-major (kh*3 + kw)
    # cb*   : (1, Cout)
    # o_ref : (1, H*W, 64)           features, rows in (H, W) order, C last
    # pad*  : (H+2, W+_SUB_OFF+1, C) zero-padded activation scratch (VMEM)

    def conv3x3_relu(pad_ref, w_ref, b_ref):
        cin = pad_ref.shape[-1]
        cout = w_ref.shape[-1]
        acc = jnp.zeros((H * W, cout), jnp.float32)
        for t in range(9):
            kh, kw = divmod(t, 3)
            patch = pad_ref[kh:kh + H,
                            _SUB_OFF - 1 + kw:_SUB_OFF - 1 + kw + W,
                            :].reshape(H * W, cin)
            acc = acc + jnp.dot(patch, w_ref[t],
                                preferred_element_type=jnp.float32)
        return jnp.maximum(acc + b_ref[...], 0.0)          # (H*W, cout)

    def set_interior(pad_ref, val_hwc):
        pad_ref[...] = jnp.zeros(pad_ref.shape, pad_ref.dtype)
        pad_ref[1:H + 1, _SUB_OFF:_SUB_OFF + W, :] = val_hwc

    # Layer 1 (in-kernel zero-padded halo; no jnp.pad / HBM copies).
    set_interior(pad1, x_ref[0])
    y = conv3x3_relu(pad1, cw1_ref, cb1_ref)               # (H*W, 32)

    # Layer 2 -- intermediate stays in VMEM.
    set_interior(pad2, y.reshape(H, W, 32))
    y = conv3x3_relu(pad2, cw2_ref, cb2_ref)               # (H*W, 64)

    # Layer 3.
    set_interior(pad3, y.reshape(H, W, 64))
    y = conv3x3_relu(pad3, cw3_ref, cb3_ref)               # (H*W, 64)

    # Features kept in (H, W, C)-major order; fc1 weight rows are permuted to
    # match at init time, so no flatten transpose is needed downstream.
    o_ref[...] = y.reshape(1, H * W, 64)


def conv_features(x_nhwc, cw1, cb1, cw2, cb2, cw3, cb3):
    B, H, W, C0 = x_nhwc.shape
    kernel = functools.partial(conv_stack_kernel, H=H, W=W)
    pad_cols = W + _SUB_OFF + 1
    return pl.pallas_call(
        kernel,
        out_shape=jax.ShapeDtypeStruct((B, H * W, 64), jnp.float32),
        grid_spec=pltpu.PrefetchScalarGridSpec(
            num_scalar_prefetch=0,
            grid=(B,),
            in_specs=[
                pl.BlockSpec((1, H, W, C0), lambda b: (b, 0, 0, 0)),
                pl.BlockSpec((9, C0, 32), lambda b: (0, 0, 0)),
                pl.BlockSpec((1, 32), lambda b: (0, 0)),
                pl.BlockSpec((9, 32, 64), lambda b: (0, 0, 0)),
                pl.BlockSpec((1, 64), lambda b: (0, 0)),
                pl.BlockSpec((9, 64, 64), lambda b: (0, 0, 0)),
                pl.BlockSpec((1, 64), lambda b: (0, 0)),
            ],
            out_specs=pl.BlockSpec((1, H * W, 64), lambda b: (b, 0, 0)),
            scratch_shapes=[
                pltpu.VMEM((H + 2, pad_cols, C0), jnp.float32),
                pltpu.VMEM((H + 2, pad_cols, 32), jnp.float32),
                pltpu.VMEM((H + 2, pad_cols, 64), jnp.float32),
            ],
        ),
        compiler_params=pltpu.CompilerParams(
            dimension_semantics=("parallel",)),
    )(x_nhwc, cw1, cb1, cw2, cb2, cw3, cb3)


# ----------------------------------------------------------------------------
# fc1 + ReLU.  Grid = (n_split, K//tk): axis 0 splits the 512 output columns
# ("parallel" -> both v7x TensorCores stream disjoint halves of the bf16
# weight concurrently); axis 1 tiles the K=64*H*W contraction ("arbitrary").
# ----------------------------------------------------------------------------
def fc1_kernel(x_ref, w_ref, b_ref, o_ref, acc_ref):
    k = pl.program_id(1)

    @pl.when(k == 0)
    def _():
        acc_ref[...] = jnp.zeros_like(acc_ref)

    acc_ref[...] += jnp.dot(x_ref[...].astype(jnp.bfloat16), w_ref[...],
                            preferred_element_type=jnp.float32)

    @pl.when(k == pl.num_programs(1) - 1)
    def _():
        o_ref[...] = jnp.maximum(acc_ref[...] + b_ref[...], 0.0)


def _choose_tk(K, cap=4096):
    # Largest lane-aligned divisor of K not exceeding cap (keeps bf16 weight
    # blocks <= 2 MiB so double-buffering fits comfortably even in v7x VMEM).
    for tk in range(min(cap, K), 0, -1):
        if K % tk == 0 and tk % 128 == 0:
            return tk
    return K


def fc1_relu(feats, w1_bf16, b1, *, n_split=2):
    B, K = feats.shape
    H1 = w1_bf16.shape[1]
    assert H1 % n_split == 0
    tn = H1 // n_split
    tk = _choose_tk(K)
    return pl.pallas_call(
        fc1_kernel,
        out_shape=jax.ShapeDtypeStruct((B, H1), jnp.float32),
        grid_spec=pltpu.PrefetchScalarGridSpec(
            num_scalar_prefetch=0,
            grid=(n_split, K // tk),
            in_specs=[
                pl.BlockSpec((B, tk), lambda n, k: (0, k)),
                pl.BlockSpec((tk, tn), lambda n, k: (k, n)),
                pl.BlockSpec((1, tn), lambda n, k: (0, n)),
            ],
            out_specs=pl.BlockSpec((B, tn), lambda n, k: (0, n)),
            scratch_shapes=[pltpu.VMEM((B, tn), jnp.float32)],
        ),
        compiler_params=pltpu.CompilerParams(
            dimension_semantics=("parallel", "arbitrary")),
    )(feats, w1_bf16, b1)


# ----------------------------------------------------------------------------
# Policy head: fc2 -> ReLU -> policy_head -> softmax(dim=1).  Tiny, single
# grid step, everything resident in VMEM.
# ----------------------------------------------------------------------------
def head_kernel(h1_ref, w2_ref, b2_ref, w3_ref, b3_ref, o_ref):
    h2 = jnp.maximum(
        jnp.dot(h1_ref[...], w2_ref[...], preferred_element_type=jnp.float32)
        + b2_ref[...], 0.0)
    logits = jnp.dot(h2, w3_ref[...],
                     preferred_element_type=jnp.float32) + b3_ref[...]
    m = jnp.max(logits, axis=1, keepdims=True)
    e = jnp.exp(logits - m)
    o_ref[...] = e / jnp.sum(e, axis=1, keepdims=True)


def policy_head(h1, w2, b2, w3, b3):
    B, H1 = h1.shape
    H2, A = w2.shape[1], w3.shape[1]
    return pl.pallas_call(
        head_kernel,
        out_shape=jax.ShapeDtypeStruct((B, A), jnp.float32),
        grid_spec=pltpu.PrefetchScalarGridSpec(
            num_scalar_prefetch=0,
            grid=(1,),
            in_specs=[
                pl.BlockSpec((B, H1), lambda i: (0, 0)),
                pl.BlockSpec((H1, H2), lambda i: (0, 0)),
                pl.BlockSpec((1, H2), lambda i: (0, 0)),
                pl.BlockSpec((H2, A), lambda i: (0, 0)),
                pl.BlockSpec((1, A), lambda i: (0, 0)),
            ],
            out_specs=pl.BlockSpec((B, A), lambda i: (0, 0)),
        ),
    )(h1, w2, b2, w3, b3)


# ----------------------------------------------------------------------------
# Parameters.  Canonical params follow torch semantics (fc1 rows indexed in
# (C, H, W) flatten order, all f32).  prepare_kernel_params does the one-time
# offline transform used by the kernel path: permute fc1 rows to the kernel's
# (H, W, C) feature order and cast fc1 to bf16 (streamed weight; f32 accum).
# ----------------------------------------------------------------------------
def init_actor_params(key, input_shape, action_size):
    C, H, W = input_shape
    flat = 64 * H * W
    ks = jax.random.split(key, 12)

    def w_init(k, fan_in, shape):
        return (jax.random.normal(k, shape, jnp.float32)
                / jnp.sqrt(jnp.float32(fan_in)))

    return {
        # conv weights stored as (9, Cin, Cout); taps flattened row-major.
        "cw1": w_init(ks[0], 9 * C, (9, C, 32)),
        "cb1": w_init(ks[1], 9 * C, (1, 32)),
        "cw2": w_init(ks[2], 9 * 32, (9, 32, 64)),
        "cb2": w_init(ks[3], 9 * 32, (1, 64)),
        "cw3": w_init(ks[4], 9 * 64, (9, 64, 64)),
        "cb3": w_init(ks[5], 9 * 64, (1, 64)),
        # fc weights stored as (in, out); w1 rows in torch (C,H,W) order.
        "w1": w_init(ks[6], flat, (flat, 512)),
        "b1": w_init(ks[7], flat, (1, 512)),
        "w2": w_init(ks[8], 512, (512, 256)),
        "b2": w_init(ks[9], 512, (1, 256)),
        "w3": w_init(ks[10], 256, (256, action_size)),
        "b3": w_init(ks[11], 256, (1, action_size)),
    }


def prepare_kernel_params(params, input_shape):
    _, H, W = input_shape
    h1 = params["w1"].shape[1]
    kp = dict(params)
    # (C,H,W)-major rows -> (H,W,C)-major rows, then bf16 for 2x less HBM.
    w1 = params["w1"].reshape(64, H, W, h1)
    kp["w1"] = jnp.transpose(w1, (1, 2, 0, 3)).reshape(64 * H * W, h1)
    kp["w1"] = kp["w1"].astype(jnp.bfloat16)
    return kp


@jax.jit
def actor_forward(kparams, x_nchw):
    # NCHW (PyTorch convention) -> NHWC for the kernels (tiny boundary op).
    x = jnp.transpose(x_nchw, (0, 2, 3, 1)).astype(jnp.float32)
    B, H, W, _ = x.shape
    feats = conv_features(x, kparams["cw1"], kparams["cb1"],
                          kparams["cw2"], kparams["cb2"],
                          kparams["cw3"], kparams["cb3"])    # (B, H*W, 64)
    feats = feats.reshape(B, H * W * 64)   # contiguous (H,W,C) flatten
    h1 = fc1_relu(feats, kparams["w1"], kparams["b1"])       # (B, 512)
    return policy_head(h1, kparams["w2"], kparams["b2"],
                       kparams["w3"], kparams["b3"])         # (B, A)


# ----------------------------------------------------------------------------
# Pure-JAX reference (torch semantics; fc1 in bf16-weight / f32-accum
# precision to match the kernel's declared weight dtype).
# ----------------------------------------------------------------------------
@jax.jit
def actor_forward_ref(params, x_nchw):
    x = jnp.transpose(x_nchw, (0, 2, 3, 1)).astype(jnp.float32)

    def conv_ref(x, w9, b):
        cin, cout = w9.shape[1], w9.shape[2]
        w = w9.reshape(3, 3, cin, cout)  # HWIO
        y = lax.conv_general_dilated(
            x, w, window_strides=(1, 1), padding="SAME",
            dimension_numbers=("NHWC", "HWIO", "NHWC"))
        return jnp.maximum(y + b.reshape(1, 1, 1, cout), 0.0)

    x = conv_ref(x, params["cw1"], params["cb1"])
    x = conv_ref(x, params["cw2"], params["cb2"])
    x = conv_ref(x, params["cw3"], params["cb3"])
    # torch-style (C, H, W) flatten.
    feats = jnp.transpose(x, (0, 3, 1, 2)).reshape(x.shape[0], -1)
    h1 = jnp.maximum(
        jnp.dot(feats.astype(jnp.bfloat16),
                params["w1"].astype(jnp.bfloat16),
                preferred_element_type=jnp.float32) + params["b1"], 0.0)
    h2 = jnp.maximum(h1 @ params["w2"] + params["b2"], 0.0)
    logits = h2 @ params["w3"] + params["b3"]
    return jax.nn.softmax(logits, axis=1)


if __name__ == "__main__":
    input_shape = (4, 16, 16)   # (C, H, W), PyTorch convention
    action_size = 6
    batch = 2

    key = jax.random.PRNGKey(0)
    k_params, k_x = jax.random.split(key)
    params = init_actor_params(k_params, input_shape, action_size)
    kparams = prepare_kernel_params(params, input_shape)
    x = jax.random.normal(k_x, (batch,) + input_shape, jnp.float32)

    policy = jax.block_until_ready(actor_forward(kparams, x))
    ref = jax.block_until_ready(actor_forward_ref(params, x))

    assert policy.shape == (batch, action_size)
    assert bool(jnp.all(jnp.isfinite(policy)))
    assert bool(jnp.allclose(jnp.sum(policy, axis=1), 1.0, atol=1e-5))
    err = float(jnp.max(jnp.abs(policy - ref)))
    assert bool(jnp.allclose(policy, ref, rtol=2e-3, atol=2e-4)), (
        f"max abs diff {err}")

    # TODO(synk): get_action's Categorical sampling / log_prob is host-side
    # control logic, not part of the kernel hot path, and is left out.
    print("KERNEL_OK")
</pallas_src>

<mosaic_0001>
module attributes {stable_mosaic.version = 11 : i64} {
  func.func @fc1_kernel(%arg0: i32, %arg1: i32, %arg2: memref<2x4096xf32, #tpu.memory_space<vmem>>, %arg3: memref<4096x256xbf16, #tpu.memory_space<vmem>>, %arg4: memref<1x256xf32, #tpu.memory_space<vmem>>, %arg5: memref<2x256xf32, #tpu.memory_space<vmem>>, %arg6: memref<2x256xf32, #tpu.memory_space<vmem>>) attributes {dimension_semantics = [#tpu.dimension_semantics<parallel>, #tpu.dimension_semantics<arbitrary>], iteration_bounds = array<i64: 2, 4>, scalar_prefetch = 0 : i64, scratch_operands = 1 : i64, tpu.core_type = #tpu.core_type<tc>, window_params = [{transform_indices = @transform_0, window_bounds = array<i64: 2, 4096>}, {transform_indices = @transform_1, window_bounds = array<i64: 4096, 256>}, {transform_indices = @transform_2, window_bounds = array<i64: 1, 256>}, {transform_indices = @transform_3, window_bounds = array<i64: 2, 256>}]} {
    %c0_i32 = arith.constant 0 : i32
    %0 = arith.cmpi eq, %arg1, %c0_i32 : i32
    %1 = arith.extui %0 : i1 to i32
    %c0_i32_0 = arith.constant 0 : i32
    %2 = arith.cmpi ne, %1, %c0_i32_0 : i32
    scf.if %2 {
      %cst_9 = arith.constant 0.000000e+00 : f32
      %13 = vector.broadcast %cst_9 : f32 to vector<2x256xf32>
      %c0_10 = arith.constant 0 : index
      %c0_11 = arith.constant 0 : index
      %14 = vector.load %arg6[%c0_10, %c0_11] : memref<2x256xf32, #tpu.memory_space<vmem>>, vector<2x256xf32>
      tpu.vector_store %arg6[%c0_10, %c0_11], %13 {strides = array<i32>} : memref<2x256xf32, #tpu.memory_space<vmem>>, vector<2x256xf32>,
    } else {
    }
    %c0 = arith.constant 0 : index
    %c0_1 = arith.constant 0 : index
    %3 = vector.load %arg6[%c0, %c0_1] : memref<2x256xf32, #tpu.memory_space<vmem>>, vector<2x256xf32>
    %c0_2 = arith.constant 0 : index
    %c0_3 = arith.constant 0 : index
    %4 = vector.load %arg2[%c0_2, %c0_3] : memref<2x4096xf32, #tpu.memory_space<vmem>>, vector<2x4096xf32>
    %5 = arith.truncf %4 : vector<2x4096xf32> to vector<2x4096xbf16>
    %c0_4 = arith.constant 0 : index
    %c0_5 = arith.constant 0 : index
    %6 = vector.load %arg3[%c0_4, %c0_5] : memref<4096x256xbf16, #tpu.memory_space<vmem>>, vector<4096x256xbf16>
    %cst = arith.constant dense<0.000000e+00> : vector<2x256xf32>
    %7 = tpu.matmul %5, %6, %cst {dimension_numbers = #tpu.dot_dimension_numbers<[1], [0], [0], [1], [0, 0, 1, 1], [], []>} : vector<2x4096xbf16>, vector<4096x256xbf16>, vector<2x256xf32> -> vector<2x256xf32>
    %8 = arith.addf %3, %7 : vector<2x256xf32>
    %c0_6 = arith.constant 0 : index
    %c0_7 = arith.constant 0 : index
    %9 = vector.load %arg6[%c0_6, %c0_7] : memref<2x256xf32, #tpu.memory_space<vmem>>, vector<2x256xf32>
    tpu.vector_store %arg6[%c0_6, %c0_7], %8 {strides = array<i32>} : memref<2x256xf32, #tpu.memory_space<vmem>>, vector<2x256xf32>,
    %c3_i32 = arith.constant 3 : i32
    %10 = arith.cmpi eq, %arg1, %c3_i32 : i32
    %11 = arith.extui %10 : i1 to i32
    %c0_i32_8 = arith.constant 0 : i32
    %12 = arith.cmpi ne, %11, %c0_i32_8 : i32
    scf.if %12 {
      %c0_9 = arith.constant 0 : index
      %c0_10 = arith.constant 0 : index
      %13 = vector.load %arg6[%c0_9, %c0_10] : memref<2x256xf32, #tpu.memory_space<vmem>>, vector<2x256xf32>
      %c0_11 = arith.constant 0 : index
      %c0_12 = arith.constant 0 : index
      %14 = vector.load %arg4[%c0_11, %c0_12] : memref<1x256xf32, #tpu.memory_space<vmem>>, vector<1x256xf32>
      %15 = vector.broadcast %14 : vector<1x256xf32> to vector<2x256xf32>
      %16 = arith.addf %13, %15 : vector<2x256xf32>
      %cst_13 = arith.constant 0.000000e+00 : f32
      %17 = vector.broadcast %cst_13 : f32 to vector<2x256xf32>
      %18 = arith.maximumf %16, %17 : vector<2x256xf32>
      %c0_14 = arith.constant 0 : index
      %c0_15 = arith.constant 0 : index
      %19 = vector.load %arg5[%c0_14, %c0_15] : memref<2x256xf32, #tpu.memory_space<vmem>>, vector<2x256xf32>
      tpu.vector_store %arg5[%c0_14, %c0_15], %18 {strides = array<i32>} : memref<2x256xf32, #tpu.memory_space<vmem>>, vector<2x256xf32>,
    } else {
    }
    return
  }
  func.func @transform_0(%arg0: i32, %arg1: i32) -> (i32, i32) {
    %c0_i32 = arith.constant 0 : i32
    %c0_i32_0 = arith.constant 0 : i32
    return %c0_i32, %arg1 : i32, i32
  }
  func.func @transform_1(%arg0: i32, %arg1: i32) -> (i32, i32) {
    %c0_i32 = arith.constant 0 : i32
    return %arg1, %arg0 : i32, i32
  }
  func.func @transform_2(%arg0: i32, %arg1: i32) -> (i32, i32) {
    %c0_i32 = arith.constant 0 : i32
    %c0_i32_0 = arith.constant 0 : i32
    return %c0_i32, %arg0 : i32, i32
  }
  func.func @transform_3(%arg0: i32, %arg1: i32) -> (i32, i32) {
    %c0_i32 = arith.constant 0 : i32
    %c0_i32_0 = arith.constant 0 : i32
    return %c0_i32, %arg0 : i32, i32
  }
}

module attributes {stable_mosaic.version = 11 : i64} {
  func.func @conv_stack_kernel(%arg0: i32, %arg1: memref<1x16x16x4xf32, #tpu.memory_space<vmem>>, %arg2: memref<9x4x32xf32, #tpu.memory_space<vmem>>, %arg3: memref<1x32xf32, #tpu.memory_space<vmem>>, %arg4: memref<9x32x64xf32, #tpu.memory_space<vmem>>, %arg5: memref<1x64xf32, #tpu.memory_space<vmem>>, %arg6: memref<9x64x64xf32, #tpu.memory_space<vmem>>, %arg7: memref<1x64xf32, #tpu.memory_space<vmem>>, %arg8: memref<1x256x64xf32, #tpu.memory_space<vmem>>, %arg9: memref<18x25x4xf32, #tpu.memory_space<vmem>>, %arg10: memref<18x25x32xf32, #tpu.memory_space<vmem>>, %arg11: memref<18x25x64xf32, #tpu.memory_space<vmem>>) attributes {dimension_semantics = [#tpu.dimension_semantics<parallel>], iteration_bounds = array<i64: 2>, scalar_prefetch = 0 : i64, scratch_operands = 3 : i64, tpu.core_type = #tpu.core_type<tc>, window_params = [{transform_indices = @transform_0, window_bounds = array<i64: 1, 16, 16, 4>}, {pipeline_mode = #tpu.pipeline_mode<synchronous>, transform_indices = @transform_1, window_bounds = array<i64: 9, 4, 32>}, {pipeline_mode = #tpu.pipeline_mode<synchronous>, transform_indices = @transform_2, window_bounds = array<i64: 1, 32>}, {pipeline_mode = #tpu.pipeline_mode<synchronous>, transform_indices = @transform_3, window_bounds = array<i64: 9, 32, 64>}, {pipeline_mode = #tpu.pipeline_mode<synchronous>, transform_indices = @transform_4, window_bounds = array<i64: 1, 64>}, {pipeline_mode = #tpu.pipeline_mode<synchronous>, transform_indices = @transform_5, window_bounds = array<i64: 9, 64, 64>}, {pipeline_mode = #tpu.pipeline_mode<synchronous>, transform_indices = @transform_6, window_bounds = array<i64: 1, 64>}, {transform_indices = @transform_7, window_bounds = array<i64: 1, 256, 64>}]} {
    %c0 = arith.constant 0 : index
    %c0_0 = arith.constant 0 : index
    %c0_1 = arith.constant 0 : index
    %c0_2 = arith.constant 0 : index
    %0 = vector.load %arg1[%c0, %c0_0, %c0_1, %c0_2] : memref<1x16x16x4xf32, #tpu.memory_space<vmem>>, vector<1x16x16x4xf32>
    %1 = vector.shape_cast %0 : vector<1x16x16x4xf32> to vector<16x16x4xf32>
    %cst = arith.constant 0.000000e+00 : f32
    %2 = vector.broadcast %cst : f32 to vector<18x25x4xf32>
    %c0_3 = arith.constant 0 : index
    %c0_4 = arith.constant 0 : index
    %c0_5 = arith.constant 0 : index
    %3 = vector.load %arg9[%c0_3, %c0_4, %c0_5] : memref<18x25x4xf32, #tpu.memory_space<vmem>>, vector<18x25x4xf32>
    tpu.vector_store %arg9[%c0_3, %c0_4, %c0_5], %2 {strides = array<i32>} : memref<18x25x4xf32, #tpu.memory_space<vmem>>, vector<18x25x4xf32>,
    %c1 = arith.constant 1 : index
    %c8 = arith.constant 8 : index
    %c0_6 = arith.constant 0 : index
    %4 = vector.load %arg9[%c1, %c8, %c0_6] : memref<18x25x4xf32, #tpu.memory_space<vmem>>, vector<16x16x4xf32>
    tpu.vector_store %arg9[%c1, %c8, %c0_6], %1 {strides = array<i32>} : memref<18x25x4xf32, #tpu.memory_space<vmem>>, vector<16x16x4xf32>,
    %cst_7 = arith.constant 0.000000e+00 : f32
    %5 = vector.broadcast %cst_7 : f32 to vector<256x32xf32>
    %c0_8 = arith.constant 0 : index
    %c7 = arith.constant 7 : index
    %c0_9 = arith.constant 0 : index
    %6 = vector.load %arg9[%c0_8, %c7, %c0_9] : memref<18x25x4xf32, #tpu.memory_space<vmem>>, vector<16x16x4xf32>
    %7 = vector.shape_cast %6 : vector<16x16x4xf32> to vector<256x4xf32>
    %c0_10 = arith.constant 0 : index
    %c0_11 = arith.constant 0 : index
    %c0_12 = arith.constant 0 : index
    %8 = vector.load %arg2[%c0_10, %c0_11, %c0_12] : memref<9x4x32xf32, #tpu.memory_space<vmem>>, vector<1x4x32xf32>
    %9 = vector.shape_cast %8 : vector<1x4x32xf32> to vector<4x32xf32>
    %cst_13 = arith.constant dense<0.000000e+00> : vector<256x32xf32>
    %10 = tpu.matmul %7, %9, %cst_13 {dimension_numbers = #tpu.dot_dimension_numbers<[1], [0], [0], [1], [0, 0, 1, 1], [], []>} : vector<256x4xf32>, vector<4x32xf32>, vector<256x32xf32> -> vector<256x32xf32>
    %11 = arith.addf %5, %10 : vector<256x32xf32>
    %c0_14 = arith.constant 0 : index
    %c8_15 = arith.constant 8 : index
    %c0_16 = arith.constant 0 : index
    %12 = vector.load %arg9[%c0_14, %c8_15, %c0_16] : memref<18x25x4xf32, #tpu.memory_space<vmem>>, vector<16x16x4xf32>
    %13 = vector.shape_cast %12 : vector<16x16x4xf32> to vector<256x4xf32>
    %c1_17 = arith.constant 1 : index
    %c0_18 = arith.constant 0 : index
    %c0_19 = arith.constant 0 : index
    %14 = vector.load %arg2[%c1_17, %c0_18, %c0_19] : memref<9x4x32xf32, #tpu.memory_space<vmem>>, vector<1x4x32xf32>
    %15 = vector.shape_cast %14 : vector<1x4x32xf32> to vector<4x32xf32>
    %cst_20 = arith.constant dense<0.000000e+00> : vector<256x32xf32>
    %16 = tpu.matmul %13, %15, %cst_20 {dimension_numbers = #tpu.dot_dimension_numbers<[1], [0], [0], [1], [0, 0, 1, 1], [], []>} : vector<256x4xf32>, vector<4x32xf32>, vector<256x32xf32> -> vector<256x32xf32>
    %17 = arith.addf %11, %16 : vector<256x32xf32>
    %c0_21 = arith.constant 0 : index
    %c9 = arith.constant 9 : index
    %c0_22 = arith.constant 0 : index
    %18 = vector.load %arg9[%c0_21, %c9, %c0_22] : memref<18x25x4xf32, #tpu.memory_space<vmem>>, vector<16x16x4xf32>
    %19 = vector.shape_cast %18 : vector<16x16x4xf32> to vector<256x4xf32>
    %c2 = arith.constant 2 : index
    %c0_23 = arith.constant 0 : index
    %c0_24 = arith.constant 0 : index
    %20 = vector.load %arg2[%c2, %c0_23, %c0_24] : memref<9x4x32xf32, #tpu.memory_space<vmem>>, vector<1x4x32xf32>
    %21 = vector.shape_cast %20 : vector<1x4x32xf32> to vector<4x32xf32>
    %cst_25 = arith.constant dense<0.000000e+00> : vector<256x32xf32>
    %22 = tpu.matmul %19, %21, %cst_25 {dimension_numbers = #tpu.dot_dimension_numbers<[1], [0], [0], [1], [0, 0, 1, 1], [], []>} : vector<256x4xf32>, vector<4x32xf32>, vector<256x32xf32> -> vector<256x32xf32>
    %23 = arith.addf %17, %22 : vector<256x32xf32>
    %c1_26 = arith.constant 1 : index
    %c7_27 = arith.constant 7 : index
    %c0_28 = arith.constant 0 : index
    %24 = vector.load %arg9[%c1_26, %c7_27, %c0_28] : memref<18x25x4xf32, #tpu.memory_space<vmem>>, vector<16x16x4xf32>
    %25 = vector.shape_cast %24 : vector<16x16x4xf32> to vector<256x4xf32>
    %c3 = arith.constant 3 : index
    %c0_29 = arith.constant 0 : index
    %c0_30 = arith.constant 0 : index
    %26 = vector.load %arg2[%c3, %c0_29, %c0_30] : memref<9x4x32xf32, #tpu.memory_space<vmem>>, vector<1x4x32xf32>
    %27 = vector.shape_cast %26 : vector<1x4x32xf32> to vector<4x32xf32>
    %cst_31 = arith.constant dense<0.000000e+00> : vector<256x32xf32>
    %28 = tpu.matmul %25, %27, %cst_31 {dimension_numbers = #tpu.dot_dimension_numbers<[1], [0], [0], [1], [0, 0, 1, 1], [], []>} : vector<256x4xf32>, vector<4x32xf32>, vector<256x32xf32> -> vector<256x32xf32>
    %29 = arith.addf %23, %28 : vector<256x32xf32>
    %c1_32 = arith.constant 1 : index
    %c8_33 = arith.constant 8 : index
    %c0_34 = arith.constant 0 : index
    %30 = vector.load %arg9[%c1_32, %c8_33, %c0_34] : memref<18x25x4xf32, #tpu.memory_space<vmem>>, vector<16x16x4xf32>
    %31 = vector.shape_cast %30 : vector<16x16x4xf32> to vector<256x4xf32>
    %c4 = arith.constant 4 : index
    %c0_35 = arith.constant 0 : index
    %c0_36 = arith.constant 0 : index
    %32 = vector.load %arg2[%c4, %c0_35, %c0_36] : memref<9x4x32xf32, #tpu.memory_space<vmem>>, vector<1x4x32xf32>
    %33 = vector.shape_cast %32 : vector<1x4x32xf32> to vector<4x32xf32>
    %cst_37 = arith.constant dense<0.000000e+00> : vector<256x32xf32>
    %34 = tpu.matmul %31, %33, %cst_37 {dimension_numbers = #tpu.dot_dimension_numbers<[1], [0], [0], [1], [0, 0, 1, 1], [], []>} : vector<256x4xf32>, vector<4x32xf32>, vector<256x32xf32> -> vector<256x32xf32>
    %35 = arith.addf %29, %34 : vector<256x32xf32>
    %c1_38 = arith.constant 1 : index
    %c9_39 = arith.constant 9 : index
    %c0_40 = arith.constant 0 : index
    %36 = vector.load %arg9[%c1_38, %c9_39, %c0_40] : memref<18x25x4xf32, #tpu.memory_space<vmem>>, vector<16x16x4xf32>
    %37 = vector.shape_cast %36 : vector<16x16x4xf32> to vector<256x4xf32>
    %c5 = arith.constant 5 : index
    %c0_41 = arith.constant 0 : index
    %c0_42 = arith.constant 0 : index
    %38 = vector.load %arg2[%c5, %c0_41, %c0_42] : memref<9x4x32xf32, #tpu.memory_space<vmem>>, vector<1x4x32xf32>
    %39 = vector.shape_cast %38 : vector<1x4x32xf32> to vector<4x32xf32>
    %cst_43 = arith.constant dense<0.000000e+00> : vector<256x32xf32>
    %40 = tpu.matmul %37, %39, %cst_43 {dimension_numbers = #tpu.dot_dimension_numbers<[1], [0], [0], [1], [0, 0, 1, 1], [], []>} : vector<256x4xf32>, vector<4x32xf32>, vector<256x32xf32> -> vector<256x32xf32>
    %41 = arith.addf %35, %40 : vector<256x32xf32>
    %c2_44 = arith.constant 2 : index
    %c7_45 = arith.constant 7 : index
    %c0_46 = arith.constant 0 : index
    %42 = vector.load %arg9[%c2_44, %c7_45, %c0_46] : memref<18x25x4xf32, #tpu.memory_space<vmem>>, vector<16x16x4xf32>
    %43 = vector.shape_cast %42 : vector<16x16x4xf32> to vector<256x4xf32>
    %c6 = arith.constant 6 : index
    %c0_47 = arith.constant 0 : index
    %c0_48 = arith.constant 0 : index
    %44 = vector.load %arg2[%c6, %c0_47, %c0_48] : memref<9x4x32xf32, #tpu.memory_space<vmem>>, vector<1x4x32xf32>
    %45 = vector.shape_cast %44 : vector<1x4x32xf32> to vector<4x32xf32>
    %cst_49 = arith.constant dense<0.000000e+00> : vector<256x32xf32>
    %46 = tpu.matmul %43, %45, %cst_49 {dimension_numbers = #tpu.dot_dimension_numbers<[1], [0], [0], [1], [0, 0, 1, 1], [], []>} : vector<256x4xf32>, vector<4x32xf32>, vector<256x32xf32> -> vector<256x32xf32>
    %47 = arith.addf %41, %46 : vector<256x32xf32>
    %c2_50 = arith.constant 2 : index
    %c8_51 = arith.constant 8 : index
    %c0_52 = arith.constant 0 : index
    %48 = vector.load %arg9[%c2_50, %c8_51, %c0_52] : memref<18x25x4xf32, #tpu.memory_space<vmem>>, vector<16x16x4xf32>
    %49 = vector.shape_cast %48 : vector<16x16x4xf32> to vector<256x4xf32>
    %c7_53 = arith.constant 7 : index
    %c0_54 = arith.constant 0 : index
    %c0_55 = arith.constant 0 : index
    %50 = vector.load %arg2[%c7_53, %c0_54, %c0_55] : memref<9x4x32xf32, #tpu.memory_space<vmem>>, vector<1x4x32xf32>
    %51 = vector.shape_cast %50 : vector<1x4x32xf32> to vector<4x32xf32>
    %cst_56 = arith.constant dense<0.000000e+00> : vector<256x32xf32>
    %52 = tpu.matmul %49, %51, %cst_56 {dimension_numbers = #tpu.dot_dimension_numbers<[1], [0], [0], [1], [0, 0, 1, 1], [], []>} : vector<256x4xf32>, vector<4x32xf32>, vector<256x32xf32> -> vector<256x32xf32>
    %53 = arith.addf %47, %52 : vector<256x32xf32>
    %c2_57 = arith.constant 2 : index
    %c9_58 = arith.constant 9 : index
    %c0_59 = arith.constant 0 : index
    %54 = vector.load %arg9[%c2_57, %c9_58, %c0_59] : memref<18x25x4xf32, #tpu.memory_space<vmem>>, vector<16x16x4xf32>
    %55 = vector.shape_cast %54 : vector<16x16x4xf32> to vector<256x4xf32>
    %c8_60 = arith.constant 8 : index
    %c0_61 = arith.constant 0 : index
    %c0_62 = arith.constant 0 : index
    %56 = vector.load %arg2[%c8_60, %c0_61, %c0_62] : memref<9x4x32xf32, #tpu.memory_space<vmem>>, vector<1x4x32xf32>
    %57 = vector.shape_cast %56 : vector<1x4x32xf32> to vector<4x32xf32>
    %cst_63 = arith.constant dense<0.000000e+00> : vector<256x32xf32>
    %58 = tpu.matmul %55, %57, %cst_63 {dimension_numbers = #tpu.dot_dimension_numbers<[1], [0], [0], [1], [0, 0, 1, 1], [], []>} : vector<256x4xf32>, vector<4x32xf32>, vector<256x32xf32> -> vector<256x32xf32>
    %59 = arith.addf %53, %58 : vector<256x32xf32>
    %c0_64 = arith.constant 0 : index
    %c0_65 = arith.constant 0 : index
    %60 = vector.load %arg3[%c0_64, %c0_65] : memref<1x32xf32, #tpu.memory_space<vmem>>, vector<1x32xf32>
    %61 = vector.broadcast %60 : vector<1x32xf32> to vector<256x32xf32>
    %62 = arith.addf %59, %61 : vector<256x32xf32>
    %cst_66 = arith.constant 0.000000e+00 : f32
    %63 = vector.broadcast %cst_66 : f32 to vector<256x32xf32>
    %64 = arith.maximumf %62, %63 : vector<256x32xf32>
    %65 = vector.shape_cast %64 : vector<256x32xf32> to vector<16x16x32xf32>
    %cst_67 = arith.constant 0.000000e+00 : f32
    %66 = vector.broadcast %cst_67 : f32 to vector<18x25x32xf32>
    %c0_68 = arith.constant 0 : index
    %c0_69 = arith.constant 0 : index
    %c0_70 = arith.constant 0 : index
    %67 = vector.load %arg10[%c0_68, %c0_69, %c0_70] : memref<18x25x32xf32, #tpu.memory_space<vmem>>, vector<18x25x32xf32>
    tpu.vector_store %arg10[%c0_68, %c0_69, %c0_70], %66 {strides = array<i32>} : memref<18x25x32xf32, #tpu.memory_space<vmem>>, vector<18x25x32xf32>,
    %c1_71 = arith.constant 1 : index
    %c8_72 = arith.constant 8 : index
    %c0_73 = arith.constant 0 : index
    %68 = vector.load %arg10[%c1_71, %c8_72, %c0_73] : memref<18x25x32xf32, #tpu.memory_space<vmem>>, vector<16x16x32xf32>
    tpu.vector_store %arg10[%c1_71, %c8_72, %c0_73], %65 {strides = array<i32>} : memref<18x25x32xf32, #tpu.memory_space<vmem>>, vector<16x16x32xf32>,
    %cst_74 = arith.constant 0.000000e+00 : f32
    %69 = vector.broadcast %cst_74 : f32 to vector<256x64xf32>
    %c0_75 = arith.constant 0 : index
    %c7_76 = arith.constant 7 : index
    %c0_77 = arith.constant 0 : index
    %70 = vector.load %arg10[%c0_75, %c7_76, %c0_77] : memref<18x25x32xf32, #tpu.memory_space<vmem>>, vector<16x16x32xf32>
    %71 = vector.shape_cast %70 : vector<16x16x32xf32> to vector<256x32xf32>
    %c0_78 = arith.constant 0 : index
    %c0_79 = arith.constant 0 : index
    %c0_80 = arith.constant 0 : index
    %72 = vector.load %arg4[%c0_78, %c0_79, %c0_80] : memref<9x32x64xf32, #tpu.memory_space<vmem>>, vector<1x32x64xf32>
    %73 = vector.shape_cast %72 : vector<1x32x64xf32> to vector<32x64xf32>
    %cst_81 = arith.constant dense<0.000000e+00> : vector<256x64xf32>
    %74 = tpu.matmul %71, %73, %cst_81 {dimension_numbers = #tpu.dot_dimension_numbers<[1], [0], [0], [1], [0, 0, 1, 1], [], []>} : vector<256x32xf32>, vector<32x64xf32>, vector<256x64xf32> -> vector<256x64xf32>
    %75 = arith.addf %69, %74 : vector<256x64xf32>
    %c0_82 = arith.constant 0 : index
    %c8_83 = arith.constant 8 : index
    %c0_84 = arith.constant 0 : index
    %76 = vector.load %arg10[%c0_82, %c8_83, %c0_84] : memref<18x25x32xf32, #tpu.memory_space<vmem>>, vector<16x16x32xf32>
    %77 = vector.shape_cast %76 : vector<16x16x32xf32> to vector<256x32xf32>
    %c1_85 = arith.constant 1 : index
    %c0_86 = arith.constant 0 : index
    %c0_87 = arith.constant 0 : index
    %78 = vector.load %arg4[%c1_85, %c0_86, %c0_87] : memref<9x32x64xf32, #tpu.memory_space<vmem>>, vector<1x32x64xf32>
    %79 = vector.shape_cast %78 : vector<1x32x64xf32> to vector<32x64xf32>
    %cst_88 = arith.constant dense<0.000000e+00> : vector<256x64xf32>
    %80 = tpu.matmul %77, %79, %cst_88 {dimension_numbers = #tpu.dot_dimension_numbers<[1], [0], [0], [1], [0, 0, 1, 1], [], []>} : vector<256x32xf32>, vector<32x64xf32>, vector<256x64xf32> -> vector<256x64xf32>
    %81 = arith.addf %75, %80 : vector<256x64xf32>
    %c0_89 = arith.constant 0 : index
    %c9_90 = arith.constant 9 : index
    %c0_91 = arith.constant 0 : index
    %82 = vector.load %arg10[%c0_89, %c9_90, %c0_91] : memref<18x25x32xf32, #tpu.memory_space<vmem>>, vector<16x16x32xf32>
    %83 = vector.shape_cast %82 : vector<16x16x32xf32> to vector<256x32xf32>
    %c2_92 = arith.constant 2 : index
    %c0_93 = arith.constant 0 : index
    %c0_94 = arith.constant 0 : index
    %84 = vector.load %arg4[%c2_92, %c0_93, %c0_94] : memref<9x32x64xf32, #tpu.memory_space<vmem>>, vector<1x32x64xf32>
    %85 = vector.shape_cast %84 : vector<1x32x64xf32> to vector<32x64xf32>
    %cst_95 = arith.constant dense<0.000000e+00> : vector<256x64xf32>
    %86 = tpu.matmul %83, %85, %cst_95 {dimension_numbers = #tpu.dot_dimension_numbers<[1], [0], [0], [1], [0, 0, 1, 1], [], []>} : vector<256x32xf32>, vector<32x64xf32>, vector<256x64xf32> -> vector<256x64xf32>
    %87 = arith.addf %81, %86 : vector<256x64xf32>
    %c1_96 = arith.constant 1 : index
    %c7_97 = arith.constant 7 : index
    %c0_98 = arith.constant 0 : index
    %88 = vector.load %arg10[%c1_96, %c7_97, %c0_98] : memref<18x25x32xf32, #tpu.memory_space<vmem>>, vector<16x16x32xf32>
    %89 = vector.shape_cast %88 : vector<16x16x32xf32> to vector<256x32xf32>
    %c3_99 = arith.constant 3 : index
    %c0_100 = arith.constant 0 : index
    %c0_101 = arith.constant 0 : index
    %90 = vector.load %arg4[%c3_99, %c0_100, %c0_101] : memref<9x32x64xf32, #tpu.memory_space<vmem>>, vector<1x32x64xf32>
    %91 = vector.shape_cast %90 : vector<1x32x64xf32> to vector<32x64xf32>
    %cst_102 = arith.constant dense<0.000000e+00> : vector<256x64xf32>
    %92 = tpu.matmul %89, %91, %cst_102 {dimension_numbers = #tpu.dot_dimension_numbers<[1], [0], [0], [1], [0, 0, 1, 1], [], []>} : vector<256x32xf32>, vector<32x64xf32>, vector<256x64xf32> -> vector<256x64xf32>
    %93 = arith.addf %87, %92 : vector<256x64xf32>
    %c1_103 = arith.constant 1 : index
    %c8_104 = arith.constant 8 : index
    %c0_105 = arith.constant 0 : index
    %94 = vector.load %arg10[%c1_103, %c8_104, %c0_105] : memref<18x25x32xf32, #tpu.memory_space<vmem>>, vector<16x16x32xf32>
    %95 = vector.shape_cast %94 : vector<16x16x32xf32> to vector<256x32xf32>
    %c4_106 = arith.constant 4 : index
    %c0_107 = arith.constant 0 : index
    %c0_108 = arith.constant 0 : index
    %96 = vector.load %arg4[%c4_106, %c0_107, %c0_108] : memref<9x32x64xf32, #tpu.memory_space<vmem>>, vector<1x32x64xf32>
    %97 = vector.shape_cast %96 : vector<1x32x64xf32> to vector<32x64xf32>
    %cst_109 = arith.constant dense<0.000000e+00> : vector<256x64xf32>
    %98 = tpu.matmul %95, %97, %cst_109 {dimension_numbers = #tpu.dot_dimension_numbers<[1], [0], [0], [1], [0, 0, 1, 1], [], []>} : vector<256x32xf32>, vector<32x64xf32>, vector<256x64xf32> -> vector<256x64xf32>
    %99 = arith.addf %93, %98 : vector<256x64xf32>
    %c1_110 = arith.constant 1 : index
    %c9_111 = arith.constant 9 : index
    %c0_112 = arith.constant 0 : index
    %100 = vector.load %arg10[%c1_110, %c9_111, %c0_112] : memref<18x25x32xf32, #tpu.memory_space<vmem>>, vector<16x16x32xf32>
    %101 = vector.shape_cast %100 : vector<16x16x32xf32> to vector<256x32xf32>
    %c5_113 = arith.constant 5 : index
    %c0_114 = arith.constant 0 : index
    %c0_115 = arith.constant 0 : index
    %102 = vector.load %arg4[%c5_113, %c0_114, %c0_115] : memref<9x32x64xf32, #tpu.memory_space<vmem>>, vector<1x32x64xf32>
    %103 = vector.shape_cast %102 : vector<1x32x64xf32> to vector<32x64xf32>
    %cst_116 = arith.constant dense<0.000000e+00> : vector<256x64xf32>
    %104 = tpu.matmul %101, %103, %cst_116 {dimension_numbers = #tpu.dot_dimension_numbers<[1], [0], [0], [1], [0, 0, 1, 1], [], []>} : vector<256x32xf32>, vector<32x64xf32>, vector<256x64xf32> -> vector<256x64xf32>
    %105 = arith.addf %99, %104 : vector<256x64xf32>
    %c2_117 = arith.constant 2 : index
    %c7_118 = arith.constant 7 : index
    %c0_119 = arith.constant 0 : index
    %106 = vector.load %arg10[%c2_117, %c7_118, %c0_119] : memref<18x25x32xf32, #tpu.memory_space<vmem>>, vector<16x16x32xf32>
    %107 = vector.shape_cast %106 : vector<16x16x32xf32> to vector<256x32xf32>
    %c6_120 = arith.constant 6 : index
    %c0_121 = arith.constant 0 : index
    %c0_122 = arith.constant 0 : index
    %108 = vector.load %arg4[%c6_120, %c0_121, %c0_122] : memref<9x32x64xf32, #tpu.memory_space<vmem>>, vector<1x32x64xf32>
    %109 = vector.shape_cast %108 : vector<1x32x64xf32> to vector<32x64xf32>
    %cst_123 = arith.constant dense<0.000000e+00> : vector<256x64xf32>
    %110 = tpu.matmul %107, %109, %cst_123 {dimension_numbers = #tpu.dot_dimension_numbers<[1], [0], [0], [1], [0, 0, 1, 1], [], []>} : vector<256x32xf32>, vector<32x64xf32>, vector<256x64xf32> -> vector<256x64xf32>
    %111 = arith.addf %105, %110 : vector<256x64xf32>
    %c2_124 = arith.constant 2 : index
    %c8_125 = arith.constant 8 : index
    %c0_126 = arith.constant 0 : index
    %112 = vector.load %arg10[%c2_124, %c8_125, %c0_126] : memref<18x25x32xf32, #tpu.memory_space<vmem>>, vector<16x16x32xf32>
    %113 = vector.shape_cast %112 : vector<16x16x32xf32> to vector<256x32xf32>
    %c7_127 = arith.constant 7 : index
    %c0_128 = arith.constant 0 : index
    %c0_129 = arith.constant 0 : index
    %114 = vector.load %arg4[%c7_127, %c0_128, %c0_129] : memref<9x32x64xf32, #tpu.memory_space<vmem>>, vector<1x32x64xf32>
    %115 = vector.shape_cast %114 : vector<1x32x64xf32> to vector<32x64xf32>
    %cst_130 = arith.constant dense<0.000000e+00> : vector<256x64xf32>
    %116 = tpu.matmul %113, %115, %cst_130 {dimension_numbers = #tpu.dot_dimension_numbers<[1], [0], [0], [1], [0, 0, 1, 1], [], []>} : vector<256x32xf32>, vector<32x64xf32>, vector<256x64xf32> -> vector<256x64xf32>
    %117 = arith.addf %111, %116 : vector<256x64xf32>
    %c2_131 = arith.constant 2 : index
    %c9_132 = arith.constant 9 : index
    %c0_133 = arith.constant 0 : index
    %118 = vector.load %arg10[%c2_131, %c9_132, %c0_133] : memref<18x25x32xf32, #tpu.memory_space<vmem>>, vector<16x16x32xf32>
    %119 = vector.shape_cast %118 : vector<16x16x32xf32> to vector<256x32xf32>
    %c8_134 = arith.constant 8 : index
    %c0_135 = arith.constant 0 : index
    %c0_136 = arith.constant 0 : index
    %120 = vector.load %arg4[%c8_134, %c0_135, %c0_136] : memref<9x32x64xf32, #tpu.memory_space<vmem>>, vector<1x32x64xf32>
    %121 = vector.shape_cast %120 : vector<1x32x64xf32> to vector<32x64xf32>
    %cst_137 = arith.constant dense<0.000000e+00> : vector<256x64xf32>
    %122 = tpu.matmul %119, %121, %cst_137 {dimension_numbers = #tpu.dot_dimension_numbers<[1], [0], [0], [1], [0, 0, 1, 1], [], []>} : vector<256x32xf32>, vector<32x64xf32>, vector<256x64xf32> -> vector<256x64xf32>
    %123 = arith.addf %117, %122 : vector<256x64xf32>
    %c0_138 = arith.constant 0 : index
    %c0_139 = arith.constant 0 : index
    %124 = vector.load %arg5[%c0_138, %c0_139] : memref<1x64xf32, #tpu.memory_space<vmem>>, vector<1x64xf32>
    %125 = vector.broadcast %124 : vector<1x64xf32> to vector<256x64xf32>
    %126 = arith.addf %123, %125 : vector<256x64xf32>
    %cst_140 = arith.constant 0.000000e+00 : f32
    %127 = vector.broadcast %cst_140 : f32 to vector<256x64xf32>
    %128 = arith.maximumf %126, %127 : vector<256x64xf32>
    %129 = vector.shape_cast %128 : vector<256x64xf32> to vector<16x16x64xf32>
    %cst_141 = arith.constant 0.000000e+00 : f32
    %130 = vector.broadcast %cst_141 : f32 to vector<18x25x64xf32>
    %c0_142 = arith.constant 0 : index
    %c0_143 = arith.constant 0 : index
    %c0_144 = arith.constant 0 : index
    %131 = vector.load %arg11[%c0_142, %c0_143, %c0_144] : memref<18x25x64xf32, #tpu.memory_space<vmem>>, vector<18x25x64xf32>
    tpu.vector_store %arg11[%c0_142, %c0_143, %c0_144], %130 {strides = array<i32>} : memref<18x25x64xf32, #tpu.memory_space<vmem>>, vector<18x25x64xf32>,
    %c1_145 = arith.constant 1 : index
    %c8_146 = arith.constant 8 : index
    %c0_147 = arith.constant 0 : index
    %132 = vector.load %arg11[%c1_145, %c8_146, %c0_147] : memref<18x25x64xf32, #tpu.memory_space<vmem>>, vector<16x16x64xf32>
    tpu.vector_store %arg11[%c1_145, %c8_146, %c0_147], %129 {strides = array<i32>} : memref<18x25x64xf32, #tpu.memory_space<vmem>>, vector<16x16x64xf32>,
    %cst_148 = arith.constant 0.000000e+00 : f32
    %133 = vector.broadcast %cst_148 : f32 to vector<256x64xf32>
    %c0_149 = arith.constant 0 : index
    %c7_150 = arith.constant 7 : index
    %c0_151 = arith.constant 0 : index
    %134 = vector.load %arg11[%c0_149, %c7_150, %c0_151] : memref<18x25x64xf32, #tpu.memory_space<vmem>>, vector<16x16x64xf32>
    %135 = vector.shape_cast %134 : vector<16x16x64xf32> to vector<256x64xf32>
    %c0_152 = arith.constant 0 : index
    %c0_153 = arith.constant 0 : index
    %c0_154 = arith.constant 0 : index
    %136 = vector.load %arg6[%c0_152, %c0_153, %c0_154] : memref<9x64x64xf32, #tpu.memory_space<vmem>>, vector<1x64x64xf32>
    %137 = vector.shape_cast %136 : vector<1x64x64xf32> to vector<64x64xf32>
    %cst_155 = arith.constant dense<0.000000e+00> : vector<256x64xf32>
    %138 = tpu.matmul %135, %137, %cst_155 {dimension_numbers = #tpu.dot_dimension_numbers<[1], [0], [0], [1], [0, 0, 1, 1], [], []>} : vector<256x64xf32>, vector<64x64xf32>, vector<256x64xf32> -> vector<256x64xf32>
    %139 = arith.addf %133, %138 : vector<256x64xf32>
    %c0_156 = arith.constant 0 : index
    %c8_157 = arith.constant 8 : index
    %c0_158 = arith.constant 0 : index
    %140 = vector.load %arg11[%c0_156, %c8_157, %c0_158] : memref<18x25x64xf32, #tpu.memory_space<vmem>>, vector<16x16x64xf32>
    %141 = vector.shape_cast %140 : vector<16x16x64xf32> to vector<256x64xf32>
    %c1_159 = arith.constant 1 : index
    %c0_160 = arith.constant 0 : index
    %c0_161 = arith.constant 0 : index
    %142 = vector.load %arg6[%c1_159, %c0_160, %c0_161] : memref<9x64x64xf32, #tpu.memory_space<vmem>>, vector<1x64x64xf32>
    %143 = vector.shape_cast %142 : vector<1x64x64xf32> to vector<64x64xf32>
    %cst_162 = arith.constant dense<0.000000e+00> : vector<256x64xf32>
    %144 = tpu.matmul %141, %143, %cst_162 {dimension_numbers = #tpu.dot_dimension_numbers<[1], [0], [0], [1], [0, 0, 1, 1], [], []>} : vector<256x64xf32>, vector<64x64xf32>, vector<256x64xf32> -> vector<256x64xf32>
    %145 = arith.addf %139, %144 : vector<256x64xf32>
    %c0_163 = arith.constant 0 : index
    %c9_164 = arith.constant 9 : index
    %c0_165 = arith.constant 0 : index
    %146 = vector.load %arg11[%c0_163, %c9_164, %c0_165] : memref<18x25x64xf32, #tpu.memory_space<vmem>>, vector<16x16x64xf32>
    %147 = vector.shape_cast %146 : vector<16x16x64xf32> to vector<256x64xf32>
    %c2_166 = arith.constant 2 : index
    %c0_167 = arith.constant 0 : index
    %c0_168 = arith.constant 0 : index
    %148 = vector.load %arg6[%c2_166, %c0_167, %c0_168] : memref<9x64x64xf32, #tpu.memory_space<vmem>>, vector<1x64x64xf32>
    %149 = vector.shape_cast %148 : vector<1x64x64xf32> to vector<64x64xf32>
    %cst_169 = arith.constant dense<0.000000e+00> : vector<256x64xf32>
    %150 = tpu.matmul %147, %149, %cst_169 {dimension_numbers = #tpu.dot_dimension_numbers<[1], [0], [0], [1], [0, 0, 1, 1], [], []>} : vector<256x64xf32>, vector<64x64xf32>, vector<256x64xf32> -> vector<256x64xf32>
    %151 = arith.addf %145, %150 : vector<256x64xf32>
    %c1_170 = arith.constant 1 : index
    %c7_171 = arith.constant 7 : index
    %c0_172 = arith.constant 0 : index
    %152 = vector.load %arg11[%c1_170, %c7_171, %c0_172] : memref<18x25x64xf32, #tpu.memory_space<vmem>>, vector<16x16x64xf32>
    %153 = vector.shape_cast %152 : vector<16x16x64xf32> to vector<256x64xf32>
    %c3_173 = arith.constant 3 : index
    %c0_174 = arith.constant 0 : index
    %c0_175 = arith.constant 0 : index
    %154 = vector.load %arg6[%c3_173, %c0_174, %c0_175] : memref<9x64x64xf32, #tpu.memory_space<vmem>>, vector<1x64x64xf32>
    %155 = vector.shape_cast %154 : vector<1x64x64xf32> to vector<64x64xf32>
    %cst_176 = arith.constant dense<0.000000e+00> : vector<256x64xf32>
    %156 = tpu.matmul %153, %155, %cst_176 {dimension_numbers = #tpu.dot_dimension_numbers<[1], [0], [0], [1], [0, 0, 1, 1], [], []>} : vector<256x64xf32>, vector<64x64xf32>, vector<256x64xf32> -> vector<256x64xf32>
    %157 = arith.addf %151, %156 : vector<256x64xf32>
    %c1_177 = arith.constant 1 : index
    %c8_178 = arith.constant 8 : index
    %c0_179 = arith.constant 0 : index
    %158 = vector.load %arg11[%c1_177, %c8_178, %c0_179] : memref<18x25x64xf32, #tpu.memory_space<vmem>>, vector<16x16x64xf32>
    %159 = vector.shape_cast %158 : vector<16x16x64xf32> to vector<256x64xf32>
    %c4_180 = arith.constant 4 : index
    %c0_181 = arith.constant 0 : index
    %c0_182 = arith.constant 0 : index
    %160 = vector.load %arg6[%c4_180, %c0_181, %c0_182] : memref<9x64x64xf32, #tpu.memory_space<vmem>>, vector<1x64x64xf32>
    %161 = vector.shape_cast %160 : vector<1x64x64xf32> to vector<64x64xf32>
    %cst_183 = arith.constant dense<0.000000e+00> : vector<256x64xf32>
    %162 = tpu.matmul %159, %161, %cst_183 {dimension_numbers = #tpu.dot_dimension_numbers<[1], [0], [0], [1], [0, 0, 1, 1], [], []>} : vector<256x64xf32>, vector<64x64xf32>, vector<256x64xf32> -> vector<256x64xf32>
    %163 = arith.addf %157, %162 : vector<256x64xf32>
    %c1_184 = arith.constant 1 : index
    %c9_185 = arith.constant 9 : index
    %c0_186 = arith.constant 0 : index
    %164 = vector.load %arg11[%c1_184, %c9_185, %c0_186] : memref<18x25x64xf32, #tpu.memory_space<vmem>>, vector<16x16x64xf32>
    %165 = vector.shape_cast %164 : vector<16x16x64xf32> to vector<256x64xf32>
    %c5_187 = arith.constant 5 : index
    %c0_188 = arith.constant 0 : index
    %c0_189 = arith.constant 0 : index
    %166 = vector.load %arg6[%c5_187, %c0_188, %c0_189] : memref<9x64x64xf32, #tpu.memory_space<vmem>>, vector<1x64x64xf32>
    %167 = vector.shape_cast %166 : vector<1x64x64xf32> to vector<64x64xf32>
    %cst_190 = arith.constant dense<0.000000e+00> : vector<256x64xf32>
    %168 = tpu.matmul %165, %167, %cst_190 {dimension_numbers = #tpu.dot_dimension_numbers<[1], [0], [0], [1], [0, 0, 1, 1], [], []>} : vector<256x64xf32>, vector<64x64xf32>, vector<256x64xf32> -> vector<256x64xf32>
    %169 = arith.addf %163, %168 : vector<256x64xf32>
    %c2_191 = arith.constant 2 : index
    %c7_192 = arith.constant 7 : index
    %c0_193 = arith.constant 0 : index
    %170 = vector.load %arg11[%c2_191, %c7_192, %c0_193] : memref<18x25x64xf32, #tpu.memory_space<vmem>>, vector<16x16x64xf32>
    %171 = vector.shape_cast %170 : vector<16x16x64xf32> to vector<256x64xf32>
    %c6_194 = arith.constant 6 : index
    %c0_195 = arith.constant 0 : index
    %c0_196 = arith.constant 0 : index
    %172 = vector.load %arg6[%c6_194, %c0_195, %c0_196] : memref<9x64x64xf32, #tpu.memory_space<vmem>>, vector<1x64x64xf32>
    %173 = vector.shape_cast %172 : vector<1x64x64xf32> to vector<64x64xf32>
    %cst_197 = arith.constant dense<0.000000e+00> : vector<256x64xf32>
    %174 = tpu.matmul %171, %173, %cst_197 {dimension_numbers = #tpu.dot_dimension_numbers<[1], [0], [0], [1], [0, 0, 1, 1], [], []>} : vector<256x64xf32>, vector<64x64xf32>, vector<256x64xf32> -> vector<256x64xf32>
    %175 = arith.addf %169, %174 : vector<256x64xf32>
    %c2_198 = arith.constant 2 : index
    %c8_199 = arith.constant 8 : index
    %c0_200 = arith.constant 0 : index
    %176 = vector.load %arg11[%c2_198, %c8_199, %c0_200] : memref<18x25x64xf32, #tpu.memory_space<vmem>>, vector<16x16x64xf32>
    %177 = vector.shape_cast %176 : vector<16x16x64xf32> to vector<256x64xf32>
    %c7_201 = arith.constant 7 : index
    %c0_202 = arith.constant 0 : index
    %c0_203 = arith.constant 0 : index
    %178 = vector.load %arg6[%c7_201, %c0_202, %c0_203] : memref<9x64x64xf32, #tpu.memory_space<vmem>>, vector<1x64x64xf32>
    %179 = vector.shape_cast %178 : vector<1x64x64xf32> to vector<64x64xf32>
    %cst_204 = arith.constant dense<0.000000e+00> : vector<256x64xf32>
    %180 = tpu.matmul %177, %179, %cst_204 {dimension_numbers = #tpu.dot_dimension_numbers<[1], [0], [0], [1], [0, 0, 1, 1], [], []>} : vector<256x64xf32>, vector<64x64xf32>, vector<256x64xf32> -> vector<256x64xf32>
    %181 = arith.addf %175, %180 : vector<256x64xf32>
    %c2_205 = arith.constant 2 : index
    %c9_206 = arith.constant 9 : index
    %c0_207 = arith.constant 0 : index
    %182 = vector.load %arg11[%c2_205, %c9_206, %c0_207] : memref<18x25x64xf32, #tpu.memory_space<vmem>>, vector<16x16x64xf32>
    %183 = vector.shape_cast %182 : vector<16x16x64xf32> to vector<256x64xf32>
    %c8_208 = arith.constant 8 : index
    %c0_209 = arith.constant 0 : index
    %c0_210 = arith.constant 0 : index
    %184 = vector.load %arg6[%c8_208, %c0_209, %c0_210] : memref<9x64x64xf32, #tpu.memory_space<vmem>>, vector<1x64x64xf32>
    %185 = vector.shape_cast %184 : vector<1x64x64xf32> to vector<64x64xf32>
    %cst_211 = arith.constant dense<0.000000e+00> : vector<256x64xf32>
    %186 = tpu.matmul %183, %185, %cst_211 {dimension_numbers = #tpu.dot_dimension_numbers<[1], [0], [0], [1], [0, 0, 1, 1], [], []>} : vector<256x64xf32>, vector<64x64xf32>, vector<256x64xf32> -> vector<256x64xf32>
    %187 = arith.addf %181, %186 : vector<256x64xf32>
    %c0_212 = arith.constant 0 : index
    %c0_213 = arith.constant 0 : index
    %188 = vector.load %arg7[%c0_212, %c0_213] : memref<1x64xf32, #tpu.memory_space<vmem>>, vector<1x64xf32>
    %189 = vector.broadcast %188 : vector<1x64xf32> to vector<256x64xf32>
    %190 = arith.addf %187, %189 : vector<256x64xf32>
    %cst_214 = arith.constant 0.000000e+00 : f32
    %191 = vector.broadcast %cst_214 : f32 to vector<256x64xf32>
    %192 = arith.maximumf %190, %191 : vector<256x64xf32>
    %193 = vector.shape_cast %192 : vector<256x64xf32> to vector<1x256x64xf32>
    %c0_215 = arith.constant 0 : index
    %c0_216 = arith.constant 0 : index
    %c0_217 = arith.constant 0 : index
    %194 = vector.load %arg8[%c0_215, %c0_216, %c0_217] : memref<1x256x64xf32, #tpu.memory_space<vmem>>, vector<1x256x64xf32>
    tpu.vector_store %arg8[%c0_215, %c0_216, %c0_217], %193 {strides = array<i32>} : memref<1x256x64xf32, #tpu.memory_space<vmem>>, vector<1x256x64xf32>,
    return
  }
  func.func @transform_0(%arg0: i32) -> (i32, i32, i32, i32) {
    %c0_i32 = arith.constant 0 : i32
    %c0_i32_0 = arith.constant 0 : i32
    %c0_i32_1 = arith.constant 0 : i32
    %c0_i32_2 = arith.constant 0 : i32
    return %arg0, %c0_i32, %c0_i32_0, %c0_i32_1 : i32, i32, i32, i32
  }
  func.func @transform_1(%arg0: i32) -> (i32, i32, i32) {
    %c0_i32 = arith.constant 0 : i32
    %c0_i32_0 = arith.constant 0 : i32
    %c0_i32_1 = arith.constant 0 : i32
    %c0_i32_2 = arith.constant 0 : i32
    return %c0_i32, %c0_i32_0, %c0_i32_1 : i32, i32, i32
  }
  func.func @transform_2(%arg0: i32) -> (i32, i32) {
    %c0_i32 = arith.constant 0 : i32
    %c0_i32_0 = arith.constant 0 : i32
    %c0_i32_1 = arith.constant 0 : i32
    return %c0_i32, %c0_i32_0 : i32, i32
  }
  func.func @transform_3(%arg0: i32) -> (i32, i32, i32) {
    %c0_i32 = arith.constant 0 : i32
    %c0_i32_0 = arith.constant 0 : i32
    %c0_i32_1 = arith.constant 0 : i32
    %c0_i32_2 = arith.constant 0 : i32
    return %c0_i32, %c0_i32_0, %c0_i32_1 : i32, i32, i32
  }
  func.func @transform_4(%arg0: i32) -> (i32, i32) {
    %c0_i32 = arith.constant 0 : i32
    %c0_i32_0 = arith.constant 0 : i32
    %c0_i32_1 = arith.constant 0 : i32
    return %c0_i32, %c0_i32_0 : i32, i32
  }
  func.func @transform_5(%arg0: i32) -> (i32, i32, i32) {
    %c0_i32 = arith.constant 0 : i32
    %c0_i32_0 = arith.constant 0 : i32
    %c0_i32_1 = arith.constant 0 : i32
    %c0_i32_2 = arith.constant 0 : i32
    return %c0_i32, %c0_i32_0, %c0_i32_1 : i32, i32, i32
  }
  func.func @transform_6(%arg0: i32) -> (i32, i32) {
    %c0_i32 = arith.constant 0 : i32
    %c0_i32_0 = arith.constant 0 : i32
    %c0_i32_1 = arith.constant 0 : i32
    return %c0_i32, %c0_i32_0 : i32, i32
  }
  func.func @transform_7(%arg0: i32) -> (i32, i32, i32) {
    %c0_i32 = arith.constant 0 : i32
    %c0_i32_0 = arith.constant 0 : i32
    %c0_i32_1 = arith.constant 0 : i32
    return %arg0, %c0_i32, %c0_i32_0 : i32, i32, i32
  }
}

module attributes {stable_mosaic.version = 11 : i64} {
  func.func @head_kernel(%arg0: i32, %arg1: memref<2x512xf32, #tpu.memory_space<vmem>>, %arg2: memref<512x256xf32, #tpu.memory_space<vmem>>, %arg3: memref<1x256xf32, #tpu.memory_space<vmem>>, %arg4: memref<256x6xf32, #tpu.memory_space<vmem>>, %arg5: memref<1x6xf32, #tpu.memory_space<vmem>>, %arg6: memref<2x6xf32, #tpu.memory_space<vmem>>) attributes {dimension_semantics = [#tpu.dimension_semantics<arbitrary>], iteration_bounds = array<i64: 1>, scalar_prefetch = 0 : i64, scratch_operands = 0 : i64, tpu.core_type = #tpu.core_type<tc>, window_params = [{pipeline_mode = #tpu.pipeline_mode<synchronous>, transform_indices = @transform_0, window_bounds = array<i64: 2, 512>}, {pipeline_mode = #tpu.pipeline_mode<synchronous>, transform_indices = @transform_1, window_bounds = array<i64: 512, 256>}, {pipeline_mode = #tpu.pipeline_mode<synchronous>, transform_indices = @transform_2, window_bounds = array<i64: 1, 256>}, {pipeline_mode = #tpu.pipeline_mode<synchronous>, transform_indices = @transform_3, window_bounds = array<i64: 256, 6>}, {pipeline_mode = #tpu.pipeline_mode<synchronous>, transform_indices = @transform_4, window_bounds = array<i64: 1, 6>}, {pipeline_mode = #tpu.pipeline_mode<synchronous>, transform_indices = @transform_5, window_bounds = array<i64: 2, 6>}]} {
    %c0 = arith.constant 0 : index
    %c0_0 = arith.constant 0 : index
    %0 = vector.load %arg1[%c0, %c0_0] : memref<2x512xf32, #tpu.memory_space<vmem>>, vector<2x512xf32>
    %c0_1 = arith.constant 0 : index
    %c0_2 = arith.constant 0 : index
    %1 = vector.load %arg2[%c0_1, %c0_2] : memref<512x256xf32, #tpu.memory_space<vmem>>, vector<512x256xf32>
    %cst = arith.constant dense<0.000000e+00> : vector<2x256xf32>
    %2 = tpu.matmul %0, %1, %cst {dimension_numbers = #tpu.dot_dimension_numbers<[1], [0], [0], [1], [0, 0, 1, 1], [], []>} : vector<2x512xf32>, vector<512x256xf32>, vector<2x256xf32> -> vector<2x256xf32>
    %c0_3 = arith.constant 0 : index
    %c0_4 = arith.constant 0 : index
    %3 = vector.load %arg3[%c0_3, %c0_4] : memref<1x256xf32, #tpu.memory_space<vmem>>, vector<1x256xf32>
    %4 = vector.broadcast %3 : vector<1x256xf32> to vector<2x256xf32>
    %5 = arith.addf %2, %4 : vector<2x256xf32>
    %cst_5 = arith.constant 0.000000e+00 : f32
    %6 = vector.broadcast %cst_5 : f32 to vector<2x256xf32>
    %7 = arith.maximumf %5, %6 : vector<2x256xf32>
    %c0_6 = arith.constant 0 : index
    %c0_7 = arith.constant 0 : index
    %8 = vector.load %arg4[%c0_6, %c0_7] : memref<256x6xf32, #tpu.memory_space<vmem>>, vector<256x6xf32>
    %cst_8 = arith.constant dense<0.000000e+00> : vector<2x6xf32>
    %9 = tpu.matmul %7, %8, %cst_8 {dimension_numbers = #tpu.dot_dimension_numbers<[1], [0], [0], [1], [0, 0, 1, 1], [], []>} : vector<2x256xf32>, vector<256x6xf32>, vector<2x6xf32> -> vector<2x6xf32>
    %c0_9 = arith.constant 0 : index
    %c0_10 = arith.constant 0 : index
    %10 = vector.load %arg5[%c0_9, %c0_10] : memref<1x6xf32, #tpu.memory_space<vmem>>, vector<1x6xf32>
    %11 = vector.broadcast %10 : vector<1x6xf32> to vector<2x6xf32>
    %12 = arith.addf %9, %11 : vector<2x6xf32>
    %cst_11 = arith.constant dense<0xFF800000> : vector<2xf32>
    %13 = vector.multi_reduction <maximumf>, %12, %cst_11 [1] : vector<2x6xf32> to vector<2xf32>
    %14 = vector.shape_cast %13 : vector<2xf32> to vector<2x1xf32>
    %15 = vector.broadcast %14 : vector<2x1xf32> to vector<2x6xf32>
    %16 = arith.subf %12, %15 : vector<2x6xf32>
    %17 = math.exp %16 : vector<2x6xf32>
    %cst_12 = arith.constant dense<0.000000e+00> : vector<2xf32>
    %18 = vector.multi_reduction <add>, %17, %cst_12 [1] : vector<2x6xf32> to vector<2xf32>
    %19 = vector.shape_cast %18 : vector<2xf32> to vector<2x1xf32>
    %20 = vector.broadcast %19 : vector<2x1xf32> to vector<2x6xf32>
    %21 = arith.divf %17, %20 : vector<2x6xf32>
    %c0_13 = arith.constant 0 : index
    %c0_14 = arith.constant 0 : index
    %22 = vector.load %arg6[%c0_13, %c0_14] : memref<2x6xf32, #tpu.memory_space<vmem>>, vector<2x6xf32>
    tpu.vector_store %arg6[%c0_13, %c0_14], %21 {strides = array<i32>} : memref<2x6xf32, #tpu.memory_space<vmem>>, vector<2x6xf32>,
    return
  }
  func.func @transform_0(%arg0: i32) -> (i32, i32) {
    %c0_i32 = arith.constant 0 : i32
    %c0_i32_0 = arith.constant 0 : i32
    %c0_i32_1 = arith.constant 0 : i32
    return %c0_i32, %c0_i32_0 : i32, i32
  }
  func.func @transform_1(%arg0: i32) -> (i32, i32) {
    %c0_i32 = arith.constant 0 : i32
    %c0_i32_0 = arith.constant 0 : i32
    %c0_i32_1 = arith.constant 0 : i32
    return %c0_i32, %c0_i32_0 : i32, i32
  }
  func.func @transform_2(%arg0: i32) -> (i32, i32) {
    %c0_i32 = arith.constant 0 : i32
    %c0_i32_0 = arith.constant 0 : i32
    %c0_i32_1 = arith.constant 0 : i32
    return %c0_i32, %c0_i32_0 : i32, i32
  }
  func.func @transform_3(%arg0: i32) -> (i32, i32) {
    %c0_i32 = arith.constant 0 : i32
    %c0_i32_0 = arith.constant 0 : i32
    %c0_i32_1 = arith.constant 0 : i32
    return %c0_i32, %c0_i32_0 : i32, i32
  }
  func.func @transform_4(%arg0: i32) -> (i32, i32) {
    %c0_i32 = arith.constant 0 : i32
    %c0_i32_0 = arith.constant 0 : i32
    %c0_i32_1 = arith.constant 0 : i32
    return %c0_i32, %c0_i32_0 : i32, i32
  }
  func.func @transform_5(%arg0: i32) -> (i32, i32) {
    %c0_i32 = arith.constant 0 : i32
    %c0_i32_0 = arith.constant 0 : i32
    %c0_i32_1 = arith.constant 0 : i32
    return %c0_i32, %c0_i32_0 : i32, i32
  }
}

</mosaic_0001>

<bundles_post_ra>
// kernel: actor_forward.5
= control target key start
LH: loop header
LB: loop body
LE: loop exit
PB: predicated region body
PF: predicated region fallthrough
CT: control target
= control target key end

     0   :  { %s1246_s0 = inlined_call_operand.vmem [shape: f32[2,512], index: 0, kind: input, shape index: {}]   ;;  %s1247_s1 = inlined_call_operand.vmem [shape: f32[512,256], index: 1, kind: input, shape index: {}]   ;;  %s1248_s2 = inlined_call_operand.vmem [shape: f32[1,256], index: 2, kind: input, shape index: {}]   ;;  %s1249_s3 = inlined_call_operand.vmem [shape: f32[256,6], index: 3, kind: input, shape index: {}]   ;;  %s1250_s4 = inlined_call_operand.vmem [shape: f32[1,6], index: 4, kind: input, shape index: {}]   ;;  %s1251_s5 = inlined_call_operand.hbm [shape: f32[2,6], index: 5, kind: output, shape index: {}]  }
   0x1   :  { %v23_v0 = vld [vmem:[%s1247_s1 + $0x8] sm:$0xff]  ;;  %v25_v1 = vld [vmem:[%s1247_s1 + $0x18] sm:$0xff]  ;;  %v22_v2 = vld [vmem:[%s1247_s1] sm:$0xff] }
   0x2   :  { %v500_v3 = vpack.c.bf16 %v25_v1, %v23_v0  ;;  %v24_v4 = vld [vmem:[%s1247_s1 + $0x10] sm:$0xff]  ;;  %v87_v5 = vld [vmem:[%s1247_s1 + $0x208] sm:$0xff]  ;;  %v89_v6 = vld [vmem:[%s1247_s1 + $0x218] sm:$0xff] }
   0x3   :  { %v502_v7 = vpack.c.bf16 %v24_v4, %v22_v2  ;;  %v564_v8 = vpack.c.bf16 %v89_v6, %v87_v5  ;;  %v86_v9 = vld [vmem:[%s1247_s1 + $0x200] sm:$0xff]  ;;  %v88_v10 = vld [vmem:[%s1247_s1 + $0x210] sm:$0xff]  ;;  %v27_v11 = vld [vmem:[%s1247_s1 + $0x28] sm:$0xff] }
   0x4   :  { %501 = vmatprep.subr.bf16.mxu1 %v500_v3  ;;  %v566_v12 = vpack.c.bf16 %v88_v10, %v86_v9  ;;  %v29_v13 = vld [vmem:[%s1247_s1 + $0x38] sm:$0xff]  ;;  %v26_v14 = vld [vmem:[%s1247_s1 + $0x20] sm:$0xff]  ;;  %v28_v15 = vld [vmem:[%s1247_s1 + $0x30] sm:$0xff] }
   0x5   :  { %503 = vmatpush1.bf16.msra.mxu1 %v502_v7  ;;  %565 = vmatprep.subr.bf16.mxu0 %v564_v8  ;;  %v504_v16 = vpack.c.bf16 %v29_v13, %v27_v11  ;;  %v506_v17 = vpack.c.bf16 %v28_v15, %v26_v14  ;;  %v91_v18 = vld [vmem:[%s1247_s1 + $0x228] sm:$0xff]  ;;  %v93_v19 = vld [vmem:[%s1247_s1 + $0x238] sm:$0xff]  ;;  %v90_v20 = vld [vmem:[%s1247_s1 + $0x220] sm:$0xff] }
   0x6   :  { %567 = vmatpush1.bf16.msra.mxu0 %v566_v12  ;;  %v568_v21 = vpack.c.bf16 %v93_v19, %v91_v18  ;;  %v92_v22 = vld [vmem:[%s1247_s1 + $0x230] sm:$0xff]  ;;  %v31_v23 = vld [vmem:[%s1247_s1 + $0x48] sm:$0xff]  ;;  %v33_v24 = vld [vmem:[%s1247_s1 + $0x58] sm:$0xff] }
   0x7   :  { %505 = vmatprep.subr.bf16.mxu1 %v504_v16  ;;  %v570_v25 = vpack.c.bf16 %v92_v22, %v90_v20  ;;  %v508_v26 = vpack.c.bf16 %v33_v24, %v31_v23  ;;  %v30_v27 = vld [vmem:[%s1247_s1 + $0x40] sm:$0xff]  ;;  %v32_v28 = vld [vmem:[%s1247_s1 + $0x50] sm:$0xff]  ;;  %v95_v29 = vld [vmem:[%s1247_s1 + $0x248] sm:$0xff] }
   0x8   :  { %569 = vmatprep.subr.bf16.mxu0 %v568_v21  ;;  %v97_v30 = vld [vmem:[%s1247_s1 + $0x258] sm:$0xff]  ;;  %v94_v31 = vld [vmem:[%s1247_s1 + $0x240] sm:$0xff]  ;;  %v96_v32 = vld [vmem:[%s1247_s1 + $0x250] sm:$0xff]  ;;  %v510_v33 = vpack.c.bf16 %v32_v28, %v30_v27 }
   0x9   :  { %507 = vmatpush1.bf16.msra.mxu1 %v506_v17  ;;  %v572_v34 = vpack.c.bf16 %v97_v30, %v95_v29  ;;  %v35_v35 = vld [vmem:[%s1247_s1 + $0x68] sm:$0xff]  ;;  %v37_v36 = vld [vmem:[%s1247_s1 + $0x78] sm:$0xff]  ;;  %v34_v37 = vld [vmem:[%s1247_s1 + $0x60] sm:$0xff]  ;;  %v574_v38 = vpack.c.bf16 %v96_v32, %v94_v31 }
   0xa   :  { %571 = vmatpush1.bf16.msra.mxu0 %v570_v25  ;;  %509 = vmatprep.subr.bf16.mxu1 %v508_v26  ;;  %v512_v39 = vpack.c.bf16 %v37_v36, %v35_v35  ;;  %v36_v40 = vld [vmem:[%s1247_s1 + $0x70] sm:$0xff]  ;;  %v99_v41 = vld [vmem:[%s1247_s1 + $0x268] sm:$0xff]  ;;  %v101_v42 = vld [vmem:[%s1247_s1 + $0x278] sm:$0xff] }
   0xb   :  { %573 = vmatprep.subr.bf16.mxu0 %v572_v34  ;;  %v576_v43 = vpack.c.bf16 %v101_v42, %v99_v41  ;;  %v98_v44 = vld [vmem:[%s1247_s1 + $0x260] sm:$0xff]  ;;  %v100_v45 = vld [vmem:[%s1247_s1 + $0x270] sm:$0xff]  ;;  %v39_v46 = vld [vmem:[%s1247_s1 + $0x88] sm:$0xff]  ;;  %v514_v48 = vpack.c.bf16 %v36_v40, %v34_v37 }
   0xc   :  { %v41_v47 = vld [vmem:[%s1247_s1 + $0x98] sm:$0xff]  ;;  %v103_v49 = vld [vmem:[%s1247_s1 + $0x288] sm:$0xff]  ;;  %v578_v51 = vpack.c.bf16 %v100_v45, %v98_v44  ;;  %v38_v53 = vld [vmem:[%s1247_s1 + $0x80] sm:$0xff] }
   0xd   :  { %511 = vmatpush1.bf16.msra.mxu1 %v510_v33  ;;  %v105_v50 = vld [vmem:[%s1247_s1 + $0x298] sm:$0xff]  ;;  %v516_v52 = vpack.c.bf16 %v41_v47, %v39_v46  ;;  %v40_v54 = vld [vmem:[%s1247_s1 + $0x90] sm:$0xff]  ;;  %v102_v55 = vld [vmem:[%s1247_s1 + $0x280] sm:$0xff]  ;;  %v152_v46 = vlaneseq  ;;  %v695_v47 = vmov 1983009808  }
   0xe   :  { %575 = vmatpush1.bf16.msra.mxu0 %v574_v38  ;;  %513 = vmatprep.subr.bf16.mxu1 %v512_v39  ;;  %v580_v56 = vpack.c.bf16 %v105_v50, %v103_v49  ;;  %v104_v57 = vld [vmem:[%s1247_s1 + $0x290] sm:$0xff]  ;;  %v43_v58 = vld [vmem:[%s1247_s1 + $0xa8] sm:$0xff]  ;;  %v45_v59 = vld [vmem:[%s1247_s1 + $0xb8] sm:$0xff]  ;;  %v518_v62 = vpack.c.bf16 %v40_v54, %v38_v53 }
   0xf   :  { %577 = vmatprep.subr.bf16.mxu0 %v576_v43  ;;  %v107_v60 = vld [vmem:[%s1247_s1 + $0x2a8] sm:$0xff]  ;;  %v109_v61 = vld [vmem:[%s1247_s1 + $0x2b8] sm:$0xff]  ;;  %v582_v63 = vpack.c.bf16 %v104_v57, %v102_v55  ;;  %v520_v0 = vpack.c.bf16 %v45_v59, %v43_v58  ;;  %v42_v1 = vld [vmem:[%s1247_s1 + $0xa0] sm:$0xff] }
  0x10   :  { %v44_v2 = vld [vmem:[%s1247_s1 + $0xb0] sm:$0xff]  ;;  %v106_v3 = vld [vmem:[%s1247_s1 + $0x2a0] sm:$0xff]  ;;  %v584_v4 = vpack.c.bf16 %v109_v61, %v107_v60  ;;  %v47_v6 = vld [vmem:[%s1247_s1 + $0xc8] sm:$0xff]  ;;  %v979_v61 = vshrl.u32 %v152_v46, 7 }
  0x11   :  { %515 = vmatpush1.bf16.msra.mxu1 %v514_v48  ;;  %v108_v5 = vld [vmem:[%s1247_s1 + $0x2b0] sm:$0xff]  ;;  %v49_v7 = vld [vmem:[%s1247_s1 + $0xd8] sm:$0xff]  ;;  %v111_v8 = vld [vmem:[%s1247_s1 + $0x2c8] sm:$0xff]  ;;  %v522_v10 = vpack.c.bf16 %v44_v2, %v42_v1  ;;  %v165_v48 = vunpack.c.l.s4 %v695_v47 }
  0x12   :  { %579 = vmatpush1.bf16.msra.mxu0 %v578_v51  ;;  %517 = vmatprep.subr.bf16.mxu1 %v516_v52  ;;  %v113_v9 = vld [vmem:[%s1247_s1 + $0x2d8] sm:$0xff]  ;;  %v586_v11 = vpack.c.bf16 %v108_v5, %v106_v3  ;;  %v524_v12 = vpack.c.bf16 %v49_v7, %v47_v6  ;;  %v46_v13 = vld [vmem:[%s1247_s1 + $0xc0] sm:$0xff]  ;;  %v48_v14 = vld [vmem:[%s1247_s1 + $0xd0] sm:$0xff] }
  0x13   :  { %581 = vmatprep.subr.bf16.mxu0 %v580_v56  ;;  %v110_v15 = vld [vmem:[%s1247_s1 + $0x2c0] sm:$0xff]  ;;  %v588_v16 = vpack.c.bf16 %v113_v9, %v111_v8  ;;  %v112_v17 = vld [vmem:[%s1247_s1 + $0x2d0] sm:$0xff]  ;;  %v51_v18 = vld [vmem:[%s1247_s1 + $0xe8] sm:$0xff]  ;;  %v526_v22 = vpack.c.bf16 %v48_v14, %v46_v13 }
  0x14   :  { %v53_v19 = vld [vmem:[%s1247_s1 + $0xf8] sm:$0xff]  ;;  %v115_v20 = vld [vmem:[%s1247_s1 + $0x2e8] sm:$0xff]  ;;  %v590_v23 = vpack.c.bf16 %v112_v17, %v110_v15  ;;  %v50_v25 = vld [vmem:[%s1247_s1 + $0xe0] sm:$0xff] }
  0x15   :  { %519 = vmatpush1.bf16.msra.mxu1 %v518_v62  ;;  %v117_v21 = vld [vmem:[%s1247_s1 + $0x2f8] sm:$0xff]  ;;  %v528_v24 = vpack.c.bf16 %v53_v19, %v51_v18  ;;  %v52_v26 = vld [vmem:[%s1247_s1 + $0xf0] sm:$0xff]  ;;  %v114_v27 = vld [vmem:[%s1247_s1 + $0x2e0] sm:$0xff]  ;;  %v166_v62 = vunpack.c.0.s8 %v165_v48 }
  0x16   :  { %583 = vmatpush1.bf16.msra.mxu0 %v582_v63  ;;  %521 = vmatprep.subr.bf16.mxu1 %v520_v0  ;;  %v592_v28 = vpack.c.bf16 %v117_v21, %v115_v20  ;;  %v116_v29 = vld [vmem:[%s1247_s1 + $0x2f0] sm:$0xff]  ;;  %v55_v30 = vld [vmem:[%s1247_s1 + $0x108] sm:$0xff]  ;;  %v57_v31 = vld [vmem:[%s1247_s1 + $0x118] sm:$0xff]  ;;  %v530_v34 = vpack.c.bf16 %v52_v26, %v50_v25 }
  0x17   :  { %585 = vmatprep.subr.bf16.mxu0 %v584_v4  ;;  %v119_v32 = vld [vmem:[%s1247_s1 + $0x308] sm:$0xff]  ;;  %v121_v33 = vld [vmem:[%s1247_s1 + $0x318] sm:$0xff]  ;;  %v594_v35 = vpack.c.bf16 %v116_v29, %v114_v27  ;;  %v532_v36 = vpack.c.bf16 %v57_v31, %v55_v30  ;;  %v54_v37 = vld [vmem:[%s1247_s1 + $0x100] sm:$0xff] }
  0x18   :  { %v56_v38 = vld [vmem:[%s1247_s1 + $0x110] sm:$0xff]  ;;  %v118_v39 = vld [vmem:[%s1247_s1 + $0x300] sm:$0xff]  ;;  %v596_v40 = vpack.c.bf16 %v121_v33, %v119_v32  ;;  %v59_v42 = vld [vmem:[%s1247_s1 + $0x128] sm:$0xff] }
  0x19   :  { %523 = vmatpush1.bf16.msra.mxu1 %v522_v10  ;;  %v120_v41 = vld [vmem:[%s1247_s1 + $0x310] sm:$0xff]  ;;  %v61_v43 = vld [vmem:[%s1247_s1 + $0x138] sm:$0xff]  ;;  %v123_v44 = vld [vmem:[%s1247_s1 + $0x328] sm:$0xff]  ;;  %v534_v49 = vpack.c.bf16 %v56_v38, %v54_v37 }
  0x1a   :  { %587 = vmatpush1.bf16.msra.mxu0 %v586_v11  ;;  %525 = vmatprep.subr.bf16.mxu1 %v524_v12  ;;  %v125_v45 = vld [vmem:[%s1247_s1 + $0x338] sm:$0xff]  ;;  %v598_v50 = vpack.c.bf16 %v120_v41, %v118_v39  ;;  %v536_v51 = vpack.c.bf16 %v61_v43, %v59_v42  ;;  %v58_v52 = vld [vmem:[%s1247_s1 + $0x120] sm:$0xff]  ;;  %v60_v53 = vld [vmem:[%s1247_s1 + $0x130] sm:$0xff]  ;;  %v169_v11 = vsub.s32 %v166_v62, %v979_v61 }
  0x1b   :  { %589 = vmatprep.subr.bf16.mxu0 %v588_v16  ;;  %v122_v54 = vld [vmem:[%s1247_s1 + $0x320] sm:$0xff]  ;;  %v600_v55 = vpack.c.bf16 %v125_v45, %v123_v44  ;;  %v124_v56 = vld [vmem:[%s1247_s1 + $0x330] sm:$0xff]  ;;  %v63_v57 = vld [vmem:[%s1247_s1 + $0x148] sm:$0xff]  ;;  %v538_v63 = vpack.c.bf16 %v60_v53, %v58_v52 }
  0x1c   :  { %v65_v58 = vld [vmem:[%s1247_s1 + $0x158] sm:$0xff]  ;;  %v127_v59 = vld [vmem:[%s1247_s1 + $0x348] sm:$0xff]  ;;  %v602_v0 = vpack.c.bf16 %v124_v56, %v122_v54  ;;  %v62_v2 = vld [vmem:[%s1247_s1 + $0x140] sm:$0xff] }
  0x1d   :  { %527 = vmatpush1.bf16.msra.mxu1 %v526_v22  ;;  %v129_v60 = vld [vmem:[%s1247_s1 + $0x358] sm:$0xff]  ;;  %v540_v1 = vpack.c.bf16 %v65_v58, %v63_v57  ;;  %v64_v3 = vld [vmem:[%s1247_s1 + $0x150] sm:$0xff]  ;;  %v126_v4 = vld [vmem:[%s1247_s1 + $0x340] sm:$0xff] }
  0x1e   :  { %591 = vmatpush1.bf16.msra.mxu0 %v590_v23  ;;  %529 = vmatprep.subr.bf16.mxu1 %v528_v24  ;;  %v604_v5 = vpack.c.bf16 %v129_v60, %v127_v59  ;;  %v128_v6 = vld [vmem:[%s1247_s1 + $0x350] sm:$0xff]  ;;  %v67_v7 = vld [vmem:[%s1247_s1 + $0x168] sm:$0xff]  ;;  %v69_v8 = vld [vmem:[%s1247_s1 + $0x178] sm:$0xff]  ;;  %v542_v12 = vpack.c.bf16 %v64_v3, %v62_v2 }
  0x1f   :  { %593 = vmatprep.subr.bf16.mxu0 %v592_v28  ;;  %v131_v9 = vld [vmem:[%s1247_s1 + $0x368] sm:$0xff]  ;;  %v133_v10 = vld [vmem:[%s1247_s1 + $0x378] sm:$0xff]  ;;  %v66_v13 = vld [vmem:[%s1247_s1 + $0x160] sm:$0xff]  ;;  %v606_v14 = vpack.c.bf16 %v128_v6, %v126_v4  ;;  %v544_v15 = vpack.c.bf16 %v69_v8, %v67_v7 }
  0x20   :  { %v68_v16 = vld [vmem:[%s1247_s1 + $0x170] sm:$0xff]  ;;  %v130_v17 = vld [vmem:[%s1247_s1 + $0x360] sm:$0xff]  ;;  %v608_v19 = vpack.c.bf16 %v133_v10, %v131_v9  ;;  %v71_v20 = vld [vmem:[%s1247_s1 + $0x188] sm:$0xff] }
  0x21   :  { %531 = vmatpush1.bf16.msra.mxu1 %v530_v34  ;;  %v132_v18 = vld [vmem:[%s1247_s1 + $0x370] sm:$0xff]  ;;  %v73_v21 = vld [vmem:[%s1247_s1 + $0x198] sm:$0xff]  ;;  %v21_v22 = vld [vmem:[%s1246_s0] sm:$0xff]  ;;  %v546_v27 = vpack.c.bf16 %v68_v16, %v66_v13 }
  0x22   :  { %595 = vmatpush1.bf16.msra.mxu0 %v594_v35  ;;  %533 = vmatprep.subr.bf16.mxu1 %v532_v36  ;;  %v135_v23 = vld [vmem:[%s1247_s1 + $0x388] sm:$0xff]  ;;  %v137_v24 = vld [vmem:[%s1247_s1 + $0x398] sm:$0xff]  ;;  %v1033_v25 = vrot.slane %v21_v22, %v169_v11  ;;  %v163_v26 = vcombine.high %v21_v22, %v21_v22  ;;  %v610_v28 = vpack.c.bf16 %v132_v18, %v130_v17  ;;  %v70_v30 = vld [vmem:[%s1247_s1 + $0x180] sm:$0xff] }
  0x23   :  { %597 = vmatprep.subr.bf16.mxu0 %v596_v40  ;;  %v548_v29 = vpack.c.bf16 %v73_v21, %v71_v20  ;;  %v72_v31 = vld [vmem:[%s1247_s1 + $0x190] sm:$0xff]  ;;  %v134_v32 = vld [vmem:[%s1247_s1 + $0x380] sm:$0xff]  ;;  %v612_v35 = vpack.c.bf16 %v137_v24, %v135_v23  ;;  %v75_v37 = vld [vmem:[%s1247_s1 + $0x1a8] sm:$0xff] }
  0x24   :  { %v178_v33 = vcombine.high %v1033_v25, %v1033_v25  ;;  %v1046_v34 = vrot.slane %v163_v26, %v169_v11  ;;  %v136_v36 = vld [vmem:[%s1247_s1 + $0x390] sm:$0xff]  ;;  %v77_v38 = vld [vmem:[%s1247_s1 + $0x1b8] sm:$0xff]  ;;  %v139_v39 = vld [vmem:[%s1247_s1 + $0x3a8] sm:$0xff]  ;;  %v550_v42 = vpack.c.bf16 %v72_v31, %v70_v30 }
  0x25   :  { %535 = vmatpush1.bf16.msra.mxu1 %v534_v49  ;;  %v141_v40 = vld [vmem:[%s1247_s1 + $0x3b8] sm:$0xff]  ;;  %v614_v43 = vpack.c.bf16 %v136_v36, %v134_v32  ;;  %v552_v44 = vpack.c.bf16 %v77_v38, %v75_v37  ;;  %v74_v45 = vld [vmem:[%s1247_s1 + $0x1a0] sm:$0xff]  ;;  %v76_v46 = vld [vmem:[%s1247_s1 + $0x1b0] sm:$0xff] }
  0x26   :  { %599 = vmatpush1.bf16.msra.mxu0 %v598_v50  ;;  %537 = vmatprep.subr.bf16.mxu1 %v536_v51  ;;  %v179_v41 = vcombine.high %v1046_v34, %v1046_v34  ;;  %v138_v47 = vld [vmem:[%s1247_s1 + $0x3a0] sm:$0xff]  ;;  %v616_v48 = vpack.c.bf16 %v141_v40, %v139_v39  ;;  %v140_v49 = vld [vmem:[%s1247_s1 + $0x3b0] sm:$0xff]  ;;  %v79_v50 = vld [vmem:[%s1247_s1 + $0x1c8] sm:$0xff] }
  0x27   :  { %601 = vmatprep.subr.bf16.mxu0 %v600_v55  ;;  %248 = vmatprep.mubr.f32.mxu1 %v178_v33  ;;  %v81_v51 = vld [vmem:[%s1247_s1 + $0x1d8] sm:$0xff]  ;;  %v143_v52 = vld [vmem:[%s1247_s1 + $0x3c8] sm:$0xff] }
  0x28   :  { %319 = vmatprep.mubr.f32.mxu0 %v179_v41  ;;  %v145_v53 = vld [vmem:[%s1247_s1 + $0x3d8] sm:$0xff] }
  0x29   :  { %539 = vmatpush1.bf16.msra.mxu1 %v538_v63 }
  0x2a   :  { %603 = vmatpush1.bf16.msra.mxu0 %v602_v0  ;;  %541 = vmatprep.subr.bf16.mxu1 %v540_v1 }
  0x2b   :  { %605 = vmatprep.subr.bf16.mxu0 %v604_v5 }
  0x2d   :  { %543 = vmatpush1.bf16.msra.mxu1 %v542_v12 }
  0x2e   :  { %607 = vmatpush1.bf16.msra.mxu0 %v606_v14  ;;  %545 = vmatprep.subr.bf16.mxu1 %v544_v15 }
  0x2f   :  { %609 = vmatprep.subr.bf16.mxu0 %v608_v19 }
  0x31   :  { %547 = vmatpush1.bf16.msra.mxu1 %v546_v27 }
  0x32   :  { %611 = vmatpush1.bf16.msra.mxu0 %v610_v28  ;;  %549 = vmatprep.subr.bf16.mxu1 %v548_v29 }
  0x33   :  { %613 = vmatprep.subr.bf16.mxu0 %v612_v35 }
  0x34   :  { %10 = vsyncpa [#allocation3], 0  ;;  %v554_v54 = vpack.c.bf16 %v76_v46, %v74_v45  ;;  %v618_v55 = vpack.c.bf16 %v140_v49, %v138_v47  ;;  %v556_v56 = vpack.c.bf16 %v81_v51, %v79_v50  ;;  %v78_v57 = vld [vmem:[%s1247_s1 + $0x1c0] sm:$0xff]  ;;  %v80_v58 = vld [vmem:[%s1247_s1 + $0x1d0] sm:$0xff]  ;;  %v620_v60 = vpack.c.bf16 %v145_v53, %v143_v52  ;;  %s696_s9 = smov [#allocation2]  }
  0x35   :  { %551 = vmatpush1.bf16.msra.mxu1 %v550_v42  ;;  %v142_v59 = vld [vmem:[%s1247_s1 + $0x3c0] sm:$0xff]  ;;  %v144_v62 = vld [vmem:[%s1247_s1 + $0x3d0] sm:$0xff]  ;;  %v83_v63 = vld [vmem:[%s1247_s1 + $0x1e8] sm:$0xff]  ;;  %v558_v3 = vpack.c.bf16 %v80_v58, %v78_v57  ;;  %vm437_vm0 = vcmask 41984   ;;  %s456_s10 = sshll.u32 %s696_s9, 4  ;;  %s457_s10 = int_to_ptr.vmem [resolvable:$true] %s456_s10 }
  0x36   :  { %615 = vmatpush1.bf16.msra.mxu0 %v614_v43  ;;  %553 = vmatprep.subr.bf16.mxu1 %v552_v44  ;;  %v85_v0 = vld [vmem:[%s1247_s1 + $0x1f8] sm:$0xff]  ;;  %v147_v1 = vld [vmem:[%s1247_s1 + $0x3e8] sm:$0xff]  ;;  %v622_v4 = vpack.c.bf16 %v144_v62, %v142_v59  ;;  %v82_v6 = vld [vmem:[%s1247_s1 + $0x1e0] sm:$0xff]  ;;  %v154_v62 = vsub.s32 0, %v979_v61  ;;  %p676_p1 = scmp.lt.s32.totalorder %s457_s10, %s457_s10 }
  0x37   :  { %617 = vmatprep.subr.bf16.mxu0 %v616_v48  ;;  %v149_v2 = vld [vmem:[%s1247_s1 + $0x3f8] sm:$0xff]  ;;  %v560_v5 = vpack.c.bf16 %v85_v0, %v83_v63  ;;  %v84_v7 = vld [vmem:[%s1247_s1 + $0x1f0] sm:$0xff]  ;;  %v146_v8 = vld [vmem:[%s1247_s1 + $0x3e0] sm:$0xff]  ;;  %v158_v0 = vsub.s32 1, %v979_v61 }
  0x38   :  { %v624_v9 = vpack.c.bf16 %v149_v2, %v147_v1  ;;  %v148_v10 = vld [vmem:[%s1247_s1 + $0x3f0] sm:$0xff]  ;;  %v344_v11 = vld [vmem:[%s1249_s3 + $0x80] sm:$0xff]  ;;  %v345_v12 = vld [vmem:[%s1249_s3 + $0x88] sm:$0xff]  ;;  %v562_v13 = vpack.c.bf16 %v84_v7, %v82_v6 }
  0x39   :  { %555 = vmatpush1.bf16.msra.mxu1 %v554_v54  ;;  %v626_v14 = vpack.c.bf16 %v148_v10, %v146_v8  ;;  %v628_v15 = vpack.c.bf16 %v345_v12, %v344_v11  ;;  %v328_v16 = vld [vmem:[%s1249_s3] sm:$0xff]  ;;  %v329_v17 = vld [vmem:[%s1249_s3 + $0x8] sm:$0xff]  ;;  %v346_v18 = vld [vmem:[%s1249_s3 + $0x90] sm:$0xff] }
  0x3a   :  { %619 = vmatpush1.bf16.msra.mxu0 %v618_v55  ;;  %557 = vmatprep.subr.bf16.mxu1 %v556_v56  ;;  %v347_v19 = vld [vmem:[%s1249_s3 + $0x98] sm:$0xff]  ;;  %v630_v20 = vpack.c.bf16 %v329_v17, %v328_v16  ;;  %v330_v22 = vld [vmem:[%s1249_s3 + $0x10] sm:$0xff]  ;;  %v348_v24 = vld [vmem:[%s1249_s3 + $0xa0] sm:$0xff] }
  0x3b   :  { %621 = vmatprep.subr.bf16.mxu0 %v620_v60  ;;  %v632_v21 = vpack.c.bf16 %v347_v19, %v346_v18  ;;  %v331_v23 = vld [vmem:[%s1249_s3 + $0x18] sm:$0xff]  ;;  %v349_v26 = vld [vmem:[%s1249_s3 + $0xa8] sm:$0xff]  ;;  %v332_v29 = vld [vmem:[%s1249_s3 + $0x20] sm:$0xff] }
  0x3c   :  { %v634_v27 = vpack.c.bf16 %v331_v23, %v330_v22  ;;  %v636_v28 = vpack.c.bf16 %v349_v26, %v348_v24  ;;  %v333_v30 = vld [vmem:[%s1249_s3 + $0x28] sm:$0xff]  ;;  %v350_v31 = vld [vmem:[%s1249_s3 + $0xb0] sm:$0xff]  ;;  %v335_v35 = vld [vmem:[%s1249_s3 + $0x38] sm:$0xff] }
  0x3d   :  { %559 = vmatpush1.bf16.msra.mxu1 %v558_v3  ;;  %v638_v32 = vpack.c.bf16 %v333_v30, %v332_v29  ;;  %v352_v36 = vld [vmem:[%s1249_s3 + $0xc0] sm:$0xff]  ;;  %v353_v37 = vld [vmem:[%s1249_s3 + $0xc8] sm:$0xff]  ;;  %v354_v42 = vld [vmem:[%s1249_s3 + $0xd0] sm:$0xff] }
  0x3e   :  { %623 = vmatpush1.bf16.msra.mxu0 %v622_v4  ;;  %561 = vmatprep.subr.bf16.mxu1 %v560_v5  ;;  %v644_v39 = vpack.c.bf16 %v353_v37, %v352_v36  ;;  %v336_v40 = vld [vmem:[%s1249_s3 + $0x40] sm:$0xff]  ;;  %v337_v41 = vld [vmem:[%s1249_s3 + $0x48] sm:$0xff]  ;;  %v355_v43 = vld [vmem:[%s1249_s3 + $0xd8] sm:$0xff] }
  0x3f   :  { %625 = vmatprep.subr.bf16.mxu0 %v624_v9  ;;  %v646_v44 = vpack.c.bf16 %v337_v41, %v336_v40  ;;  %v648_v45 = vpack.c.bf16 %v355_v43, %v354_v42  ;;  %v338_v46 = vld [vmem:[%s1249_s3 + $0x50] sm:$0xff]  ;;  %v339_v47 = vld [vmem:[%s1249_s3 + $0x58] sm:$0xff]  ;;  %v356_v49 = vld [vmem:[%s1249_s3 + $0xe0] sm:$0xff] }
  0x40   :  { %v650_v48 = vpack.c.bf16 %v339_v47, %v338_v46  ;;  %v357_v50 = vld [vmem:[%s1249_s3 + $0xe8] sm:$0xff]  ;;  %v340_v52 = vld [vmem:[%s1249_s3 + $0x60] sm:$0xff]  ;;  %v358_v55 = vld [vmem:[%s1249_s3 + $0xf0] sm:$0xff] }
  0x41   :  { %563 = vmatpush1.bf16.msra.mxu1 %v562_v13  ;;  %v652_v51 = vpack.c.bf16 %v357_v50, %v356_v49  ;;  %v341_v53 = vld [vmem:[%s1249_s3 + $0x68] sm:$0xff]  ;;  %v359_v56 = vld [vmem:[%s1249_s3 + $0xf8] sm:$0xff]  ;;  %v342_v58 = vld [vmem:[%s1249_s3 + $0x70] sm:$0xff] }
  0x42   :  { %627 = vmatpush1.bf16.msra.mxu0 %v626_v14  ;;  %629 = vmatprep.subr.bf16.mxu1 %v628_v15  ;;  %v654_v54 = vpack.c.bf16 %v341_v53, %v340_v52  ;;  %v656_v57 = vpack.c.bf16 %v359_v56, %v358_v55  ;;  %v343_v59 = vld [vmem:[%s1249_s3 + $0x78] sm:$0xff]  ;;  %v150_v63 = vld [vmem:[%s1248_s2] sm:$0x3] }
  0x43   :  { %v658_v60 = vpack.c.bf16 %v343_v59, %v342_v58  ;;  %v155_v1 = vrot.slane %v150_v63, %v154_v62  ;;  %v159_v2 = vrot.slane %v150_v63, %v158_v0  ;;  %v464_v61 = vld [vmem:[%s1250_s4] ss:$0 sm:$0xff]  ;;  %s671_s4 = scalar_lea.vmem %s457_s10, 32 }
  0x44   :  { %249 = vmatmul.mubr.f32.vlgmr.msra.gmra.mrb[0].mxu1 %v1033_v25  ;;  %v351_v25 = vld [vmem:[%s1249_s3 + $0xb8] sm:$0xff]  ;;  %p672_p0 = scmp.ne.s32.totalorder %s457_s10, %s671_s4  ;;  %p677_p2 = scmp.lt.s32.totalorder %s671_s4, %s671_s4 }
  0x45   :  { %320 = vmatmul.mubr.f32.vlgmr.msra.gmra.mrb[0].mxu0 %v1046_v34  ;;  %631 = vmatpush3.bf16.msra.mxu1 %v630_v20  ;;  %v640_v33 = vpack.c.bf16 %v351_v25, %v350_v31  ;;  %v334_v34 = vld [vmem:[%s1249_s3 + $0x30] sm:$0xff] }
  0x46   :  { %633 = vmatprep.subr.bf16.mxu1 %v632_v21  ;;  %v642_v38 = vpack.c.bf16 %v335_v35, %v334_v34  ;;  %p678_p3 = por %p677_p2, %p676_p1 }
  0x48   :  { %p679_p4 = pnand %p678_p3, %p672_p0 }
  0x49   :  { %635 = vmatpush3.bf16.msra.mxu1 %v634_v27 }
  0x4a   :  { %637 = vmatprep.subr.bf16.mxu1 %v636_v28 }
  0x4d   :  { %639 = vmatpush3.bf16.msra.mxu1 %v638_v32 }
  0x4e   :  { %641 = vmatprep.subr.bf16.mxu1 %v640_v33 }
  0x51   :  { %643 = vmatpush3.bf16.msra.mxu1 %v642_v38 }
  0x52   :  { %645 = vmatprep.subr.bf16.mxu1 %v644_v39 }
  0x55   :  { %647 = vmatpush3.bf16.msra.mxu1 %v646_v44 }
  0x56   :  { %649 = vmatprep.subr.bf16.mxu1 %v648_v45 }
  0x59   :  { %651 = vmatpush3.bf16.msra.mxu1 %v650_v48 }
  0x5a   :  { %653 = vmatprep.subr.bf16.mxu1 %v652_v51 }
  0x5d   :  { %655 = vmatpush3.bf16.msra.mxu1 %v654_v54 }
  0x5e   :  { %657 = vmatprep.subr.bf16.mxu1 %v656_v57 }
  0x61   :  { %659 = vmatpush3.bf16.msra.mxu1 %v658_v60 }
 0x117   :  { %v250_v3 = vpop.f32.mrb[0].mxu1 }
 0x118   :  { %v251_v4 = vadd.f32 %v250_v3, %v155_v1  ;;  %v252_v5 = vpop.f32.mrb[1].mxu1  ;;  %v321_v6 = vpop.f32.mrb[0].mxu0 }
 0x119   :  { %v253_v7 = vadd.f32 %v252_v5, %v159_v2  ;;  %v323_v8 = vpop.f32.mrb[1].mxu0 }
 0x11a   :  { %v322_v9 = vadd.f32 %v321_v6, %v251_v4 }
 0x11b   :  { %v324_v10 = vadd.f32 %v323_v8, %v253_v7 }
 0x11c   :  { %v326_v12 = vmax.f32 %v322_v9, 0.0 }
 0x11d   :  { %v327_v11 = vmax.f32 %v324_v10, 0.0 }
 0x11f   :  { %431 = vmatprep.mubr.f32.mxu1 %v327_v11 }
 0x120   :  { %432 = vmatmul.mubr.f32.vlgmr.msra.gmra.mrb[2].mxu1 %v326_v12 }
 0x1f3   :  { %v497_v13 = vpop.f32.mrb[2].mxu1 }
 0x1f4   :  { %v498_v14 = vpop.f32.mrb[3].mxu1 }
 0x1f5   :  { %v499_v15 = vadd.f32 %v498_v14, %v497_v13 }
 0x1f7   :  { %v434_v16 = vadd.f32 %v499_v15, %v464_v61 }
 0x1f9   :  { %v438_v17 = vsel %vm437_vm0, %v434_v16, -inf }
 0x1fa   :  { %439 = vmax.xlane.f32.xlu0 %v438_v17 }
 0x287   :  { %v440_v18 = vpop.xlane.xlu0 %439 }
 0x288   :  { %v441_v19 = vsub.f32 %v434_v16, %v440_v18 }
 0x28a   :  { %v442_v20 = vmul.f32 1.442695, %v441_v19 }
 0x28c   :  { %667 = vpow2.f32 %v442_v20 }
 0x296   :  { %v668_v21 = vpop.eup %667 }
 0x297   :  { %v444_v22 = vsel %vm437_vm0, %v668_v21, 0.0 }
 0x298   :  { %445 = vadd.xlane.f32.xlu0 %v444_v22 }
 0x325   :  { %v446_v23 = vpop.xlane.xlu0 %445 }
 0x326   :  { %669 = vrcp.f32 %v446_v23 }
 0x330   :  { %v670_v24 = vpop.eup %669 }
 0x331   :  { %v448_v26 = vmul.f32 %v670_v24, %v668_v21 }
 0x333   :  { %449 = vst.msk [vmem:[#allocation2] sm:$0x3] %vm437_vm0, %v448_v26 }
 0x334   :  { %682 = shalt.err (!%p679_p4)
}
 0x335   :  { %s683_s13 = scalar_lea.hbm %s1251_s5, 32 }
 0x336   :  { %p684_p5 = scmp.ne.s32.totalorder %s1251_s5, %s683_s13  ;;  %p687_p6 = scmp.lt.u32.totalorder %s683_s13, %s1251_s5 }
 0x338   :  { %p689_p7 = pnand %p687_p6, %p684_p5 }
 0x33a   :  { %692 = shalt.err (!%p689_p7)
}
 0x33b   :  { %459 = dma.vmem_to_hbm [thread:$0]  %s457_s10, 32, %s1251_s5, [#allocation3]  }
 0x33c   :  { %693 = dma.done.wait [#allocation3], 32  }
 0x33d   :  { %694 = vsyncadd [#allocation3], 4294967264 }
 0x33e   :  { %463 = vsyncpa [#allocation3], 1 }

// kernel: actor_forward.4
= control target key start
LH: loop header
LB: loop body
LE: loop exit
PB: predicated region body
PF: predicated region fallthrough
CT: control target
= control target key end

     0   :  { %s6986_s0 = inlined_call_operand.vmem [shape: f32[2,16384], index: 0, kind: input, shape index: {}]   ;;  %s6987_s1 = inlined_call_operand.hbm [shape: bf16[16384,512], index: 1, kind: input, shape index: {}]   ;;  %s6988_s2 = inlined_call_operand.hbm [shape: f32[1,512], index: 2, kind: input, shape index: {}]   ;;  %s6989_s3 = inlined_call_operand.vmem [shape: f32[2,512], index: 3, kind: output, shape index: {}]  }
   0x1   :  { %6995 = sst [smem:[#allocation10_spill]] %s6987_s1 }
   0x2   :  { %8 = vsyncpa [#allocation4], 0 }
   0x3   :  { %10 = vsyncpa [#allocation4 + $0x1], 0 }
   0x4   :  { %11 = vsyncpa [#allocation6], 0 }
   0x5   :  { %13 = vsyncpa [#allocation6 + $0x1], 0  ;;  %s6038_s12 = smov 0   ;;  %s6040_s13 = smov 0  }
   0x6   :  { %s6042_s14 = smov 0   ;;  %s6044_s15 = smov 0  }
   0x7   :  { %s6046_s16 = smov 0   ;;  %s6048_s17 = smov 0  }
   0x8   :  { %s6050_s18 = smov 0   ;;  %s6052_s19 = smov 0  }
   0x9   :  { %s6054_s20 = smov 0   ;;  %s6056_s21 = smov 0  }
   0xa   :  { %s6058_s22 = smov 0  }
   0xb LB: > { %s28_s23 = sadd.s32 1, %s6001_s20  ;;  %s66_s24 = sadd.s32 1, %s5989_s17  ;;  %s6009_s22 = sphi %s6058_s22, %s19_s22   ;;  %s6005_s21 = sphi %s6056_s21, %s7021_s21   ;;  %s6001_s20 = sphi %s6054_s20, %s7020_s20   ;;  %s5997_s19 = sphi %s6052_s19, %s7019_s19   ;;  %s5993_s18 = sphi %s6050_s18, %s7018_s18   ;;  %s5989_s17 = sphi %s6048_s17, %s7017_s17   ;;  %s5985_s16 = sphi %s6046_s16, %s7016_s16   ;;  %s5981_s15 = sphi %s6044_s15, %s7015_s15   ;;  %s5977_s14 = sphi %s6042_s14, %s7014_s14   ;;  %s5973_s13 = sphi %s6040_s13, %s7013_s13   ;;  %s5969_s12 = sphi %s6038_s12, %s7012_s12  }
   0xc   : > { %p6095_p0 = scmp.ge.s32.totalorder %s28_s23, 4  ;;  %p73_p1 = scmp.ne.s32.totalorder %s5989_s17, %s5985_s16 }
   0xd   : > { %p6991_p2 = scmp.eq.s32.totalorder %s6009_s22, 0  ;;  %p6990_p4 = scmp.lt.s32.totalorder %s6009_s22, 8 }
   0xe   : > { %s7023_s23 = smov (%p6095_p0, %s28_s23), 0  ;;  %s164_s27 = sand.u32 1, %s5989_s17  }
   0xf   : > { %p75_p3 = por %p6991_p2, %p73_p1  ;;  %s61_s26 = ssub.s32 %s6001_s20, %s7023_s23 }
  0x10   : > { %s4383_s28 = sshll.u32 %s164_s27, 12  ;;  %s4385_s29 = sshll.u32 %s6005_s21, 1 }
  0x11   : > { %s4914_s30 = sshll.u32 %s6001_s20, 11  ;;  %s168_s4 = scalar_lea.vmem [#allocation3], %s4383_s28 }
  0x12   : > { %s178_s5 = sshll.u32 %s168_s4, 4  ;;  %s175_s6 = sadd.s32 %s4914_s30, %s4385_s29  ;;  %s6114_s5 = int_to_ptr.vmem [resolvable:$true] %s178_s5 }
  0x13   : > { %s4387_s7 = sshll.u32 %s175_s6, 6  ;;  %p6118_p5 = pnand %p6990_p4, %p75_p3 }
  0x14   : > { %s6998_s1 = sld [smem:[#allocation10_spill]]  ;;  %s6128_s28 = scalar_lea.sflag [#allocation4], %s164_s27 }
  0x15   : > { %p5857_p8 = pneg %p6118_p5 }
  0x1a   : > { %s6125_s11 = scalar_lea.hbm %s6998_s1, %s4387_s7  ;;  %s5860_s6 = scalar_lea.hbm %s6998_s1, 524288 }
  0x1b   : > { %s5855_s29 = scalar_lea.hbm %s6125_s11, 65536  ;;  %p5861_p11 = scmp.lt.u32.totalorder %s6125_s11, %s6998_s1 }
  0x1c   : > { %p5856_p7 = scmp.ne.s32.totalorder %s6125_s11, %s5855_s29  ;;  %p5862_p12 = scmp.lt.u32.totalorder %s5860_s6, %s5855_s29 }
  0x1d   : > { %p5864_p1 = scmp.lt.u32.totalorder %s5855_s29, %s6125_s11 }
  0x1e   : > { %p5858_p9 = pnand %p5857_p8, %p5856_p7  ;;  %p5863_p13 = por %p5862_p12, %p5861_p11 }
  0x20   : > { %p5859_p10 = pneg %p5858_p9  ;;  %p5865_p3 = por %p5864_p1, %p5863_p13 }
  0x22   : > { %p5866_p4 = pnand %p5865_p3, %p5859_p10 }
  0x24   : > { %5869 = shalt.err (!%p5866_p4)
}
  0x25   : > { %s5870_s27 = scalar_lea.vmem %s6114_s5, 65536  ;;  %s6011_s10 = smov [#allocation3]  }
  0x26   : > { %p5871_p7 = scmp.ne.s32.totalorder %s6114_s5, %s5870_s27  ;;  %s5875_s30 = sshll.u32 %s6011_s10, 4  ;;  %s5876_s30 = int_to_ptr.vmem [resolvable:$false] %s5875_s30 }
  0x27   : > { %s5877_s4 = scalar_lea.vmem %s5876_s30, 131072  ;;  %p5878_p6 = scmp.lt.s32.totalorder %s6114_s5, %s5876_s30 }
  0x28   : > { %p5873_p9 = pnand %p5871_p7, %p5857_p8  ;;  %p5879_p11 = scmp.lt.s32.totalorder %s5877_s4, %s5870_s27 }
  0x2a   : > { %p5874_p2 = pneg %p5873_p9  ;;  %p5880_p12 = por %p5879_p11, %p5878_p6 }
  0x2c   : > { %p5881_p13 = pnand %p5880_p12, %p5874_p2 }
  0x2e   : > { %5884 = shalt.err (!%p5881_p13)
}
  0x2f   : > { %s6012_s29 = smov 256   ;;  %s6013_s6 = smov 128  }
  0x30   : > { %s6014_s7 = smov 8   ;;  %p205_p2 = scmp.lt.s32.totalorder %s6009_s22, 9 }
  0x31   : > { %4981 = dma.hbm_to_vmem [thread:$0]  (!%p6118_p5), %s6125_s11, 65536, %s6114_s5, %s6128_s28, %s6012_s29, %s6013_s6, %s6014_s7  }
  0x32   : > { %p6999_p4 = scmp.ge.s32.totalorder %s6009_s22, 1  ;;  %s4379_s27 = sadd.s32 4294967295, %s6009_s22  }
  0x33   : > { %s31_s10 = sadd.s32 1, %s6005_s21  ;;  %p79_p8 = scmp.ne.s32.totalorder %s5985_s16, %s5981_s15 }
  0x34   : > { %p6159_p6 = pnand %p6999_p4, %p205_p2  ;;  %s7025_s10 = smov (!%p6095_p0, %s31_s10), %s6005_s21 }
  0x35   : > { %p6170_p10 = scmp.eq.s32.totalorder %s4379_s27, 0  ;;  %p33_p5 = scmp.ge.s32.totalorder %s7025_s10, 2 }
  0x36   : > { %s92_s5 = sadd.s32 1, %s5977_s14  ;;  %p99_p3 = scmp.ne.s32.totalorder %s5977_s14, %s5973_s13 }
  0x37   : > { %p6177_p1 = por %p6170_p10, %p79_p8  ;;  %s7027_s10 = smov (%p33_p5, %s7025_s10), 0 }
  0x38   : > { %7003 = sst [smem:[#allocation9_spill]] %s7027_s10  ;;  %p7004_p0 = scmp.eq.s32.totalorder %s6009_s22, 0 }
  0x39   : > { %s7002_s11 = scalar_select %p6177_p1, 1, 0 }
  0x3a   : > { %p6187_p7 = por %p99_p3, %p7004_p0  ;;  %p105_p9 = scmp.ne.s32.totalorder %s5973_s13, %s5969_s12 }
  0x3b   : > { %s62_s25 = ssub.s32 %s6005_s21, %s7027_s10  ;;  %s188_s28 = sand.u32 1, %s5977_s14  }
  0x3c   : > { %s63_s30 = sor.u32 %s62_s25, %s61_s26  ;;  %p90_p11 = scmp.eq.s32.totalorder %s62_s25, 0 }
  0x3d   : > { %p64_p12 = scmp.eq.s32.totalorder %s63_s30, 0  ;;  %p6201_p13 = por %p105_p9, %p6170_p10 }
  0x3e   : > { %s6206_s29 = scalar_select %p90_p11, %s5977_s14, %s92_s5  }
  0x3f   : > { %s7006_s4 = scalar_select %p6201_p13, 1, 0 }
  0x40   : > { %s6211_s6 = scalar_select %p64_p12, %s5989_s17, %s66_s24  }
  0x41   : > { %s4388_s7 = sshll.u32 %s188_s28, 1  ;;  %s4915_s27 = sshll.u32 %s6005_s21, 5 }
  0x42   : > { %s6217_s10 = scalar_lea.hbm %s6988_s2, %s4915_s27  ;;  %s192_s26 = scalar_lea.vmem [#allocation5], %s4388_s7 }
  0x43   : > { %s200_s8 = sshll.u32 %s192_s26, 4  ;;  %p7007_p2 = scmp.lt.s32.totalorder %s6009_s22, 8  ;;  %s6219_s8 = int_to_ptr.vmem [resolvable:$true] %s200_s8 }
  0x44   : > { %s189_s5 = scalar_lea.sflag [#allocation6], %s188_s28  ;;  %s5885_s1 = scalar_lea.hbm %s6217_s10, 32 }
  0x45   : > { %p6225_p4 = pnand %p7007_p2, %p6187_p7  ;;  %p5886_p8 = scmp.ne.s32.totalorder %s6217_s10, %s5885_s1 }
  0x46   : > { %s5890_s15 = scalar_lea.hbm %s6988_s2, 64  ;;  %p5891_p0 = scmp.lt.u32.totalorder %s6217_s10, %s6988_s2 }
  0x47   : > { %p5887_p10 = pneg %p6225_p4  ;;  %p5892_p7 = scmp.lt.u32.totalorder %s5890_s15, %s5885_s1 }
  0x48   : > { %p5894_p11 = scmp.lt.u32.totalorder %s5885_s1, %s6217_s10 }
  0x49   : > { %p5888_p5 = pnand %p5887_p10, %p5886_p8  ;;  %p5893_p9 = por %p5892_p7, %p5891_p0 }
  0x4b   : > { %p5889_p3 = pneg %p5888_p5  ;;  %p5895_p12 = por %p5894_p11, %p5893_p9 }
  0x4d   : > { %p5896_p2 = pnand %p5895_p12, %p5889_p3 }
  0x4f   : > { %5899 = shalt.err (!%p5896_p2)
}
  0x50   : > { %s5900_s28 = scalar_lea.vmem %s6219_s8, 32  ;;  %s6015_s12 = smov [#allocation5]  }
  0x51   : > { %p5901_p8 = scmp.ne.s32.totalorder %s6219_s8, %s5900_s28  ;;  %s5905_s26 = sshll.u32 %s6015_s12, 4  ;;  %s5906_s26 = int_to_ptr.vmem [resolvable:$false] %s5905_s26 }
  0x52   : > { %s5907_s25 = scalar_lea.vmem %s5906_s26, 64  ;;  %p5908_p1 = scmp.lt.s32.totalorder %s6219_s8, %s5906_s26 }
  0x53   : > { %p5903_p5 = pnand %p5901_p8, %p5887_p10  ;;  %p5909_p0 = scmp.lt.s32.totalorder %s5907_s25, %s5900_s28 }
  0x55   : > { %p5904_p13 = pneg %p5903_p5  ;;  %p5910_p7 = por %p5909_p0, %p5908_p1 }
  0x57   : > { %p5911_p9 = pnand %p5910_p7, %p5904_p13 }
  0x59   : > { %5914 = shalt.err (!%p5911_p9)
}
  0x5a   : > { %4984 = dma.hbm_to_vmem [thread:$0]  (!%p6225_p4), %s6217_s10, 32, %s6219_s8, %s189_s5  }
  0x5b   : > { %209 = sbr.rel (%p6159_p6) target bundleno = 864 (0x360), region = 32  ;;  %s211_s1 = sand.u32 (!%p6159_p6), 1, %s5985_s16  }
  0x5c   : > { %s4392_s30 = sshll.u32 (!%p6159_p6), %s211_s1, 12  ;;  %s212_s15 = scalar_lea.sflag (!%p6159_p6), [#allocation4], %s211_s1 }
  0x5d   : > { %s6257_s7 = scalar_lea.vmem (!%p6159_p6), [#allocation3], %s4392_s30  ;;  %p7009_p10 = scmp.ne.s32.totalorder (!%p6159_p6), %s7002_s11, 0 }
  0x62   : > { %5960 = dma.done.wait (%p7009_p10), %s212_s15, 65536  }
  0x63   : > { %5962 = vsyncadd (%p7009_p10), %s212_s15, 4294901760  ;;  %s220_s24 = sand.u32 1, %s5973_s13   ;;  %p7010_p6 = scmp.ne.s32.totalorder %s7006_s4, 0 }
  0x64   : > { %s6264_s27 = sshll.u32 %s220_s24, 1  ;;  %s221_s9 = scalar_lea.sflag [#allocation6], %s220_s24 }
  0x65   : > { %s224_s10 = scalar_lea.vmem [#allocation5], %s6264_s27 }
  0x66   : > { %5964 = dma.done.wait (%p7010_p6), %s221_s9, 32  }
  0x67   : > { %5966 = vsyncadd (%p7010_p6), %s221_s9, 4294967264  ;;  %s4394_s8 = sshll.u32 %s5993_s18, 5  ;;  %s4396_s5 = sshll.u32 %s5997_s19, 1 }
  0x68   : > { %p258_p1 = scmp.lt.s32.totalorder %s4394_s8, 127  ;;  %p267_p13 = scmp.lt.s32.totalorder %s4396_s5, 3 }
  0x69   : > { %p4398_p4 = scmp.ne.s32.totalorder %s5993_s18, 0 }
  0x6a   : > { %s7029_s8 = smov (!%p258_p1, %s4394_s8), 127  ;;  %s7031_s5 = smov (!%p267_p13, %s4396_s5), 3 }
  0x6b   : > { %s4395_s11 = sshll.u32 %s7029_s8, 1  ;;  %s4397_s25 = sshll.u32 %s7031_s5, 1  ;;  %v6016_v0 = vmov (!%p4398_p4), 0.0  }
  0x6c   : > { %s6276_s26 = scalar_lea.vmem %s6986_s0, %s4395_s11  ;;  %s6281_s4 = scalar_lea.vmem %s6989_s3, %s4397_s25  ;;  %276 = vst [vmem:[#allocation2] sm:$0xf] (!%p4398_p4), %v6016_v0 }
  0x6d   : > { %275 = sbr.rel (%p4398_p4) target bundleno = 116 (0x74), region = 44 }
  0x74 PF: > { %v5079_v1 = vld [vmem:[%s6257_s7 + $0x4] ss:$8 sps:$4 sm:$0xff]   ;;  %v5083_v3 = vld [vmem:[%s6257_s7] ss:$8 sps:$4 sm:$0xff]   ;;  %v5085_v5 = vld [vmem:[%s6257_s7 + $0x14] ss:$8 sps:$4 sm:$0xff]   ;;  %v298_v39 = vlaneseq }
  0x75   : > { %v5081_v2 = vld [vmem:[%s6257_s7 + $0x804] ss:$8 sps:$4 sm:$0xff]   ;;  %3566 = vmatprep.subr.bf16.mxu1 %v5079_v1  ;;  %v5084_v4 = vld [vmem:[%s6257_s7 + $0x800] ss:$8 sps:$4 sm:$0xff]   ;;  %v5087_v6 = vld [vmem:[%s6257_s7 + $0x814] ss:$8 sps:$4 sm:$0xff]  }
  0x76   : > { %3894 = vmatprep.subr.bf16.mxu0 %v5081_v2  ;;  %3567 = vmatpush1.bf16.msra.mxu1 %v5083_v3  ;;  %v5089_v7 = vld [vmem:[%s6257_s7 + $0x10] ss:$8 sps:$4 sm:$0xff]   ;;  %v5091_v9 = vld [vmem:[%s6257_s7 + $0x24] ss:$8 sps:$4 sm:$0xff]   ;;  %v5095_v11 = vld [vmem:[%s6257_s7 + $0x20] ss:$8 sps:$4 sm:$0xff]  }
  0x77   : > { %3895 = vmatpush1.bf16.msra.mxu0 %v5084_v4  ;;  %3568 = vmatprep.subr.bf16.mxu1 %v5085_v5  ;;  %v5090_v8 = vld [vmem:[%s6257_s7 + $0x810] ss:$8 sps:$4 sm:$0xff]   ;;  %v5093_v10 = vld [vmem:[%s6257_s7 + $0x824] ss:$8 sps:$4 sm:$0xff]   ;;  %v5096_v12 = vld [vmem:[%s6257_s7 + $0x820] ss:$8 sps:$4 sm:$0xff]  }
  0x78   : > { %3896 = vmatprep.subr.bf16.mxu0 %v5087_v6  ;;  %v5097_v13 = vld [vmem:[%s6257_s7 + $0x34] ss:$8 sps:$4 sm:$0xff]   ;;  %v5101_v15 = vld [vmem:[%s6257_s7 + $0x30] ss:$8 sps:$4 sm:$0xff]   ;;  %v5103_v17 = vld [vmem:[%s6257_s7 + $0x44] ss:$8 sps:$4 sm:$0xff]  }
  0x79   : > { %v5099_v14 = vld [vmem:[%s6257_s7 + $0x834] ss:$8 sps:$4 sm:$0xff]   ;;  %v5102_v16 = vld [vmem:[%s6257_s7 + $0x830] ss:$8 sps:$4 sm:$0xff]   ;;  %v5105_v18 = vld [vmem:[%s6257_s7 + $0x844] ss:$8 sps:$4 sm:$0xff]  }
  0x7a   : > { %3569 = vmatpush1.bf16.msra.mxu1 %v5089_v7  ;;  %v5107_v19 = vld [vmem:[%s6257_s7 + $0x40] ss:$8 sps:$4 sm:$0xff]   ;;  %v5109_v21 = vld [vmem:[%s6257_s7 + $0x54] ss:$8 sps:$4 sm:$0xff]   ;;  %v5113_v23 = vld [vmem:[%s6257_s7 + $0x50] ss:$8 sps:$4 sm:$0xff]  }
  0x7b   : > { %3897 = vmatpush1.bf16.msra.mxu0 %v5090_v8  ;;  %3570 = vmatprep.subr.bf16.mxu1 %v5091_v9  ;;  %v5108_v20 = vld [vmem:[%s6257_s7 + $0x840] ss:$8 sps:$4 sm:$0xff]   ;;  %v5111_v22 = vld [vmem:[%s6257_s7 + $0x854] ss:$8 sps:$4 sm:$0xff]   ;;  %v5114_v24 = vld [vmem:[%s6257_s7 + $0x850] ss:$8 sps:$4 sm:$0xff]  }
  0x7c   : > { %3898 = vmatprep.subr.bf16.mxu0 %v5093_v10  ;;  %v5115_v25 = vld [vmem:[%s6257_s7 + $0x64] ss:$8 sps:$4 sm:$0xff]   ;;  %v5119_v27 = vld [vmem:[%s6257_s7 + $0x60] ss:$8 sps:$4 sm:$0xff]   ;;  %v5121_v29 = vld [vmem:[%s6257_s7 + $0x74] ss:$8 sps:$4 sm:$0xff]  }
  0x7d   : > { %v5117_v26 = vld [vmem:[%s6257_s7 + $0x864] ss:$8 sps:$4 sm:$0xff]   ;;  %v5120_v28 = vld [vmem:[%s6257_s7 + $0x860] ss:$8 sps:$4 sm:$0xff]   ;;  %v5123_v30 = vld [vmem:[%s6257_s7 + $0x874] ss:$8 sps:$4 sm:$0xff]  }
  0x7e   : > { %3571 = vmatpush1.bf16.msra.mxu1 %v5095_v11  ;;  %v5125_v31 = vld [vmem:[%s6257_s7 + $0x70] ss:$8 sps:$4 sm:$0xff]   ;;  %v5127_v33 = vld [vmem:[%s6257_s7 + $0x84] ss:$8 sps:$4 sm:$0xff]   ;;  %v5131_v35 = vld [vmem:[%s6257_s7 + $0x80] ss:$8 sps:$4 sm:$0xff]  }
  0x7f   : > { %3899 = vmatpush1.bf16.msra.mxu0 %v5096_v12  ;;  %3572 = vmatprep.subr.bf16.mxu1 %v5097_v13  ;;  %v5126_v32 = vld [vmem:[%s6257_s7 + $0x870] ss:$8 sps:$4 sm:$0xff]   ;;  %v5129_v34 = vld [vmem:[%s6257_s7 + $0x884] ss:$8 sps:$4 sm:$0xff]   ;;  %v5132_v36 = vld [vmem:[%s6257_s7 + $0x880] ss:$8 sps:$4 sm:$0xff]  }
  0x80   : > { %3900 = vmatprep.subr.bf16.mxu0 %v5099_v14  ;;  %v6017_v37 = vmov 1983009808   ;;  %v5133_v40 = vld [vmem:[%s6257_s7 + $0x94] ss:$8 sps:$4 sm:$0xff]   ;;  %v5137_v42 = vld [vmem:[%s6257_s7 + $0x90] ss:$8 sps:$4 sm:$0xff]  }
  0x81   : > { %v296_v38 = vunpack.c.l.s4 %v6017_v37  ;;  %v5135_v41 = vld [vmem:[%s6257_s7 + $0x894] ss:$8 sps:$4 sm:$0xff]   ;;  %v6323_v44 = vshrl.u32 %v298_v39, 7  ;;  %v5138_v45 = vld [vmem:[%s6257_s7 + $0x890] ss:$8 sps:$4 sm:$0xff]   ;;  %p4911_p3 = scmp.ne.s32.totalorder %s5993_s18, 3 }
  0x82   : > { %3573 = vmatpush1.bf16.msra.mxu1 %v5101_v15  ;;  %v5139_v46 = vld [vmem:[%s6257_s7 + $0xa4] ss:$8 sps:$4 sm:$0xff]   ;;  %v5143_v48 = vld [vmem:[%s6257_s7 + $0xa0] ss:$8 sps:$4 sm:$0xff]   ;;  %v5145_v51 = vld [vmem:[%s6257_s7 + $0xb4] ss:$8 sps:$4 sm:$0xff]  }
  0x83   : > { %3901 = vmatpush1.bf16.msra.mxu0 %v5102_v16  ;;  %3574 = vmatprep.subr.bf16.mxu1 %v5103_v17  ;;  %v297_v43 = vunpack.c.0.s8 %v296_v38  ;;  %v5141_v47 = vld [vmem:[%s6257_s7 + $0x8a4] ss:$8 sps:$4 sm:$0xff]   ;;  %v5144_v49 = vld [vmem:[%s6257_s7 + $0x8a0] ss:$8 sps:$4 sm:$0xff]   ;;  %v5147_v52 = vld [vmem:[%s6257_s7 + $0x8b4] ss:$8 sps:$4 sm:$0xff]  }
  0x84   : > { %3902 = vmatprep.subr.bf16.mxu0 %v5105_v18  ;;  %v278_v53 = vld [vmem:[%s6276_s26] sm:$0xff]  ;;  %v5149_v54 = vld [vmem:[%s6257_s7 + $0xb0] ss:$8 sps:$4 sm:$0xff]   ;;  %v5151_v58 = vld [vmem:[%s6257_s7 + $0xc4] ss:$8 sps:$4 sm:$0xff]  }
  0x85   : > { %v6331_v50 = vsub.s32 %v297_v43, %v6323_v44  ;;  %v5150_v56 = vld [vmem:[%s6257_s7 + $0x8b0] ss:$8 sps:$4 sm:$0xff]   ;;  %v282_v57 = vld [vmem:[%s6276_s26 + $0x20] sm:$0xff]  ;;  %v5153_v59 = vld [vmem:[%s6257_s7 + $0x8c4] ss:$8 sps:$4 sm:$0xff]   ;;  %v294_v9 = vcombine.high %v278_v53, %v278_v53 }
  0x86   : > { %3575 = vmatpush1.bf16.msra.mxu1 %v5107_v19  ;;  %v5155_v0 = vld [vmem:[%s6257_s7 + $0xc0] ss:$8 sps:$4 sm:$0xff]   ;;  %v5157_v2 = vld [vmem:[%s6257_s7 + $0xd4] ss:$8 sps:$4 sm:$0xff]   ;;  %v5161_v5 = vld [vmem:[%s6257_s7 + $0xd0] ss:$8 sps:$4 sm:$0xff]   ;;  %v362_v10 = vcombine.high %v282_v57, %v282_v57 }
  0x87   : > { %3903 = vmatpush1.bf16.msra.mxu0 %v5108_v20  ;;  %3576 = vmatprep.subr.bf16.mxu1 %v5109_v21  ;;  %v6338_v55 = vrot.slane %v278_v53, %v6331_v50  ;;  %v369_v61 = vrot.slane %v282_v57, %v6331_v50  ;;  %v5156_v1 = vld [vmem:[%s6257_s7 + $0x8c0] ss:$8 sps:$4 sm:$0xff]   ;;  %v5159_v3 = vld [vmem:[%s6257_s7 + $0x8d4] ss:$8 sps:$4 sm:$0xff]   ;;  %v5162_v6 = vld [vmem:[%s6257_s7 + $0x8d0] ss:$8 sps:$4 sm:$0xff]   ;;  %v6360_v15 = vrot.slane %v294_v9, %v6331_v50 }
  0x88   : > { %3904 = vmatprep.subr.bf16.mxu0 %v5111_v22  ;;  %v5163_v7 = vld [vmem:[%s6257_s7 + $0xe4] ss:$8 sps:$4 sm:$0xff]   ;;  %v5167_v11 = vld [vmem:[%s6257_s7 + $0xe0] ss:$8 sps:$4 sm:$0xff]   ;;  %v5169_v13 = vld [vmem:[%s6257_s7 + $0xf4] ss:$8 sps:$4 sm:$0xff]   ;;  %v6363_v16 = vrot.slane %v362_v10, %v6331_v50 }
  0x89   : > { %v309_v60 = vcombine.high %v6338_v55, %v6338_v55  ;;  %v377_v63 = vcombine.high %v369_v61, %v369_v61  ;;  %v5165_v8 = vld [vmem:[%s6257_s7 + $0x8e4] ss:$8 sps:$4 sm:$0xff]   ;;  %v5168_v12 = vld [vmem:[%s6257_s7 + $0x8e0] ss:$8 sps:$4 sm:$0xff]   ;;  %v5171_v14 = vld [vmem:[%s6257_s7 + $0x8f4] ss:$8 sps:$4 sm:$0xff]   ;;  %v310_v21 = vcombine.high %v6360_v15, %v6360_v15 }
  0x8a   : > { %3577 = vmatpush1.bf16.msra.mxu1 %v5113_v23  ;;  %v5173_v17 = vld [vmem:[%s6257_s7 + $0xf0] ss:$8 sps:$4 sm:$0xff]   ;;  %v5178_v19 = vld [vmem:[%s6257_s7 + $0x104] ss:$8 sps:$4 sm:$0xff]   ;;  %v378_v22 = vcombine.high %v6363_v16, %v6363_v16  ;;  %v462_v23 = vpack.c.bf16 %v6338_v55, %v6338_v55  ;;  %v5197_v37 = vld [vmem:[%s6257_s7 + $0x134] ss:$8 sps:$4 sm:$0xff]  }
  0x8b   : > { %3905 = vmatpush1.bf16.msra.mxu0 %v5114_v24  ;;  %3578 = vmatprep.subr.bf16.mxu1 %v5115_v25  ;;  %v463_v62 = vpack.c.bf16 %v309_v60, %v309_v60  ;;  %v479_v4 = vpack.c.bf16 %v377_v63, %v377_v63  ;;  %v5174_v18 = vld [vmem:[%s6257_s7 + $0x8f0] ss:$8 sps:$4 sm:$0xff]   ;;  %v5182_v20 = vld [vmem:[%s6257_s7 + $0x904] ss:$8 sps:$4 sm:$0xff]   ;;  %v478_v24 = vpack.c.bf16 %v369_v61, %v369_v61  ;;  %v5176_v25 = vld [vmem:[%s6257_s7 + $0x100] ss:$8 sps:$4 sm:$0xff]  }
  0x8c   : > { %3906 = vmatprep.subr.bf16.mxu0 %v5117_v26  ;;  %v5180_v26 = vld [vmem:[%s6257_s7 + $0x900] ss:$8 sps:$4 sm:$0xff]   ;;  %v5200_v38 = vld [vmem:[%s6257_s7 + $0x934] ss:$8 sps:$4 sm:$0xff]   ;;  %v5195_v39 = vld [vmem:[%s6257_s7 + $0x130] ss:$8 sps:$4 sm:$0xff]  }
  0x8d   : > { %3598 = vmatprep.mubr.bf16.mxu1 %v463_v62  ;;  %3926 = vmatprep.mubr.bf16.mxu0 %v479_v4  ;;  %v5201_v43 = vld [vmem:[%s6257_s7 + $0x140] ss:$8 sps:$4 sm:$0xff]   ;;  %v5221_v55 = vld [vmem:[%s6257_s7 + $0x174] ss:$8 sps:$4 sm:$0xff]   ;;  %v5219_v57 = vld [vmem:[%s6257_s7 + $0x170] ss:$8 sps:$4 sm:$0xff]  }
  0x8e   : > { %3579 = vmatpush1.bf16.msra.mxu1 %v5119_v27  ;;  %v5185_v27 = vld [vmem:[%s6257_s7 + $0x114] ss:$8 sps:$4 sm:$0xff]   ;;  %v5213_v53 = vld [vmem:[%s6257_s7 + $0x160] ss:$8 sps:$4 sm:$0xff]   ;;  %v5230_v60 = vld [vmem:[%s6257_s7 + $0x984] ss:$8 sps:$4 sm:$0xff]  }
  0x8f   : > { %3907 = vmatpush1.bf16.msra.mxu0 %v5120_v28  ;;  %3580 = vmatprep.subr.bf16.mxu1 %v5121_v29  ;;  %v5188_v28 = vld [vmem:[%s6257_s7 + $0x914] ss:$8 sps:$4 sm:$0xff]   ;;  %v465_v29 = vpack.c.bf16 %v310_v21, %v310_v21  ;;  %v5225_v61 = vld [vmem:[%s6257_s7 + $0x180] ss:$8 sps:$4 sm:$0xff]   ;;  %v5242_v4 = vld [vmem:[%s6257_s7 + $0x9a4] ss:$8 sps:$4 sm:$0xff]  }
  0x90   : > { %3908 = vmatprep.subr.bf16.mxu0 %v5123_v30  ;;  %v481_v30 = vpack.c.bf16 %v378_v22, %v378_v22  ;;  %v5228_v62 = vld [vmem:[%s6257_s7 + $0x980] ss:$8 sps:$4 sm:$0xff]   ;;  %v5233_v63 = vld [vmem:[%s6257_s7 + $0x194] ss:$8 sps:$4 sm:$0xff]   ;;  %v5243_v9 = vld [vmem:[%s6257_s7 + $0x1b0] ss:$8 sps:$4 sm:$0xff]  }
  0x91   : > { %v5246_v10 = vld [vmem:[%s6257_s7 + $0x9b0] ss:$8 sps:$4 sm:$0xff]   ;;  %v5263_v21 = vld [vmem:[%s6257_s7 + $0x1e4] ss:$8 sps:$4 sm:$0xff]  }
  0x92   : > { %3581 = vmatpush1.bf16.msra.mxu1 %v5125_v31  ;;  %v5183_v31 = vld [vmem:[%s6257_s7 + $0x110] ss:$8 sps:$4 sm:$0xff]   ;;  %v5266_v22 = vld [vmem:[%s6257_s7 + $0x9e4] ss:$8 sps:$4 sm:$0xff]  }
  0x93   : > { %3909 = vmatpush1.bf16.msra.mxu0 %v5126_v32  ;;  %3582 = vmatprep.subr.bf16.mxu1 %v5127_v33  ;;  %v5186_v32 = vld [vmem:[%s6257_s7 + $0x910] ss:$8 sps:$4 sm:$0xff]   ;;  %v5191_v33 = vld [vmem:[%s6257_s7 + $0x124] ss:$8 sps:$4 sm:$0xff]  }
  0x94   : > { %3910 = vmatprep.subr.bf16.mxu0 %v5129_v34  ;;  %v5194_v34 = vld [vmem:[%s6257_s7 + $0x924] ss:$8 sps:$4 sm:$0xff]  }
  0x96   : > { %3583 = vmatpush1.bf16.msra.mxu1 %v5131_v35  ;;  %v5189_v35 = vld [vmem:[%s6257_s7 + $0x120] ss:$8 sps:$4 sm:$0xff]  }
  0x97   : > { %3911 = vmatpush1.bf16.msra.mxu0 %v5132_v36  ;;  %3584 = vmatprep.subr.bf16.mxu1 %v5133_v40  ;;  %v5192_v36 = vld [vmem:[%s6257_s7 + $0x920] ss:$8 sps:$4 sm:$0xff]   ;;  %v5198_v40 = vld [vmem:[%s6257_s7 + $0x930] ss:$8 sps:$4 sm:$0xff]  }
  0x98   : > { %3912 = vmatprep.subr.bf16.mxu0 %v5135_v41  ;;  %v5203_v41 = vld [vmem:[%s6257_s7 + $0x144] ss:$8 sps:$4 sm:$0xff]  }
  0x9a   : > { %3585 = vmatpush1.bf16.msra.mxu1 %v5137_v42  ;;  %v5206_v42 = vld [vmem:[%s6257_s7 + $0x944] ss:$8 sps:$4 sm:$0xff]  }
  0x9b   : > { %3913 = vmatpush1.bf16.msra.mxu0 %v5138_v45  ;;  %3586 = vmatprep.subr.bf16.mxu1 %v5139_v46  ;;  %v5204_v45 = vld [vmem:[%s6257_s7 + $0x940] ss:$8 sps:$4 sm:$0xff]   ;;  %v5209_v46 = vld [vmem:[%s6257_s7 + $0x154] ss:$8 sps:$4 sm:$0xff]  }
  0x9c   : > { %3914 = vmatprep.subr.bf16.mxu0 %v5141_v47  ;;  %v5212_v47 = vld [vmem:[%s6257_s7 + $0x954] ss:$8 sps:$4 sm:$0xff]  }
  0x9e   : > { %3587 = vmatpush1.bf16.msra.mxu1 %v5143_v48  ;;  %v5207_v48 = vld [vmem:[%s6257_s7 + $0x150] ss:$8 sps:$4 sm:$0xff]  }
  0x9f   : > { %3915 = vmatpush1.bf16.msra.mxu0 %v5144_v49  ;;  %3588 = vmatprep.subr.bf16.mxu1 %v5145_v51  ;;  %v5210_v49 = vld [vmem:[%s6257_s7 + $0x950] ss:$8 sps:$4 sm:$0xff]   ;;  %v5215_v51 = vld [vmem:[%s6257_s7 + $0x164] ss:$8 sps:$4 sm:$0xff]  }
  0xa0   : > { %3916 = vmatprep.subr.bf16.mxu0 %v5147_v52  ;;  %v5218_v52 = vld [vmem:[%s6257_s7 + $0x964] ss:$8 sps:$4 sm:$0xff]  }
  0xa2   : > { %3589 = vmatpush1.bf16.msra.mxu1 %v5149_v54  ;;  %v5216_v54 = vld [vmem:[%s6257_s7 + $0x960] ss:$8 sps:$4 sm:$0xff]  }
  0xa3   : > { %3917 = vmatpush1.bf16.msra.mxu0 %v5150_v56  ;;  %3590 = vmatprep.subr.bf16.mxu1 %v5151_v58  ;;  %v5224_v56 = vld [vmem:[%s6257_s7 + $0x974] ss:$8 sps:$4 sm:$0xff]   ;;  %v5222_v58 = vld [vmem:[%s6257_s7 + $0x970] ss:$8 sps:$4 sm:$0xff]  }
  0xa4   : > { %3918 = vmatprep.subr.bf16.mxu0 %v5153_v59  ;;  %v5227_v59 = vld [vmem:[%s6257_s7 + $0x184] ss:$8 sps:$4 sm:$0xff]  }
  0xa6   : > { %3591 = vmatpush1.bf16.msra.mxu1 %v5155_v0  ;;  %v5236_v0 = vld [vmem:[%s6257_s7 + $0x994] ss:$8 sps:$4 sm:$0xff]  }
  0xa7   : > { %3919 = vmatpush1.bf16.msra.mxu0 %v5156_v1  ;;  %3592 = vmatprep.subr.bf16.mxu1 %v5157_v2  ;;  %v5231_v1 = vld [vmem:[%s6257_s7 + $0x190] ss:$8 sps:$4 sm:$0xff]  }
  0xa8   : > { %3920 = vmatprep.subr.bf16.mxu0 %v5159_v3  ;;  %v5234_v2 = vld [vmem:[%s6257_s7 + $0x990] ss:$8 sps:$4 sm:$0xff]   ;;  %v5239_v3 = vld [vmem:[%s6257_s7 + $0x1a4] ss:$8 sps:$4 sm:$0xff]  }
  0xaa   : > { %3593 = vmatpush1.bf16.msra.mxu1 %v5161_v5  ;;  %v5237_v5 = vld [vmem:[%s6257_s7 + $0x1a0] ss:$8 sps:$4 sm:$0xff]  }
  0xab   : > { %3921 = vmatpush1.bf16.msra.mxu0 %v5162_v6  ;;  %3594 = vmatprep.subr.bf16.mxu1 %v5163_v7  ;;  %v5240_v6 = vld [vmem:[%s6257_s7 + $0x9a0] ss:$8 sps:$4 sm:$0xff]   ;;  %v5245_v7 = vld [vmem:[%s6257_s7 + $0x1b4] ss:$8 sps:$4 sm:$0xff]  }
  0xac   : > { %3922 = vmatprep.subr.bf16.mxu0 %v5165_v8  ;;  %v5248_v8 = vld [vmem:[%s6257_s7 + $0x9b4] ss:$8 sps:$4 sm:$0xff]  }
  0xae   : > { %3595 = vmatpush1.bf16.msra.mxu1 %v5167_v11  ;;  %v5251_v11 = vld [vmem:[%s6257_s7 + $0x1c4] ss:$8 sps:$4 sm:$0xff]  }
  0xaf   : > { %3923 = vmatpush1.bf16.msra.mxu0 %v5168_v12  ;;  %3596 = vmatprep.subr.bf16.mxu1 %v5169_v13  ;;  %v5254_v12 = vld [vmem:[%s6257_s7 + $0x9c4] ss:$8 sps:$4 sm:$0xff]   ;;  %v5249_v13 = vld [vmem:[%s6257_s7 + $0x1c0] ss:$8 sps:$4 sm:$0xff]  }
  0xb0   : > { %3924 = vmatprep.subr.bf16.mxu0 %v5171_v14  ;;  %v5252_v14 = vld [vmem:[%s6257_s7 + $0x9c0] ss:$8 sps:$4 sm:$0xff]  }
  0xb2   : > { %3597 = vmatpush1.bf16.msra.mxu1 %v5173_v17  ;;  %v5257_v17 = vld [vmem:[%s6257_s7 + $0x1d4] ss:$8 sps:$4 sm:$0xff]  }
  0xb3   : > { %3925 = vmatpush1.bf16.msra.mxu0 %v5174_v18  ;;  %3607 = vmatprep.subr.bf16.mxu1 %v5178_v19  ;;  %v5260_v18 = vld [vmem:[%s6257_s7 + $0x9d4] ss:$8 sps:$4 sm:$0xff]   ;;  %v5255_v19 = vld [vmem:[%s6257_s7 + $0x1d0] ss:$8 sps:$4 sm:$0xff]  }
  0xb4   : > { %3935 = vmatprep.subr.bf16.mxu0 %v5182_v20  ;;  %v5258_v20 = vld [vmem:[%s6257_s7 + $0x9d0] ss:$8 sps:$4 sm:$0xff]  }
  0xb5   : > { %3599 = vmatmul.mubr.bf16.vlgmr.msra.gmra.mrb[0].mxu1 %v462_v23  ;;  %v5261_v23 = vld [vmem:[%s6257_s7 + $0x1e0] ss:$8 sps:$4 sm:$0xff]  }
  0xb6   : > { %3927 = vmatmul.mubr.bf16.vlgmr.msra.gmra.mrb[0].mxu0 %v478_v24  ;;  %3608 = vmatpush1.bf16.msra.mxu1 %v5176_v25  ;;  %v5264_v24 = vld [vmem:[%s6257_s7 + $0x9e0] ss:$8 sps:$4 sm:$0xff]   ;;  %v5269_v25 = vld [vmem:[%s6257_s7 + $0x1f4] ss:$8 sps:$4 sm:$0xff]  }
  0xb7   : > { %3936 = vmatpush1.bf16.msra.mxu0 %v5180_v26  ;;  %3609 = vmatprep.subr.bf16.mxu1 %v5185_v27  ;;  %v5272_v26 = vld [vmem:[%s6257_s7 + $0x9f4] ss:$8 sps:$4 sm:$0xff]   ;;  %v5267_v27 = vld [vmem:[%s6257_s7 + $0x1f0] ss:$8 sps:$4 sm:$0xff]  }
  0xb8   : > { %3937 = vmatprep.subr.bf16.mxu0 %v5188_v28  ;;  %3639 = vmatprep.mubr.bf16.mxu1 %v465_v29  ;;  %v5270_v28 = vld [vmem:[%s6257_s7 + $0x9f0] ss:$8 sps:$4 sm:$0xff]   ;;  %v5275_v29 = vld [vmem:[%s6257_s7 + $0x204] ss:$8 sps:$4 sm:$0xff]  }
  0xb9   : > { %3967 = vmatprep.mubr.bf16.mxu0 %v481_v30  ;;  %v5278_v30 = vld [vmem:[%s6257_s7 + $0xa04] ss:$8 sps:$4 sm:$0xff]  }
  0xba   : > { %3610 = vmatpush1.bf16.msra.mxu1 %v5183_v31  ;;  %v5273_v31 = vld [vmem:[%s6257_s7 + $0x200] ss:$8 sps:$4 sm:$0xff]  }
  0xbb   : > { %3938 = vmatpush1.bf16.msra.mxu0 %v5186_v32  ;;  %3611 = vmatprep.subr.bf16.mxu1 %v5191_v33  ;;  %v464_v32 = vpack.c.bf16 %v6360_v15, %v6360_v15  ;;  %v480_v33 = vpack.c.bf16 %v6363_v16, %v6363_v16  ;;  %v6455_v15 = vld [vmem:[%s6276_s26 + $0x28] sm:$0xff]  ;;  %v5279_v16 = vld [vmem:[%s6257_s7 + $0x210] ss:$8 sps:$4 sm:$0xff]  }
  0xbc   : > { %3939 = vmatprep.subr.bf16.mxu0 %v5194_v34  ;;  %v5276_v34 = vld [vmem:[%s6257_s7 + $0xa00] ss:$8 sps:$4 sm:$0xff]  }
  0xbe   : > { %3612 = vmatpush1.bf16.msra.mxu1 %v5189_v35  ;;  %v5281_v35 = vld [vmem:[%s6257_s7 + $0x214] ss:$8 sps:$4 sm:$0xff]  }
  0xbf   : > { %3940 = vmatpush1.bf16.msra.mxu0 %v5192_v36  ;;  %3613 = vmatprep.subr.bf16.mxu1 %v5197_v37  ;;  %v6447_v36 = vld [vmem:[%s6276_s26 + $0x8] sm:$0xff]  ;;  %v5284_v37 = vld [vmem:[%s6257_s7 + $0xa14] ss:$8 sps:$4 sm:$0xff]  }
  0xc0   : > { %3941 = vmatprep.subr.bf16.mxu0 %v5200_v38  ;;  %v6452_v38 = vrot.slane %v6447_v36, %v6331_v50 }
  0xc2   : > { %3614 = vmatpush1.bf16.msra.mxu1 %v5195_v39  ;;  %v5282_v39 = vld [vmem:[%s6257_s7 + $0xa10] ss:$8 sps:$4 sm:$0xff]  }
  0xc3   : > { %3942 = vmatpush1.bf16.msra.mxu0 %v5198_v40  ;;  %3615 = vmatprep.subr.bf16.mxu1 %v5203_v41  ;;  %v326_v40 = vcombine.high %v6452_v38, %v6452_v38  ;;  %v6463_v41 = vrot.slane %v6455_v15, %v6331_v50 }
  0xc4   : > { %3943 = vmatprep.subr.bf16.mxu0 %v5206_v42  ;;  %v5287_v42 = vld [vmem:[%s6257_s7 + $0x224] ss:$8 sps:$4 sm:$0xff]  }
  0xc6   : > { %3616 = vmatpush1.bf16.msra.mxu1 %v5201_v43  ;;  %v5290_v43 = vld [vmem:[%s6257_s7 + $0xa24] ss:$8 sps:$4 sm:$0xff]  }
  0xc7   : > { %3944 = vmatpush1.bf16.msra.mxu0 %v5204_v45  ;;  %3617 = vmatprep.subr.bf16.mxu1 %v5209_v46  ;;  %v467_v45 = vpack.c.bf16 %v326_v40, %v326_v40  ;;  %v394_v46 = vcombine.high %v6463_v41, %v6463_v41  ;;  %v5365_v40 = vld [vmem:[%s6257_s7 + $0x2f4] ss:$8 sps:$4 sm:$0xff]  }
  0xc8   : > { %3945 = vmatprep.subr.bf16.mxu0 %v5212_v47  ;;  %v5285_v47 = vld [vmem:[%s6257_s7 + $0x220] ss:$8 sps:$4 sm:$0xff]  }
  0xca   : > { %3618 = vmatpush1.bf16.msra.mxu1 %v5207_v48  ;;  %v5288_v48 = vld [vmem:[%s6257_s7 + $0xa20] ss:$8 sps:$4 sm:$0xff]  }
  0xcb   : > { %3946 = vmatpush1.bf16.msra.mxu0 %v5210_v49  ;;  %3619 = vmatprep.subr.bf16.mxu1 %v5215_v51  ;;  %v483_v49 = vpack.c.bf16 %v394_v46, %v394_v46  ;;  %v5293_v51 = vld [vmem:[%s6257_s7 + $0x234] ss:$8 sps:$4 sm:$0xff]   ;;  %v5371_v46 = vld [vmem:[%s6257_s7 + $0x304] ss:$8 sps:$4 sm:$0xff]  }
  0xcc   : > { %3947 = vmatprep.subr.bf16.mxu0 %v5218_v52  ;;  %v5296_v52 = vld [vmem:[%s6257_s7 + $0xa34] ss:$8 sps:$4 sm:$0xff]  }
  0xce   : > { %3620 = vmatpush1.bf16.msra.mxu1 %v5213_v53  ;;  %v5291_v53 = vld [vmem:[%s6257_s7 + $0x230] ss:$8 sps:$4 sm:$0xff]  }
  0xcf   : > { %3948 = vmatpush1.bf16.msra.mxu0 %v5216_v54  ;;  %3621 = vmatprep.subr.bf16.mxu1 %v5221_v55  ;;  %v5294_v54 = vld [vmem:[%s6257_s7 + $0xa30] ss:$8 sps:$4 sm:$0xff]   ;;  %v5299_v55 = vld [vmem:[%s6257_s7 + $0x244] ss:$8 sps:$4 sm:$0xff]  }
  0xd0   : > { %3949 = vmatprep.subr.bf16.mxu0 %v5224_v56  ;;  %v5302_v56 = vld [vmem:[%s6257_s7 + $0xa44] ss:$8 sps:$4 sm:$0xff]  }
  0xd2   : > { %3622 = vmatpush1.bf16.msra.mxu1 %v5219_v57  ;;  %v5297_v57 = vld [vmem:[%s6257_s7 + $0x240] ss:$8 sps:$4 sm:$0xff]  }
  0xd3   : > { %3950 = vmatpush1.bf16.msra.mxu0 %v5222_v58  ;;  %3623 = vmatprep.subr.bf16.mxu1 %v5227_v59  ;;  %v5300_v58 = vld [vmem:[%s6257_s7 + $0xa40] ss:$8 sps:$4 sm:$0xff]   ;;  %v5305_v59 = vld [vmem:[%s6257_s7 + $0x254] ss:$8 sps:$4 sm:$0xff]  }
  0xd4   : > { %3951 = vmatprep.subr.bf16.mxu0 %v5230_v60  ;;  %v5308_v60 = vld [vmem:[%s6257_s7 + $0xa54] ss:$8 sps:$4 sm:$0xff]  }
  0xd6   : > { %3624 = vmatpush1.bf16.msra.mxu1 %v5225_v61  ;;  %v5303_v61 = vld [vmem:[%s6257_s7 + $0x250] ss:$8 sps:$4 sm:$0xff]  }
  0xd7   : > { %3952 = vmatpush1.bf16.msra.mxu0 %v5228_v62  ;;  %3625 = vmatprep.subr.bf16.mxu1 %v5233_v63  ;;  %v5306_v62 = vld [vmem:[%s6257_s7 + $0xa50] ss:$8 sps:$4 sm:$0xff]   ;;  %v5311_v63 = vld [vmem:[%s6257_s7 + $0x264] ss:$8 sps:$4 sm:$0xff]  }
  0xd8   : > { %3953 = vmatprep.subr.bf16.mxu0 %v5236_v0  ;;  %v5314_v0 = vld [vmem:[%s6257_s7 + $0xa64] ss:$8 sps:$4 sm:$0xff]  }
  0xda   : > { %3626 = vmatpush1.bf16.msra.mxu1 %v5231_v1  ;;  %v5309_v1 = vld [vmem:[%s6257_s7 + $0x260] ss:$8 sps:$4 sm:$0xff]  }
  0xdb   : > { %3954 = vmatpush1.bf16.msra.mxu0 %v5234_v2  ;;  %3627 = vmatprep.subr.bf16.mxu1 %v5239_v3  ;;  %v5312_v2 = vld [vmem:[%s6257_s7 + $0xa60] ss:$8 sps:$4 sm:$0xff]   ;;  %v5317_v3 = vld [vmem:[%s6257_s7 + $0x274] ss:$8 sps:$4 sm:$0xff]  }
  0xdc   : > { %3955 = vmatprep.subr.bf16.mxu0 %v5242_v4  ;;  %v5320_v4 = vld [vmem:[%s6257_s7 + $0xa74] ss:$8 sps:$4 sm:$0xff]  }
  0xde   : > { %3628 = vmatpush1.bf16.msra.mxu1 %v5237_v5  ;;  %v5315_v5 = vld [vmem:[%s6257_s7 + $0x270] ss:$8 sps:$4 sm:$0xff]  }
  0xdf   : > { %3956 = vmatpush1.bf16.msra.mxu0 %v5240_v6  ;;  %3629 = vmatprep.subr.bf16.mxu1 %v5245_v7  ;;  %v5318_v6 = vld [vmem:[%s6257_s7 + $0xa70] ss:$8 sps:$4 sm:$0xff]   ;;  %v5323_v7 = vld [vmem:[%s6257_s7 + $0x284] ss:$8 sps:$4 sm:$0xff]  }
  0xe0   : > { %3957 = vmatprep.subr.bf16.mxu0 %v5248_v8  ;;  %v5326_v8 = vld [vmem:[%s6257_s7 + $0xa84] ss:$8 sps:$4 sm:$0xff]  }
  0xe2   : > { %3630 = vmatpush1.bf16.msra.mxu1 %v5243_v9  ;;  %v5321_v9 = vld [vmem:[%s6257_s7 + $0x280] ss:$8 sps:$4 sm:$0xff]  }
  0xe3   : > { %3958 = vmatpush1.bf16.msra.mxu0 %v5246_v10  ;;  %3631 = vmatprep.subr.bf16.mxu1 %v5251_v11  ;;  %v5324_v10 = vld [vmem:[%s6257_s7 + $0xa80] ss:$8 sps:$4 sm:$0xff]   ;;  %v5329_v11 = vld [vmem:[%s6257_s7 + $0x294] ss:$8 sps:$4 sm:$0xff]  }
  0xe4   : > { %3959 = vmatprep.subr.bf16.mxu0 %v5254_v12  ;;  %v5332_v12 = vld [vmem:[%s6257_s7 + $0xa94] ss:$8 sps:$4 sm:$0xff]  }
  0xe6   : > { %3632 = vmatpush1.bf16.msra.mxu1 %v5249_v13  ;;  %v5327_v13 = vld [vmem:[%s6257_s7 + $0x290] ss:$8 sps:$4 sm:$0xff]  }
  0xe7   : > { %3960 = vmatpush1.bf16.msra.mxu0 %v5252_v14  ;;  %3633 = vmatprep.subr.bf16.mxu1 %v5257_v17  ;;  %v5330_v14 = vld [vmem:[%s6257_s7 + $0xa90] ss:$8 sps:$4 sm:$0xff]   ;;  %v5335_v17 = vld [vmem:[%s6257_s7 + $0x2a4] ss:$8 sps:$4 sm:$0xff]  }
  0xe8   : > { %3961 = vmatprep.subr.bf16.mxu0 %v5260_v18  ;;  %v5338_v18 = vld [vmem:[%s6257_s7 + $0xaa4] ss:$8 sps:$4 sm:$0xff]  }
  0xea   : > { %3634 = vmatpush1.bf16.msra.mxu1 %v5255_v19  ;;  %v5333_v19 = vld [vmem:[%s6257_s7 + $0x2a0] ss:$8 sps:$4 sm:$0xff]  }
  0xeb   : > { %3962 = vmatpush1.bf16.msra.mxu0 %v5258_v20  ;;  %3635 = vmatprep.subr.bf16.mxu1 %v5263_v21  ;;  %v5336_v20 = vld [vmem:[%s6257_s7 + $0xaa0] ss:$8 sps:$4 sm:$0xff]   ;;  %v5341_v21 = vld [vmem:[%s6257_s7 + $0x2b4] ss:$8 sps:$4 sm:$0xff]  }
  0xec   : > { %3963 = vmatprep.subr.bf16.mxu0 %v5266_v22  ;;  %v5344_v22 = vld [vmem:[%s6257_s7 + $0xab4] ss:$8 sps:$4 sm:$0xff]  }
  0xee   : > { %3636 = vmatpush1.bf16.msra.mxu1 %v5261_v23  ;;  %v5339_v23 = vld [vmem:[%s6257_s7 + $0x2b0] ss:$8 sps:$4 sm:$0xff]  }
  0xef   : > { %3964 = vmatpush1.bf16.msra.mxu0 %v5264_v24  ;;  %3637 = vmatprep.subr.bf16.mxu1 %v5269_v25  ;;  %v5342_v24 = vld [vmem:[%s6257_s7 + $0xab0] ss:$8 sps:$4 sm:$0xff]   ;;  %v5347_v25 = vld [vmem:[%s6257_s7 + $0x2c4] ss:$8 sps:$4 sm:$0xff]  }
  0xf0   : > { %3965 = vmatprep.subr.bf16.mxu0 %v5272_v26  ;;  %v5350_v26 = vld [vmem:[%s6257_s7 + $0xac4] ss:$8 sps:$4 sm:$0xff]  }
  0xf2   : > { %3638 = vmatpush1.bf16.msra.mxu1 %v5267_v27  ;;  %v5345_v27 = vld [vmem:[%s6257_s7 + $0x2c0] ss:$8 sps:$4 sm:$0xff]  }
  0xf3   : > { %3966 = vmatpush1.bf16.msra.mxu0 %v5270_v28  ;;  %3648 = vmatprep.subr.bf16.mxu1 %v5275_v29  ;;  %v5348_v28 = vld [vmem:[%s6257_s7 + $0xac0] ss:$8 sps:$4 sm:$0xff]   ;;  %v5353_v29 = vld [vmem:[%s6257_s7 + $0x2d4] ss:$8 sps:$4 sm:$0xff]  }
  0xf4   : > { %3976 = vmatprep.subr.bf16.mxu0 %v5278_v30  ;;  %v5356_v30 = vld [vmem:[%s6257_s7 + $0xad4] ss:$8 sps:$4 sm:$0xff]  }
  0xf5   : > { %3640 = vmatmul.mubr.bf16.vlgmr.msra.gmra.mrb[0].mxu1 %v464_v32  ;;  %v5354_v32 = vld [vmem:[%s6257_s7 + $0xad0] ss:$8 sps:$4 sm:$0xff]  }
  0xf6   : > { %3968 = vmatmul.mubr.bf16.vlgmr.msra.gmra.mrb[0].mxu0 %v480_v33  ;;  %3649 = vmatpush1.bf16.msra.mxu1 %v5273_v31  ;;  %v5351_v31 = vld [vmem:[%s6257_s7 + $0x2d0] ss:$8 sps:$4 sm:$0xff]   ;;  %v5359_v33 = vld [vmem:[%s6257_s7 + $0x2e4] ss:$8 sps:$4 sm:$0xff]  }
  0xf7   : > { %3977 = vmatpush1.bf16.msra.mxu0 %v5276_v34  ;;  %3650 = vmatprep.subr.bf16.mxu1 %v5281_v35  ;;  %v5362_v34 = vld [vmem:[%s6257_s7 + $0xae4] ss:$8 sps:$4 sm:$0xff]   ;;  %v311_v35 = vcombine.high %v6447_v36, %v6447_v36 }
  0xf8   : > { %3978 = vmatprep.subr.bf16.mxu0 %v5284_v37  ;;  %3680 = vmatprep.mubr.bf16.mxu1 %v467_v45  ;;  %v379_v37 = vcombine.high %v6455_v15, %v6455_v15  ;;  %v5363_v45 = vld [vmem:[%s6257_s7 + $0x2f0] ss:$8 sps:$4 sm:$0xff]  }
  0xf9   : > { %4008 = vmatprep.mubr.bf16.mxu0 %v483_v49  ;;  %v5366_v15 = vld [vmem:[%s6257_s7 + $0xaf0] ss:$8 sps:$4 sm:$0xff]  }
  0xfa   : > { %3651 = vmatpush1.bf16.msra.mxu1 %v5279_v16  ;;  %v5357_v16 = vld [vmem:[%s6257_s7 + $0x2e0] ss:$8 sps:$4 sm:$0xff]   ;;  %v6529_v36 = vrot.slane %v379_v37, %v6331_v50  ;;  %v5438_v37 = vld [vmem:[%s6257_s7 + $0xbb0] ss:$8 sps:$4 sm:$0xff]  }
  0xfb   : > { %3979 = vmatpush1.bf16.msra.mxu0 %v5282_v39  ;;  %3652 = vmatprep.subr.bf16.mxu1 %v5287_v42  ;;  %v5360_v39 = vld [vmem:[%s6257_s7 + $0xae0] ss:$8 sps:$4 sm:$0xff]   ;;  %v5368_v42 = vld [vmem:[%s6257_s7 + $0xaf4] ss:$8 sps:$4 sm:$0xff]  }
  0xfc   : > { %3980 = vmatprep.subr.bf16.mxu0 %v5290_v43  ;;  %v6526_v43 = vrot.slane %v311_v35, %v6331_v50  ;;  %v395_v49 = vcombine.high %v6529_v36, %v6529_v36  ;;  %v5435_v35 = vld [vmem:[%s6257_s7 + $0x3b0] ss:$8 sps:$4 sm:$0xff]  }
  0xfe   : > { %3653 = vmatpush1.bf16.msra.mxu1 %v5285_v47  ;;  %v5374_v47 = vld [vmem:[%s6257_s7 + $0xb04] ss:$8 sps:$4 sm:$0xff]  }
  0xff   : > { %3981 = vmatpush1.bf16.msra.mxu0 %v5288_v48  ;;  %3654 = vmatprep.subr.bf16.mxu1 %v5293_v51  ;;  %v327_v48 = vcombine.high %v6526_v43, %v6526_v43  ;;  %v5369_v51 = vld [vmem:[%s6257_s7 + $0x300] ss:$8 sps:$4 sm:$0xff]  }
 0x100   : > { %3982 = vmatprep.subr.bf16.mxu0 %v5296_v52  ;;  %v5372_v52 = vld [vmem:[%s6257_s7 + $0xb00] ss:$8 sps:$4 sm:$0xff]  }
 0x102   : > { %3655 = vmatpush1.bf16.msra.mxu1 %v5291_v53  ;;  %v466_v53 = vpack.c.bf16 %v6452_v38, %v6452_v38  ;;  %v5378_v38 = vld [vmem:[%s6257_s7 + $0xb10] ss:$8 sps:$4 sm:$0xff]  }
 0x103   : > { %3983 = vmatpush1.bf16.msra.mxu0 %v5294_v54  ;;  %3656 = vmatprep.subr.bf16.mxu1 %v5299_v55  ;;  %v482_v54 = vpack.c.bf16 %v6463_v41, %v6463_v41  ;;  %v5377_v55 = vld [vmem:[%s6257_s7 + $0x314] ss:$8 sps:$4 sm:$0xff]   ;;  %v5383_v41 = vld [vmem:[%s6257_s7 + $0x324] ss:$8 sps:$4 sm:$0xff]  }
 0x104   : > { %3984 = vmatprep.subr.bf16.mxu0 %v5302_v56  ;;  %v5380_v56 = vld [vmem:[%s6257_s7 + $0xb14] ss:$8 sps:$4 sm:$0xff]  }
 0x106   : > { %3657 = vmatpush1.bf16.msra.mxu1 %v5297_v57  ;;  %v469_v57 = vpack.c.bf16 %v327_v48, %v327_v48  ;;  %v5455_v48 = vld [vmem:[%s6257_s7 + $0x3e4] ss:$8 sps:$4 sm:$0xff]  }
 0x107   : > { %3985 = vmatpush1.bf16.msra.mxu0 %v5300_v58  ;;  %3658 = vmatprep.subr.bf16.mxu1 %v5305_v59  ;;  %v485_v58 = vpack.c.bf16 %v395_v49, %v395_v49  ;;  %v5375_v59 = vld [vmem:[%s6257_s7 + $0x310] ss:$8 sps:$4 sm:$0xff]   ;;  %v5458_v49 = vld [vmem:[%s6257_s7 + $0xbe4] ss:$8 sps:$4 sm:$0xff]  }
 0x108   : > { %3986 = vmatprep.subr.bf16.mxu0 %v5308_v60  ;;  %v5386_v60 = vld [vmem:[%s6257_s7 + $0xb24] ss:$8 sps:$4 sm:$0xff]  }
 0x10a   : > { %3659 = vmatpush1.bf16.msra.mxu1 %v5303_v61  ;;  %v5381_v61 = vld [vmem:[%s6257_s7 + $0x320] ss:$8 sps:$4 sm:$0xff]  }
 0x10b   : > { %3987 = vmatpush1.bf16.msra.mxu0 %v5306_v62  ;;  %3660 = vmatprep.subr.bf16.mxu1 %v5311_v63  ;;  %v5384_v62 = vld [vmem:[%s6257_s7 + $0xb20] ss:$8 sps:$4 sm:$0xff]   ;;  %v5389_v63 = vld [vmem:[%s6257_s7 + $0x334] ss:$8 sps:$4 sm:$0xff]  }
 0x10c   : > { %3988 = vmatprep.subr.bf16.mxu0 %v5314_v0  ;;  %v5392_v0 = vld [vmem:[%s6257_s7 + $0xb34] ss:$8 sps:$4 sm:$0xff]  }
 0x10e   : > { %3661 = vmatpush1.bf16.msra.mxu1 %v5309_v1  ;;  %v5387_v1 = vld [vmem:[%s6257_s7 + $0x330] ss:$8 sps:$4 sm:$0xff]  }
 0x10f   : > { %3989 = vmatpush1.bf16.msra.mxu0 %v5312_v2  ;;  %3662 = vmatprep.subr.bf16.mxu1 %v5317_v3  ;;  %v5390_v2 = vld [vmem:[%s6257_s7 + $0xb30] ss:$8 sps:$4 sm:$0xff]   ;;  %v5395_v3 = vld [vmem:[%s6257_s7 + $0x344] ss:$8 sps:$4 sm:$0xff]  }
 0x110   : > { %3990 = vmatprep.subr.bf16.mxu0 %v5320_v4  ;;  %v5398_v4 = vld [vmem:[%s6257_s7 + $0xb44] ss:$8 sps:$4 sm:$0xff]  }
 0x112   : > { %3663 = vmatpush1.bf16.msra.mxu1 %v5315_v5  ;;  %v5393_v5 = vld [vmem:[%s6257_s7 + $0x340] ss:$8 sps:$4 sm:$0xff]  }
 0x113   : > { %3991 = vmatpush1.bf16.msra.mxu0 %v5318_v6  ;;  %3664 = vmatprep.subr.bf16.mxu1 %v5323_v7  ;;  %v5396_v6 = vld [vmem:[%s6257_s7 + $0xb40] ss:$8 sps:$4 sm:$0xff]   ;;  %v5401_v7 = vld [vmem:[%s6257_s7 + $0x354] ss:$8 sps:$4 sm:$0xff]  }
 0x114   : > { %3992 = vmatprep.subr.bf16.mxu0 %v5326_v8  ;;  %v5404_v8 = vld [vmem:[%s6257_s7 + $0xb54] ss:$8 sps:$4 sm:$0xff]  }
 0x116   : > { %3665 = vmatpush1.bf16.msra.mxu1 %v5321_v9  ;;  %v5399_v9 = vld [vmem:[%s6257_s7 + $0x350] ss:$8 sps:$4 sm:$0xff]  }
 0x117   : > { %3993 = vmatpush1.bf16.msra.mxu0 %v5324_v10  ;;  %3666 = vmatprep.subr.bf16.mxu1 %v5329_v11  ;;  %v5402_v10 = vld [vmem:[%s6257_s7 + $0xb50] ss:$8 sps:$4 sm:$0xff]   ;;  %v5407_v11 = vld [vmem:[%s6257_s7 + $0x364] ss:$8 sps:$4 sm:$0xff]  }
 0x118   : > { %3994 = vmatprep.subr.bf16.mxu0 %v5332_v12  ;;  %v5410_v12 = vld [vmem:[%s6257_s7 + $0xb64] ss:$8 sps:$4 sm:$0xff]  }
 0x11a   : > { %3667 = vmatpush1.bf16.msra.mxu1 %v5327_v13  ;;  %v5405_v13 = vld [vmem:[%s6257_s7 + $0x360] ss:$8 sps:$4 sm:$0xff]  }
 0x11b   : > { %3995 = vmatpush1.bf16.msra.mxu0 %v5330_v14  ;;  %3668 = vmatprep.subr.bf16.mxu1 %v5335_v17  ;;  %v5408_v14 = vld [vmem:[%s6257_s7 + $0xb60] ss:$8 sps:$4 sm:$0xff]   ;;  %v5413_v17 = vld [vmem:[%s6257_s7 + $0x374] ss:$8 sps:$4 sm:$0xff]  }
 0x11c   : > { %3996 = vmatprep.subr.bf16.mxu0 %v5338_v18  ;;  %v5416_v18 = vld [vmem:[%s6257_s7 + $0xb74] ss:$8 sps:$4 sm:$0xff]  }
 0x11e   : > { %3669 = vmatpush1.bf16.msra.mxu1 %v5333_v19  ;;  %v5411_v19 = vld [vmem:[%s6257_s7 + $0x370] ss:$8 sps:$4 sm:$0xff]  }
 0x11f   : > { %3997 = vmatpush1.bf16.msra.mxu0 %v5336_v20  ;;  %3670 = vmatprep.subr.bf16.mxu1 %v5341_v21  ;;  %v5414_v20 = vld [vmem:[%s6257_s7 + $0xb70] ss:$8 sps:$4 sm:$0xff]   ;;  %v5419_v21 = vld [vmem:[%s6257_s7 + $0x384] ss:$8 sps:$4 sm:$0xff]  }
 0x120   : > { %3998 = vmatprep.subr.bf16.mxu0 %v5344_v22  ;;  %v5422_v22 = vld [vmem:[%s6257_s7 + $0xb84] ss:$8 sps:$4 sm:$0xff]  }
 0x122   : > { %3671 = vmatpush1.bf16.msra.mxu1 %v5339_v23  ;;  %v5417_v23 = vld [vmem:[%s6257_s7 + $0x380] ss:$8 sps:$4 sm:$0xff]  }
 0x123   : > { %3999 = vmatpush1.bf16.msra.mxu0 %v5342_v24  ;;  %3672 = vmatprep.subr.bf16.mxu1 %v5347_v25  ;;  %v5420_v24 = vld [vmem:[%s6257_s7 + $0xb80] ss:$8 sps:$4 sm:$0xff]   ;;  %v5425_v25 = vld [vmem:[%s6257_s7 + $0x394] ss:$8 sps:$4 sm:$0xff]  }
 0x124   : > { %4000 = vmatprep.subr.bf16.mxu0 %v5350_v26  ;;  %v5428_v26 = vld [vmem:[%s6257_s7 + $0xb94] ss:$8 sps:$4 sm:$0xff]  }
 0x126   : > { %3673 = vmatpush1.bf16.msra.mxu1 %v5345_v27  ;;  %v5423_v27 = vld [vmem:[%s6257_s7 + $0x390] ss:$8 sps:$4 sm:$0xff]  }
 0x127   : > { %4001 = vmatpush1.bf16.msra.mxu0 %v5348_v28  ;;  %3674 = vmatprep.subr.bf16.mxu1 %v5353_v29  ;;  %v5426_v28 = vld [vmem:[%s6257_s7 + $0xb90] ss:$8 sps:$4 sm:$0xff]   ;;  %v5431_v29 = vld [vmem:[%s6257_s7 + $0x3a4] ss:$8 sps:$4 sm:$0xff]  }
 0x128   : > { %4002 = vmatprep.subr.bf16.mxu0 %v5356_v30  ;;  %v5434_v30 = vld [vmem:[%s6257_s7 + $0xba4] ss:$8 sps:$4 sm:$0xff]  }
 0x12a   : > { %3675 = vmatpush1.bf16.msra.mxu1 %v5351_v31  ;;  %v5429_v31 = vld [vmem:[%s6257_s7 + $0x3a0] ss:$8 sps:$4 sm:$0xff]  }
 0x12b   : > { %4003 = vmatpush1.bf16.msra.mxu0 %v5354_v32  ;;  %3676 = vmatprep.subr.bf16.mxu1 %v5359_v33  ;;  %v5432_v32 = vld [vmem:[%s6257_s7 + $0xba0] ss:$8 sps:$4 sm:$0xff]   ;;  %v5437_v33 = vld [vmem:[%s6257_s7 + $0x3b4] ss:$8 sps:$4 sm:$0xff]  }
 0x12c   : > { %4004 = vmatprep.subr.bf16.mxu0 %v5362_v34  ;;  %v5440_v34 = vld [vmem:[%s6257_s7 + $0xbb4] ss:$8 sps:$4 sm:$0xff]  }
 0x12e   : > { %3677 = vmatpush1.bf16.msra.mxu1 %v5357_v16  ;;  %v5443_v16 = vld [vmem:[%s6257_s7 + $0x3c4] ss:$8 sps:$4 sm:$0xff]  }
 0x12f   : > { %4005 = vmatpush1.bf16.msra.mxu0 %v5360_v39  ;;  %3678 = vmatprep.subr.bf16.mxu1 %v5365_v40  ;;  %v5446_v39 = vld [vmem:[%s6257_s7 + $0xbc4] ss:$8 sps:$4 sm:$0xff]   ;;  %v5441_v40 = vld [vmem:[%s6257_s7 + $0x3c0] ss:$8 sps:$4 sm:$0xff]  }
 0x130   : > { %4006 = vmatprep.subr.bf16.mxu0 %v5368_v42  ;;  %v5444_v42 = vld [vmem:[%s6257_s7 + $0xbc0] ss:$8 sps:$4 sm:$0xff]  }
 0x132   : > { %3679 = vmatpush1.bf16.msra.mxu1 %v5363_v45  ;;  %v5449_v45 = vld [vmem:[%s6257_s7 + $0x3d4] ss:$8 sps:$4 sm:$0xff]  }
 0x133   : > { %4007 = vmatpush1.bf16.msra.mxu0 %v5366_v15  ;;  %3689 = vmatprep.subr.bf16.mxu1 %v5371_v46  ;;  %v5452_v15 = vld [vmem:[%s6257_s7 + $0xbd4] ss:$8 sps:$4 sm:$0xff]   ;;  %v5447_v46 = vld [vmem:[%s6257_s7 + $0x3d0] ss:$8 sps:$4 sm:$0xff]  }
 0x134   : > { %4017 = vmatprep.subr.bf16.mxu0 %v5374_v47  ;;  %v5450_v47 = vld [vmem:[%s6257_s7 + $0xbd0] ss:$8 sps:$4 sm:$0xff]  }
 0x135   : > { %3681 = vmatmul.mubr.bf16.vlgmr.msra.gmra.mrb[0].mxu1 %v466_v53  ;;  %v5453_v53 = vld [vmem:[%s6257_s7 + $0x3e0] ss:$8 sps:$4 sm:$0xff]  }
 0x136   : > { %4009 = vmatmul.mubr.bf16.vlgmr.msra.gmra.mrb[0].mxu0 %v482_v54  ;;  %3690 = vmatpush1.bf16.msra.mxu1 %v5369_v51  ;;  %v6600_v51 = vld [vmem:[%s6276_s26 + $0x10] sm:$0xff]  ;;  %v5456_v54 = vld [vmem:[%s6257_s7 + $0xbe0] ss:$8 sps:$4 sm:$0xff]  }
 0x137   : > { %4018 = vmatpush1.bf16.msra.mxu0 %v5372_v52  ;;  %3691 = vmatprep.subr.bf16.mxu1 %v5377_v55  ;;  %v6603_v52 = vld [vmem:[%s6276_s26 + $0x30] sm:$0xff]  ;;  %v5461_v55 = vld [vmem:[%s6257_s7 + $0x3f4] ss:$8 sps:$4 sm:$0xff]  }
 0x138   : > { %4019 = vmatprep.subr.bf16.mxu0 %v5380_v56  ;;  %3721 = vmatprep.mubr.bf16.mxu1 %v469_v57  ;;  %v5464_v56 = vld [vmem:[%s6257_s7 + $0xbf4] ss:$8 sps:$4 sm:$0xff]   ;;  %v6611_v57 = vrot.slane %v6600_v51, %v6331_v50 }
 0x139   : > { %4049 = vmatprep.mubr.bf16.mxu0 %v485_v58  ;;  %v6615_v58 = vrot.slane %v6603_v52, %v6331_v50 }
 0x13a   : > { %3692 = vmatpush1.bf16.msra.mxu1 %v5375_v59  ;;  %v5459_v59 = vld [vmem:[%s6257_s7 + $0x3f0] ss:$8 sps:$4 sm:$0xff]  }
 0x13b   : > { %4020 = vmatpush1.bf16.msra.mxu0 %v5378_v38  ;;  %3693 = vmatprep.subr.bf16.mxu1 %v5383_v41  ;;  %v5462_v38 = vld [vmem:[%s6257_s7 + $0xbf0] ss:$8 sps:$4 sm:$0xff]   ;;  %v5468_v41 = vld [vmem:[%s6257_s7 + $0x404] ss:$8 sps:$4 sm:$0xff]  }
 0x13c   : > { %4021 = vmatprep.subr.bf16.mxu0 %v5386_v60  ;;  %v5472_v60 = vld [vmem:[%s6257_s7 + $0xc04] ss:$8 sps:$4 sm:$0xff]  }
 0x13e   : > { %3694 = vmatpush1.bf16.msra.mxu1 %v5381_v61  ;;  %v343_v61 = vcombine.high %v6611_v57, %v6611_v57 }
 0x13f   : > { %4022 = vmatpush1.bf16.msra.mxu0 %v5384_v62  ;;  %3695 = vmatprep.subr.bf16.mxu1 %v5389_v63  ;;  %v411_v62 = vcombine.high %v6615_v58, %v6615_v58  ;;  %v468_v63 = vpack.c.bf16 %v6526_v43, %v6526_v43  ;;  %v5473_v43 = vld [vmem:[%s6257_s7 + $0x410] ss:$8 sps:$4 sm:$0xff]  }
 0x140   : > { %4023 = vmatprep.subr.bf16.mxu0 %v5392_v0  ;;  %v484_v0 = vpack.c.bf16 %v6529_v36, %v6529_v36  ;;  %v5476_v36 = vld [vmem:[%s6257_s7 + $0xc10] ss:$8 sps:$4 sm:$0xff]  }
 0x142   : > { %3696 = vmatpush1.bf16.msra.mxu1 %v5387_v1  ;;  %v5466_v1 = vld [vmem:[%s6257_s7 + $0x400] ss:$8 sps:$4 sm:$0xff]  }
 0x143   : > { %4024 = vmatpush1.bf16.msra.mxu0 %v5390_v2  ;;  %3697 = vmatprep.subr.bf16.mxu1 %v5395_v3  ;;  %v5470_v2 = vld [vmem:[%s6257_s7 + $0xc00] ss:$8 sps:$4 sm:$0xff]   ;;  %v5475_v3 = vld [vmem:[%s6257_s7 + $0x414] ss:$8 sps:$4 sm:$0xff]  }
 0x144   : > { %4025 = vmatprep.subr.bf16.mxu0 %v5398_v4  ;;  %v5478_v4 = vld [vmem:[%s6257_s7 + $0xc14] ss:$8 sps:$4 sm:$0xff]  }
 0x146   : > { %3698 = vmatpush1.bf16.msra.mxu1 %v5393_v5  ;;  %v471_v5 = vpack.c.bf16 %v343_v61, %v343_v61  ;;  %v5545_v61 = vld [vmem:[%s6257_s7 + $0x4d0] ss:$8 sps:$4 sm:$0xff]  }
 0x147   : > { %4026 = vmatpush1.bf16.msra.mxu0 %v5396_v6  ;;  %3699 = vmatprep.subr.bf16.mxu1 %v5401_v7  ;;  %v487_v6 = vpack.c.bf16 %v411_v62, %v411_v62  ;;  %v5481_v7 = vld [vmem:[%s6257_s7 + $0x424] ss:$8 sps:$4 sm:$0xff]   ;;  %v5548_v62 = vld [vmem:[%s6257_s7 + $0xcd0] ss:$8 sps:$4 sm:$0xff]  }
 0x148   : > { %4027 = vmatprep.subr.bf16.mxu0 %v5404_v8  ;;  %v5484_v8 = vld [vmem:[%s6257_s7 + $0xc24] ss:$8 sps:$4 sm:$0xff]  }
 0x14a   : > { %3700 = vmatpush1.bf16.msra.mxu1 %v5399_v9  ;;  %v5479_v9 = vld [vmem:[%s6257_s7 + $0x420] ss:$8 sps:$4 sm:$0xff]  }
 0x14b   : > { %4028 = vmatpush1.bf16.msra.mxu0 %v5402_v10  ;;  %3701 = vmatprep.subr.bf16.mxu1 %v5407_v11  ;;  %v5482_v10 = vld [vmem:[%s6257_s7 + $0xc20] ss:$8 sps:$4 sm:$0xff]   ;;  %v5487_v11 = vld [vmem:[%s6257_s7 + $0x434] ss:$8 sps:$4 sm:$0xff]  }
 0x14c   : > { %4029 = vmatprep.subr.bf16.mxu0 %v5410_v12  ;;  %v5490_v12 = vld [vmem:[%s6257_s7 + $0xc34] ss:$8 sps:$4 sm:$0xff]  }
 0x14e   : > { %3702 = vmatpush1.bf16.msra.mxu1 %v5405_v13  ;;  %v5485_v13 = vld [vmem:[%s6257_s7 + $0x430] ss:$8 sps:$4 sm:$0xff]  }
 0x14f   : > { %4030 = vmatpush1.bf16.msra.mxu0 %v5408_v14  ;;  %3703 = vmatprep.subr.bf16.mxu1 %v5413_v17  ;;  %v5488_v14 = vld [vmem:[%s6257_s7 + $0xc30] ss:$8 sps:$4 sm:$0xff]   ;;  %v5493_v17 = vld [vmem:[%s6257_s7 + $0x444] ss:$8 sps:$4 sm:$0xff]  }
 0x150   : > { %4031 = vmatprep.subr.bf16.mxu0 %v5416_v18  ;;  %v5496_v18 = vld [vmem:[%s6257_s7 + $0xc44] ss:$8 sps:$4 sm:$0xff]  }
 0x152   : > { %3704 = vmatpush1.bf16.msra.mxu1 %v5411_v19  ;;  %v5491_v19 = vld [vmem:[%s6257_s7 + $0x440] ss:$8 sps:$4 sm:$0xff]  }
 0x153   : > { %4032 = vmatpush1.bf16.msra.mxu0 %v5414_v20  ;;  %3705 = vmatprep.subr.bf16.mxu1 %v5419_v21  ;;  %v5494_v20 = vld [vmem:[%s6257_s7 + $0xc40] ss:$8 sps:$4 sm:$0xff]   ;;  %v5499_v21 = vld [vmem:[%s6257_s7 + $0x454] ss:$8 sps:$4 sm:$0xff]  }
 0x154   : > { %4033 = vmatprep.subr.bf16.mxu0 %v5422_v22  ;;  %v5502_v22 = vld [vmem:[%s6257_s7 + $0xc54] ss:$8 sps:$4 sm:$0xff]  }
 0x156   : > { %3706 = vmatpush1.bf16.msra.mxu1 %v5417_v23  ;;  %v5497_v23 = vld [vmem:[%s6257_s7 + $0x450] ss:$8 sps:$4 sm:$0xff]  }
 0x157   : > { %4034 = vmatpush1.bf16.msra.mxu0 %v5420_v24  ;;  %3707 = vmatprep.subr.bf16.mxu1 %v5425_v25  ;;  %v5500_v24 = vld [vmem:[%s6257_s7 + $0xc50] ss:$8 sps:$4 sm:$0xff]   ;;  %v5505_v25 = vld [vmem:[%s6257_s7 + $0x464] ss:$8 sps:$4 sm:$0xff]  }
 0x158   : > { %4035 = vmatprep.subr.bf16.mxu0 %v5428_v26  ;;  %v5508_v26 = vld [vmem:[%s6257_s7 + $0xc64] ss:$8 sps:$4 sm:$0xff]  }
 0x15a   : > { %3708 = vmatpush1.bf16.msra.mxu1 %v5423_v27  ;;  %v5503_v27 = vld [vmem:[%s6257_s7 + $0x460] ss:$8 sps:$4 sm:$0xff]  }
 0x15b   : > { %4036 = vmatpush1.bf16.msra.mxu0 %v5426_v28  ;;  %3709 = vmatprep.subr.bf16.mxu1 %v5431_v29  ;;  %v5506_v28 = vld [vmem:[%s6257_s7 + $0xc60] ss:$8 sps:$4 sm:$0xff]   ;;  %v5511_v29 = vld [vmem:[%s6257_s7 + $0x474] ss:$8 sps:$4 sm:$0xff]  }
 0x15c   : > { %4037 = vmatprep.subr.bf16.mxu0 %v5434_v30  ;;  %v5514_v30 = vld [vmem:[%s6257_s7 + $0xc74] ss:$8 sps:$4 sm:$0xff]  }
 0x15e   : > { %3710 = vmatpush1.bf16.msra.mxu1 %v5429_v31  ;;  %v5509_v31 = vld [vmem:[%s6257_s7 + $0x470] ss:$8 sps:$4 sm:$0xff]  }
 0x15f   : > { %4038 = vmatpush1.bf16.msra.mxu0 %v5432_v32  ;;  %3711 = vmatprep.subr.bf16.mxu1 %v5437_v33  ;;  %v5512_v32 = vld [vmem:[%s6257_s7 + $0xc70] ss:$8 sps:$4 sm:$0xff]   ;;  %v5517_v33 = vld [vmem:[%s6257_s7 + $0x484] ss:$8 sps:$4 sm:$0xff]  }
 0x160   : > { %4039 = vmatprep.subr.bf16.mxu0 %v5440_v34  ;;  %v5520_v34 = vld [vmem:[%s6257_s7 + $0xc84] ss:$8 sps:$4 sm:$0xff]  }
 0x162   : > { %3712 = vmatpush1.bf16.msra.mxu1 %v5435_v35  ;;  %v5515_v35 = vld [vmem:[%s6257_s7 + $0x480] ss:$8 sps:$4 sm:$0xff]  }
 0x163   : > { %4040 = vmatpush1.bf16.msra.mxu0 %v5438_v37  ;;  %3713 = vmatprep.subr.bf16.mxu1 %v5443_v16  ;;  %v5518_v37 = vld [vmem:[%s6257_s7 + $0xc80] ss:$8 sps:$4 sm:$0xff]   ;;  %v5523_v16 = vld [vmem:[%s6257_s7 + $0x494] ss:$8 sps:$4 sm:$0xff]  }
 0x164   : > { %4041 = vmatprep.subr.bf16.mxu0 %v5446_v39  ;;  %v5526_v39 = vld [vmem:[%s6257_s7 + $0xc94] ss:$8 sps:$4 sm:$0xff]  }
 0x166   : > { %3714 = vmatpush1.bf16.msra.mxu1 %v5441_v40  ;;  %v5521_v40 = vld [vmem:[%s6257_s7 + $0x490] ss:$8 sps:$4 sm:$0xff]  }
 0x167   : > { %4042 = vmatpush1.bf16.msra.mxu0 %v5444_v42  ;;  %3715 = vmatprep.subr.bf16.mxu1 %v5449_v45  ;;  %v5524_v42 = vld [vmem:[%s6257_s7 + $0xc90] ss:$8 sps:$4 sm:$0xff]   ;;  %v5529_v45 = vld [vmem:[%s6257_s7 + $0x4a4] ss:$8 sps:$4 sm:$0xff]  }
 0x168   : > { %4043 = vmatprep.subr.bf16.mxu0 %v5452_v15  ;;  %v5532_v15 = vld [vmem:[%s6257_s7 + $0xca4] ss:$8 sps:$4 sm:$0xff]  }
 0x16a   : > { %3716 = vmatpush1.bf16.msra.mxu1 %v5447_v46  ;;  %v5527_v46 = vld [vmem:[%s6257_s7 + $0x4a0] ss:$8 sps:$4 sm:$0xff]  }
 0x16b   : > { %4044 = vmatpush1.bf16.msra.mxu0 %v5450_v47  ;;  %3717 = vmatprep.subr.bf16.mxu1 %v5455_v48  ;;  %v5530_v47 = vld [vmem:[%s6257_s7 + $0xca0] ss:$8 sps:$4 sm:$0xff]   ;;  %v5535_v48 = vld [vmem:[%s6257_s7 + $0x4b4] ss:$8 sps:$4 sm:$0xff]  }
 0x16c   : > { %4045 = vmatprep.subr.bf16.mxu0 %v5458_v49  ;;  %v5538_v49 = vld [vmem:[%s6257_s7 + $0xcb4] ss:$8 sps:$4 sm:$0xff]  }
 0x16e   : > { %3718 = vmatpush1.bf16.msra.mxu1 %v5453_v53  ;;  %v5533_v53 = vld [vmem:[%s6257_s7 + $0x4b0] ss:$8 sps:$4 sm:$0xff]  }
 0x16f   : > { %4046 = vmatpush1.bf16.msra.mxu0 %v5456_v54  ;;  %3719 = vmatprep.subr.bf16.mxu1 %v5461_v55  ;;  %v5536_v54 = vld [vmem:[%s6257_s7 + $0xcb0] ss:$8 sps:$4 sm:$0xff]   ;;  %v5541_v55 = vld [vmem:[%s6257_s7 + $0x4c4] ss:$8 sps:$4 sm:$0xff]  }
 0x170   : > { %4047 = vmatprep.subr.bf16.mxu0 %v5464_v56  ;;  %v5544_v56 = vld [vmem:[%s6257_s7 + $0xcc4] ss:$8 sps:$4 sm:$0xff]  }
 0x172   : > { %3720 = vmatpush1.bf16.msra.mxu1 %v5459_v59  ;;  %v5539_v59 = vld [vmem:[%s6257_s7 + $0x4c0] ss:$8 sps:$4 sm:$0xff]  }
 0x173   : > { %4048 = vmatpush1.bf16.msra.mxu0 %v5462_v38  ;;  %3730 = vmatprep.subr.bf16.mxu1 %v5468_v41  ;;  %v5542_v38 = vld [vmem:[%s6257_s7 + $0xcc0] ss:$8 sps:$4 sm:$0xff]   ;;  %v5547_v41 = vld [vmem:[%s6257_s7 + $0x4d4] ss:$8 sps:$4 sm:$0xff]  }
 0x174   : > { %4058 = vmatprep.subr.bf16.mxu0 %v5472_v60  ;;  %v5550_v60 = vld [vmem:[%s6257_s7 + $0xcd4] ss:$8 sps:$4 sm:$0xff]  }
 0x175   : > { %3722 = vmatmul.mubr.bf16.vlgmr.msra.gmra.mrb[0].mxu1 %v468_v63  ;;  %v5553_v63 = vld [vmem:[%s6257_s7 + $0x4e4] ss:$8 sps:$4 sm:$0xff]  }
 0x176   : > { %4050 = vmatmul.mubr.bf16.vlgmr.msra.gmra.mrb[0].mxu0 %v484_v0  ;;  %3731 = vmatpush1.bf16.msra.mxu1 %v5466_v1  ;;  %v5556_v0 = vld [vmem:[%s6257_s7 + $0xce4] ss:$8 sps:$4 sm:$0xff]   ;;  %v328_v1 = vcombine.high %v6600_v51, %v6600_v51  ;;  %v5557_v51 = vld [vmem:[%s6257_s7 + $0x4f0] ss:$8 sps:$4 sm:$0xff]  }
 0x177   : > { %4059 = vmatpush1.bf16.msra.mxu0 %v5470_v2  ;;  %3732 = vmatprep.subr.bf16.mxu1 %v5475_v3  ;;  %v396_v2 = vcombine.high %v6603_v52, %v6603_v52  ;;  %v5551_v3 = vld [vmem:[%s6257_s7 + $0x4e0] ss:$8 sps:$4 sm:$0xff]   ;;  %v5560_v52 = vld [vmem:[%s6257_s7 + $0xcf0] ss:$8 sps:$4 sm:$0xff]  }
 0x178   : > { %4060 = vmatprep.subr.bf16.mxu0 %v5478_v4  ;;  %3762 = vmatprep.mubr.bf16.mxu1 %v471_v5  ;;  %v5554_v4 = vld [vmem:[%s6257_s7 + $0xce0] ss:$8 sps:$4 sm:$0xff]   ;;  %v5559_v5 = vld [vmem:[%s6257_s7 + $0x4f4] ss:$8 sps:$4 sm:$0xff]  }
 0x179   : > { %4090 = vmatprep.mubr.bf16.mxu0 %v487_v6  ;;  %v5562_v6 = vld [vmem:[%s6257_s7 + $0xcf4] ss:$8 sps:$4 sm:$0xff]  }
 0x17a   : > { %3733 = vmatpush1.bf16.msra.mxu1 %v5473_v43  ;;  %v6694_v43 = vrot.slane %v328_v1, %v6331_v50  ;;  %v5629_v1 = vld [vmem:[%s6257_s7 + $0x5b0] ss:$8 sps:$4 sm:$0xff]  }
 0x17b   : > { %4061 = vmatpush1.bf16.msra.mxu0 %v5476_v36  ;;  %3734 = vmatprep.subr.bf16.mxu1 %v5481_v7  ;;  %v6697_v36 = vrot.slane %v396_v2, %v6331_v50  ;;  %v5565_v7 = vld [vmem:[%s6257_s7 + $0x504] ss:$8 sps:$4 sm:$0xff]   ;;  %v5632_v2 = vld [vmem:[%s6257_s7 + $0xdb0] ss:$8 sps:$4 sm:$0xff]  }
 0x17c   : > { %4062 = vmatprep.subr.bf16.mxu0 %v5484_v8  ;;  %v5568_v8 = vld [vmem:[%s6257_s7 + $0xd04] ss:$8 sps:$4 sm:$0xff]  }
 0x17e   : > { %3735 = vmatpush1.bf16.msra.mxu1 %v5479_v9  ;;  %v344_v9 = vcombine.high %v6694_v43, %v6694_v43 }
 0x17f   : > { %4063 = vmatpush1.bf16.msra.mxu0 %v5482_v10  ;;  %3736 = vmatprep.subr.bf16.mxu1 %v5487_v11  ;;  %v412_v10 = vcombine.high %v6697_v36, %v6697_v36  ;;  %v470_v11 = vpack.c.bf16 %v6611_v57, %v6611_v57  ;;  %v5569_v57 = vld [vmem:[%s6257_s7 + $0x510] ss:$8 sps:$4 sm:$0xff]  }
 0x180   : > { %4064 = vmatprep.subr.bf16.mxu0 %v5490_v12  ;;  %v486_v12 = vpack.c.bf16 %v6615_v58, %v6615_v58  ;;  %v5572_v58 = vld [vmem:[%s6257_s7 + $0xd10] ss:$8 sps:$4 sm:$0xff]  }
 0x182   : > { %3737 = vmatpush1.bf16.msra.mxu1 %v5485_v13  ;;  %v5563_v13 = vld [vmem:[%s6257_s7 + $0x500] ss:$8 sps:$4 sm:$0xff]  }
 0x183   : > { %4065 = vmatpush1.bf16.msra.mxu0 %v5488_v14  ;;  %3738 = vmatprep.subr.bf16.mxu1 %v5493_v17  ;;  %v5566_v14 = vld [vmem:[%s6257_s7 + $0xd00] ss:$8 sps:$4 sm:$0xff]   ;;  %v5571_v17 = vld [vmem:[%s6257_s7 + $0x514] ss:$8 sps:$4 sm:$0xff]  }
 0x184   : > { %4066 = vmatprep.subr.bf16.mxu0 %v5496_v18  ;;  %v5574_v18 = vld [vmem:[%s6257_s7 + $0xd14] ss:$8 sps:$4 sm:$0xff]  }
 0x186   : > { %3739 = vmatpush1.bf16.msra.mxu1 %v5491_v19  ;;  %v473_v19 = vpack.c.bf16 %v344_v9, %v344_v9  ;;  %v5649_v9 = vld [vmem:[%s6257_s7 + $0x5e4] ss:$8 sps:$4 sm:$0xff]  }
 0x187   : > { %4067 = vmatpush1.bf16.msra.mxu0 %v5494_v20  ;;  %3740 = vmatprep.subr.bf16.mxu1 %v5499_v21  ;;  %v489_v20 = vpack.c.bf16 %v412_v10, %v412_v10  ;;  %v5577_v21 = vld [vmem:[%s6257_s7 + $0x524] ss:$8 sps:$4 sm:$0xff]  }
 0x188   : > { %4068 = vmatprep.subr.bf16.mxu0 %v5502_v22  ;;  %v5580_v22 = vld [vmem:[%s6257_s7 + $0xd24] ss:$8 sps:$4 sm:$0xff]  }
 0x189   : > { %v5652_v10 = vld [vmem:[%s6257_s7 + $0xde4] ss:$8 sps:$4 sm:$0xff]  }
 0x18a   : > { %3741 = vmatpush1.bf16.msra.mxu1 %v5497_v23  ;;  %v5575_v23 = vld [vmem:[%s6257_s7 + $0x520] ss:$8 sps:$4 sm:$0xff]  }
 0x18b   : > { %4069 = vmatpush1.bf16.msra.mxu0 %v5500_v24  ;;  %3742 = vmatprep.subr.bf16.mxu1 %v5505_v25  ;;  %v5578_v24 = vld [vmem:[%s6257_s7 + $0xd20] ss:$8 sps:$4 sm:$0xff]   ;;  %v5583_v25 = vld [vmem:[%s6257_s7 + $0x534] ss:$8 sps:$4 sm:$0xff]  }
 0x18c   : > { %4070 = vmatprep.subr.bf16.mxu0 %v5508_v26  ;;  %v5586_v26 = vld [vmem:[%s6257_s7 + $0xd34] ss:$8 sps:$4 sm:$0xff]  }
 0x18e   : > { %3743 = vmatpush1.bf16.msra.mxu1 %v5503_v27  ;;  %v5581_v27 = vld [vmem:[%s6257_s7 + $0x530] ss:$8 sps:$4 sm:$0xff]  }
 0x18f   : > { %4071 = vmatpush1.bf16.msra.mxu0 %v5506_v28  ;;  %3744 = vmatprep.subr.bf16.mxu1 %v5511_v29  ;;  %v5584_v28 = vld [vmem:[%s6257_s7 + $0xd30] ss:$8 sps:$4 sm:$0xff]   ;;  %v5589_v29 = vld [vmem:[%s6257_s7 + $0x544] ss:$8 sps:$4 sm:$0xff]  }
 0x190   : > { %4072 = vmatprep.subr.bf16.mxu0 %v5514_v30  ;;  %v5592_v30 = vld [vmem:[%s6257_s7 + $0xd44] ss:$8 sps:$4 sm:$0xff]  }
 0x192   : > { %3745 = vmatpush1.bf16.msra.mxu1 %v5509_v31  ;;  %v5587_v31 = vld [vmem:[%s6257_s7 + $0x540] ss:$8 sps:$4 sm:$0xff]  }
 0x193   : > { %4073 = vmatpush1.bf16.msra.mxu0 %v5512_v32  ;;  %3746 = vmatprep.subr.bf16.mxu1 %v5517_v33  ;;  %v5590_v32 = vld [vmem:[%s6257_s7 + $0xd40] ss:$8 sps:$4 sm:$0xff]   ;;  %v5595_v33 = vld [vmem:[%s6257_s7 + $0x554] ss:$8 sps:$4 sm:$0xff]  }
 0x194   : > { %4074 = vmatprep.subr.bf16.mxu0 %v5520_v34  ;;  %v5598_v34 = vld [vmem:[%s6257_s7 + $0xd54] ss:$8 sps:$4 sm:$0xff]  }
 0x196   : > { %3747 = vmatpush1.bf16.msra.mxu1 %v5515_v35  ;;  %v5593_v35 = vld [vmem:[%s6257_s7 + $0x550] ss:$8 sps:$4 sm:$0xff]  }
 0x197   : > { %4075 = vmatpush1.bf16.msra.mxu0 %v5518_v37  ;;  %3748 = vmatprep.subr.bf16.mxu1 %v5523_v16  ;;  %v5596_v37 = vld [vmem:[%s6257_s7 + $0xd50] ss:$8 sps:$4 sm:$0xff]   ;;  %v5601_v16 = vld [vmem:[%s6257_s7 + $0x564] ss:$8 sps:$4 sm:$0xff]  }
 0x198   : > { %4076 = vmatprep.subr.bf16.mxu0 %v5526_v39  ;;  %v5604_v39 = vld [vmem:[%s6257_s7 + $0xd64] ss:$8 sps:$4 sm:$0xff]  }
 0x19a   : > { %3749 = vmatpush1.bf16.msra.mxu1 %v5521_v40  ;;  %v5599_v40 = vld [vmem:[%s6257_s7 + $0x560] ss:$8 sps:$4 sm:$0xff]  }
 0x19b   : > { %4077 = vmatpush1.bf16.msra.mxu0 %v5524_v42  ;;  %3750 = vmatprep.subr.bf16.mxu1 %v5529_v45  ;;  %v5602_v42 = vld [vmem:[%s6257_s7 + $0xd60] ss:$8 sps:$4 sm:$0xff]   ;;  %v5607_v45 = vld [vmem:[%s6257_s7 + $0x574] ss:$8 sps:$4 sm:$0xff]  }
 0x19c   : > { %4078 = vmatprep.subr.bf16.mxu0 %v5532_v15  ;;  %v5610_v15 = vld [vmem:[%s6257_s7 + $0xd74] ss:$8 sps:$4 sm:$0xff]  }
 0x19e   : > { %3751 = vmatpush1.bf16.msra.mxu1 %v5527_v46  ;;  %v5605_v46 = vld [vmem:[%s6257_s7 + $0x570] ss:$8 sps:$4 sm:$0xff]  }
 0x19f   : > { %4079 = vmatpush1.bf16.msra.mxu0 %v5530_v47  ;;  %3752 = vmatprep.subr.bf16.mxu1 %v5535_v48  ;;  %v5608_v47 = vld [vmem:[%s6257_s7 + $0xd70] ss:$8 sps:$4 sm:$0xff]   ;;  %v5613_v48 = vld [vmem:[%s6257_s7 + $0x584] ss:$8 sps:$4 sm:$0xff]  }
 0x1a0   : > { %4080 = vmatprep.subr.bf16.mxu0 %v5538_v49  ;;  %v5616_v49 = vld [vmem:[%s6257_s7 + $0xd84] ss:$8 sps:$4 sm:$0xff]  }
 0x1a2   : > { %3753 = vmatpush1.bf16.msra.mxu1 %v5533_v53  ;;  %v5611_v53 = vld [vmem:[%s6257_s7 + $0x580] ss:$8 sps:$4 sm:$0xff]  }
 0x1a3   : > { %4081 = vmatpush1.bf16.msra.mxu0 %v5536_v54  ;;  %3754 = vmatprep.subr.bf16.mxu1 %v5541_v55  ;;  %v5614_v54 = vld [vmem:[%s6257_s7 + $0xd80] ss:$8 sps:$4 sm:$0xff]   ;;  %v5619_v55 = vld [vmem:[%s6257_s7 + $0x594] ss:$8 sps:$4 sm:$0xff]  }
 0x1a4   : > { %4082 = vmatprep.subr.bf16.mxu0 %v5544_v56  ;;  %v5622_v56 = vld [vmem:[%s6257_s7 + $0xd94] ss:$8 sps:$4 sm:$0xff]  }
 0x1a6   : > { %3755 = vmatpush1.bf16.msra.mxu1 %v5539_v59  ;;  %v5617_v59 = vld [vmem:[%s6257_s7 + $0x590] ss:$8 sps:$4 sm:$0xff]  }
 0x1a7   : > { %4083 = vmatpush1.bf16.msra.mxu0 %v5542_v38  ;;  %3756 = vmatprep.subr.bf16.mxu1 %v5547_v41  ;;  %v5620_v38 = vld [vmem:[%s6257_s7 + $0xd90] ss:$8 sps:$4 sm:$0xff]   ;;  %v5625_v41 = vld [vmem:[%s6257_s7 + $0x5a4] ss:$8 sps:$4 sm:$0xff]  }
 0x1a8   : > { %4084 = vmatprep.subr.bf16.mxu0 %v5550_v60  ;;  %v5628_v60 = vld [vmem:[%s6257_s7 + $0xda4] ss:$8 sps:$4 sm:$0xff]  }
 0x1aa   : > { %3757 = vmatpush1.bf16.msra.mxu1 %v5545_v61  ;;  %v5623_v61 = vld [vmem:[%s6257_s7 + $0x5a0] ss:$8 sps:$4 sm:$0xff]  }
 0x1ab   : > { %4085 = vmatpush1.bf16.msra.mxu0 %v5548_v62  ;;  %3758 = vmatprep.subr.bf16.mxu1 %v5553_v63  ;;  %v5626_v62 = vld [vmem:[%s6257_s7 + $0xda0] ss:$8 sps:$4 sm:$0xff]   ;;  %v5631_v63 = vld [vmem:[%s6257_s7 + $0x5b4] ss:$8 sps:$4 sm:$0xff]  }
 0x1ac   : > { %4086 = vmatprep.subr.bf16.mxu0 %v5556_v0  ;;  %v5634_v0 = vld [vmem:[%s6257_s7 + $0xdb4] ss:$8 sps:$4 sm:$0xff]  }
 0x1ae   : > { %3759 = vmatpush1.bf16.msra.mxu1 %v5551_v3  ;;  %v5637_v3 = vld [vmem:[%s6257_s7 + $0x5c4] ss:$8 sps:$4 sm:$0xff]  }
 0x1af   : > { %4087 = vmatpush1.bf16.msra.mxu0 %v5554_v4  ;;  %3760 = vmatprep.subr.bf16.mxu1 %v5559_v5  ;;  %v5640_v4 = vld [vmem:[%s6257_s7 + $0xdc4] ss:$8 sps:$4 sm:$0xff]   ;;  %v5635_v5 = vld [vmem:[%s6257_s7 + $0x5c0] ss:$8 sps:$4 sm:$0xff]  }
 0x1b0   : > { %4088 = vmatprep.subr.bf16.mxu0 %v5562_v6  ;;  %v5638_v6 = vld [vmem:[%s6257_s7 + $0xdc0] ss:$8 sps:$4 sm:$0xff]  }
 0x1b2   : > { %3761 = vmatpush1.bf16.msra.mxu1 %v5557_v51  ;;  %v5643_v51 = vld [vmem:[%s6257_s7 + $0x5d4] ss:$8 sps:$4 sm:$0xff]  }
 0x1b3   : > { %4089 = vmatpush1.bf16.msra.mxu0 %v5560_v52  ;;  %3771 = vmatprep.subr.bf16.mxu1 %v5565_v7  ;;  %v5646_v52 = vld [vmem:[%s6257_s7 + $0xdd4] ss:$8 sps:$4 sm:$0xff]   ;;  %v5641_v7 = vld [vmem:[%s6257_s7 + $0x5d0] ss:$8 sps:$4 sm:$0xff]  }
 0x1b4   : > { %4099 = vmatprep.subr.bf16.mxu0 %v5568_v8  ;;  %v5644_v8 = vld [vmem:[%s6257_s7 + $0xdd0] ss:$8 sps:$4 sm:$0xff]  }
 0x1b5   : > { %3763 = vmatmul.mubr.bf16.vlgmr.msra.gmra.mrb[0].mxu1 %v470_v11  ;;  %v6768_v11 = vld [vmem:[%s6276_s26 + $0x18] sm:$0xff] }
 0x1b6   : > { %4091 = vmatmul.mubr.bf16.vlgmr.msra.gmra.mrb[0].mxu0 %v486_v12  ;;  %3772 = vmatpush1.bf16.msra.mxu1 %v5563_v13  ;;  %v6771_v12 = vld [vmem:[%s6276_s26 + $0x38] sm:$0xff]  ;;  %v5647_v13 = vld [vmem:[%s6257_s7 + $0x5e0] ss:$8 sps:$4 sm:$0xff]  }
 0x1b7   : > { %4100 = vmatpush1.bf16.msra.mxu0 %v5566_v14  ;;  %3773 = vmatprep.subr.bf16.mxu1 %v5571_v17  ;;  %v5650_v14 = vld [vmem:[%s6257_s7 + $0xde0] ss:$8 sps:$4 sm:$0xff]   ;;  %v5655_v17 = vld [vmem:[%s6257_s7 + $0x5f4] ss:$8 sps:$4 sm:$0xff]  }
 0x1b8   : > { %4101 = vmatprep.subr.bf16.mxu0 %v5574_v18  ;;  %3803 = vmatprep.mubr.bf16.mxu1 %v473_v19  ;;  %v5658_v18 = vld [vmem:[%s6257_s7 + $0xdf4] ss:$8 sps:$4 sm:$0xff]   ;;  %v6779_v19 = vrot.slane %v6768_v11, %v6331_v50 }
 0x1b9   : > { %4131 = vmatprep.mubr.bf16.mxu0 %v489_v20  ;;  %v6783_v20 = vrot.slane %v6771_v12, %v6331_v50 }
 0x1ba   : > { %3774 = vmatpush1.bf16.msra.mxu1 %v5569_v57  ;;  %v5653_v57 = vld [vmem:[%s6257_s7 + $0x5f0] ss:$8 sps:$4 sm:$0xff]  }
 0x1bb   : > { %4102 = vmatpush1.bf16.msra.mxu0 %v5572_v58  ;;  %3775 = vmatprep.subr.bf16.mxu1 %v5577_v21  ;;  %v5656_v58 = vld [vmem:[%s6257_s7 + $0xdf0] ss:$8 sps:$4 sm:$0xff]   ;;  %v5662_v21 = vld [vmem:[%s6257_s7 + $0x604] ss:$8 sps:$4 sm:$0xff]  }
 0x1bc   : > { %4103 = vmatprep.subr.bf16.mxu0 %v5580_v22  ;;  %v5666_v22 = vld [vmem:[%s6257_s7 + $0xe04] ss:$8 sps:$4 sm:$0xff]  }
 0x1be   : > { %3776 = vmatpush1.bf16.msra.mxu1 %v5575_v23  ;;  %v360_v23 = vcombine.high %v6779_v19, %v6779_v19 }
 0x1bf   : > { %4104 = vmatpush1.bf16.msra.mxu0 %v5578_v24  ;;  %3777 = vmatprep.subr.bf16.mxu1 %v5583_v25  ;;  %v428_v24 = vcombine.high %v6783_v20, %v6783_v20  ;;  %v472_v25 = vpack.c.bf16 %v6694_v43, %v6694_v43  ;;  %v5667_v43 = vld [vmem:[%s6257_s7 + $0x610] ss:$8 sps:$4 sm:$0xff]  }
 0x1c0   : > { %4105 = vmatprep.subr.bf16.mxu0 %v5586_v26  ;;  %v488_v26 = vpack.c.bf16 %v6697_v36, %v6697_v36  ;;  %v5670_v36 = vld [vmem:[%s6257_s7 + $0xe10] ss:$8 sps:$4 sm:$0xff]  }
 0x1c2   : > { %3778 = vmatpush1.bf16.msra.mxu1 %v5581_v27  ;;  %v5660_v27 = vld [vmem:[%s6257_s7 + $0x600] ss:$8 sps:$4 sm:$0xff]  }
 0x1c3   : > { %4106 = vmatpush1.bf16.msra.mxu0 %v5584_v28  ;;  %3779 = vmatprep.subr.bf16.mxu1 %v5589_v29  ;;  %v5664_v28 = vld [vmem:[%s6257_s7 + $0xe00] ss:$8 sps:$4 sm:$0xff]   ;;  %v5669_v29 = vld [vmem:[%s6257_s7 + $0x614] ss:$8 sps:$4 sm:$0xff]  }
 0x1c4   : > { %4107 = vmatprep.subr.bf16.mxu0 %v5592_v30  ;;  %v5672_v30 = vld [vmem:[%s6257_s7 + $0xe14] ss:$8 sps:$4 sm:$0xff]  }
 0x1c6   : > { %3780 = vmatpush1.bf16.msra.mxu1 %v5587_v31  ;;  %v475_v31 = vpack.c.bf16 %v360_v23, %v360_v23  ;;  %v5739_v23 = vld [vmem:[%s6257_s7 + $0x6d0] ss:$8 sps:$4 sm:$0xff]  }
 0x1c7   : > { %4108 = vmatpush1.bf16.msra.mxu0 %v5590_v32  ;;  %3781 = vmatprep.subr.bf16.mxu1 %v5595_v33  ;;  %v491_v32 = vpack.c.bf16 %v428_v24, %v428_v24  ;;  %v5675_v33 = vld [vmem:[%s6257_s7 + $0x624] ss:$8 sps:$4 sm:$0xff]   ;;  %v5742_v24 = vld [vmem:[%s6257_s7 + $0xed0] ss:$8 sps:$4 sm:$0xff]  }
 0x1c8   : > { %4109 = vmatprep.subr.bf16.mxu0 %v5598_v34  ;;  %v5678_v34 = vld [vmem:[%s6257_s7 + $0xe24] ss:$8 sps:$4 sm:$0xff]  }
 0x1ca   : > { %3782 = vmatpush1.bf16.msra.mxu1 %v5593_v35  ;;  %v5673_v35 = vld [vmem:[%s6257_s7 + $0x620] ss:$8 sps:$4 sm:$0xff]  }
 0x1cb   : > { %4110 = vmatpush1.bf16.msra.mxu0 %v5596_v37  ;;  %3783 = vmatprep.subr.bf16.mxu1 %v5601_v16  ;;  %v5676_v37 = vld [vmem:[%s6257_s7 + $0xe20] ss:$8 sps:$4 sm:$0xff]   ;;  %v5681_v16 = vld [vmem:[%s6257_s7 + $0x634] ss:$8 sps:$4 sm:$0xff]  }
 0x1cc   : > { %4111 = vmatprep.subr.bf16.mxu0 %v5604_v39  ;;  %v5684_v39 = vld [vmem:[%s6257_s7 + $0xe34] ss:$8 sps:$4 sm:$0xff]  }
 0x1ce   : > { %3784 = vmatpush1.bf16.msra.mxu1 %v5599_v40  ;;  %v5679_v40 = vld [vmem:[%s6257_s7 + $0x630] ss:$8 sps:$4 sm:$0xff]  }
 0x1cf   : > { %4112 = vmatpush1.bf16.msra.mxu0 %v5602_v42  ;;  %3785 = vmatprep.subr.bf16.mxu1 %v5607_v45  ;;  %v5682_v42 = vld [vmem:[%s6257_s7 + $0xe30] ss:$8 sps:$4 sm:$0xff]   ;;  %v5687_v45 = vld [vmem:[%s6257_s7 + $0x644] ss:$8 sps:$4 sm:$0xff]  }
 0x1d0   : > { %4113 = vmatprep.subr.bf16.mxu0 %v5610_v15  ;;  %v5690_v15 = vld [vmem:[%s6257_s7 + $0xe44] ss:$8 sps:$4 sm:$0xff]  }
 0x1d2   : > { %3786 = vmatpush1.bf16.msra.mxu1 %v5605_v46  ;;  %v5685_v46 = vld [vmem:[%s6257_s7 + $0x640] ss:$8 sps:$4 sm:$0xff]  }
 0x1d3   : > { %4114 = vmatpush1.bf16.msra.mxu0 %v5608_v47  ;;  %3787 = vmatprep.subr.bf16.mxu1 %v5613_v48  ;;  %v5688_v47 = vld [vmem:[%s6257_s7 + $0xe40] ss:$8 sps:$4 sm:$0xff]   ;;  %v5693_v48 = vld [vmem:[%s6257_s7 + $0x654] ss:$8 sps:$4 sm:$0xff]  }
 0x1d4   : > { %4115 = vmatprep.subr.bf16.mxu0 %v5616_v49  ;;  %v5696_v49 = vld [vmem:[%s6257_s7 + $0xe54] ss:$8 sps:$4 sm:$0xff]  }
 0x1d6   : > { %3788 = vmatpush1.bf16.msra.mxu1 %v5611_v53  ;;  %v5691_v53 = vld [vmem:[%s6257_s7 + $0x650] ss:$8 sps:$4 sm:$0xff]  }
 0x1d7   : > { %4116 = vmatpush1.bf16.msra.mxu0 %v5614_v54  ;;  %3789 = vmatprep.subr.bf16.mxu1 %v5619_v55  ;;  %v5694_v54 = vld [vmem:[%s6257_s7 + $0xe50] ss:$8 sps:$4 sm:$0xff]   ;;  %v5699_v55 = vld [vmem:[%s6257_s7 + $0x664] ss:$8 sps:$4 sm:$0xff]  }
 0x1d8   : > { %4117 = vmatprep.subr.bf16.mxu0 %v5622_v56  ;;  %v5702_v56 = vld [vmem:[%s6257_s7 + $0xe64] ss:$8 sps:$4 sm:$0xff]  }
 0x1da   : > { %3790 = vmatpush1.bf16.msra.mxu1 %v5617_v59  ;;  %v5697_v59 = vld [vmem:[%s6257_s7 + $0x660] ss:$8 sps:$4 sm:$0xff]  }
 0x1db   : > { %4118 = vmatpush1.bf16.msra.mxu0 %v5620_v38  ;;  %3791 = vmatprep.subr.bf16.mxu1 %v5625_v41  ;;  %v5700_v38 = vld [vmem:[%s6257_s7 + $0xe60] ss:$8 sps:$4 sm:$0xff]   ;;  %v5705_v41 = vld [vmem:[%s6257_s7 + $0x674] ss:$8 sps:$4 sm:$0xff]  }
 0x1dc   : > { %4119 = vmatprep.subr.bf16.mxu0 %v5628_v60  ;;  %v5708_v60 = vld [vmem:[%s6257_s7 + $0xe74] ss:$8 sps:$4 sm:$0xff]  }
 0x1de   : > { %3792 = vmatpush1.bf16.msra.mxu1 %v5623_v61  ;;  %v5703_v61 = vld [vmem:[%s6257_s7 + $0x670] ss:$8 sps:$4 sm:$0xff]  }
 0x1df   : > { %4120 = vmatpush1.bf16.msra.mxu0 %v5626_v62  ;;  %3793 = vmatprep.subr.bf16.mxu1 %v5631_v63  ;;  %v5706_v62 = vld [vmem:[%s6257_s7 + $0xe70] ss:$8 sps:$4 sm:$0xff]   ;;  %v5711_v63 = vld [vmem:[%s6257_s7 + $0x684] ss:$8 sps:$4 sm:$0xff]  }
 0x1e0   : > { %4121 = vmatprep.subr.bf16.mxu0 %v5634_v0  ;;  %v5714_v0 = vld [vmem:[%s6257_s7 + $0xe84] ss:$8 sps:$4 sm:$0xff]  }
 0x1e2   : > { %3794 = vmatpush1.bf16.msra.mxu1 %v5629_v1  ;;  %v5709_v1 = vld [vmem:[%s6257_s7 + $0x680] ss:$8 sps:$4 sm:$0xff]  }
 0x1e3   : > { %4122 = vmatpush1.bf16.msra.mxu0 %v5632_v2  ;;  %3795 = vmatprep.subr.bf16.mxu1 %v5637_v3  ;;  %v5712_v2 = vld [vmem:[%s6257_s7 + $0xe80] ss:$8 sps:$4 sm:$0xff]   ;;  %v5717_v3 = vld [vmem:[%s6257_s7 + $0x694] ss:$8 sps:$4 sm:$0xff]  }
 0x1e4   : > { %4123 = vmatprep.subr.bf16.mxu0 %v5640_v4  ;;  %v5720_v4 = vld [vmem:[%s6257_s7 + $0xe94] ss:$8 sps:$4 sm:$0xff]  }
 0x1e6   : > { %3796 = vmatpush1.bf16.msra.mxu1 %v5635_v5  ;;  %v5715_v5 = vld [vmem:[%s6257_s7 + $0x690] ss:$8 sps:$4 sm:$0xff]  }
 0x1e7   : > { %4124 = vmatpush1.bf16.msra.mxu0 %v5638_v6  ;;  %3797 = vmatprep.subr.bf16.mxu1 %v5643_v51  ;;  %v5718_v6 = vld [vmem:[%s6257_s7 + $0xe90] ss:$8 sps:$4 sm:$0xff]   ;;  %v5723_v51 = vld [vmem:[%s6257_s7 + $0x6a4] ss:$8 sps:$4 sm:$0xff]  }
 0x1e8   : > { %4125 = vmatprep.subr.bf16.mxu0 %v5646_v52  ;;  %v5726_v52 = vld [vmem:[%s6257_s7 + $0xea4] ss:$8 sps:$4 sm:$0xff]  }
 0x1ea   : > { %3798 = vmatpush1.bf16.msra.mxu1 %v5641_v7  ;;  %v5721_v7 = vld [vmem:[%s6257_s7 + $0x6a0] ss:$8 sps:$4 sm:$0xff]  }
 0x1eb   : > { %4126 = vmatpush1.bf16.msra.mxu0 %v5644_v8  ;;  %3799 = vmatprep.subr.bf16.mxu1 %v5649_v9  ;;  %v5724_v8 = vld [vmem:[%s6257_s7 + $0xea0] ss:$8 sps:$4 sm:$0xff]   ;;  %v5729_v9 = vld [vmem:[%s6257_s7 + $0x6b4] ss:$8 sps:$4 sm:$0xff]  }
 0x1ec   : > { %4127 = vmatprep.subr.bf16.mxu0 %v5652_v10  ;;  %v5732_v10 = vld [vmem:[%s6257_s7 + $0xeb4] ss:$8 sps:$4 sm:$0xff]  }
 0x1ee   : > { %3800 = vmatpush1.bf16.msra.mxu1 %v5647_v13  ;;  %v5727_v13 = vld [vmem:[%s6257_s7 + $0x6b0] ss:$8 sps:$4 sm:$0xff]  }
 0x1ef   : > { %4128 = vmatpush1.bf16.msra.mxu0 %v5650_v14  ;;  %3801 = vmatprep.subr.bf16.mxu1 %v5655_v17  ;;  %v5730_v14 = vld [vmem:[%s6257_s7 + $0xeb0] ss:$8 sps:$4 sm:$0xff]   ;;  %v5735_v17 = vld [vmem:[%s6257_s7 + $0x6c4] ss:$8 sps:$4 sm:$0xff]  }
 0x1f0   : > { %4129 = vmatprep.subr.bf16.mxu0 %v5658_v18  ;;  %v5738_v18 = vld [vmem:[%s6257_s7 + $0xec4] ss:$8 sps:$4 sm:$0xff]  }
 0x1f2   : > { %3802 = vmatpush1.bf16.msra.mxu1 %v5653_v57  ;;  %v5733_v57 = vld [vmem:[%s6257_s7 + $0x6c0] ss:$8 sps:$4 sm:$0xff]  }
 0x1f3   : > { %4130 = vmatpush1.bf16.msra.mxu0 %v5656_v58  ;;  %3812 = vmatprep.subr.bf16.mxu1 %v5662_v21  ;;  %v5736_v58 = vld [vmem:[%s6257_s7 + $0xec0] ss:$8 sps:$4 sm:$0xff]   ;;  %v5741_v21 = vld [vmem:[%s6257_s7 + $0x6d4] ss:$8 sps:$4 sm:$0xff]  }
 0x1f4   : > { %4140 = vmatprep.subr.bf16.mxu0 %v5666_v22  ;;  %v5744_v22 = vld [vmem:[%s6257_s7 + $0xed4] ss:$8 sps:$4 sm:$0xff]  }
 0x1f5   : > { %3804 = vmatmul.mubr.bf16.vlgmr.msra.gmra.mrb[0].mxu1 %v472_v25  ;;  %v5747_v25 = vld [vmem:[%s6257_s7 + $0x6e4] ss:$8 sps:$4 sm:$0xff]  }
 0x1f6   : > { %4132 = vmatmul.mubr.bf16.vlgmr.msra.gmra.mrb[0].mxu0 %v488_v26  ;;  %3813 = vmatpush1.bf16.msra.mxu1 %v5660_v27  ;;  %v5750_v26 = vld [vmem:[%s6257_s7 + $0xee4] ss:$8 sps:$4 sm:$0xff]   ;;  %v345_v27 = vcombine.high %v6768_v11, %v6768_v11  ;;  %v5751_v11 = vld [vmem:[%s6257_s7 + $0x6f0] ss:$8 sps:$4 sm:$0xff]  }
 0x1f7   : > { %4141 = vmatpush1.bf16.msra.mxu0 %v5664_v28  ;;  %3814 = vmatprep.subr.bf16.mxu1 %v5669_v29  ;;  %v413_v28 = vcombine.high %v6771_v12, %v6771_v12  ;;  %v5745_v29 = vld [vmem:[%s6257_s7 + $0x6e0] ss:$8 sps:$4 sm:$0xff]   ;;  %v5754_v12 = vld [vmem:[%s6257_s7 + $0xef0] ss:$8 sps:$4 sm:$0xff]  }
 0x1f8   : > { %4142 = vmatprep.subr.bf16.mxu0 %v5672_v30  ;;  %3844 = vmatprep.mubr.bf16.mxu1 %v475_v31  ;;  %v5748_v30 = vld [vmem:[%s6257_s7 + $0xee0] ss:$8 sps:$4 sm:$0xff]   ;;  %v5753_v31 = vld [vmem:[%s6257_s7 + $0x6f4] ss:$8 sps:$4 sm:$0xff]  }
 0x1f9   : > { %4172 = vmatprep.mubr.bf16.mxu0 %v491_v32  ;;  %v5756_v32 = vld [vmem:[%s6257_s7 + $0xef4] ss:$8 sps:$4 sm:$0xff]  }
 0x1fa   : > { %3815 = vmatpush1.bf16.msra.mxu1 %v5667_v43  ;;  %v6862_v43 = vrot.slane %v345_v27, %v6331_v50  ;;  %v5823_v27 = vld [vmem:[%s6257_s7 + $0x7b0] ss:$8 sps:$4 sm:$0xff]  }
 0x1fb   : > { %4143 = vmatpush1.bf16.msra.mxu0 %v5670_v36  ;;  %3816 = vmatprep.subr.bf16.mxu1 %v5675_v33  ;;  %v6865_v36 = vrot.slane %v413_v28, %v6331_v50  ;;  %v5759_v33 = vld [vmem:[%s6257_s7 + $0x704] ss:$8 sps:$4 sm:$0xff]   ;;  %v5826_v28 = vld [vmem:[%s6257_s7 + $0xfb0] ss:$8 sps:$4 sm:$0xff]  }
 0x1fc   : > { %4144 = vmatprep.subr.bf16.mxu0 %v5678_v34  ;;  %v5762_v34 = vld [vmem:[%s6257_s7 + $0xf04] ss:$8 sps:$4 sm:$0xff]  }
 0x1fe   : > { %3817 = vmatpush1.bf16.msra.mxu1 %v5673_v35  ;;  %v361_v35 = vcombine.high %v6862_v43, %v6862_v43 }
 0x1ff   : > { %4145 = vmatpush1.bf16.msra.mxu0 %v5676_v37  ;;  %3818 = vmatprep.subr.bf16.mxu1 %v5681_v16  ;;  %v429_v37 = vcombine.high %v6865_v36, %v6865_v36  ;;  %v474_v16 = vpack.c.bf16 %v6779_v19, %v6779_v19  ;;  %v5763_v19 = vld [vmem:[%s6257_s7 + $0x710] ss:$8 sps:$4 sm:$0xff]  }
 0x200   : > { %4146 = vmatprep.subr.bf16.mxu0 %v5684_v39  ;;  %v490_v39 = vpack.c.bf16 %v6783_v20, %v6783_v20  ;;  %v5766_v20 = vld [vmem:[%s6257_s7 + $0xf10] ss:$8 sps:$4 sm:$0xff]  }
 0x202   : > { %3819 = vmatpush1.bf16.msra.mxu1 %v5679_v40  ;;  %v5757_v40 = vld [vmem:[%s6257_s7 + $0x700] ss:$8 sps:$4 sm:$0xff]  }
 0x203   : > { %4147 = vmatpush1.bf16.msra.mxu0 %v5682_v42  ;;  %3820 = vmatprep.subr.bf16.mxu1 %v5687_v45  ;;  %v5760_v42 = vld [vmem:[%s6257_s7 + $0xf00] ss:$8 sps:$4 sm:$0xff]   ;;  %v5765_v45 = vld [vmem:[%s6257_s7 + $0x714] ss:$8 sps:$4 sm:$0xff]  }
 0x204   : > { %4148 = vmatprep.subr.bf16.mxu0 %v5690_v15  ;;  %v5768_v15 = vld [vmem:[%s6257_s7 + $0xf14] ss:$8 sps:$4 sm:$0xff]  }
 0x206   : > { %3821 = vmatpush1.bf16.msra.mxu1 %v5685_v46  ;;  %v477_v46 = vpack.c.bf16 %v361_v35, %v361_v35  ;;  %v5843_v35 = vld [vmem:[%s6257_s7 + $0x7e4] ss:$8 sps:$4 sm:$0xff]  }
 0x207   : > { %4149 = vmatpush1.bf16.msra.mxu0 %v5688_v47  ;;  %3822 = vmatprep.subr.bf16.mxu1 %v5693_v48  ;;  %v493_v47 = vpack.c.bf16 %v429_v37, %v429_v37  ;;  %v5771_v48 = vld [vmem:[%s6257_s7 + $0x724] ss:$8 sps:$4 sm:$0xff]  }
 0x208   : > { %4150 = vmatprep.subr.bf16.mxu0 %v5696_v49  ;;  %v5774_v49 = vld [vmem:[%s6257_s7 + $0xf24] ss:$8 sps:$4 sm:$0xff]  }
 0x209   : > { %v5846_v37 = vld [vmem:[%s6257_s7 + $0xfe4] ss:$8 sps:$4 sm:$0xff]  }
 0x20a   : > { %3823 = vmatpush1.bf16.msra.mxu1 %v5691_v53  ;;  %v5769_v53 = vld [vmem:[%s6257_s7 + $0x720] ss:$8 sps:$4 sm:$0xff]  }
 0x20b   : > { %4151 = vmatpush1.bf16.msra.mxu0 %v5694_v54  ;;  %3824 = vmatprep.subr.bf16.mxu1 %v5699_v55  ;;  %v5772_v54 = vld [vmem:[%s6257_s7 + $0xf20] ss:$8 sps:$4 sm:$0xff]   ;;  %v5777_v55 = vld [vmem:[%s6257_s7 + $0x734] ss:$8 sps:$4 sm:$0xff]  }
 0x20c   : > { %4152 = vmatprep.subr.bf16.mxu0 %v5702_v56  ;;  %v5780_v56 = vld [vmem:[%s6257_s7 + $0xf34] ss:$8 sps:$4 sm:$0xff]  }
 0x20e   : > { %3825 = vmatpush1.bf16.msra.mxu1 %v5697_v59  ;;  %v5775_v59 = vld [vmem:[%s6257_s7 + $0x730] ss:$8 sps:$4 sm:$0xff]  }
 0x20f   : > { %4153 = vmatpush1.bf16.msra.mxu0 %v5700_v38  ;;  %3826 = vmatprep.subr.bf16.mxu1 %v5705_v41  ;;  %v5778_v38 = vld [vmem:[%s6257_s7 + $0xf30] ss:$8 sps:$4 sm:$0xff]   ;;  %v5783_v41 = vld [vmem:[%s6257_s7 + $0x744] ss:$8 sps:$4 sm:$0xff]  }
 0x210   : > { %4154 = vmatprep.subr.bf16.mxu0 %v5708_v60  ;;  %v5786_v60 = vld [vmem:[%s6257_s7 + $0xf44] ss:$8 sps:$4 sm:$0xff]  }
 0x212   : > { %3827 = vmatpush1.bf16.msra.mxu1 %v5703_v61  ;;  %v5781_v61 = vld [vmem:[%s6257_s7 + $0x740] ss:$8 sps:$4 sm:$0xff]  }
 0x213   : > { %4155 = vmatpush1.bf16.msra.mxu0 %v5706_v62  ;;  %3828 = vmatprep.subr.bf16.mxu1 %v5711_v63  ;;  %v5784_v62 = vld [vmem:[%s6257_s7 + $0xf40] ss:$8 sps:$4 sm:$0xff]   ;;  %v5789_v63 = vld [vmem:[%s6257_s7 + $0x754] ss:$8 sps:$4 sm:$0xff]  }
 0x214   : > { %4156 = vmatprep.subr.bf16.mxu0 %v5714_v0  ;;  %v5792_v0 = vld [vmem:[%s6257_s7 + $0xf54] ss:$8 sps:$4 sm:$0xff]  }
 0x216   : > { %3829 = vmatpush1.bf16.msra.mxu1 %v5709_v1  ;;  %v5787_v1 = vld [vmem:[%s6257_s7 + $0x750] ss:$8 sps:$4 sm:$0xff]  }
 0x217   : > { %4157 = vmatpush1.bf16.msra.mxu0 %v5712_v2  ;;  %3830 = vmatprep.subr.bf16.mxu1 %v5717_v3  ;;  %v5790_v2 = vld [vmem:[%s6257_s7 + $0xf50] ss:$8 sps:$4 sm:$0xff]   ;;  %v5795_v3 = vld [vmem:[%s6257_s7 + $0x764] ss:$8 sps:$4 sm:$0xff]  }
 0x218   : > { %4158 = vmatprep.subr.bf16.mxu0 %v5720_v4  ;;  %v5798_v4 = vld [vmem:[%s6257_s7 + $0xf64] ss:$8 sps:$4 sm:$0xff]  }
 0x21a   : > { %3831 = vmatpush1.bf16.msra.mxu1 %v5715_v5  ;;  %v5793_v5 = vld [vmem:[%s6257_s7 + $0x760] ss:$8 sps:$4 sm:$0xff]  }
 0x21b   : > { %4159 = vmatpush1.bf16.msra.mxu0 %v5718_v6  ;;  %3832 = vmatprep.subr.bf16.mxu1 %v5723_v51  ;;  %v5796_v6 = vld [vmem:[%s6257_s7 + $0xf60] ss:$8 sps:$4 sm:$0xff]   ;;  %v5801_v51 = vld [vmem:[%s6257_s7 + $0x774] ss:$8 sps:$4 sm:$0xff]  }
 0x21c   : > { %4160 = vmatprep.subr.bf16.mxu0 %v5726_v52  ;;  %v5804_v52 = vld [vmem:[%s6257_s7 + $0xf74] ss:$8 sps:$4 sm:$0xff]  }
 0x21e   : > { %3833 = vmatpush1.bf16.msra.mxu1 %v5721_v7  ;;  %v5799_v7 = vld [vmem:[%s6257_s7 + $0x770] ss:$8 sps:$4 sm:$0xff]  }
 0x21f   : > { %4161 = vmatpush1.bf16.msra.mxu0 %v5724_v8  ;;  %3834 = vmatprep.subr.bf16.mxu1 %v5729_v9  ;;  %v5802_v8 = vld [vmem:[%s6257_s7 + $0xf70] ss:$8 sps:$4 sm:$0xff]   ;;  %v5807_v9 = vld [vmem:[%s6257_s7 + $0x784] ss:$8 sps:$4 sm:$0xff]  }
 0x220   : > { %4162 = vmatprep.subr.bf16.mxu0 %v5732_v10  ;;  %v5810_v10 = vld [vmem:[%s6257_s7 + $0xf84] ss:$8 sps:$4 sm:$0xff]  }
 0x222   : > { %3835 = vmatpush1.bf16.msra.mxu1 %v5727_v13  ;;  %v5805_v13 = vld [vmem:[%s6257_s7 + $0x780] ss:$8 sps:$4 sm:$0xff]  }
 0x223   : > { %4163 = vmatpush1.bf16.msra.mxu0 %v5730_v14  ;;  %3836 = vmatprep.subr.bf16.mxu1 %v5735_v17  ;;  %v5808_v14 = vld [vmem:[%s6257_s7 + $0xf80] ss:$8 sps:$4 sm:$0xff]   ;;  %v5813_v17 = vld [vmem:[%s6257_s7 + $0x794] ss:$8 sps:$4 sm:$0xff]  }
 0x224   : > { %4164 = vmatprep.subr.bf16.mxu0 %v5738_v18  ;;  %v5816_v18 = vld [vmem:[%s6257_s7 + $0xf94] ss:$8 sps:$4 sm:$0xff]  }
 0x226   : > { %3837 = vmatpush1.bf16.msra.mxu1 %v5733_v57  ;;  %v5811_v57 = vld [vmem:[%s6257_s7 + $0x790] ss:$8 sps:$4 sm:$0xff]  }
 0x227   : > { %4165 = vmatpush1.bf16.msra.mxu0 %v5736_v58  ;;  %3838 = vmatprep.subr.bf16.mxu1 %v5741_v21  ;;  %v5814_v58 = vld [vmem:[%s6257_s7 + $0xf90] ss:$8 sps:$4 sm:$0xff]   ;;  %v5819_v21 = vld [vmem:[%s6257_s7 + $0x7a4] ss:$8 sps:$4 sm:$0xff]  }
 0x228   : > { %4166 = vmatprep.subr.bf16.mxu0 %v5744_v22  ;;  %v5822_v22 = vld [vmem:[%s6257_s7 + $0xfa4] ss:$8 sps:$4 sm:$0xff]  }
 0x22a   : > { %3839 = vmatpush1.bf16.msra.mxu1 %v5739_v23  ;;  %v5817_v23 = vld [vmem:[%s6257_s7 + $0x7a0] ss:$8 sps:$4 sm:$0xff]  }
 0x22b   : > { %4167 = vmatpush1.bf16.msra.mxu0 %v5742_v24  ;;  %3840 = vmatprep.subr.bf16.mxu1 %v5747_v25  ;;  %v5820_v24 = vld [vmem:[%s6257_s7 + $0xfa0] ss:$8 sps:$4 sm:$0xff]   ;;  %v5825_v25 = vld [vmem:[%s6257_s7 + $0x7b4] ss:$8 sps:$4 sm:$0xff]  }
 0x22c   : > { %4168 = vmatprep.subr.bf16.mxu0 %v5750_v26  ;;  %v5828_v26 = vld [vmem:[%s6257_s7 + $0xfb4] ss:$8 sps:$4 sm:$0xff]  }
 0x22e   : > { %3841 = vmatpush1.bf16.msra.mxu1 %v5745_v29  ;;  %v5831_v29 = vld [vmem:[%s6257_s7 + $0x7c4] ss:$8 sps:$4 sm:$0xff]  }
 0x22f   : > { %4169 = vmatpush1.bf16.msra.mxu0 %v5748_v30  ;;  %3842 = vmatprep.subr.bf16.mxu1 %v5753_v31  ;;  %v5834_v30 = vld [vmem:[%s6257_s7 + $0xfc4] ss:$8 sps:$4 sm:$0xff]   ;;  %v5829_v31 = vld [vmem:[%s6257_s7 + $0x7c0] ss:$8 sps:$4 sm:$0xff]  }
 0x230   : > { %4170 = vmatprep.subr.bf16.mxu0 %v5756_v32  ;;  %v5832_v32 = vld [vmem:[%s6257_s7 + $0xfc0] ss:$8 sps:$4 sm:$0xff]  }
 0x232   : > { %3843 = vmatpush1.bf16.msra.mxu1 %v5751_v11  ;;  %v5837_v11 = vld [vmem:[%s6257_s7 + $0x7d4] ss:$8 sps:$4 sm:$0xff]  }
 0x233   : > { %4171 = vmatpush1.bf16.msra.mxu0 %v5754_v12  ;;  %3853 = vmatprep.subr.bf16.mxu1 %v5759_v33  ;;  %v5840_v12 = vld [vmem:[%s6257_s7 + $0xfd4] ss:$8 sps:$4 sm:$0xff]   ;;  %v5835_v33 = vld [vmem:[%s6257_s7 + $0x7d0] ss:$8 sps:$4 sm:$0xff]  }
 0x234   : > { %4181 = vmatprep.subr.bf16.mxu0 %v5762_v34  ;;  %v5838_v34 = vld [vmem:[%s6257_s7 + $0xfd0] ss:$8 sps:$4 sm:$0xff]  }
 0x235   : > { %3845 = vmatmul.mubr.bf16.vlgmr.msra.gmra.mrb[0].mxu1 %v474_v16  ;;  %v5841_v16 = vld [vmem:[%s6257_s7 + $0x7e0] ss:$8 sps:$4 sm:$0xff]  }
 0x236   : > { %4173 = vmatmul.mubr.bf16.vlgmr.msra.gmra.mrb[0].mxu0 %v490_v39  ;;  %3854 = vmatpush1.bf16.msra.mxu1 %v5757_v40  ;;  %v5844_v39 = vld [vmem:[%s6257_s7 + $0xfe0] ss:$8 sps:$4 sm:$0xff]   ;;  %v5849_v40 = vld [vmem:[%s6257_s7 + $0x7f4] ss:$8 sps:$4 sm:$0xff]  }
 0x237   : > { %4182 = vmatpush1.bf16.msra.mxu0 %v5760_v42  ;;  %3855 = vmatprep.subr.bf16.mxu1 %v5765_v45  ;;  %v5852_v42 = vld [vmem:[%s6257_s7 + $0xff4] ss:$8 sps:$4 sm:$0xff]   ;;  %v5847_v45 = vld [vmem:[%s6257_s7 + $0x7f0] ss:$8 sps:$4 sm:$0xff]  }
 0x238   : > { %4183 = vmatprep.subr.bf16.mxu0 %v5768_v15  ;;  %3885 = vmatprep.mubr.bf16.mxu1 %v477_v46  ;;  %v5850_v15 = vld [vmem:[%s6257_s7 + $0xff0] ss:$8 sps:$4 sm:$0xff]   ;;  %v476_v46 = vpack.c.bf16 %v6862_v43, %v6862_v43 }
 0x239   : > { %4213 = vmatprep.mubr.bf16.mxu0 %v493_v47  ;;  %v492_v47 = vpack.c.bf16 %v6865_v36, %v6865_v36  ;;  %v4240_v36 = vld [vmem:[%s224_s10] sm:$0x3] (!%p4911_p3) }
 0x23a   : > { %3856 = vmatpush1.bf16.msra.mxu1 %v5763_v19 }
 0x23b   : > { %4184 = vmatpush1.bf16.msra.mxu0 %v5766_v20  ;;  %3857 = vmatprep.subr.bf16.mxu1 %v5771_v48 }
 0x23c   : > { %4185 = vmatprep.subr.bf16.mxu0 %v5774_v49 }
 0x23e   : > { %3858 = vmatpush1.bf16.msra.mxu1 %v5769_v53 }
 0x23f   : > { %4186 = vmatpush1.bf16.msra.mxu0 %v5772_v54  ;;  %3859 = vmatprep.subr.bf16.mxu1 %v5777_v55 }
 0x240   : > { %4187 = vmatprep.subr.bf16.mxu0 %v5780_v56 }
 0x242   : > { %3860 = vmatpush1.bf16.msra.mxu1 %v5775_v59 }
 0x243   : > { %4188 = vmatpush1.bf16.msra.mxu0 %v5778_v38  ;;  %3861 = vmatprep.subr.bf16.mxu1 %v5783_v41 }
 0x244   : > { %4189 = vmatprep.subr.bf16.mxu0 %v5786_v60  ;;  %v277_v60 = vld [vmem:[#allocation2] sm:$0xf] }
 0x246   : > { %3862 = vmatpush1.bf16.msra.mxu1 %v5781_v61 }
 0x247   : > { %4190 = vmatpush1.bf16.msra.mxu0 %v5784_v62  ;;  %3863 = vmatprep.subr.bf16.mxu1 %v5789_v63  ;;  %v4244_v62 = vsub.s32 (!%p4911_p3), 0, %v6323_v44  ;;  %v4248_v63 = vsub.s32 (!%p4911_p3), 1, %v6323_v44 }
 0x248   : > { %4191 = vmatprep.subr.bf16.mxu0 %v5792_v0 }
 0x249   : > { %v4245_v0 = vrot.slane (!%p4911_p3), %v4240_v36, %v4244_v62 }
 0x24a   : > { %3864 = vmatpush1.bf16.msra.mxu1 %v5787_v1  ;;  %v4249_v1 = vrot.slane (!%p4911_p3), %v4240_v36, %v4248_v63 }
 0x24b   : > { %4192 = vmatpush1.bf16.msra.mxu0 %v5790_v2  ;;  %3865 = vmatprep.subr.bf16.mxu1 %v5795_v3 }
 0x24c   : > { %4193 = vmatprep.subr.bf16.mxu0 %v5798_v4  ;;  %v4250_v2 = vcombine.low (!%p4911_p3), %v4245_v0, %v4249_v1 }
 0x24e   : > { %3866 = vmatpush1.bf16.msra.mxu1 %v5793_v5  ;;  %v4257_v4 = vrot.slane (!%p4911_p3), %v4250_v2, %v6331_v50 }
 0x24f   : > { %4194 = vmatpush1.bf16.msra.mxu0 %v5796_v6  ;;  %3867 = vmatprep.subr.bf16.mxu1 %v5801_v51 }
 0x250   : > { %4195 = vmatprep.subr.bf16.mxu0 %v5804_v52 }
 0x252   : > { %3868 = vmatpush1.bf16.msra.mxu1 %v5799_v7 }
 0x253   : > { %4196 = vmatpush1.bf16.msra.mxu0 %v5802_v8  ;;  %3869 = vmatprep.subr.bf16.mxu1 %v5807_v9 }
 0x254   : > { %4197 = vmatprep.subr.bf16.mxu0 %v5810_v10 }
 0x256   : > { %3870 = vmatpush1.bf16.msra.mxu1 %v5805_v13 }
 0x257   : > { %4198 = vmatpush1.bf16.msra.mxu0 %v5808_v14  ;;  %3871 = vmatprep.subr.bf16.mxu1 %v5813_v17 }
 0x258   : > { %4199 = vmatprep.subr.bf16.mxu0 %v5816_v18 }
 0x25a   : > { %3872 = vmatpush1.bf16.msra.mxu1 %v5811_v57 }
 0x25b   : > { %4200 = vmatpush1.bf16.msra.mxu0 %v5814_v58  ;;  %3873 = vmatprep.subr.bf16.mxu1 %v5819_v21 }
 0x25c   : > { %4201 = vmatprep.subr.bf16.mxu0 %v5822_v22 }
 0x25e   : > { %3874 = vmatpush1.bf16.msra.mxu1 %v5817_v23 }
 0x25f   : > { %4202 = vmatpush1.bf16.msra.mxu0 %v5820_v24  ;;  %3875 = vmatprep.subr.bf16.mxu1 %v5825_v25 }
 0x260   : > { %4203 = vmatprep.subr.bf16.mxu0 %v5828_v26 }
 0x262   : > { %3876 = vmatpush1.bf16.msra.mxu1 %v5823_v27 }
 0x263   : > { %4204 = vmatpush1.bf16.msra.mxu0 %v5826_v28  ;;  %3877 = vmatprep.subr.bf16.mxu1 %v5831_v29 }
 0x264   : > { %4205 = vmatprep.subr.bf16.mxu0 %v5834_v30 }
 0x266   : > { %3878 = vmatpush1.bf16.msra.mxu1 %v5829_v31 }
 0x267   : > { %4206 = vmatpush1.bf16.msra.mxu0 %v5832_v32  ;;  %3879 = vmatprep.subr.bf16.mxu1 %v5837_v11 }
 0x268   : > { %4207 = vmatprep.subr.bf16.mxu0 %v5840_v12 }
 0x26a   : > { %3880 = vmatpush1.bf16.msra.mxu1 %v5835_v33 }
 0x26b   : > { %4208 = vmatpush1.bf16.msra.mxu0 %v5838_v34  ;;  %3881 = vmatprep.subr.bf16.mxu1 %v5843_v35 }
 0x26c   : > { %4209 = vmatprep.subr.bf16.mxu0 %v5846_v37 }
 0x26e   : > { %3882 = vmatpush1.bf16.msra.mxu1 %v5841_v16 }
 0x26f   : > { %4210 = vmatpush1.bf16.msra.mxu0 %v5844_v39  ;;  %3883 = vmatprep.subr.bf16.mxu1 %v5849_v40 }
 0x270   : > { %4211 = vmatprep.subr.bf16.mxu0 %v5852_v42 }
 0x272   : > { %3884 = vmatpush1.bf16.msra.mxu1 %v5847_v45 }
 0x273   : > { %4212 = vmatpush1.bf16.msra.mxu0 %v5850_v15 }
 0x275   : > { %3886 = vmatmul.mubr.bf16.vlgmr.msra.gmra.mrb[0].mxu1 %v476_v46 }
 0x276   : > { %4214 = vmatmul.mubr.bf16.vlgmr.msra.gmra.mrb[0].mxu0 %v492_v47 }
 0x348   : > { %v3887_v19 = vpop.f32.mrb[0].mxu1 }
 0x349   : > { %v4215_v20 = vpop.f32.mrb[0].mxu0  ;;  %v3889_v49 = vpop.f32.mrb[1].mxu1 }
 0x34a   : > { %v4916_v48 = vadd.f32 %v4215_v20, %v3887_v19  ;;  %v4217_v53 = vpop.f32.mrb[1].mxu0  ;;  %v3891_v55 = vpop.f32.mrb[2].mxu1 }
 0x34b   : > { %v4917_v54 = vadd.f32 %v4217_v53, %v3889_v49  ;;  %v4219_v56 = vpop.f32.mrb[2].mxu0  ;;  %v3892_v59 = vpop.f32.mrb[3].mxu1 }
 0x34c   : > { %v4220_v38 = vpop.f32.mrb[3].mxu0 }
 0x34d   : > { %v4224_v41 = vcombine.low %v4916_v48, %v4917_v54  ;;  %4238 = sbr.rel (%p4911_p3) target bundleno = 864 (0x360), region = 48 }
 0x34f   : > { %v4231_v43 = vrot.slane %v4224_v41, %v6331_v50 }
 0x351   : > { %v4233_v61 = vadd.f32 %v4231_v43, %v277_v60 }
 0x353   : > { %4234 = vst [vmem:[#allocation2] sm:$0xf] %v4233_v61 }
 0x35a   : > { %v4239_v3 = vld [vmem:[#allocation2] sm:$0xf] }
 0x35b   : > { %v4259_v5 = vadd.f32 %v4257_v4, %v4239_v3 }
 0x35d   : > { %v4260_v6 = vmax.f32 %v4259_v5, 0.0 }
 0x35f   : > { %4261 = vst [vmem:[%s6281_s4] sm:$0xf] %v4260_v6 }
 0x360 PF: > { %s19_s22 = sadd.s32 1, %s6009_s22   ;;  %s7011_s7 = sld [smem:[#allocation9_spill]] }
 0x361   : > { %p16_p11 = scmp.ge.s32.totalorder %s19_s22, 10   ;;  %s7012_s12 = smov %s5973_s13 }
 0x362   : > { %s7013_s13 = smov %s5977_s14  ;;  %s7014_s14 = smov %s6206_s29 }
 0x363   : > { %s7015_s15 = smov %s5985_s16  ;;  %s7016_s16 = smov %s5989_s17 }
 0x364   : > { %s7017_s17 = smov %s6211_s6  ;;  %s7018_s18 = smov %s6001_s20 }
 0x365   : > { %s7019_s19 = smov %s6005_s21  ;;  %s7020_s20 = smov %s7023_s23 }
 0x366   : > { %s7021_s21 = smov %s7011_s7  ;;  %18 = sbr.rel (!%p16_p11) target bundleno = 11 (0xb), region = 96 }
 0x36d   :  { %4284 = vsyncpa [#allocation4], 1 }
 0x36e   :  { %4286 = vsyncpa [#allocation4 + $0x1], 1 }
 0x36f   :  { %4287 = vsyncpa [#allocation6], 1 }
 0x370   :  { %4289 = vsyncpa [#allocation6 + $0x1], 1 }

// kernel: actor_forward.3
= control target key start
LH: loop header
LB: loop body
LE: loop exit
PB: predicated region body
PF: predicated region fallthrough
CT: control target
= control target key end

     0   :  { %12 = vsyncpa [#allocation6], 0  ;;  %s19376_s0 = inlined_call_operand.vmem [shape: f32[2,16,16,4], index: 0, kind: input, shape index: {}]   ;;  %s19377_s1 = inlined_call_operand.hbm [shape: f32[9,4,32], index: 1, kind: input, shape index: {}]   ;;  %s19378_s2 = inlined_call_operand.hbm [shape: f32[1,32], index: 2, kind: input, shape index: {}]   ;;  %s19379_s3 = inlined_call_operand.hbm [shape: f32[9,32,64], index: 3, kind: input, shape index: {}]   ;;  %s19380_s4 = inlined_call_operand.hbm [shape: f32[1,64], index: 4, kind: input, shape index: {}]   ;;  %s19381_s5 = inlined_call_operand.hbm [shape: f32[9,64,64], index: 5, kind: input, shape index: {}]   ;;  %s19382_s6 = inlined_call_operand.hbm [shape: f32[1,64], index: 6, kind: input, shape index: {}]   ;;  %s19383_s7 = inlined_call_operand.vmem [shape: f32[2,256,64], index: 7, kind: output, shape index: {}]  }
   0x1   :  { %13 = vsyncpa [#allocation8], 0 }
   0x2   :  { %14 = vsyncpa [#allocation11], 0 }
   0x3   :  { %15 = vsyncpa [#allocation14], 0  ;;  %s16164_s24 = smov 0  }
   0x4 LB: > { %s16113_s25 = smov [#allocation7]   ;;  %s16170_s27 = sadd.s32 4294967295, %s16111_s24   ;;  %s16111_s24 = sphi %s16164_s24, %s21_s24  }
   0x5   : > { %s230_s26 = sshll.u32 %s16113_s25, 4  ;;  %p11451_p0 = scmp.ge.s32.totalorder %s16111_s24, 1  ;;  %s16175_s26 = int_to_ptr.vmem [resolvable:$true] %s230_s26 }
   0x6   : > { %p204_p1 = scmp.lt.s32.totalorder %s16111_s24, 3  ;;  %p19384_p2 = scmp.eq.s32.totalorder %s16170_s27, 0 }
   0x7   : > { %s16114_s29 = smov [#allocation10]   ;;  %s16115_s8 = smov [#allocation5]  }
   0x8   : > { %p16177_p3 = pnand %p11451_p0, %p204_p1  ;;  %s254_s30 = sshll.u32 %s16114_s29, 4  ;;  %s16183_s30 = int_to_ptr.vmem [resolvable:$true] %s254_s30 }
   0x9   : > { %s216_s9 = sshll.u32 %s16115_s8, 4  ;;  %s16116_s11 = smov [#allocation9]   ;;  %s16191_s9 = int_to_ptr.vmem [resolvable:$true] %s216_s9 }
   0xa   : > { %s19558_s28 = scalar_select %p16177_p3, 1, 0 }
   0xb   : > { %p15871_p4 = pneg %p16177_p3  ;;  %s16193_s12 = sshll.u32 %s16116_s11, 4  ;;  %s241_s12 = int_to_ptr.vmem [resolvable:$true] %s16193_s12 }
   0xc   : > { %s15921_s15 = scalar_lea.hbm %s19378_s2, 16 }
   0xd   : > { %p16187_p5 = pnand %p19384_p2, %p15871_p4  ;;  %p15922_p6 = scmp.ne.s32.totalorder %s19378_s2, %s15921_s15 }
   0xe   : > { %p15928_p10 = scmp.lt.u32.totalorder %s15921_s15, %s19378_s2 }
   0xf   : > { %p16203_p7 = pneg %p16187_p5 }
  0x11   : > { %p15924_p8 = pnand %p16203_p7, %p15922_p6 }
  0x13   : > { %p15925_p9 = pneg %p15924_p8 }
  0x15   : > { %p15930_p11 = pnand %p15928_p10, %p15925_p9 }
  0x17   : > { %15933 = shalt.err (!%p15930_p11)
}
  0x18   : > { %s15934_s21 = scalar_lea.vmem %s16175_s26, 16  ;;  %s15941_s22 = scalar_lea.vmem %s16175_s26, 32 }
  0x19   : > { %p15935_p12 = scmp.ne.s32.totalorder %s16175_s26, %s15934_s21  ;;  %p15942_p1 = scmp.lt.s32.totalorder %s16175_s26, %s16175_s26 }
  0x1a   : > { %p15943_p4 = scmp.lt.s32.totalorder %s15941_s22, %s15934_s21 }
  0x1b   : > { %p15937_p13 = pnand %p15935_p12, %p16203_p7 }
  0x1c   : > { %p15944_p6 = por %p15943_p4, %p15942_p1 }
  0x1d   : > { %p15938_p0 = pneg %p15937_p13 }
  0x1f   : > { %p15945_p8 = pnand %p15944_p6, %p15938_p0 }
  0x21   : > { %15948 = shalt.err (!%p15945_p8)
}
  0x22   : > { %15877 = dma.hbm_to_vmem [thread:$0]  (!%p16187_p5), %s19378_s2, 16, %s16175_s26, [#allocation8]  }
  0x23   : > { %s15949_s11 = scalar_lea.hbm %s19380_s4, 16 }
  0x24   : > { %p15950_p9 = scmp.ne.s32.totalorder %s19380_s4, %s15949_s11  ;;  %p15956_p12 = scmp.lt.u32.totalorder %s15949_s11, %s19380_s4 }
  0x26   : > { %p15952_p10 = pnand %p15950_p9, %p16203_p7 }
  0x28   : > { %p15953_p11 = pneg %p15952_p10 }
  0x2a   : > { %p15958_p13 = pnand %p15956_p12, %p15953_p11 }
  0x2c   : > { %15961 = shalt.err (!%p15958_p13)
}
  0x2d   : > { %s15962_s26 = scalar_lea.vmem %s16183_s30, 16  ;;  %s15969_s17 = scalar_lea.vmem %s16183_s30, 32 }
  0x2e   : > { %p15963_p0 = scmp.ne.s32.totalorder %s16183_s30, %s15962_s26  ;;  %p15970_p6 = scmp.lt.s32.totalorder %s16183_s30, %s16183_s30 }
  0x2f   : > { %p15971_p8 = scmp.lt.s32.totalorder %s15969_s17, %s15962_s26 }
  0x30   : > { %p15965_p1 = pnand %p15963_p0, %p16203_p7 }
  0x31   : > { %p15972_p9 = por %p15971_p8, %p15970_p6 }
  0x32   : > { %p15966_p4 = pneg %p15965_p1 }
  0x34   : > { %p15973_p10 = pnand %p15972_p9, %p15966_p4 }
  0x36   : > { %15976 = shalt.err (!%p15973_p10)
}
  0x37   : > { %15883 = dma.hbm_to_vmem [thread:$0]  (!%p16187_p5), %s19380_s4, 16, %s16183_s30, [#allocation11]  }
  0x38   : > { %s15977_s23 = scalar_lea.hbm %s19377_s1, 576 }
  0x39   : > { %p15978_p11 = scmp.ne.s32.totalorder %s19377_s1, %s15977_s23  ;;  %p15984_p0 = scmp.lt.u32.totalorder %s15977_s23, %s19377_s1 }
  0x3b   : > { %p15980_p12 = pnand %p15978_p11, %p16203_p7 }
  0x3d   : > { %p15981_p13 = pneg %p15980_p12 }
  0x3f   : > { %p15986_p1 = pnand %p15984_p0, %p15981_p13 }
  0x41   : > { %15989 = shalt.err (!%p15986_p1)
}
  0x42   : > { %s15990_s30 = scalar_lea.vmem %s16191_s9, 576  ;;  %p15998_p9 = scmp.lt.s32.totalorder %s16191_s9, %s16191_s9 }
  0x43   : > { %p15991_p4 = scmp.ne.s32.totalorder %s16191_s9, %s15990_s30  ;;  %p15999_p10 = scmp.lt.s32.totalorder %s15990_s30, %s15990_s30 }
  0x45   : > { %p15993_p6 = pnand %p15991_p4, %p16203_p7  ;;  %p16000_p11 = por %p15999_p10, %p15998_p9 }
  0x47   : > { %p15994_p8 = pneg %p15993_p6 }
  0x49   : > { %p16001_p12 = pnand %p16000_p11, %p15994_p8 }
  0x4b   : > { %16004 = shalt.err (!%p16001_p12)
}
  0x4c   : > { %s16117_s13 = smov 64   ;;  %s16118_s14 = smov 4  }
  0x4d   : > { %15874 = dma.hbm_to_vmem [thread:$0]  (!%p16187_p5), %s19377_s1, 576, %s16191_s9, [#allocation6], %s16117_s13, %s16117_s13, %s16118_s14  }
  0x4e   : > { %s16005_s19 = scalar_lea.hbm %s19379_s3, 4608 }
  0x4f   : > { %p16006_p13 = scmp.ne.s32.totalorder %s19379_s3, %s16005_s19  ;;  %p16012_p4 = scmp.lt.u32.totalorder %s16005_s19, %s19379_s3 }
  0x51   : > { %p16008_p0 = pnand %p16006_p13, %p16203_p7 }
  0x53   : > { %p16009_p1 = pneg %p16008_p0 }
  0x55   : > { %p16014_p6 = pnand %p16012_p4, %p16009_p1 }
  0x57   : > { %16017 = shalt.err (!%p16014_p6)
}
  0x58   : > { %s16018_s25 = scalar_lea.vmem %s241_s12, 4608  ;;  %p16026_p11 = scmp.lt.s32.totalorder %s241_s12, %s241_s12 }
  0x59   : > { %p16019_p8 = scmp.ne.s32.totalorder %s241_s12, %s16018_s25  ;;  %p16027_p12 = scmp.lt.s32.totalorder %s16018_s25, %s16018_s25 }
  0x5b   : > { %p16021_p9 = pnand %p16019_p8, %p16203_p7  ;;  %p16028_p2 = por %p16027_p12, %p16026_p11 }
  0x5d   : > { %p16022_p10 = pneg %p16021_p9 }
  0x5f   : > { %p16029_p3 = pnand %p16028_p2, %p16022_p10 }
  0x61   : > { %16032 = shalt.err (!%p16029_p3)
}
  0x62   : > { %s16119_s9 = smov 128   ;;  %s16120_s29 = smov 8  }
  0x63   : > { %15880 = dma.hbm_to_vmem [thread:$0]  (!%p16187_p5), %s19379_s3, 4608, %s241_s12, [#allocation8], %s16119_s9, %s16119_s9, %s16120_s29  }
  0x64   : > { %s16121_s30 = smov [#allocation12]   ;;  %s16122_s14 = smov [#allocation13]  }
  0x65   : > { %s264_s13 = sshll.u32 %s16121_s30, 4  ;;  %s278_s15 = sshll.u32 %s16122_s14, 4  ;;  %s265_s13 = int_to_ptr.vmem [resolvable:$true] %s264_s13  ;;  %s279_s15 = int_to_ptr.vmem [resolvable:$true] %s278_s15 }
  0x66   : > { %s16033_s17 = scalar_lea.hbm %s19381_s5, 9216 }
  0x67   : > { %p16034_p2 = scmp.ne.s32.totalorder %s19381_s5, %s16033_s17  ;;  %p16040_p0 = scmp.lt.u32.totalorder %s16033_s17, %s19381_s5 }
  0x69   : > { %p16036_p3 = pnand %p16034_p2, %p16203_p7 }
  0x6b   : > { %p16037_p13 = pneg %p16036_p3 }
  0x6d   : > { %p16042_p1 = pnand %p16040_p0, %p16037_p13 }
  0x6f   : > { %16045 = shalt.err (!%p16042_p1)
}
  0x70   : > { %s16046_s12 = scalar_lea.vmem %s265_s13, 9216  ;;  %p16054_p9 = scmp.lt.s32.totalorder %s265_s13, %s265_s13 }
  0x71   : > { %p16047_p4 = scmp.ne.s32.totalorder %s265_s13, %s16046_s12  ;;  %p16055_p10 = scmp.lt.s32.totalorder %s16046_s12, %s16046_s12 }
  0x73   : > { %p16049_p6 = pnand %p16047_p4, %p16203_p7  ;;  %p16056_p11 = por %p16055_p10, %p16054_p9 }
  0x75   : > { %p16050_p8 = pneg %p16049_p6 }
  0x77   : > { %p16057_p12 = pnand %p16056_p11, %p16050_p8 }
  0x79   : > { %16060 = shalt.err (!%p16057_p12)
}
  0x7a   : > { %15886 = dma.hbm_to_vmem [thread:$0]  (!%p16187_p5), %s19381_s5, 9216, %s265_s13, [#allocation11], %s16119_s9, %s16119_s9, %s16120_s29  }
  0x7b   : > { %s16061_s30 = scalar_lea.hbm %s19382_s6, 16 }
  0x7c   : > { %p16062_p2 = scmp.ne.s32.totalorder %s19382_s6, %s16061_s30  ;;  %p16068_p0 = scmp.lt.u32.totalorder %s16061_s30, %s19382_s6 }
  0x7e   : > { %p16064_p3 = pnand %p16062_p2, %p16203_p7 }
  0x80   : > { %p16065_p13 = pneg %p16064_p3 }
  0x82   : > { %p16070_p1 = pnand %p16068_p0, %p16065_p13 }
  0x84   : > { %16073 = shalt.err (!%p16070_p1)
}
  0x85   : > { %s16074_s19 = scalar_lea.vmem %s279_s15, 16  ;;  %s16081_s9 = scalar_lea.vmem %s279_s15, 32 }
  0x86   : > { %p16075_p4 = scmp.ne.s32.totalorder %s279_s15, %s16074_s19  ;;  %p16082_p9 = scmp.lt.s32.totalorder %s279_s15, %s279_s15 }
  0x87   : > { %p16083_p10 = scmp.lt.s32.totalorder %s16081_s9, %s16074_s19 }
  0x88   : > { %p16077_p6 = pnand %p16075_p4, %p16203_p7 }
  0x89   : > { %p16084_p11 = por %p16083_p10, %p16082_p9 }
  0x8a   : > { %p16078_p8 = pneg %p16077_p6 }
  0x8c   : > { %p16085_p12 = pnand %p16084_p11, %p16078_p8 }
  0x8e   : > { %16088 = shalt.err (!%p16085_p12)
}
  0x8f   : > { %15889 = dma.hbm_to_vmem [thread:$0]  (!%p16187_p5), %s19382_s6, 16, %s279_s15, [#allocation14]  }
  0x90   : > { %p19561_p2 = scmp.ne.s32.totalorder %s19558_s28, 0 }
  0x92   : > { %299 = sbr.rel (%p19561_p2) target bundleno = 2184 (0x888), region = 48 }
  0x99   : > { %p19562_p3 = scmp.eq.s32.totalorder %s16170_s27, 0 }
  0x9b   : > { %16094 = dma.done.wait (%p19562_p3), [#allocation6], 576   ;;  %p19563_p7 = pmov %p19562_p3 }
  0x9c   : > { %p19564_p13 = pmov %p19562_p3 }
  0x9d   : > { %16096 = vsyncadd (%p19563_p7), [#allocation6], 4294966720 }
  0x9e   : > { %16098 = dma.done.wait (%p19564_p13), [#allocation8], 4624   ;;  %p19565_p0 = pmov %p19562_p3 }
  0xa0   : > { %16100 = vsyncadd (%p19565_p0), [#allocation8], 4294962672  ;;  %p19566_p1 = pmov %p19565_p0 }
  0xa1   : > { %p19567_p5 = pmov %p19565_p0 }
  0xa2   : > { %16102 = dma.done.wait (%p19566_p1), [#allocation11], 9232  }
  0xa3   : > { %16104 = vsyncadd (%p19567_p5), [#allocation11], 4294958064  ;;  %p19568_p4 = pmov %p19565_p0 }
  0xa4   : > { %p19569_p6 = pmov %p19565_p0 }
  0xa5   : > { %16106 = dma.done.wait (%p19568_p4), [#allocation14], 16  }
  0xa6   : > { %16108 = vsyncadd (%p19569_p6), [#allocation14], 4294967280  ;;  %vm393_vm0 = vcmask 31744   ;;  %p351_p8 = scmp.lt.s32.totalorder %s16170_s27, 1  ;;  %v19386_v0 = vmov 0.0   ;;  %vm397_vm1 = vcmask 24576  }
  0xa7   : > { %395 = vst.msk [vmem:[#allocation2 + $0x8] sm:$0xff] %vm393_vm0, %v19386_v0  ;;  %394 = vst.msk [vmem:[#allocation2] sm:$0xff] %vm393_vm0, %v19386_v0  ;;  %vm663_vm2 = vcmask 1043456   ;;  %v566_v1 = vld [vmem:[#allocation5 + $0x4] sm:$0xf]  ;;  %vm4018_vm3 = vcmask 261120  }
  0xa8   : > { %396 = vst.msk [vmem:[#allocation2 + $0x10] sm:$0xff] %vm393_vm0, %v19386_v0  ;;  %399 = vst.msk [vmem:[#allocation2 + $0x20] sm:$0xff] %vm393_vm0, %v19386_v0  ;;  %s19787_s27 = smov (!%p351_p8, %s16170_s27), 1  ;;  %v16503_v2 = vld [vmem:[#allocation5 + $0x10] sm:$0xf]  ;;  %13331 = vmatprep.subr.msk.mxu1 %vm663_vm2, %v566_v1  ;;  %vm4022_vm4 = vcmask 253952  }
  0xa9   : > { %400 = vst.msk [vmem:[#allocation2 + $0x28] sm:$0xff] %vm393_vm0, %v19386_v0  ;;  %401 = vst.msk [vmem:[#allocation2 + $0x30] sm:$0xff] %vm393_vm0, %v19386_v0  ;;  %s12348_s28 = sshll.u32 %s19787_s27, 8  ;;  %13531 = vmatprep.subr.msk.mxu0 %vm663_vm2, %v16503_v2  ;;  %v532_v6 = vld [vmem:[#allocation5] sm:$0xf]  ;;  %13332 = vmatpush3.msk.msra.mxu1 %vm663_vm2, %v566_v1  ;;  %vm7642_vm5 = vcmask 523264  }
  0xaa   : > { %403 = vst.msk [vmem:[#allocation2 + $0x40] sm:$0xff] %vm393_vm0, %v19386_v0  ;;  %404 = vst.msk [vmem:[#allocation2 + $0x48] sm:$0xff] %vm393_vm0, %v19386_v0  ;;  %s16501_s15 = scalar_lea.vmem %s19376_s0, %s12348_s28  ;;  %v2419_v7 = vld [vmem:[#allocation5 + $0x14] sm:$0xf]  ;;  %13532 = vmatpush3.msk.msra.mxu0 %vm663_vm2, %v16503_v2  ;;  %13381 = vmatprep.subr.msk.mxu1 %vm663_vm2, %v532_v6  ;;  %v16561_v32 = vld [vmem:[#allocation5 + $0x18] sm:$0xf]  ;;  %s19276_s22 = scalar_lea.vmem %s19383_s7, %s12348_s28 }
  0xab   : > { %405 = vst.msk [vmem:[#allocation2 + $0x50] sm:$0xff] %vm393_vm0, %v19386_v0  ;;  %407 = vst.msk [vmem:[#allocation2 + $0x60] sm:$0xff] %vm393_vm0, %v19386_v0  ;;  %v361_v3 = vld [vmem:[%s16501_s15] sm:$0xff]  ;;  %v362_v8 = vld [vmem:[%s16501_s15 + $0x8] sm:$0xff]  ;;  %13581 = vmatprep.subr.msk.mxu0 %vm663_vm2, %v2419_v7  ;;  %vm7646_vm6 = vcmask 516096  }
  0xac   : > { %408 = vst.msk [vmem:[#allocation2 + $0x68] sm:$0xff] %vm393_vm0, %v19386_v0  ;;  %409 = vst.msk [vmem:[#allocation2 + $0x70] sm:$0xff] %vm393_vm0, %v19386_v0  ;;  %v363_v9 = vld [vmem:[%s16501_s15 + $0x10] sm:$0xff]  ;;  %v364_v10 = vld [vmem:[%s16501_s15 + $0x18] sm:$0xff] }
  0xad   : > { %411 = vst.msk [vmem:[#allocation2 + $0x80] sm:$0xff] %vm393_vm0, %v19386_v0  ;;  %412 = vst.msk [vmem:[#allocation2 + $0x88] sm:$0xff] %vm393_vm0, %v19386_v0  ;;  %v365_v11 = vld [vmem:[%s16501_s15 + $0x20] sm:$0xff]  ;;  %v366_v12 = vld [vmem:[%s16501_s15 + $0x28] sm:$0xff] }
  0xae   : > { %413 = vst.msk [vmem:[#allocation2 + $0x90] sm:$0xff] %vm393_vm0, %v19386_v0  ;;  %415 = vst.msk [vmem:[#allocation2 + $0xa0] sm:$0xff] %vm393_vm0, %v19386_v0  ;;  %v533_v4 = vld [vmem:[#allocation2 + $0x8] sm:$0xff]  ;;  %v367_v13 = vld [vmem:[%s16501_s15 + $0x30] sm:$0xff] }
  0xaf   : > { %416 = vst.msk [vmem:[#allocation2 + $0xa8] sm:$0xff] %vm393_vm0, %v19386_v0  ;;  %417 = vst.msk [vmem:[#allocation2 + $0xb0] sm:$0xff] %vm393_vm0, %v19386_v0  ;;  %v534_v5 = vld [vmem:[#allocation2 + $0x10] sm:$0xff]  ;;  %13333 = vmatprep.mubr.msk.f32.mxu1 %vm393_vm0, %v533_v4  ;;  %v368_v14 = vld [vmem:[%s16501_s15 + $0x38] sm:$0xff] }
  0xb0   : > { %419 = vst.msk [vmem:[#allocation2 + $0xc0] sm:$0xff] %vm393_vm0, %v19386_v0  ;;  %420 = vst.msk [vmem:[#allocation2 + $0xc8] sm:$0xff] %vm393_vm0, %v19386_v0  ;;  %13334 = vmatmul.mubr.msk.f32.vlgmr.msra.gmra.mrb[0].mxu1 %vm393_vm0, %v534_v5  ;;  %v369_v15 = vld [vmem:[%s16501_s15 + $0x40] sm:$0xff]  ;;  %v370_v16 = vld [vmem:[%s16501_s15 + $0x48] sm:$0xff] }
  0xb1   : > { %421 = vst.msk [vmem:[#allocation2 + $0xd0] sm:$0xff] %vm393_vm0, %v19386_v0  ;;  %423 = vst.msk [vmem:[#allocation2 + $0xe0] sm:$0xff] %vm393_vm0, %v19386_v0  ;;  %13382 = vmatpush3.msk.msra.mxu1 %vm663_vm2, %v532_v6  ;;  %v371_v17 = vld [vmem:[%s16501_s15 + $0x50] sm:$0xff]  ;;  %v372_v18 = vld [vmem:[%s16501_s15 + $0x58] sm:$0xff] }
  0xb2   : > { %424 = vst.msk [vmem:[#allocation2 + $0xe8] sm:$0xff] %vm393_vm0, %v19386_v0  ;;  %425 = vst.msk [vmem:[#allocation2 + $0xf0] sm:$0xff] %vm393_vm0, %v19386_v0  ;;  %v373_v19 = vld [vmem:[%s16501_s15 + $0x60] sm:$0xff]  ;;  %v374_v20 = vld [vmem:[%s16501_s15 + $0x68] sm:$0xff] }
  0xb3   : > { %427 = vst.msk [vmem:[#allocation2 + $0x100] sm:$0xff] %vm393_vm0, %v19386_v0  ;;  %428 = vst.msk [vmem:[#allocation2 + $0x108] sm:$0xff] %vm393_vm0, %v19386_v0  ;;  %v375_v21 = vld [vmem:[%s16501_s15 + $0x70] sm:$0xff]  ;;  %v376_v22 = vld [vmem:[%s16501_s15 + $0x78] sm:$0xff] }
  0xb4   : > { %429 = vst.msk [vmem:[#allocation2 + $0x110] sm:$0xff] %vm393_vm0, %v19386_v0  ;;  %431 = vst.msk [vmem:[#allocation2 + $0x120] sm:$0xff] %vm393_vm0, %v19386_v0  ;;  %v377_v23 = vld [vmem:[%s16501_s15 + $0x80] sm:$0xff]  ;;  %v378_v25 = vld [vmem:[%s16501_s15 + $0x88] sm:$0xff] }
  0xb5   : > { %432 = vst.msk [vmem:[#allocation2 + $0x128] sm:$0xff] %vm393_vm0, %v19386_v0  ;;  %433 = vst.msk [vmem:[#allocation2 + $0x130] sm:$0xff] %vm393_vm0, %v19386_v0  ;;  %v379_v26 = vld [vmem:[%s16501_s15 + $0x90] sm:$0xff]  ;;  %v380_v27 = vld [vmem:[%s16501_s15 + $0x98] sm:$0xff] }
  0xb6   : > { %435 = vst.msk [vmem:[#allocation2 + $0x140] sm:$0xff] %vm393_vm0, %v19386_v0  ;;  %436 = vst.msk [vmem:[#allocation2 + $0x148] sm:$0xff] %vm393_vm0, %v19386_v0  ;;  %v381_v28 = vld [vmem:[%s16501_s15 + $0xa0] sm:$0xff]  ;;  %v382_v29 = vld [vmem:[%s16501_s15 + $0xa8] sm:$0xff] }
  0xb7   : > { %437 = vst.msk [vmem:[#allocation2 + $0x150] sm:$0xff] %vm393_vm0, %v19386_v0  ;;  %439 = vst.msk [vmem:[#allocation2 + $0x160] sm:$0xff] %vm393_vm0, %v19386_v0  ;;  %v383_v37 = vld [vmem:[%s16501_s15 + $0xb0] sm:$0xff]  ;;  %v384_v38 = vld [vmem:[%s16501_s15 + $0xb8] sm:$0xff] }
  0xb8   : > { %440 = vst.msk [vmem:[#allocation2 + $0x168] sm:$0xff] %vm393_vm0, %v19386_v0  ;;  %441 = vst.msk [vmem:[#allocation2 + $0x170] sm:$0xff] %vm393_vm0, %v19386_v0  ;;  %v385_v40 = vld [vmem:[%s16501_s15 + $0xc0] sm:$0xff]  ;;  %v386_v42 = vld [vmem:[%s16501_s15 + $0xc8] sm:$0xff] }
  0xb9   : > { %443 = vst.msk [vmem:[#allocation2 + $0x180] sm:$0xff] %vm393_vm0, %v19386_v0  ;;  %444 = vst.msk [vmem:[#allocation2 + $0x188] sm:$0xff] %vm393_vm0, %v19386_v0  ;;  %v387_v43 = vld [vmem:[%s16501_s15 + $0xd0] sm:$0xff]  ;;  %v388_v44 = vld [vmem:[%s16501_s15 + $0xd8] sm:$0xff] }
  0xba   : > { %445 = vst.msk [vmem:[#allocation2 + $0x190] sm:$0xff] %vm393_vm0, %v19386_v0  ;;  %447 = vst.msk [vmem:[#allocation2 + $0x1a0] sm:$0xff] %vm393_vm0, %v19386_v0  ;;  %v389_v45 = vld [vmem:[%s16501_s15 + $0xe0] sm:$0xff]  ;;  %v390_v46 = vld [vmem:[%s16501_s15 + $0xe8] sm:$0xff] }
  0xbb   : > { %448 = vst.msk [vmem:[#allocation2 + $0x1a8] sm:$0xff] %vm393_vm0, %v19386_v0  ;;  %449 = vst.msk [vmem:[#allocation2 + $0x1b0] sm:$0xff] %vm393_vm0, %v19386_v0  ;;  %v16631_v49 = vld [vmem:[#allocation5 + $0x8] sm:$0xf]  ;;  %v391_v57 = vld [vmem:[%s16501_s15 + $0xf0] sm:$0xff] }
  0xbc   : > { %451 = vst.msk [vmem:[#allocation2 + $0x1c0] sm:$0xff] %vm393_vm0, %v19386_v0  ;;  %452 = vst.msk [vmem:[#allocation2 + $0x1c8] sm:$0xff] %vm393_vm0, %v19386_v0  ;;  %13431 = vmatprep.subr.msk.mxu1 %vm663_vm2, %v16631_v49  ;;  %v392_v58 = vld [vmem:[%s16501_s15 + $0xf8] sm:$0xff] }
  0xbd   : > { %453 = vst.msk [vmem:[#allocation2 + $0x1d0] sm:$0xff] %vm393_vm0, %v19386_v0  ;;  %455 = vst.msk [vmem:[#allocation2 + $0x1e0] sm:$0xff] %vm393_vm0, %v19386_v0  ;;  %v16693_v63 = vld [vmem:[#allocation5 + $0x1c] sm:$0xf] }
  0xbe   : > { %456 = vst.msk [vmem:[#allocation2 + $0x1e8] sm:$0xff] %vm393_vm0, %v19386_v0  ;;  %457 = vst.msk [vmem:[#allocation2 + $0x1f0] sm:$0xff] %vm393_vm0, %v19386_v0 }
  0xbf   : > { %459 = vst.msk [vmem:[#allocation2 + $0x200] sm:$0xff] %vm393_vm0, %v19386_v0  ;;  %460 = vst.msk [vmem:[#allocation2 + $0x208] sm:$0xff] %vm393_vm0, %v19386_v0 }
  0xc0   : > { %461 = vst.msk [vmem:[#allocation2 + $0x210] sm:$0xff] %vm393_vm0, %v19386_v0  ;;  %463 = vst.msk [vmem:[#allocation2 + $0x220] sm:$0xff] %vm393_vm0, %v19386_v0 }
  0xc1   : > { %464 = vst.msk [vmem:[#allocation2 + $0x228] sm:$0xff] %vm393_vm0, %v19386_v0  ;;  %465 = vst.msk [vmem:[#allocation2 + $0x230] sm:$0xff] %vm393_vm0, %v19386_v0 }
  0xc2   : > { %402 = vst.msk [vmem:[#allocation2 + $0x38] sm:$0x1] %vm397_vm1, %v19386_v0  ;;  %398 = vst.msk [vmem:[#allocation2 + $0x18] sm:$0x1] %vm397_vm1, %v19386_v0 }
  0xc3   : > { %406 = vst.msk [vmem:[#allocation2 + $0x58] sm:$0x1] %vm397_vm1, %v19386_v0  ;;  %410 = vst.msk [vmem:[#allocation2 + $0x78] sm:$0x1] %vm397_vm1, %v19386_v0 }
  0xc4   : > { %414 = vst.msk [vmem:[#allocation2 + $0x98] sm:$0x1] %vm397_vm1, %v19386_v0  ;;  %418 = vst.msk [vmem:[#allocation2 + $0xb8] sm:$0x1] %vm397_vm1, %v19386_v0 }
  0xc5   : > { %422 = vst.msk [vmem:[#allocation2 + $0xd8] sm:$0x1] %vm397_vm1, %v19386_v0  ;;  %426 = vst.msk [vmem:[#allocation2 + $0xf8] sm:$0x1] %vm397_vm1, %v19386_v0 }
  0xc6   : > { %430 = vst.msk [vmem:[#allocation2 + $0x118] sm:$0x1] %vm397_vm1, %v19386_v0  ;;  %434 = vst.msk [vmem:[#allocation2 + $0x138] sm:$0x1] %vm397_vm1, %v19386_v0 }
  0xc7   : > { %438 = vst.msk [vmem:[#allocation2 + $0x158] sm:$0x1] %vm397_vm1, %v19386_v0  ;;  %442 = vst.msk [vmem:[#allocation2 + $0x178] sm:$0x1] %vm397_vm1, %v19386_v0 }
  0xc8   : > { %446 = vst.msk [vmem:[#allocation2 + $0x198] sm:$0x1] %vm397_vm1, %v19386_v0  ;;  %450 = vst.msk [vmem:[#allocation2 + $0x1b8] sm:$0x1] %vm397_vm1, %v19386_v0 }
  0xc9   : > { %454 = vst.msk [vmem:[#allocation2 + $0x1d8] sm:$0x1] %vm397_vm1, %v19386_v0  ;;  %458 = vst.msk [vmem:[#allocation2 + $0x1f8] sm:$0x1] %vm397_vm1, %v19386_v0 }
  0xca   : > { %462 = vst.msk [vmem:[#allocation2 + $0x218] sm:$0x1] %vm397_vm1, %v19386_v0  ;;  %466 = vst.msk [vmem:[#allocation2 + $0x238] sm:$0x1] %vm397_vm1, %v19386_v0 }
  0xcb   : > { %468 = vst.msk [vmem:[#allocation2 + $0x28] sm:$0xff] %vm393_vm0, %v361_v3  ;;  %469 = vst.msk [vmem:[#allocation2 + $0x30] sm:$0xff] %vm393_vm0, %v362_v8 }
  0xcc   : > { %470 = vst.msk [vmem:[#allocation2 + $0x48] sm:$0xff] %vm393_vm0, %v363_v9  ;;  %471 = vst.msk [vmem:[#allocation2 + $0x50] sm:$0xff] %vm393_vm0, %v364_v10 }
  0xcd   : > { %472 = vst.msk [vmem:[#allocation2 + $0x68] sm:$0xff] %vm393_vm0, %v365_v11  ;;  %473 = vst.msk [vmem:[#allocation2 + $0x70] sm:$0xff] %vm393_vm0, %v366_v12 }
  0xce   : > { %474 = vst.msk [vmem:[#allocation2 + $0x88] sm:$0xff] %vm393_vm0, %v367_v13  ;;  %475 = vst.msk [vmem:[#allocation2 + $0x90] sm:$0xff] %vm393_vm0, %v368_v14 }
  0xcf   : > { %476 = vst.msk [vmem:[#allocation2 + $0xa8] sm:$0xff] %vm393_vm0, %v369_v15  ;;  %477 = vst.msk [vmem:[#allocation2 + $0xb0] sm:$0xff] %vm393_vm0, %v370_v16 }
  0xd0   : > { %478 = vst.msk [vmem:[#allocation2 + $0xc8] sm:$0xff] %vm393_vm0, %v371_v17  ;;  %479 = vst.msk [vmem:[#allocation2 + $0xd0] sm:$0xff] %vm393_vm0, %v372_v18 }
  0xd1   : > { %480 = vst.msk [vmem:[#allocation2 + $0xe8] sm:$0xff] %vm393_vm0, %v373_v19  ;;  %481 = vst.msk [vmem:[#allocation2 + $0xf0] sm:$0xff] %vm393_vm0, %v374_v20 }
  0xd2   : > { %482 = vst.msk [vmem:[#allocation2 + $0x108] sm:$0xff] %vm393_vm0, %v375_v21  ;;  %v535_v24 = vld [vmem:[#allocation2 + $0x28] sm:$0xff]  ;;  %483 = vst.msk [vmem:[#allocation2 + $0x110] sm:$0xff] %vm393_vm0, %v376_v22  ;;  %v536_v30 = vld [vmem:[#allocation2 + $0x30] sm:$0xff] }
  0xd3   : > { %484 = vst.msk [vmem:[#allocation2 + $0x128] sm:$0xff] %vm393_vm0, %v377_v23  ;;  %13336 = vmatprep.mubr.msk.f32.mxu1 %vm393_vm0, %v535_v24  ;;  %13533 = vmatprep.mubr.msk.f32.mxu0 %vm393_vm0, %v535_v24  ;;  %485 = vst.msk [vmem:[#allocation2 + $0x130] sm:$0xff] %vm393_vm0, %v378_v25  ;;  %v16559_v31 = vld [vmem:[#allocation2 + $0x48] sm:$0xff]  ;;  %v16571_v33 = vld [vmem:[#allocation2 + $0x50] sm:$0xff] }
  0xd4   : > { %486 = vst.msk [vmem:[#allocation2 + $0x148] sm:$0xff] %vm393_vm0, %v379_v26  ;;  %487 = vst.msk [vmem:[#allocation2 + $0x150] sm:$0xff] %vm393_vm0, %v380_v27  ;;  %13337 = vmatmul.mubr.msk.f32.gmra.mrb[2].mxu1 %vm393_vm0, %v536_v30  ;;  %13534 = vmatmul.mubr.msk.f32.vlgmr.msra.gmra.mrb[0].mxu0 %vm393_vm0, %v536_v30  ;;  %v16575_v34 = vld [vmem:[#allocation2 + $0x68] sm:$0xff]  ;;  %v16587_v35 = vld [vmem:[#allocation2 + $0x70] sm:$0xff] }
  0xd5   : > { %488 = vst.msk [vmem:[#allocation2 + $0x168] sm:$0xff] %vm393_vm0, %v381_v28  ;;  %489 = vst.msk [vmem:[#allocation2 + $0x170] sm:$0xff] %vm393_vm0, %v382_v29  ;;  %13582 = vmatpush3.msk.msra.mxu0 %vm663_vm2, %v2419_v7  ;;  %13339 = vmatprep.mubr.msk.f32.mxu1 %vm393_vm0, %v16559_v31  ;;  %v16589_v36 = vld [vmem:[#allocation2 + $0x88] sm:$0xff]  ;;  %v16601_v39 = vld [vmem:[#allocation2 + $0x90] sm:$0xff] }
  0xd6   : > { %13536 = vmatprep.mubr.msk.f32.mxu0 %vm393_vm0, %v16559_v31  ;;  %13631 = vmatprep.subr.msk.mxu0 %vm663_vm2, %v16561_v32  ;;  %490 = vst.msk [vmem:[#allocation2 + $0x188] sm:$0xff] %vm393_vm0, %v383_v37  ;;  %491 = vst.msk [vmem:[#allocation2 + $0x190] sm:$0xff] %vm393_vm0, %v384_v38  ;;  %v16606_v41 = vld [vmem:[#allocation2 + $0xa8] sm:$0xff]  ;;  %v16625_v47 = vld [vmem:[#allocation2 + $0xb0] sm:$0xff] }
  0xd7   : > { %492 = vst.msk [vmem:[#allocation2 + $0x1a8] sm:$0xff] %vm393_vm0, %v385_v40  ;;  %493 = vst.msk [vmem:[#allocation2 + $0x1b0] sm:$0xff] %vm393_vm0, %v386_v42  ;;  %v16629_v48 = vld [vmem:[#allocation2 + $0xc8] sm:$0xff]  ;;  %v16641_v50 = vld [vmem:[#allocation2 + $0xd0] sm:$0xff] }
  0xd8   : > { %13340 = vmatmul.mubr.msk.f32.gmra.mrb[4].mxu1 %vm393_vm0, %v16571_v33  ;;  %13537 = vmatmul.mubr.msk.f32.gmra.mrb[2].mxu0 %vm393_vm0, %v16571_v33  ;;  %494 = vst.msk [vmem:[#allocation2 + $0x1c8] sm:$0xff] %vm393_vm0, %v387_v43  ;;  %495 = vst.msk [vmem:[#allocation2 + $0x1d0] sm:$0xff] %vm393_vm0, %v388_v44  ;;  %v16643_v51 = vld [vmem:[#allocation2 + $0xe8] sm:$0xff]  ;;  %v16655_v52 = vld [vmem:[#allocation2 + $0xf0] sm:$0xff] }
  0xd9   : > { %13342 = vmatprep.mubr.msk.f32.mxu1 %vm393_vm0, %v16575_v34  ;;  %13539 = vmatprep.mubr.msk.f32.mxu0 %vm393_vm0, %v16575_v34  ;;  %496 = vst.msk [vmem:[#allocation2 + $0x1e8] sm:$0xff] %vm393_vm0, %v389_v45  ;;  %497 = vst.msk [vmem:[#allocation2 + $0x1f0] sm:$0xff] %vm393_vm0, %v390_v46  ;;  %v16657_v53 = vld [vmem:[#allocation2 + $0x108] sm:$0xff]  ;;  %v16667_v54 = vld [vmem:[#allocation2 + $0x110] sm:$0xff] }
  0xda   : > { %19570 = vst [vmem:[#allocation19_spill] sm:$0xff] %v16667_v54  ;;  %v16669_v55 = vld [vmem:[#allocation2 + $0x128] sm:$0xff]  ;;  %498 = vst.msk [vmem:[#allocation2 + $0x208] sm:$0xff] %vm393_vm0, %v391_v57  ;;  %v16685_v59 = vld [vmem:[#allocation2 + $0x130] sm:$0xff] }
  0xdb   : > { %19571 = vst [vmem:[#allocation20_spill] sm:$0xff] %v16669_v55  ;;  %v16671_v56 = vld [vmem:[#allocation2 + $0x29] sm:$0xff]  ;;  %499 = vst.msk [vmem:[#allocation2 + $0x210] sm:$0xff] %vm393_vm0, %v392_v58  ;;  %v16687_v60 = vld [vmem:[#allocation2 + $0x31] sm:$0xff] }
  0xdc   : > { %13343 = vmatmul.mubr.msk.f32.gmra.mrb[6].mxu1 %vm393_vm0, %v16587_v35  ;;  %13540 = vmatmul.mubr.msk.f32.gmra.mrb[4].mxu0 %vm393_vm0, %v16587_v35  ;;  %19572 = vst [vmem:[#allocation21_spill] sm:$0xff] %v16685_v59  ;;  %v16689_v61 = vld [vmem:[#allocation2 + $0x148] sm:$0xff]  ;;  %v16703_v1 = vld [vmem:[#allocation2 + $0x150] sm:$0xff] }
  0xdd   : > { %13345 = vmatprep.mubr.msk.f32.mxu1 %vm393_vm0, %v16589_v36  ;;  %13542 = vmatprep.mubr.msk.f32.mxu0 %vm393_vm0, %v16589_v36  ;;  %19573 = vst [vmem:[#allocation22_spill] sm:$0xff] %v16689_v61  ;;  %v16691_v62 = vld [vmem:[#allocation2 + $0x49] sm:$0xff]  ;;  %19574 = vst [vmem:[#allocation23_spill] sm:$0xff] %v16703_v1  ;;  %v16705_v3 = vld [vmem:[#allocation2 + $0x51] sm:$0xff] }
  0xde   : > { %v16709_v4 = vld [vmem:[#allocation2 + $0x168] sm:$0xff]  ;;  %v16723_v6 = vld [vmem:[#allocation2 + $0x170] sm:$0xff] }
  0xdf   : > { %19575 = vst [vmem:[#allocation24_spill] sm:$0xff] %v16709_v4  ;;  %v16711_v5 = vld [vmem:[#allocation2 + $0x69] sm:$0xff]  ;;  %19576 = vst [vmem:[#allocation25_spill] sm:$0xff] %v16723_v6  ;;  %v16725_v7 = vld [vmem:[#allocation2 + $0x71] sm:$0xff] }
  0xe0   : > { %13346 = vmatmul.mubr.msk.f32.gmra.mrb[8].mxu1 %vm393_vm0, %v16601_v39  ;;  %13543 = vmatmul.mubr.msk.f32.gmra.mrb[6].mxu0 %vm393_vm0, %v16601_v39  ;;  %v16727_v8 = vld [vmem:[#allocation2 + $0x188] sm:$0xff]  ;;  %v16739_v10 = vld [vmem:[#allocation2 + $0x190] sm:$0xff] }
  0xe1   : > { %13348 = vmatprep.mubr.msk.f32.mxu1 %vm393_vm0, %v16606_v41  ;;  %13545 = vmatprep.mubr.msk.f32.mxu0 %vm393_vm0, %v16606_v41  ;;  %19577 = vst [vmem:[#allocation26_spill] sm:$0xff] %v16727_v8  ;;  %v16729_v9 = vld [vmem:[#allocation2 + $0x89] sm:$0xff]  ;;  %19578 = vst [vmem:[#allocation27_spill] sm:$0xff] %v16739_v10  ;;  %v16741_v11 = vld [vmem:[#allocation2 + $0x91] sm:$0xff] }
  0xe2   : > { %v16743_v12 = vld [vmem:[#allocation2 + $0x1a8] sm:$0xff]  ;;  %v16755_v14 = vld [vmem:[#allocation2 + $0x1b0] sm:$0xff] }
  0xe3   : > { %19579 = vst [vmem:[#allocation28_spill] sm:$0xff] %v16743_v12  ;;  %v16745_v13 = vld [vmem:[#allocation2 + $0xa9] sm:$0xff]  ;;  %19580 = vst [vmem:[#allocation29_spill] sm:$0xff] %v16755_v14  ;;  %v16757_v15 = vld [vmem:[#allocation2 + $0xb1] sm:$0xff] }
  0xe4   : > { %13349 = vmatmul.mubr.msk.f32.gmra.mrb[10].mxu1 %vm393_vm0, %v16625_v47  ;;  %13546 = vmatmul.mubr.msk.f32.gmra.mrb[8].mxu0 %vm393_vm0, %v16625_v47  ;;  %v16759_v16 = vld [vmem:[#allocation2 + $0x1c8] sm:$0xff]  ;;  %v16771_v18 = vld [vmem:[#allocation2 + $0x1d0] sm:$0xff] }
  0xe5   : > { %13351 = vmatprep.mubr.msk.f32.mxu1 %vm393_vm0, %v16629_v48  ;;  %13548 = vmatprep.mubr.msk.f32.mxu0 %vm393_vm0, %v16629_v48  ;;  %19581 = vst [vmem:[#allocation30_spill] sm:$0xff] %v16759_v16  ;;  %v16761_v17 = vld [vmem:[#allocation2 + $0xc9] sm:$0xff]  ;;  %19582 = vst [vmem:[#allocation31_spill] sm:$0xff] %v16771_v18  ;;  %v16773_v19 = vld [vmem:[#allocation2 + $0xd1] sm:$0xff] }
  0xe6   : > { %v16775_v20 = vld [vmem:[#allocation2 + $0x1e8] sm:$0xff]  ;;  %v16787_v22 = vld [vmem:[#allocation2 + $0x1f0] sm:$0xff] }
  0xe7   : > { %19583 = vst [vmem:[#allocation32_spill] sm:$0xff] %v16775_v20  ;;  %v16777_v21 = vld [vmem:[#allocation2 + $0xe9] sm:$0xff]  ;;  %19584 = vst [vmem:[#allocation33_spill] sm:$0xff] %v16787_v22  ;;  %v16789_v23 = vld [vmem:[#allocation2 + $0xf1] sm:$0xff] }
  0xe8   : > { %13352 = vmatmul.mubr.msk.f32.gmra.mrb[12].mxu1 %vm393_vm0, %v16641_v50  ;;  %13549 = vmatmul.mubr.msk.f32.gmra.mrb[10].mxu0 %vm393_vm0, %v16641_v50  ;;  %v500_v24 = vld [vmem:[#allocation2 + $0x7] sm:$0xff]  ;;  %v501_v26 = vld [vmem:[#allocation2 + $0xf] sm:$0xff] }
  0xe9   : > { %13354 = vmatprep.mubr.msk.f32.mxu1 %vm393_vm0, %v16643_v51  ;;  %13551 = vmatprep.mubr.msk.f32.mxu0 %vm393_vm0, %v16643_v51  ;;  %v16791_v25 = vld [vmem:[#allocation2 + $0x109] sm:$0xff]  ;;  %v16800_v27 = vld [vmem:[#allocation2 + $0x111] sm:$0xff] }
  0xea   : > { %v16802_v28 = vld [vmem:[#allocation2 + $0x27] sm:$0xff]  ;;  %v16817_v37 = vld [vmem:[#allocation2 + $0x131] sm:$0xff] }
  0xeb   : > { %19585 = vst [vmem:[#allocation34_spill] sm:$0xff] %v16802_v28  ;;  %v16804_v29 = vld [vmem:[#allocation2 + $0x129] sm:$0xff]  ;;  %v16837_v43 = vld [vmem:[#allocation2 + $0x151] sm:$0xff] }
  0xec   : > { %13355 = vmatmul.mubr.msk.f32.gmra.mrb[14].mxu1 %vm393_vm0, %v16655_v52  ;;  %13552 = vmatmul.mubr.msk.f32.gmra.mrb[12].mxu0 %vm393_vm0, %v16655_v52  ;;  %v16809_v30 = vld [vmem:[#allocation5 + $0xc] sm:$0xf] }
  0xed   : > { %13357 = vmatprep.mubr.msk.f32.mxu1 %vm393_vm0, %v16657_v53  ;;  %13554 = vmatprep.mubr.msk.f32.mxu0 %vm393_vm0, %v16657_v53  ;;  %v16821_v38 = vld [vmem:[#allocation2 + $0x47] sm:$0xff]  ;;  %v16835_v42 = vld [vmem:[#allocation2 + $0x4f] sm:$0xff] }
  0xee   : > { %19587 = vst [vmem:[#allocation36_spill] sm:$0xff] %v16821_v38  ;;  %v16823_v40 = vld [vmem:[#allocation2 + $0x149] sm:$0xff]  ;;  %19588 = vst [vmem:[#allocation37_spill] sm:$0xff] %v16835_v42 }
  0xef   : > { %v16839_v44 = vld [vmem:[#allocation2 + $0x67] sm:$0xff]  ;;  %v16851_v46 = vld [vmem:[#allocation2 + $0x6f] sm:$0xff] }
  0xf0   : > { %13358 = vmatmul.mubr.msk.f32.gmra.mrb[16].mxu1 %vm393_vm0, %v16667_v54  ;;  %13555 = vmatmul.mubr.msk.f32.gmra.mrb[14].mxu0 %vm393_vm0, %v16667_v54  ;;  %19589 = vst [vmem:[#allocation38_spill] sm:$0xff] %v16839_v44  ;;  %v16841_v45 = vld [vmem:[#allocation2 + $0x169] sm:$0xff]  ;;  %19590 = vst [vmem:[#allocation39_spill] sm:$0xff] %v16851_v46 }
  0xf1   : > { %13360 = vmatprep.mubr.msk.f32.mxu1 %vm393_vm0, %v16669_v55  ;;  %13583 = vmatprep.mubr.msk.f32.mxu0 %vm393_vm0, %v16671_v56  ;;  %v16855_v57 = vld [vmem:[#allocation2 + $0x87] sm:$0xff]  ;;  %v16933_v55 = vld [vmem:[#allocation2 + $0x211] sm:$0xff] }
  0xf2   : > { %19591 = vst [vmem:[#allocation40_spill] sm:$0xff] %v16855_v57  ;;  %v16857_v58 = vld [vmem:[#allocation2 + $0x189] sm:$0xff]  ;;  %19600 = vst [vmem:[#allocation49_spill] sm:$0xff] %v16933_v55 }
  0xf3   : > { %v16871_v0 = vld [vmem:[#allocation2 + $0xa7] sm:$0xff]  ;;  %v16945_v54 = vld [vmem:[#allocation2 + $0x12f] sm:$0xff] }
  0xf4   : > { %13361 = vmatmul.mubr.msk.f32.gmra.mrb[18].mxu1 %vm393_vm0, %v16685_v59  ;;  %13584 = vmatmul.mubr.msk.f32.vlgmr.msra.gmra.mrb[0].mxu0 %vm393_vm0, %v16687_v60  ;;  %19593 = vst [vmem:[#allocation42_spill] sm:$0xff] %v16871_v0  ;;  %v16921_v59 = vld [vmem:[#allocation2 + $0x209] sm:$0xff] }
  0xf5   : > { %13632 = vmatpush3.msk.msra.mxu0 %vm663_vm2, %v16561_v32  ;;  %13363 = vmatprep.mubr.msk.f32.mxu1 %vm393_vm0, %v16689_v61  ;;  %v16815_v32 = vld [vmem:[#allocation2 + $0x2f] sm:$0xff]  ;;  %v16919_v61 = vld [vmem:[#allocation2 + $0x107] sm:$0xff]  ;;  %19599 = vst [vmem:[#allocation48_spill] sm:$0xff] %v16921_v59 }
  0xf6   : > { %13586 = vmatprep.mubr.msk.f32.mxu0 %vm393_vm0, %v16691_v62  ;;  %13681 = vmatprep.subr.msk.mxu0 %vm663_vm2, %v16693_v63  ;;  %19586 = vst [vmem:[#allocation35_spill] sm:$0xff] %v16815_v32 }
  0xf8   : > { %13364 = vmatmul.mubr.msk.f32.gmra.mrb[20].mxu1 %vm393_vm0, %v16703_v1  ;;  %13587 = vmatmul.mubr.msk.f32.gmra.mrb[2].mxu0 %vm393_vm0, %v16705_v3  ;;  %v16917_v1 = vld [vmem:[#allocation2 + $0x1f1] sm:$0xff] }
  0xf9   : > { %13366 = vmatprep.mubr.msk.f32.mxu1 %vm393_vm0, %v16709_v4  ;;  %13589 = vmatprep.mubr.msk.f32.mxu0 %vm393_vm0, %v16711_v5  ;;  %v16915_v4 = vld [vmem:[#allocation2 + $0xef] sm:$0xff]  ;;  %19598 = vst [vmem:[#allocation47_spill] sm:$0xff] %v16917_v1 }
  0xfa   : > { %19597 = vst [vmem:[#allocation46_spill] sm:$0xff] %v16915_v4 }
  0xfc   : > { %13367 = vmatmul.mubr.msk.f32.gmra.mrb[22].mxu1 %vm393_vm0, %v16723_v6  ;;  %13590 = vmatmul.mubr.msk.f32.gmra.mrb[4].mxu0 %vm393_vm0, %v16725_v7  ;;  %v16905_v6 = vld [vmem:[#allocation2 + $0x1e9] sm:$0xff] }
  0xfd   : > { %13369 = vmatprep.mubr.msk.f32.mxu1 %vm393_vm0, %v16727_v8  ;;  %13592 = vmatprep.mubr.msk.f32.mxu0 %vm393_vm0, %v16729_v9  ;;  %v16903_v8 = vld [vmem:[#allocation2 + $0xe7] sm:$0xff] }
 0x100   : > { %13370 = vmatmul.mubr.msk.f32.gmra.mrb[24].mxu1 %vm393_vm0, %v16739_v10  ;;  %13593 = vmatmul.mubr.msk.f32.gmra.mrb[6].mxu0 %vm393_vm0, %v16741_v11  ;;  %v16901_v10 = vld [vmem:[#allocation2 + $0x1d1] sm:$0xff] }
 0x101   : > { %13372 = vmatprep.mubr.msk.f32.mxu1 %vm393_vm0, %v16743_v12  ;;  %13595 = vmatprep.mubr.msk.f32.mxu0 %vm393_vm0, %v16745_v13  ;;  %v16899_v12 = vld [vmem:[#allocation2 + $0xcf] sm:$0xff] }
 0x102   : > { %19596 = vst [vmem:[#allocation45_spill] sm:$0xff] %v16899_v12 }
 0x104   : > { %13373 = vmatmul.mubr.msk.f32.gmra.mrb[26].mxu1 %vm393_vm0, %v16755_v14  ;;  %13596 = vmatmul.mubr.msk.f32.gmra.mrb[8].mxu0 %vm393_vm0, %v16757_v15  ;;  %v16889_v14 = vld [vmem:[#allocation2 + $0x1c9] sm:$0xff] }
 0x105   : > { %13375 = vmatprep.mubr.msk.f32.mxu1 %vm393_vm0, %v16759_v16  ;;  %13598 = vmatprep.mubr.msk.f32.mxu0 %vm393_vm0, %v16761_v17  ;;  %v16887_v16 = vld [vmem:[#allocation2 + $0xc7] sm:$0xff] }
 0x106   : > { %19595 = vst [vmem:[#allocation44_spill] sm:$0xff] %v16887_v16 }
 0x108   : > { %13376 = vmatmul.mubr.msk.f32.gmra.mrb[28].mxu1 %vm393_vm0, %v16771_v18  ;;  %13599 = vmatmul.mubr.msk.f32.gmra.mrb[10].mxu0 %vm393_vm0, %v16773_v19  ;;  %v16885_v18 = vld [vmem:[#allocation2 + $0x1b1] sm:$0xff] }
 0x109   : > { %13378 = vmatprep.mubr.msk.f32.mxu1 %vm393_vm0, %v16775_v20  ;;  %13601 = vmatprep.mubr.msk.f32.mxu0 %vm393_vm0, %v16777_v21  ;;  %v16883_v20 = vld [vmem:[#allocation2 + $0xaf] sm:$0xff] }
 0x10a   : > { %19594 = vst [vmem:[#allocation43_spill] sm:$0xff] %v16883_v20 }
 0x10c   : > { %13379 = vmatmul.mubr.msk.f32.gmra.mrb[30].mxu1 %vm393_vm0, %v16787_v22  ;;  %13602 = vmatmul.mubr.msk.f32.gmra.mrb[12].mxu0 %vm393_vm0, %v16789_v23  ;;  %v16873_v22 = vld [vmem:[#allocation2 + $0x1a9] sm:$0xff] }
 0x10d   : > { %13383 = vmatprep.mubr.msk.f32.mxu1 %vm393_vm0, %v500_v24  ;;  %13604 = vmatprep.mubr.msk.f32.mxu0 %vm393_vm0, %v16791_v25  ;;  %v16867_v24 = vld [vmem:[#allocation2 + $0x8f] sm:$0xff] }
 0x10e   : > { %19592 = vst [vmem:[#allocation41_spill] sm:$0xff] %v16867_v24 }
 0x110   : > { %13384 = vmatmul.mubr.msk.f32.vlgmr.msra.gmra.mrb[0].mxu1 %vm393_vm0, %v501_v26  ;;  %13605 = vmatmul.mubr.msk.f32.gmra.mrb[14].mxu0 %vm393_vm0, %v16800_v27  ;;  %v16869_v26 = vld [vmem:[#allocation2 + $0x191] sm:$0xff] }
 0x111   : > { %13386 = vmatprep.mubr.msk.f32.mxu1 %vm393_vm0, %v16802_v28  ;;  %13607 = vmatprep.mubr.msk.f32.mxu0 %vm393_vm0, %v16804_v29  ;;  %v16935_v28 = vld [vmem:[#allocation2 + $0x127] sm:$0xff] }
 0x112   : > { %13432 = vmatpush3.msk.msra.mxu1 %vm663_vm2, %v16631_v49  ;;  %v16853_v49 = vld [vmem:[#allocation2 + $0x171] sm:$0xff] }
 0x113   : > { %13481 = vmatprep.subr.msk.mxu1 %vm663_vm2, %v16809_v30 }
 0x114   : > { %13387 = vmatmul.mubr.msk.f32.gmra.mrb[2].mxu1 %vm393_vm0, %v16815_v32  ;;  %13608 = vmatmul.mubr.msk.f32.gmra.mrb[16].mxu0 %vm393_vm0, %v16817_v37  ;;  %v16931_v32 = vld [vmem:[#allocation2 + $0x10f] sm:$0xff] }
 0x115   : > { %13389 = vmatprep.mubr.msk.f32.mxu1 %vm393_vm0, %v16821_v38  ;;  %13610 = vmatprep.mubr.msk.f32.mxu0 %vm393_vm0, %v16823_v40 }
 0x118   : > { %13390 = vmatmul.mubr.msk.f32.gmra.mrb[4].mxu1 %vm393_vm0, %v16835_v42  ;;  %13611 = vmatmul.mubr.msk.f32.gmra.mrb[18].mxu0 %vm393_vm0, %v16837_v43 }
 0x119   : > { %13392 = vmatprep.mubr.msk.f32.mxu1 %vm393_vm0, %v16839_v44  ;;  %13613 = vmatprep.mubr.msk.f32.mxu0 %vm393_vm0, %v16841_v45 }
 0x11c   : > { %13393 = vmatmul.mubr.msk.f32.gmra.mrb[6].mxu1 %vm393_vm0, %v16851_v46  ;;  %13614 = vmatmul.mubr.msk.f32.gmra.mrb[20].mxu0 %vm393_vm0, %v16853_v49 }
 0x11d   : > { %13395 = vmatprep.mubr.msk.f32.mxu1 %vm393_vm0, %v16855_v57  ;;  %13616 = vmatprep.mubr.msk.f32.mxu0 %vm393_vm0, %v16857_v58 }
 0x120   : > { %13396 = vmatmul.mubr.msk.f32.gmra.mrb[8].mxu1 %vm393_vm0, %v16867_v24  ;;  %13617 = vmatmul.mubr.msk.f32.gmra.mrb[22].mxu0 %vm393_vm0, %v16869_v26 }
 0x121   : > { %13398 = vmatprep.mubr.msk.f32.mxu1 %vm393_vm0, %v16871_v0  ;;  %13619 = vmatprep.mubr.msk.f32.mxu0 %vm393_vm0, %v16873_v22 }
 0x124   : > { %13399 = vmatmul.mubr.msk.f32.gmra.mrb[10].mxu1 %vm393_vm0, %v16883_v20  ;;  %13620 = vmatmul.mubr.msk.f32.gmra.mrb[24].mxu0 %vm393_vm0, %v16885_v18 }
 0x125   : > { %13401 = vmatprep.mubr.msk.f32.mxu1 %vm393_vm0, %v16887_v16  ;;  %13622 = vmatprep.mubr.msk.f32.mxu0 %vm393_vm0, %v16889_v14 }
 0x128   : > { %13402 = vmatmul.mubr.msk.f32.gmra.mrb[12].mxu1 %vm393_vm0, %v16899_v12  ;;  %13623 = vmatmul.mubr.msk.f32.gmra.mrb[26].mxu0 %vm393_vm0, %v16901_v10 }
 0x129   : > { %13404 = vmatprep.mubr.msk.f32.mxu1 %vm393_vm0, %v16903_v8  ;;  %13625 = vmatprep.mubr.msk.f32.mxu0 %vm393_vm0, %v16905_v6 }
 0x12c   : > { %13405 = vmatmul.mubr.msk.f32.gmra.mrb[14].mxu1 %vm393_vm0, %v16915_v4  ;;  %13626 = vmatmul.mubr.msk.f32.gmra.mrb[28].mxu0 %vm393_vm0, %v16917_v1  ;;  %v16949_v1 = vld [vmem:[#allocation5 + $0x20] sm:$0xf] }
 0x12d   : > { %13407 = vmatprep.mubr.msk.f32.mxu1 %vm393_vm0, %v16919_v61  ;;  %13628 = vmatprep.mubr.msk.f32.mxu0 %vm393_vm0, %v16921_v59  ;;  %v16947_v59 = vld [vmem:[#allocation2 + $0x147] sm:$0xff] }
 0x130   : > { %13408 = vmatmul.mubr.msk.f32.gmra.mrb[16].mxu1 %vm393_vm0, %v16931_v32  ;;  %13629 = vmatmul.mubr.msk.f32.gmra.mrb[30].mxu0 %vm393_vm0, %v16933_v55  ;;  %v16959_v55 = vld [vmem:[#allocation2 + $0x14f] sm:$0xff] }
 0x131   : > { %13410 = vmatprep.mubr.msk.f32.mxu1 %vm393_vm0, %v16935_v28  ;;  %13633 = vmatprep.mubr.msk.f32.mxu0 %vm393_vm0, %v16821_v38  ;;  %v16963_v38 = vld [vmem:[#allocation2 + $0x167] sm:$0xff] }
 0x134   : > { %13411 = vmatmul.mubr.msk.f32.gmra.mrb[18].mxu1 %vm393_vm0, %v16945_v54  ;;  %13634 = vmatmul.mubr.msk.f32.vlgmr.msra.gmra.mrb[0].mxu0 %vm393_vm0, %v16835_v42  ;;  %v16989_v42 = vld [vmem:[#allocation2 + $0x1a7] sm:$0xff] }
 0x135   : > { %13682 = vmatpush3.msk.msra.mxu0 %vm663_vm2, %v16693_v63  ;;  %13413 = vmatprep.mubr.msk.f32.mxu1 %vm393_vm0, %v16947_v59  ;;  %v16975_v63 = vld [vmem:[#allocation2 + $0x16f] sm:$0xff] }
 0x136   : > { %13636 = vmatprep.mubr.msk.f32.mxu0 %vm393_vm0, %v16839_v44  ;;  %13731 = vmatprep.subr.msk.mxu0 %vm663_vm2, %v16949_v1  ;;  %v16977_v44 = vld [vmem:[#allocation2 + $0x187] sm:$0xff] }
 0x138   : > { %13414 = vmatmul.mubr.msk.f32.gmra.mrb[20].mxu1 %vm393_vm0, %v16959_v55  ;;  %13637 = vmatmul.mubr.msk.f32.gmra.mrb[2].mxu0 %vm393_vm0, %v16851_v46  ;;  %v16987_v46 = vld [vmem:[#allocation2 + $0x18f] sm:$0xff] }
 0x139   : > { %13416 = vmatprep.mubr.msk.f32.mxu1 %vm393_vm0, %v16963_v38  ;;  %13639 = vmatprep.mubr.msk.f32.mxu0 %vm393_vm0, %v16855_v57  ;;  %v17001_v57 = vld [vmem:[#allocation2 + $0x1c7] sm:$0xff] }
 0x13c   : > { %13417 = vmatmul.mubr.msk.f32.gmra.mrb[22].mxu1 %vm393_vm0, %v16975_v63  ;;  %13640 = vmatmul.mubr.msk.f32.gmra.mrb[4].mxu0 %vm393_vm0, %v16867_v24  ;;  %v16999_v24 = vld [vmem:[#allocation2 + $0x1af] sm:$0xff] }
 0x13d   : > { %13419 = vmatprep.mubr.msk.f32.mxu1 %vm393_vm0, %v16977_v44  ;;  %13642 = vmatprep.mubr.msk.f32.mxu0 %vm393_vm0, %v16871_v0  ;;  %v17013_v0 = vld [vmem:[#allocation2 + $0x1e7] sm:$0xff] }
 0x140   : > { %13420 = vmatmul.mubr.msk.f32.gmra.mrb[24].mxu1 %vm393_vm0, %v16987_v46  ;;  %13643 = vmatmul.mubr.msk.f32.gmra.mrb[6].mxu0 %vm393_vm0, %v16883_v20  ;;  %v17011_v20 = vld [vmem:[#allocation2 + $0x1cf] sm:$0xff] }
 0x141   : > { %13422 = vmatprep.mubr.msk.f32.mxu1 %vm393_vm0, %v16989_v42  ;;  %13645 = vmatprep.mubr.msk.f32.mxu0 %vm393_vm0, %v16887_v16  ;;  %v1216_v16 = vld [vmem:[#allocation2 + $0x9] sm:$0xff] }
 0x144   : > { %13423 = vmatmul.mubr.msk.f32.gmra.mrb[26].mxu1 %vm393_vm0, %v16999_v24  ;;  %13646 = vmatmul.mubr.msk.f32.gmra.mrb[8].mxu0 %vm393_vm0, %v16899_v12  ;;  %v17023_v12 = vld [vmem:[#allocation2 + $0x1ef] sm:$0xff] }
 0x145   : > { %13425 = vmatprep.mubr.msk.f32.mxu1 %vm393_vm0, %v17001_v57  ;;  %13648 = vmatprep.mubr.msk.f32.mxu0 %vm393_vm0, %v16903_v8 }
 0x148   : > { %13426 = vmatmul.mubr.msk.f32.gmra.mrb[28].mxu1 %vm393_vm0, %v17011_v20  ;;  %13649 = vmatmul.mubr.msk.f32.gmra.mrb[10].mxu0 %vm393_vm0, %v16915_v4  ;;  %v1217_v4 = vld [vmem:[#allocation2 + $0x11] sm:$0xff] }
 0x149   : > { %13428 = vmatprep.mubr.msk.f32.mxu1 %vm393_vm0, %v17013_v0  ;;  %13651 = vmatprep.mubr.msk.f32.mxu0 %vm393_vm0, %v16919_v61 }
 0x14c   : > { %13429 = vmatmul.mubr.msk.f32.gmra.mrb[30].mxu1 %vm393_vm0, %v17023_v12  ;;  %13652 = vmatmul.mubr.msk.f32.gmra.mrb[12].mxu0 %vm393_vm0, %v16931_v32 }
 0x14d   : > { %13433 = vmatprep.mubr.msk.f32.mxu1 %vm393_vm0, %v1216_v16  ;;  %13654 = vmatprep.mubr.msk.f32.mxu0 %vm393_vm0, %v16935_v28  ;;  %v2808_v16 = vld [vmem:[#allocation2 + $0x22f] sm:$0xff] }
 0x150   : > { %13434 = vmatmul.mubr.msk.f32.vlgmr.msra.gmra.mrb[0].mxu1 %vm393_vm0, %v1217_v4  ;;  %13655 = vmatmul.mubr.msk.f32.gmra.mrb[14].mxu0 %vm393_vm0, %v16945_v54  ;;  %v2807_v4 = vld [vmem:[#allocation2 + $0x227] sm:$0xff] }
 0x151   : > { %13436 = vmatprep.mubr.msk.f32.mxu1 %vm393_vm0, %v16671_v56  ;;  %13657 = vmatprep.mubr.msk.f32.mxu0 %vm393_vm0, %v16947_v59  ;;  %v17083_v56 = vld [vmem:[#allocation2 + $0x207] sm:$0xff] }
 0x152   : > { %13482 = vmatpush3.msk.msra.mxu1 %vm663_vm2, %v16809_v30  ;;  %v19615_v30 = vld [vmem:[#allocation40_spill] sm:$0xff] }
 0x153   : > { %15077 = vmatprep.subr.msk.mxu1 %vm663_vm2, %v16503_v2 }
 0x154   : > { %13437 = vmatmul.mubr.msk.f32.gmra.mrb[2].mxu1 %vm393_vm0, %v16687_v60  ;;  %13658 = vmatmul.mubr.msk.f32.gmra.mrb[16].mxu0 %vm393_vm0, %v16959_v55  ;;  %v17093_v60 = vld [vmem:[#allocation2 + $0x20f] sm:$0xff] }
 0x155   : > { %13439 = vmatprep.mubr.msk.f32.mxu1 %vm393_vm0, %v16691_v62  ;;  %13660 = vmatprep.mubr.msk.f32.mxu0 %vm393_vm0, %v16963_v38 }
 0x158   : > { %13440 = vmatmul.mubr.msk.f32.gmra.mrb[4].mxu1 %vm393_vm0, %v16705_v3  ;;  %13661 = vmatmul.mubr.msk.f32.gmra.mrb[18].mxu0 %vm393_vm0, %v16975_v63 }
 0x159   : > { %13442 = vmatprep.mubr.msk.f32.mxu1 %vm393_vm0, %v16711_v5  ;;  %13663 = vmatprep.mubr.msk.f32.mxu0 %vm393_vm0, %v16977_v44 }
 0x15c   : > { %13443 = vmatmul.mubr.msk.f32.gmra.mrb[6].mxu1 %vm393_vm0, %v16725_v7  ;;  %13664 = vmatmul.mubr.msk.f32.gmra.mrb[20].mxu0 %vm393_vm0, %v16987_v46 }
 0x15d   : > { %13445 = vmatprep.mubr.msk.f32.mxu1 %vm393_vm0, %v16729_v9  ;;  %13666 = vmatprep.mubr.msk.f32.mxu0 %vm393_vm0, %v16989_v42 }
 0x160   : > { %13446 = vmatmul.mubr.msk.f32.gmra.mrb[8].mxu1 %vm393_vm0, %v16741_v11  ;;  %13667 = vmatmul.mubr.msk.f32.gmra.mrb[22].mxu0 %vm393_vm0, %v16999_v24 }
 0x161   : > { %13448 = vmatprep.mubr.msk.f32.mxu1 %vm393_vm0, %v16745_v13  ;;  %13669 = vmatprep.mubr.msk.f32.mxu0 %vm393_vm0, %v17001_v57 }
 0x164   : > { %13449 = vmatmul.mubr.msk.f32.gmra.mrb[10].mxu1 %vm393_vm0, %v16757_v15  ;;  %13670 = vmatmul.mubr.msk.f32.gmra.mrb[24].mxu0 %vm393_vm0, %v17011_v20 }
 0x165   : > { %13451 = vmatprep.mubr.msk.f32.mxu1 %vm393_vm0, %v16761_v17  ;;  %13672 = vmatprep.mubr.msk.f32.mxu0 %vm393_vm0, %v17013_v0 }
 0x168   : > { %13452 = vmatmul.mubr.msk.f32.gmra.mrb[12].mxu1 %vm393_vm0, %v16773_v19  ;;  %13673 = vmatmul.mubr.msk.f32.gmra.mrb[26].mxu0 %vm393_vm0, %v17023_v12 }
 0x169   : > { %13454 = vmatprep.mubr.msk.f32.mxu1 %vm393_vm0, %v16777_v21  ;;  %13675 = vmatprep.mubr.msk.f32.mxu0 %vm393_vm0, %v17083_v56 }
 0x16c   : > { %13455 = vmatmul.mubr.msk.f32.gmra.mrb[14].mxu1 %vm393_vm0, %v16789_v23  ;;  %13676 = vmatmul.mubr.msk.f32.gmra.mrb[28].mxu0 %vm393_vm0, %v17093_v60 }
 0x16d   : > { %13457 = vmatprep.mubr.msk.f32.mxu1 %vm393_vm0, %v16791_v25  ;;  %13678 = vmatprep.mubr.msk.f32.mxu0 %vm393_vm0, %v2807_v4  ;;  %v19617_v4 = vld [vmem:[#allocation41_spill] sm:$0xff] }
 0x170   : > { %13458 = vmatmul.mubr.msk.f32.gmra.mrb[16].mxu1 %vm393_vm0, %v16800_v27  ;;  %13679 = vmatmul.mubr.msk.f32.gmra.mrb[30].mxu0 %vm393_vm0, %v2808_v16  ;;  %v19618_v16 = vld [vmem:[#allocation27_spill] sm:$0xff] }
 0x171   : > { %13460 = vmatprep.mubr.msk.f32.mxu1 %vm393_vm0, %v16804_v29  ;;  %13683 = vmatprep.mubr.msk.f32.mxu0 %vm393_vm0, %v16559_v31  ;;  %v19601_v31 = vld [vmem:[#allocation47_spill] sm:$0xff] }
 0x174   : > { %13461 = vmatmul.mubr.msk.f32.gmra.mrb[18].mxu1 %vm393_vm0, %v16817_v37  ;;  %13684 = vmatmul.mubr.msk.f32.vlgmr.msra.gmra.mrb[0].mxu0 %vm393_vm0, %v16571_v33  ;;  %v19602_v33 = vld [vmem:[#allocation19_spill] sm:$0xff] }
 0x175   : > { %13732 = vmatpush3.msk.msra.mxu0 %vm663_vm2, %v16949_v1  ;;  %13463 = vmatprep.mubr.msk.f32.mxu1 %vm393_vm0, %v16823_v40  ;;  %v19614_v1 = vld [vmem:[#allocation25_spill] sm:$0xff] }
 0x176   : > { %13686 = vmatprep.mubr.msk.f32.mxu0 %vm393_vm0, %v16575_v34  ;;  %v19603_v34 = vld [vmem:[#allocation34_spill] sm:$0xff] }
 0x178   : > { %13464 = vmatmul.mubr.msk.f32.gmra.mrb[20].mxu1 %vm393_vm0, %v16837_v43  ;;  %13687 = vmatmul.mubr.msk.f32.gmra.mrb[2].mxu0 %vm393_vm0, %v16587_v35  ;;  %v19604_v35 = vld [vmem:[#allocation20_spill] sm:$0xff] }
 0x179   : > { %13466 = vmatprep.mubr.msk.f32.mxu1 %vm393_vm0, %v16841_v45  ;;  %13689 = vmatprep.mubr.msk.f32.mxu0 %vm393_vm0, %v16589_v36  ;;  %v19605_v36 = vld [vmem:[#allocation35_spill] sm:$0xff] }
 0x17c   : > { %13467 = vmatmul.mubr.msk.f32.gmra.mrb[22].mxu1 %vm393_vm0, %v16853_v49  ;;  %13690 = vmatmul.mubr.msk.f32.gmra.mrb[4].mxu0 %vm393_vm0, %v16601_v39  ;;  %v19606_v39 = vld [vmem:[#allocation21_spill] sm:$0xff] }
 0x17d   : > { %13469 = vmatprep.mubr.msk.f32.mxu1 %vm393_vm0, %v16857_v58  ;;  %13692 = vmatprep.mubr.msk.f32.mxu0 %vm393_vm0, %v16606_v41  ;;  %v19607_v41 = vld [vmem:[#allocation36_spill] sm:$0xff] }
 0x180   : > { %13470 = vmatmul.mubr.msk.f32.gmra.mrb[24].mxu1 %vm393_vm0, %v16869_v26  ;;  %13693 = vmatmul.mubr.msk.f32.gmra.mrb[6].mxu0 %vm393_vm0, %v16625_v47  ;;  %v19608_v47 = vld [vmem:[#allocation22_spill] sm:$0xff] }
 0x181   : > { %13472 = vmatprep.mubr.msk.f32.mxu1 %vm393_vm0, %v16873_v22  ;;  %13695 = vmatprep.mubr.msk.f32.mxu0 %vm393_vm0, %v16629_v48  ;;  %v19609_v48 = vld [vmem:[#allocation37_spill] sm:$0xff] }
 0x184   : > { %13473 = vmatmul.mubr.msk.f32.gmra.mrb[26].mxu1 %vm393_vm0, %v16885_v18  ;;  %13696 = vmatmul.mubr.msk.f32.gmra.mrb[8].mxu0 %vm393_vm0, %v16641_v50  ;;  %v19610_v50 = vld [vmem:[#allocation23_spill] sm:$0xff] }
 0x185   : > { %13475 = vmatprep.mubr.msk.f32.mxu1 %vm393_vm0, %v16889_v14  ;;  %13698 = vmatprep.mubr.msk.f32.mxu0 %vm393_vm0, %v16643_v51  ;;  %v19611_v51 = vld [vmem:[#allocation38_spill] sm:$0xff] }
 0x188   : > { %13476 = vmatmul.mubr.msk.f32.gmra.mrb[28].mxu1 %vm393_vm0, %v16901_v10  ;;  %13699 = vmatmul.mubr.msk.f32.gmra.mrb[10].mxu0 %vm393_vm0, %v16655_v52  ;;  %v19612_v52 = vld [vmem:[#allocation24_spill] sm:$0xff] }
 0x189   : > { %13478 = vmatprep.mubr.msk.f32.mxu1 %vm393_vm0, %v16905_v6  ;;  %13701 = vmatprep.mubr.msk.f32.mxu0 %vm393_vm0, %v16657_v53  ;;  %v19613_v53 = vld [vmem:[#allocation39_spill] sm:$0xff] }
 0x18c   : > { %13479 = vmatmul.mubr.msk.f32.gmra.mrb[30].mxu1 %vm393_vm0, %v19601_v31  ;;  %13702 = vmatmul.mubr.msk.f32.gmra.mrb[12].mxu0 %vm393_vm0, %v19602_v33  ;;  %v19619_v33 = vld [vmem:[#allocation42_spill] sm:$0xff] }
 0x18d   : > { %13483 = vmatprep.mubr.msk.f32.mxu1 %vm393_vm0, %v19603_v34  ;;  %13704 = vmatprep.mubr.msk.f32.mxu0 %vm393_vm0, %v19604_v35  ;;  %v19620_v34 = vld [vmem:[#allocation28_spill] sm:$0xff] }
 0x190   : > { %13484 = vmatmul.mubr.msk.f32.vlgmr.msra.gmra.mrb[0].mxu1 %vm393_vm0, %v19605_v36  ;;  %13705 = vmatmul.mubr.msk.f32.gmra.mrb[14].mxu0 %vm393_vm0, %v19606_v39  ;;  %v19621_v36 = vld [vmem:[#allocation43_spill] sm:$0xff] }
 0x191   : > { %13486 = vmatprep.mubr.msk.f32.mxu1 %vm393_vm0, %v19607_v41  ;;  %13707 = vmatprep.mubr.msk.f32.mxu0 %vm393_vm0, %v19608_v47  ;;  %v19622_v41 = vld [vmem:[#allocation29_spill] sm:$0xff] }
 0x192   : > { %15078 = vmatpush3.msk.msra.mxu1 %vm663_vm2, %v16503_v2  ;;  %v19616_v2 = vld [vmem:[#allocation26_spill] sm:$0xff] }
 0x194   : > { %13487 = vmatmul.mubr.msk.f32.gmra.mrb[2].mxu1 %vm393_vm0, %v19609_v48  ;;  %13708 = vmatmul.mubr.msk.f32.gmra.mrb[16].mxu0 %vm393_vm0, %v19610_v50  ;;  %v19623_v48 = vld [vmem:[#allocation44_spill] sm:$0xff] }
 0x195   : > { %13489 = vmatprep.mubr.msk.f32.mxu1 %vm393_vm0, %v19611_v51  ;;  %13710 = vmatprep.mubr.msk.f32.mxu0 %vm393_vm0, %v19612_v52  ;;  %v19624_v51 = vld [vmem:[#allocation30_spill] sm:$0xff] }
 0x198   : > { %13490 = vmatmul.mubr.msk.f32.gmra.mrb[4].mxu1 %vm393_vm0, %v19613_v53  ;;  %13711 = vmatmul.mubr.msk.f32.gmra.mrb[18].mxu0 %vm393_vm0, %v19614_v1  ;;  %v19625_v53 = vld [vmem:[#allocation45_spill] sm:$0xff] }
 0x199   : > { %13492 = vmatprep.mubr.msk.f32.mxu1 %vm393_vm0, %v19615_v30  ;;  %13713 = vmatprep.mubr.msk.f32.mxu0 %vm393_vm0, %v19616_v2  ;;  %v19626_v30 = vld [vmem:[#allocation31_spill] sm:$0xff] }
 0x19c   : > { %13493 = vmatmul.mubr.msk.f32.gmra.mrb[6].mxu1 %vm393_vm0, %v19617_v4  ;;  %13714 = vmatmul.mubr.msk.f32.gmra.mrb[20].mxu0 %vm393_vm0, %v19618_v16  ;;  %v19627_v4 = vld [vmem:[#allocation32_spill] sm:$0xff] }
 0x19d   : > { %13495 = vmatprep.mubr.msk.f32.mxu1 %vm393_vm0, %v19619_v33  ;;  %13716 = vmatprep.mubr.msk.f32.mxu0 %vm393_vm0, %v19620_v34  ;;  %v17217_v33 = vld [vmem:[#allocation2 + $0x208] sm:$0xff] }
 0x1a0   : > { %13496 = vmatmul.mubr.msk.f32.gmra.mrb[8].mxu1 %vm393_vm0, %v19621_v36  ;;  %13717 = vmatmul.mubr.msk.f32.gmra.mrb[22].mxu0 %vm393_vm0, %v19622_v41  ;;  %v19628_v36 = vld [vmem:[#allocation46_spill] sm:$0xff] }
 0x1a1   : > { %13498 = vmatprep.mubr.msk.f32.mxu1 %vm393_vm0, %v19623_v48  ;;  %13719 = vmatprep.mubr.msk.f32.mxu0 %vm393_vm0, %v19624_v51  ;;  %v19629_v48 = vld [vmem:[#allocation33_spill] sm:$0xff] }
 0x1a4   : > { %13499 = vmatmul.mubr.msk.f32.gmra.mrb[10].mxu1 %vm393_vm0, %v19625_v53  ;;  %13720 = vmatmul.mubr.msk.f32.gmra.mrb[24].mxu0 %vm393_vm0, %v19626_v30  ;;  %v17227_v53 = vld [vmem:[#allocation2 + $0x210] sm:$0xff] }
 0x1a5   : > { %13501 = vmatprep.mubr.msk.f32.mxu1 %vm393_vm0, %v16903_v8  ;;  %13722 = vmatprep.mubr.msk.f32.mxu0 %vm393_vm0, %v19627_v4  ;;  %v3197_v8 = vld [vmem:[#allocation2 + $0x228] sm:$0xff] }
 0x1a8   : > { %13502 = vmatmul.mubr.msk.f32.gmra.mrb[12].mxu1 %vm393_vm0, %v19628_v36  ;;  %13723 = vmatmul.mubr.msk.f32.gmra.mrb[26].mxu0 %vm393_vm0, %v19629_v48  ;;  %v3198_v36 = vld [vmem:[#allocation2 + $0x230] sm:$0xff] }
 0x1a9   : > { %13504 = vmatprep.mubr.msk.f32.mxu1 %vm393_vm0, %v16919_v61  ;;  %13725 = vmatprep.mubr.msk.f32.mxu0 %vm393_vm0, %v17217_v33  ;;  %v4194_v61 = vld [vmem:[#allocation9 + $0x20] sm:$0xff] }
 0x1ac   : > { %13505 = vmatmul.mubr.msk.f32.gmra.mrb[14].mxu1 %vm393_vm0, %v16931_v32  ;;  %13726 = vmatmul.mubr.msk.f32.gmra.mrb[28].mxu0 %vm393_vm0, %v17227_v53 }
 0x1ad   : > { %13507 = vmatprep.mubr.msk.f32.mxu1 %vm393_vm0, %v16935_v28  ;;  %13728 = vmatprep.mubr.msk.f32.mxu0 %vm393_vm0, %v3197_v8 }
 0x1b0   : > { %13508 = vmatmul.mubr.msk.f32.gmra.mrb[16].mxu1 %vm393_vm0, %v16945_v54  ;;  %13729 = vmatmul.mubr.msk.f32.gmra.mrb[30].mxu0 %vm393_vm0, %v3198_v36  ;;  %v3587_v54 = vld [vmem:[#allocation2 + $0x229] sm:$0xff] }
 0x1b1   : > { %13510 = vmatprep.mubr.msk.f32.mxu1 %vm393_vm0, %v16947_v59  ;;  %13733 = vmatprep.mubr.msk.f32.mxu0 %vm393_vm0, %v16691_v62  ;;  %v3588_v59 = vld [vmem:[#allocation2 + $0x231] sm:$0xff] }
 0x1b2   : > { %v4195_v62 = vld [vmem:[#allocation9 + $0x28] sm:$0xff] }
 0x1b4   : > { %13511 = vmatmul.mubr.msk.f32.gmra.mrb[18].mxu1 %vm393_vm0, %v16959_v55  ;;  %13734 = vmatmul.mubr.msk.f32.vlgmr.msra.gmra.mrb[0].mxu0 %vm393_vm0, %v16705_v3  ;;  %v19631_v55 = vld [vmem:[#allocation49_spill] sm:$0xff]  ;;  %v14861_v3 = vpack.c.bf16 %v4195_v62, %v4194_v61 }
 0x1b5   : > { %13513 = vmatprep.mubr.msk.f32.mxu1 %vm393_vm0, %v16963_v38  ;;  %13736 = vmatprep.mubr.msk.f32.mxu0 %vm393_vm0, %v16711_v5  ;;  %v4196_v5 = vld [vmem:[#allocation9 + $0x30] sm:$0xff] }
 0x1b6   : > { %14862 = vmatprep.subr.bf16.mxu1 %v14861_v3 }
 0x1b8   : > { %13514 = vmatmul.mubr.msk.f32.gmra.mrb[20].mxu1 %vm393_vm0, %v16975_v63  ;;  %13737 = vmatmul.mubr.msk.f32.gmra.mrb[2].mxu0 %vm393_vm0, %v16725_v7 }
 0x1b9   : > { %13516 = vmatprep.mubr.msk.f32.mxu1 %vm393_vm0, %v16977_v44  ;;  %13739 = vmatprep.mubr.msk.f32.mxu0 %vm393_vm0, %v16729_v9  ;;  %v19632_v9 = vmov 0.0  }
 0x1ba   : > { %4026 = vst.msk [vmem:[#allocation3 + $0x30] sm:$0xff] %vm4018_vm3, %v19632_v9  ;;  %4019 = vst.msk [vmem:[#allocation3] sm:$0xff] %vm4018_vm3, %v19632_v9 }
 0x1bb   : > { %4020 = vst.msk [vmem:[#allocation3 + $0x8] sm:$0xff] %vm4018_vm3, %v19632_v9  ;;  %4021 = vst.msk [vmem:[#allocation3 + $0x10] sm:$0xff] %vm4018_vm3, %v19632_v9 }
 0x1bc   : > { %13517 = vmatmul.mubr.msk.f32.gmra.mrb[22].mxu1 %vm393_vm0, %v16987_v46  ;;  %13740 = vmatmul.mubr.msk.f32.gmra.mrb[4].mxu0 %vm393_vm0, %v16741_v11  ;;  %4024 = vst.msk [vmem:[#allocation3 + $0x20] sm:$0xff] %vm4018_vm3, %v19632_v9  ;;  %4025 = vst.msk [vmem:[#allocation3 + $0x28] sm:$0xff] %vm4018_vm3, %v19632_v9 }
 0x1bd   : > { %13519 = vmatprep.mubr.msk.f32.mxu1 %vm393_vm0, %v16989_v42  ;;  %13742 = vmatprep.mubr.msk.f32.mxu0 %vm393_vm0, %v16745_v13  ;;  %4028 = vst.msk [vmem:[#allocation3 + $0x40] sm:$0xff] %vm4018_vm3, %v19632_v9  ;;  %4029 = vst.msk [vmem:[#allocation3 + $0x48] sm:$0xff] %vm4018_vm3, %v19632_v9  ;;  %v4158_v13 = vld [vmem:[#allocation9 + $0x8] sm:$0xff] }
 0x1be   : > { %4030 = vst.msk [vmem:[#allocation3 + $0x50] sm:$0xff] %vm4018_vm3, %v19632_v9  ;;  %4032 = vst.msk [vmem:[#allocation3 + $0x60] sm:$0xff] %vm4018_vm3, %v19632_v9 }
 0x1bf   : > { %4033 = vst.msk [vmem:[#allocation3 + $0x68] sm:$0xff] %vm4018_vm3, %v19632_v9  ;;  %4034 = vst.msk [vmem:[#allocation3 + $0x70] sm:$0xff] %vm4018_vm3, %v19632_v9 }
 0x1c0   : > { %13520 = vmatmul.mubr.msk.f32.gmra.mrb[24].mxu1 %vm393_vm0, %v16999_v24  ;;  %13743 = vmatmul.mubr.msk.f32.gmra.mrb[6].mxu0 %vm393_vm0, %v16757_v15  ;;  %4036 = vst.msk [vmem:[#allocation3 + $0x80] sm:$0xff] %vm4018_vm3, %v19632_v9  ;;  %4037 = vst.msk [vmem:[#allocation3 + $0x88] sm:$0xff] %vm4018_vm3, %v19632_v9  ;;  %v4159_v15 = vld [vmem:[#allocation9 + $0x10] sm:$0xff] }
 0x1c1   : > { %13522 = vmatprep.mubr.msk.f32.mxu1 %vm393_vm0, %v17001_v57  ;;  %13745 = vmatprep.mubr.msk.f32.mxu0 %vm393_vm0, %v16761_v17  ;;  %4038 = vst.msk [vmem:[#allocation3 + $0x90] sm:$0xff] %vm4018_vm3, %v19632_v9  ;;  %4040 = vst.msk [vmem:[#allocation3 + $0xa0] sm:$0xff] %vm4018_vm3, %v19632_v9  ;;  %v4160_v17 = vld [vmem:[#allocation9 + $0x18] sm:$0xff] }
 0x1c2   : > { %4041 = vst.msk [vmem:[#allocation3 + $0xa8] sm:$0xff] %vm4018_vm3, %v19632_v9  ;;  %4042 = vst.msk [vmem:[#allocation3 + $0xb0] sm:$0xff] %vm4018_vm3, %v19632_v9  ;;  %v4162_v11 = vld [vmem:[#allocation3 + $0x10] sm:$0xff] }
 0x1c3   : > { %4044 = vst.msk [vmem:[#allocation3 + $0xc0] sm:$0xff] %vm4018_vm3, %v19632_v9  ;;  %4045 = vst.msk [vmem:[#allocation3 + $0xc8] sm:$0xff] %vm4018_vm3, %v19632_v9 }
 0x1c4   : > { %13523 = vmatmul.mubr.msk.f32.gmra.mrb[26].mxu1 %vm393_vm0, %v17011_v20  ;;  %13746 = vmatmul.mubr.msk.f32.gmra.mrb[8].mxu0 %vm393_vm0, %v16773_v19  ;;  %4046 = vst.msk [vmem:[#allocation3 + $0xd0] sm:$0xff] %vm4018_vm3, %v19632_v9  ;;  %4048 = vst.msk [vmem:[#allocation3 + $0xe0] sm:$0xff] %vm4018_vm3, %v19632_v9  ;;  %v4873_v19 = vld [vmem:[#allocation9 + $0x40] sm:$0xff]  ;;  %v4874_v20 = vld [vmem:[#allocation9 + $0x48] sm:$0xff] }
 0x1c5   : > { %13525 = vmatprep.mubr.msk.f32.mxu1 %vm393_vm0, %v17013_v0  ;;  %13748 = vmatprep.mubr.msk.f32.mxu0 %vm393_vm0, %v16777_v21  ;;  %v19630_v0 = vld [vmem:[#allocation48_spill] sm:$0xff]  ;;  %4049 = vst.msk [vmem:[#allocation3 + $0xe8] sm:$0xff] %vm4018_vm3, %v19632_v9  ;;  %4050 = vst.msk [vmem:[#allocation3 + $0xf0] sm:$0xff] %vm4018_vm3, %v19632_v9  ;;  %v17507_v21 = vpack.c.bf16 %v4874_v20, %v4873_v19 }
 0x1c6   : > { %4052 = vst.msk [vmem:[#allocation3 + $0x100] sm:$0xff] %vm4018_vm3, %v19632_v9  ;;  %4053 = vst.msk [vmem:[#allocation3 + $0x108] sm:$0xff] %vm4018_vm3, %v19632_v9 }
 0x1c7   : > { %4054 = vst.msk [vmem:[#allocation3 + $0x110] sm:$0xff] %vm4018_vm3, %v19632_v9  ;;  %4056 = vst.msk [vmem:[#allocation3 + $0x120] sm:$0xff] %vm4018_vm3, %v19632_v9 }
 0x1c8   : > { %13526 = vmatmul.mubr.msk.f32.gmra.mrb[28].mxu1 %vm393_vm0, %v17023_v12  ;;  %13749 = vmatmul.mubr.msk.f32.gmra.mrb[10].mxu0 %vm393_vm0, %v16789_v23  ;;  %4057 = vst.msk [vmem:[#allocation3 + $0x128] sm:$0xff] %vm4018_vm3, %v19632_v9  ;;  %4058 = vst.msk [vmem:[#allocation3 + $0x130] sm:$0xff] %vm4018_vm3, %v19632_v9  ;;  %v4157_v12 = vld [vmem:[#allocation9] sm:$0xff] }
 0x1c9   : > { %13528 = vmatprep.mubr.msk.f32.mxu1 %vm393_vm0, %v17083_v56  ;;  %13751 = vmatprep.mubr.msk.f32.mxu0 %vm393_vm0, %v16791_v25  ;;  %4060 = vst.msk [vmem:[#allocation3 + $0x140] sm:$0xff] %vm4018_vm3, %v19632_v9  ;;  %4061 = vst.msk [vmem:[#allocation3 + $0x148] sm:$0xff] %vm4018_vm3, %v19632_v9 }
 0x1ca   : > { %4062 = vst.msk [vmem:[#allocation3 + $0x150] sm:$0xff] %vm4018_vm3, %v19632_v9  ;;  %4064 = vst.msk [vmem:[#allocation3 + $0x160] sm:$0xff] %vm4018_vm3, %v19632_v9 }
 0x1cb   : > { %4065 = vst.msk [vmem:[#allocation3 + $0x168] sm:$0xff] %vm4018_vm3, %v19632_v9  ;;  %4066 = vst.msk [vmem:[#allocation3 + $0x170] sm:$0xff] %vm4018_vm3, %v19632_v9 }
 0x1cc   : > { %13529 = vmatmul.mubr.msk.f32.gmra.mrb[30].mxu1 %vm393_vm0, %v17093_v60  ;;  %13752 = vmatmul.mubr.msk.f32.gmra.mrb[12].mxu0 %vm393_vm0, %v16800_v27  ;;  %4068 = vst.msk [vmem:[#allocation3 + $0x180] sm:$0xff] %vm4018_vm3, %v19632_v9  ;;  %4069 = vst.msk [vmem:[#allocation3 + $0x188] sm:$0xff] %vm4018_vm3, %v19632_v9 }
 0x1cd   : > { %13557 = vmatprep.mubr.msk.f32.mxu1 %vm393_vm0, %v19604_v35  ;;  %13754 = vmatprep.mubr.msk.f32.mxu0 %vm393_vm0, %v16804_v29  ;;  %4070 = vst.msk [vmem:[#allocation3 + $0x190] sm:$0xff] %vm4018_vm3, %v19632_v9  ;;  %4072 = vst.msk [vmem:[#allocation3 + $0x1a0] sm:$0xff] %vm4018_vm3, %v19632_v9 }
 0x1ce   : > { %4073 = vst.msk [vmem:[#allocation3 + $0x1a8] sm:$0xff] %vm4018_vm3, %v19632_v9  ;;  %4074 = vst.msk [vmem:[#allocation3 + $0x1b0] sm:$0xff] %vm4018_vm3, %v19632_v9 }
 0x1cf   : > { %4076 = vst.msk [vmem:[#allocation3 + $0x1c0] sm:$0xff] %vm4018_vm3, %v19632_v9  ;;  %4077 = vst.msk [vmem:[#allocation3 + $0x1c8] sm:$0xff] %vm4018_vm3, %v19632_v9 }
 0x1d0   : > { %13558 = vmatmul.mubr.msk.f32.vlgmr.msra.gmra.mrb[16].mxu1 %vm393_vm0, %v19606_v39  ;;  %13755 = vmatmul.mubr.msk.f32.gmra.mrb[14].mxu0 %vm393_vm0, %v16817_v37  ;;  %4078 = vst.msk [vmem:[#allocation3 + $0x1d0] sm:$0xff] %vm4018_vm3, %v19632_v9  ;;  %4080 = vst.msk [vmem:[#allocation3 + $0x1e0] sm:$0xff] %vm4018_vm3, %v19632_v9 }
 0x1d1   : > { %13560 = vmatprep.mubr.msk.f32.mxu1 %vm393_vm0, %v19608_v47  ;;  %13757 = vmatprep.mubr.msk.f32.mxu0 %vm393_vm0, %v16823_v40  ;;  %4081 = vst.msk [vmem:[#allocation3 + $0x1e8] sm:$0xff] %vm4018_vm3, %v19632_v9  ;;  %4082 = vst.msk [vmem:[#allocation3 + $0x1f0] sm:$0xff] %vm4018_vm3, %v19632_v9 }
 0x1d2   : > { %14864 = vmatpush3.bf16.msra.mxu1 %v14861_v3  ;;  %4084 = vst.msk [vmem:[#allocation3 + $0x200] sm:$0xff] %vm4018_vm3, %v19632_v9  ;;  %4085 = vst.msk [vmem:[#allocation3 + $0x208] sm:$0xff] %vm4018_vm3, %v19632_v9 }
 0x1d3   : > { %4086 = vst.msk [vmem:[#allocation3 + $0x210] sm:$0xff] %vm4018_vm3, %v19632_v9  ;;  %4088 = vst.msk [vmem:[#allocation3 + $0x220] sm:$0xff] %vm4018_vm3, %v19632_v9 }
 0x1d4   : > { %13561 = vmatmul.mubr.msk.f32.gmra.mrb[18].mxu1 %vm393_vm0, %v19610_v50  ;;  %13758 = vmatmul.mubr.msk.f32.gmra.mrb[16].mxu0 %vm393_vm0, %v16837_v43  ;;  %4089 = vst.msk [vmem:[#allocation3 + $0x228] sm:$0xff] %vm4018_vm3, %v19632_v9  ;;  %4090 = vst.msk [vmem:[#allocation3 + $0x230] sm:$0xff] %vm4018_vm3, %v19632_v9 }
 0x1d5   : > { %13563 = vmatprep.mubr.msk.f32.mxu1 %vm393_vm0, %v19612_v52  ;;  %13760 = vmatprep.mubr.msk.f32.mxu0 %vm393_vm0, %v16841_v45  ;;  %4023 = vst.msk [vmem:[#allocation3 + $0x18] sm:$0x1] %vm4022_vm4, %v19632_v9  ;;  %4027 = vst.msk [vmem:[#allocation3 + $0x38] sm:$0x1] %vm4022_vm4, %v19632_v9 }
 0x1d6   : > { %4031 = vst.msk [vmem:[#allocation3 + $0x58] sm:$0x1] %vm4022_vm4, %v19632_v9  ;;  %4035 = vst.msk [vmem:[#allocation3 + $0x78] sm:$0x1] %vm4022_vm4, %v19632_v9 }
 0x1d7   : > { %4039 = vst.msk [vmem:[#allocation3 + $0x98] sm:$0x1] %vm4022_vm4, %v19632_v9  ;;  %4043 = vst.msk [vmem:[#allocation3 + $0xb8] sm:$0x1] %vm4022_vm4, %v19632_v9 }
 0x1d8   : > { %13564 = vmatmul.mubr.msk.f32.gmra.mrb[20].mxu1 %vm393_vm0, %v19614_v1  ;;  %13761 = vmatmul.mubr.msk.f32.gmra.mrb[18].mxu0 %vm393_vm0, %v16853_v49  ;;  %4047 = vst.msk [vmem:[#allocation3 + $0xd8] sm:$0x1] %vm4022_vm4, %v19632_v9  ;;  %4051 = vst.msk [vmem:[#allocation3 + $0xf8] sm:$0x1] %vm4022_vm4, %v19632_v9 }
 0x1d9   : > { %13566 = vmatprep.mubr.msk.f32.mxu1 %vm393_vm0, %v19616_v2  ;;  %13763 = vmatprep.mubr.msk.f32.mxu0 %vm393_vm0, %v16857_v58  ;;  %4055 = vst.msk [vmem:[#allocation3 + $0x118] sm:$0x1] %vm4022_vm4, %v19632_v9  ;;  %4059 = vst.msk [vmem:[#allocation3 + $0x138] sm:$0x1] %vm4022_vm4, %v19632_v9  ;;  %v17520_v58 = vld [vmem:[#allocation7] ss:$0 sm:$0xff] }
 0x1da   : > { %4063 = vst.msk [vmem:[#allocation3 + $0x158] sm:$0x1] %vm4022_vm4, %v19632_v9  ;;  %4067 = vst.msk [vmem:[#allocation3 + $0x178] sm:$0x1] %vm4022_vm4, %v19632_v9 }
 0x1db   : > { %4071 = vst.msk [vmem:[#allocation3 + $0x198] sm:$0x1] %vm4022_vm4, %v19632_v9  ;;  %4075 = vst.msk [vmem:[#allocation3 + $0x1b8] sm:$0x1] %vm4022_vm4, %v19632_v9 }
 0x1dc   : > { %13567 = vmatmul.mubr.msk.f32.gmra.mrb[22].mxu1 %vm393_vm0, %v19618_v16  ;;  %13764 = vmatmul.mubr.msk.f32.gmra.mrb[20].mxu0 %vm393_vm0, %v16869_v26  ;;  %4079 = vst.msk [vmem:[#allocation3 + $0x1d8] sm:$0x1] %vm4022_vm4, %v19632_v9  ;;  %4083 = vst.msk [vmem:[#allocation3 + $0x1f8] sm:$0x1] %vm4022_vm4, %v19632_v9 }
 0x1dd   : > { %13569 = vmatprep.mubr.msk.f32.mxu1 %vm393_vm0, %v19620_v34  ;;  %13766 = vmatprep.mubr.msk.f32.mxu0 %vm393_vm0, %v16873_v22  ;;  %4087 = vst.msk [vmem:[#allocation3 + $0x218] sm:$0x1] %vm4022_vm4, %v19632_v9  ;;  %4091 = vst.msk [vmem:[#allocation3 + $0x238] sm:$0x1] %vm4022_vm4, %v19632_v9  ;;  %v5266_v9 = vld [vmem:[#allocation9 + $0x78] sm:$0xff] }
 0x1e0   : > { %13570 = vmatmul.mubr.msk.f32.gmra.mrb[24].mxu1 %vm393_vm0, %v19622_v41  ;;  %13767 = vmatmul.mubr.msk.f32.gmra.mrb[22].mxu0 %vm393_vm0, %v16885_v18  ;;  %v14873_v18 = vpack.c.bf16 %v4160_v17, %v4159_v15 }
 0x1e1   : > { %13572 = vmatprep.mubr.msk.f32.mxu1 %vm393_vm0, %v19624_v51  ;;  %13769 = vmatprep.mubr.msk.f32.mxu0 %vm393_vm0, %v16889_v14  ;;  %v14869_v14 = vpack.c.bf16 %v4158_v13, %v4157_v12 }
 0x1e4   : > { %13573 = vmatmul.mubr.msk.f32.gmra.mrb[26].mxu1 %vm393_vm0, %v19626_v30  ;;  %13770 = vmatmul.mubr.msk.f32.gmra.mrb[24].mxu0 %vm393_vm0, %v16901_v10  ;;  %v4161_v10 = vld [vmem:[#allocation3 + $0x8] sm:$0xff] }
 0x1e5   : > { %13575 = vmatprep.mubr.msk.f32.mxu1 %vm393_vm0, %v19627_v4  ;;  %13772 = vmatprep.mubr.msk.f32.mxu0 %vm393_vm0, %v16905_v6  ;;  %v4197_v6 = vld [vmem:[#allocation9 + $0x38] sm:$0xff] }
 0x1e6   : > { %v14865_v7 = vpack.c.bf16 %v4197_v6, %v4196_v5 }
 0x1e8   : > { %13576 = vmatmul.mubr.msk.f32.gmra.mrb[28].mxu1 %vm393_vm0, %v19629_v48  ;;  %13773 = vmatmul.mubr.msk.f32.gmra.mrb[26].mxu0 %vm393_vm0, %v19601_v31 }
 0x1e9   : > { %13578 = vmatprep.mubr.msk.f32.mxu1 %vm393_vm0, %v17217_v33  ;;  %13775 = vmatprep.mubr.msk.f32.mxu0 %vm393_vm0, %v19630_v0 }
 0x1ea   : > { %14866 = vmatprep.subr.bf16.mxu1 %v14865_v7 }
 0x1eb   : > { %14868 = vmatpush3.bf16.msra.mxu1 %v14865_v7 }
 0x1ec   : > { %13579 = vmatmul.mubr.msk.f32.gmra.mrb[30].mxu1 %vm393_vm0, %v17227_v53  ;;  %13776 = vmatmul.mubr.msk.f32.gmra.mrb[28].mxu0 %vm393_vm0, %v19631_v55 }
 0x1ed   : > { %13778 = vmatprep.mubr.msk.f32.mxu0 %vm393_vm0, %v3587_v54  ;;  %13789 = vmatprep.mubr.msk.f32.mxu1 %vm4018_vm3, %v4161_v10 }
 0x1ee   : > { %14870 = vmatprep.subr.bf16.mxu1 %v14869_v14 }
 0x1f0   : > { %13779 = vmatmul.mubr.msk.f32.gmra.mrb[30].mxu0 %vm393_vm0, %v3588_v59  ;;  %13790 = vmatmul.mubr.msk.f32.vlgmr.msra.gmra.mrb[32].mxu1 %vm4018_vm3, %v4162_v11 }
 0x1f1   : > { %14872 = vmatpush3.bf16.msra.mxu1 %v14869_v14 }
 0x1f2   : > { %14874 = vmatprep.subr.bf16.mxu1 %v14873_v18 }
 0x1f5   : > { %14876 = vmatpush3.bf16.msra.mxu1 %v14873_v18 }
 0x1f6   : > { %14878 = vmatprep.subr.bf16.mxu1 %v17507_v21 }
 0x263   : > { %v13485_v22 = vpop.f32.mrb[0].mxu1 }
 0x264   : > { %v1805_v23 = vpop.f32.mrb[1].mxu1 }
 0x267   : > { %v13488_v25 = vpop.f32.mrb[2].mxu1 }
 0x268   : > { %v1815_v27 = vpop.f32.mrb[3].mxu1 }
 0x26b   : > { %v13491_v28 = vpop.f32.mrb[4].mxu1 }
 0x26c   : > { %v1825_v29 = vpop.f32.mrb[5].mxu1 }
 0x26f   : > { %v13494_v32 = vpop.f32.mrb[6].mxu1 }
 0x270   : > { %v1835_v37 = vpop.f32.mrb[7].mxu1 }
 0x273   : > { %v13497_v38 = vpop.f32.mrb[8].mxu1 }
 0x274   : > { %v1845_v40 = vpop.f32.mrb[9].mxu1 }
 0x277   : > { %v13500_v42 = vpop.f32.mrb[10].mxu1 }
 0x278   : > { %v17510_v43 = vpop.f32.mrb[11].mxu1 }
 0x27b   : > { %v17512_v44 = vpop.f32.mrb[12].mxu1 }
 0x27c   : > { %v17514_v45 = vpop.f32.mrb[13].mxu1 }
 0x27f   : > { %v17516_v46 = vpop.f32.mrb[14].mxu1 }
 0x280   : > { %v17518_v49 = vpop.f32.mrb[15].mxu1 }
 0x287   : > { %v13735_v57 = vpop.f32.mrb[0].mxu0 }
 0x288   : > { %v15079_v24 = vadd.f32 %v13735_v57, %v13485_v22  ;;  %v3756_v26 = vpop.f32.mrb[1].mxu0 }
 0x289   : > { %v15080_v63 = vadd.f32 %v3756_v26, %v1805_v23 }
 0x28a   : > { %v3955_v56 = vadd.f32 %v15079_v24, %v17520_v58 }
 0x28b   : > { %v3954_v60 = vadd.f32 %v15080_v63, %v17520_v58  ;;  %v13738_v31 = vpop.f32.mrb[2].mxu0 }
 0x28c   : > { %v3987_v35 = vmax.f32 %v3955_v56, 0.0  ;;  %v15081_v39 = vadd.f32 %v13738_v31, %v13488_v25  ;;  %v3766_v47 = vpop.f32.mrb[3].mxu0 }
 0x28d   : > { %v3986_v50 = vmax.f32 %v3954_v60, 0.0  ;;  %v15082_v52 = vadd.f32 %v3766_v47, %v1815_v27 }
 0x28e   : > { %4094 = vst.msk [vmem:[#allocation3 + $0x30] sm:$0xff] %vm4018_vm3, %v3987_v35  ;;  %v3957_v1 = vadd.f32 %v15081_v39, %v17520_v58 }
 0x28f   : > { %4093 = vst.msk [vmem:[#allocation3 + $0x28] sm:$0xff] %vm4018_vm3, %v3986_v50  ;;  %v3956_v2 = vadd.f32 %v15082_v52, %v17520_v58  ;;  %v13741_v16 = vpop.f32.mrb[4].mxu0 }
 0x290   : > { %v3989_v34 = vmax.f32 %v3957_v1, 0.0  ;;  %v15083_v41 = vadd.f32 %v13741_v16, %v13491_v28  ;;  %v3776_v51 = vpop.f32.mrb[5].mxu0 }
 0x291   : > { %v3988_v30 = vmax.f32 %v3956_v2, 0.0  ;;  %v15084_v4 = vadd.f32 %v3776_v51, %v1825_v29 }
 0x292   : > { %4096 = vst.msk [vmem:[#allocation3 + $0x50] sm:$0xff] %vm4018_vm3, %v3989_v34  ;;  %v3959_v33 = vadd.f32 %v15083_v41, %v17520_v58 }
 0x293   : > { %4095 = vst.msk [vmem:[#allocation3 + $0x48] sm:$0xff] %vm4018_vm3, %v3988_v30  ;;  %v3958_v48 = vadd.f32 %v15084_v4, %v17520_v58  ;;  %v13744_v53 = vpop.f32.mrb[6].mxu0 }
 0x294   : > { %v3991_v8 = vmax.f32 %v3959_v33, 0.0  ;;  %v15085_v36 = vadd.f32 %v13744_v53, %v13494_v32  ;;  %v3786_v0 = vpop.f32.mrb[7].mxu0 }
 0x295   : > { %v3990_v54 = vmax.f32 %v3958_v48, 0.0  ;;  %v15086_v55 = vadd.f32 %v3786_v0, %v1835_v37  ;;  %v17540_v5 = vld [vmem:[#allocation3 + $0x30] sm:$0xff] }
 0x296   : > { %4098 = vst.msk [vmem:[#allocation3 + $0x70] sm:$0xff] %vm4018_vm3, %v3991_v8  ;;  %v3961_v59 = vadd.f32 %v15085_v36, %v17520_v58  ;;  %v17534_v61 = vld [vmem:[#allocation3 + $0x28] sm:$0xff] }
 0x297   : > { %4097 = vst.msk [vmem:[#allocation3 + $0x68] sm:$0xff] %vm4018_vm3, %v3990_v54  ;;  %v3960_v62 = vadd.f32 %v15086_v55, %v17520_v58  ;;  %v13747_v3 = vpop.f32.mrb[8].mxu0  ;;  %13792 = vmatprep.mubr.msk.f32.mxu1 %vm4018_vm3, %v17534_v61 }
 0x298   : > { %v3993_v6 = vmax.f32 %v3961_v59, 0.0  ;;  %v15087_v7 = vadd.f32 %v13747_v3, %v13497_v38  ;;  %v3796_v10 = vpop.f32.mrb[9].mxu0  ;;  %13793 = vmatmul.mubr.msk.f32.gmra.mrb[34].mxu1 %vm4018_vm3, %v17540_v5 }
 0x299   : > { %v3992_v11 = vmax.f32 %v3960_v62, 0.0  ;;  %v15088_v12 = vadd.f32 %v3796_v10, %v1845_v40  ;;  %v17552_v18 = vld [vmem:[#allocation3 + $0x50] sm:$0xff] }
 0x29a   : > { %4100 = vst.msk [vmem:[#allocation3 + $0x90] sm:$0xff] %vm4018_vm3, %v3993_v6  ;;  %v3963_v13 = vadd.f32 %v15087_v7, %v17520_v58  ;;  %v17546_v14 = vld [vmem:[#allocation3 + $0x48] sm:$0xff] }
 0x29b   : > { %4099 = vst.msk [vmem:[#allocation3 + $0x88] sm:$0xff] %vm4018_vm3, %v3992_v11  ;;  %v3962_v15 = vadd.f32 %v15088_v12, %v17520_v58  ;;  %v13750_v17 = vpop.f32.mrb[10].mxu0  ;;  %13795 = vmatprep.mubr.msk.f32.mxu1 %vm4018_vm3, %v17546_v14 }
 0x29c   : > { %v3995_v19 = vmax.f32 %v3963_v13, 0.0  ;;  %v15089_v20 = vadd.f32 %v13750_v17, %v13500_v42  ;;  %v3806_v22 = vpop.f32.mrb[11].mxu0  ;;  %13796 = vmatmul.mubr.msk.f32.gmra.mrb[36].mxu1 %vm4018_vm3, %v17552_v18 }
 0x29d   : > { %v3994_v23 = vmax.f32 %v3962_v15, 0.0  ;;  %v15090_v25 = vadd.f32 %v3806_v22, %v17510_v43  ;;  %v17565_v37 = vld [vmem:[#allocation3 + $0x70] sm:$0xff] }
 0x29e   : > { %4102 = vst.msk [vmem:[#allocation3 + $0xb0] sm:$0xff] %vm4018_vm3, %v3995_v19  ;;  %v3965_v27 = vadd.f32 %v15089_v20, %v17520_v58  ;;  %v17559_v28 = vld [vmem:[#allocation3 + $0x68] sm:$0xff] }
 0x29f   : > { %4101 = vst.msk [vmem:[#allocation3 + $0xa8] sm:$0xff] %vm4018_vm3, %v3994_v23  ;;  %v3964_v29 = vadd.f32 %v15090_v25, %v17520_v58  ;;  %v13753_v32 = vpop.f32.mrb[12].mxu0  ;;  %13798 = vmatprep.mubr.msk.f32.mxu1 %vm4018_vm3, %v17559_v28 }
 0x2a0   : > { %v3997_v38 = vmax.f32 %v3965_v27, 0.0  ;;  %v15091_v40 = vadd.f32 %v13753_v32, %v17512_v44  ;;  %v3816_v42 = vpop.f32.mrb[13].mxu0  ;;  %13799 = vmatmul.mubr.msk.f32.gmra.mrb[38].mxu1 %vm4018_vm3, %v17565_v37 }
 0x2a1   : > { %v3996_v43 = vmax.f32 %v3964_v29, 0.0  ;;  %v15092_v57 = vadd.f32 %v3816_v42, %v17514_v45  ;;  %v17579_v44 = vld [vmem:[#allocation3 + $0x90] sm:$0xff] }
 0x2a2   : > { %4104 = vst.msk [vmem:[#allocation3 + $0xd0] sm:$0xff] %vm4018_vm3, %v3997_v38  ;;  %v3967_v24 = vadd.f32 %v15091_v40, %v17520_v58  ;;  %v17573_v26 = vld [vmem:[#allocation3 + $0x88] sm:$0xff] }
 0x2a3   : > { %4103 = vst.msk [vmem:[#allocation3 + $0xc8] sm:$0xff] %vm4018_vm3, %v3996_v43  ;;  %v3966_v63 = vadd.f32 %v15092_v57, %v17520_v58  ;;  %v13559_v56 = vpop.f32.mrb[16].mxu1  ;;  %v13756_v60 = vpop.f32.mrb[14].mxu0  ;;  %13801 = vmatprep.mubr.msk.f32.mxu1 %vm4018_vm3, %v17573_v26 }
 0x2a4   : > { %v3999_v31 = vmax.f32 %v3967_v24, 0.0  ;;  %v15093_v45 = vadd.f32 %v13756_v60, %v17516_v46  ;;  %v2275_v35 = vpop.f32.mrb[17].mxu1  ;;  %v3826_v39 = vpop.f32.mrb[15].mxu0  ;;  %13802 = vmatmul.mubr.msk.f32.gmra.mrb[40].mxu1 %vm4018_vm3, %v17579_v44 }
 0x2a5   : > { %v3998_v47 = vmax.f32 %v3966_v63, 0.0  ;;  %v15094_v50 = vadd.f32 %v3826_v39, %v17518_v49  ;;  %v17593_v34 = vld [vmem:[#allocation3 + $0xb0] sm:$0xff] }
 0x2a6   : > { %4106 = vst.msk [vmem:[#allocation3 + $0xf0] sm:$0xff] %vm4018_vm3, %v3999_v31  ;;  %v3969_v52 = vadd.f32 %v15093_v45, %v17520_v58  ;;  %v17587_v1 = vld [vmem:[#allocation3 + $0xa8] sm:$0xff] }
 0x2a7   : > { %4105 = vst.msk [vmem:[#allocation3 + $0xe8] sm:$0xff] %vm4018_vm3, %v3998_v47  ;;  %v3968_v2 = vadd.f32 %v15094_v50, %v17520_v58  ;;  %v13562_v16 = vpop.f32.mrb[18].mxu1  ;;  %v13759_v46 = vpop.f32.mrb[16].mxu0  ;;  %13804 = vmatprep.mubr.msk.f32.mxu1 %vm4018_vm3, %v17587_v1 }
 0x2a8   : > { %v4001_v41 = vmax.f32 %v3969_v52, 0.0  ;;  %v15095_v51 = vadd.f32 %v13759_v46, %v13559_v56  ;;  %v2285_v49 = vpop.f32.mrb[19].mxu1  ;;  %v3836_v30 = vpop.f32.mrb[17].mxu0  ;;  %13805 = vmatmul.mubr.msk.f32.gmra.mrb[42].mxu1 %vm4018_vm3, %v17593_v34 }
 0x2a9   : > { %v4000_v4 = vmax.f32 %v3968_v2, 0.0  ;;  %v15096_v33 = vadd.f32 %v3836_v30, %v2275_v35  ;;  %v17605_v54 = vld [vmem:[#allocation3 + $0xd0] sm:$0xff] }
 0x2aa   : > { %4108 = vst.msk [vmem:[#allocation3 + $0x110] sm:$0xff] %vm4018_vm3, %v4001_v41  ;;  %v3971_v48 = vadd.f32 %v15095_v51, %v17520_v58  ;;  %v17599_v53 = vld [vmem:[#allocation3 + $0xc8] sm:$0xff] }
 0x2ab   : > { %4107 = vst.msk [vmem:[#allocation3 + $0x108] sm:$0xff] %vm4018_vm3, %v4000_v4  ;;  %v3970_v8 = vadd.f32 %v15096_v33, %v17520_v58  ;;  %v13565_v36 = vpop.f32.mrb[20].mxu1  ;;  %v13762_v0 = vpop.f32.mrb[18].mxu0  ;;  %13807 = vmatprep.mubr.msk.f32.mxu1 %vm4018_vm3, %v17599_v53 }
 0x2ac   : > { %v4003_v55 = vmax.f32 %v3971_v48, 0.0  ;;  %v15097_v59 = vadd.f32 %v13762_v0, %v13562_v16  ;;  %v2295_v62 = vpop.f32.mrb[21].mxu1  ;;  %v3846_v3 = vpop.f32.mrb[19].mxu0  ;;  %13808 = vmatmul.mubr.msk.f32.gmra.mrb[44].mxu1 %vm4018_vm3, %v17605_v54 }
 0x2ad   : > { %v4002_v6 = vmax.f32 %v3970_v8, 0.0  ;;  %v15098_v7 = vadd.f32 %v3846_v3, %v2285_v49  ;;  %v17617_v17 = vld [vmem:[#allocation3 + $0xf0] sm:$0xff] }
 0x2ae   : > { %4110 = vst.msk [vmem:[#allocation3 + $0x130] sm:$0xff] %vm4018_vm3, %v4003_v55  ;;  %v3973_v10 = vadd.f32 %v15097_v59, %v17520_v58  ;;  %v17611_v11 = vld [vmem:[#allocation3 + $0xe8] sm:$0xff] }
 0x2af   : > { %4109 = vst.msk [vmem:[#allocation3 + $0x128] sm:$0xff] %vm4018_vm3, %v4002_v6  ;;  %v3972_v12 = vadd.f32 %v15098_v7, %v17520_v58  ;;  %v13568_v13 = vpop.f32.mrb[22].mxu1  ;;  %v13765_v15 = vpop.f32.mrb[20].mxu0  ;;  %13810 = vmatprep.mubr.msk.f32.mxu1 %vm4018_vm3, %v17611_v11 }
 0x2b0   : > { %v4005_v19 = vmax.f32 %v3973_v10, 0.0  ;;  %v15099_v20 = vadd.f32 %v13765_v15, %v13565_v36  ;;  %v2305_v22 = vpop.f32.mrb[23].mxu1  ;;  %v3856_v23 = vpop.f32.mrb[21].mxu0  ;;  %13811 = vmatmul.mubr.msk.f32.gmra.mrb[46].mxu1 %vm4018_vm3, %v17617_v17 }
 0x2b1   : > { %v4004_v25 = vmax.f32 %v3972_v12, 0.0  ;;  %v15100_v27 = vadd.f32 %v3856_v23, %v2295_v62  ;;  %v17629_v43 = vld [vmem:[#allocation3 + $0x110] sm:$0xff] }
 0x2b2   : > { %4112 = vst.msk [vmem:[#allocation3 + $0x150] sm:$0xff] %vm4018_vm3, %v4005_v19  ;;  %v3975_v29 = vadd.f32 %v15099_v20, %v17520_v58  ;;  %v17623_v32 = vld [vmem:[#allocation3 + $0x108] sm:$0xff] }
 0x2b3   : > { %4111 = vst.msk [vmem:[#allocation3 + $0x148] sm:$0xff] %vm4018_vm3, %v4004_v25  ;;  %v3974_v38 = vadd.f32 %v15100_v27, %v17520_v58  ;;  %v13571_v40 = vpop.f32.mrb[24].mxu1  ;;  %v13768_v42 = vpop.f32.mrb[22].mxu0  ;;  %13813 = vmatprep.mubr.msk.f32.mxu1 %vm4018_vm3, %v17623_v32 }
 0x2b4   : > { %v4007_v57 = vmax.f32 %v3975_v29, 0.0  ;;  %v15101_v24 = vadd.f32 %v13768_v42, %v13568_v13  ;;  %v2315_v63 = vpop.f32.mrb[25].mxu1  ;;  %v3866_v56 = vpop.f32.mrb[23].mxu0  ;;  %13814 = vmatmul.mubr.msk.f32.gmra.mrb[48].mxu1 %vm4018_vm3, %v17629_v43 }
 0x2b5   : > { %v4006_v60 = vmax.f32 %v3974_v38, 0.0  ;;  %v15102_v31 = vadd.f32 %v3866_v56, %v2305_v22  ;;  %v17641_v52 = vld [vmem:[#allocation3 + $0x130] sm:$0xff] }
 0x2b6   : > { %4114 = vst.msk [vmem:[#allocation3 + $0x170] sm:$0xff] %vm4018_vm3, %v4007_v57  ;;  %v3977_v45 = vadd.f32 %v15101_v24, %v17520_v58  ;;  %v17635_v35 = vld [vmem:[#allocation3 + $0x128] sm:$0xff] }
 0x2b7   : > { %4113 = vst.msk [vmem:[#allocation3 + $0x168] sm:$0xff] %vm4018_vm3, %v4006_v60  ;;  %v3976_v39 = vadd.f32 %v15102_v31, %v17520_v58  ;;  %v13574_v47 = vpop.f32.mrb[26].mxu1  ;;  %v13771_v50 = vpop.f32.mrb[24].mxu0  ;;  %13816 = vmatprep.mubr.msk.f32.mxu1 %vm4018_vm3, %v17635_v35 }
 0x2b8   : > { %v4009_v2 = vmax.f32 %v3977_v45, 0.0  ;;  %v15103_v16 = vadd.f32 %v13771_v50, %v13571_v40  ;;  %v2325_v46 = vpop.f32.mrb[27].mxu1  ;;  %v3876_v41 = vpop.f32.mrb[25].mxu0  ;;  %13817 = vmatmul.mubr.msk.f32.gmra.mrb[50].mxu1 %vm4018_vm3, %v17641_v52 }
 0x2b9   : > { %v4008_v51 = vmax.f32 %v3976_v39, 0.0  ;;  %v15104_v49 = vadd.f32 %v3876_v41, %v2315_v63  ;;  %v17653_v36 = vld [vmem:[#allocation3 + $0x150] sm:$0xff] }
 0x2ba   : > { %4116 = vst.msk [vmem:[#allocation3 + $0x190] sm:$0xff] %vm4018_vm3, %v4009_v2  ;;  %v3979_v30 = vadd.f32 %v15103_v16, %v17520_v58  ;;  %v17647_v4 = vld [vmem:[#allocation3 + $0x148] sm:$0xff] }
 0x2bb   : > { %4115 = vst.msk [vmem:[#allocation3 + $0x188] sm:$0xff] %vm4018_vm3, %v4008_v51  ;;  %v3978_v33 = vadd.f32 %v15104_v49, %v17520_v58  ;;  %v13577_v48 = vpop.f32.mrb[28].mxu1  ;;  %v13774_v8 = vpop.f32.mrb[26].mxu0  ;;  %13819 = vmatprep.mubr.msk.f32.mxu1 %vm4018_vm3, %v17647_v4  ;;  %v4125_v49 = vld [vmem:[#allocation3 + $0x7] sm:$0xff] }
 0x2bc   : > { %v4011_v0 = vmax.f32 %v3979_v30, 0.0  ;;  %v15105_v55 = vadd.f32 %v13774_v8, %v13574_v47  ;;  %v2335_v59 = vpop.f32.mrb[29].mxu1  ;;  %v3886_v62 = vpop.f32.mrb[27].mxu0  ;;  %13820 = vmatmul.mubr.msk.f32.gmra.mrb[52].mxu1 %vm4018_vm3, %v17653_v36  ;;  %v4126_v8 = vld [vmem:[#allocation3 + $0xf] sm:$0xff] }
 0x2bd   : > { %v4010_v3 = vmax.f32 %v3978_v33, 0.0  ;;  %v15106_v6 = vadd.f32 %v3886_v62, %v2325_v46  ;;  %v17665_v19 = vld [vmem:[#allocation3 + $0x170] sm:$0xff]  ;;  %v17713_v62 = vld [vmem:[#allocation3 + $0x27] sm:$0xff] }
 0x2be   : > { %4118 = vst.msk [vmem:[#allocation3 + $0x1b0] sm:$0xff] %vm4018_vm3, %v4011_v0  ;;  %v3981_v7 = vadd.f32 %v15105_v55, %v17520_v58  ;;  %v17659_v10 = vld [vmem:[#allocation3 + $0x168] sm:$0xff]  ;;  %v4875_v33 = vld [vmem:[#allocation9 + $0x50] sm:$0xff] }
 0x2bf   : > { %4117 = vst.msk [vmem:[#allocation3 + $0x1a8] sm:$0xff] %vm4018_vm3, %v4010_v3  ;;  %v3980_v12 = vadd.f32 %v15106_v6, %v17520_v58  ;;  %v13580_v13 = vpop.f32.mrb[30].mxu1  ;;  %v13777_v15 = vpop.f32.mrb[28].mxu0  ;;  %13822 = vmatprep.mubr.msk.f32.mxu1 %vm4018_vm3, %v17659_v10  ;;  %v5263_v55 = vld [vmem:[#allocation9 + $0x60] sm:$0xff]  ;;  %v17720_v6 = vld [vmem:[#allocation3 + $0x2f] sm:$0xff] }
 0x2c0   : > { %v4013_v20 = vmax.f32 %v3981_v7, 0.0  ;;  %v15107_v22 = vadd.f32 %v13777_v15, %v13577_v48  ;;  %v2345_v23 = vpop.f32.mrb[31].mxu1  ;;  %v3896_v25 = vpop.f32.mrb[29].mxu0  ;;  %13823 = vmatmul.mubr.msk.f32.gmra.mrb[54].mxu1 %vm4018_vm3, %v17665_v19  ;;  %v4876_v48 = vld [vmem:[#allocation9 + $0x58] sm:$0xff]  ;;  %v17724_v7 = vld [vmem:[#allocation3 + $0x47] sm:$0xff] }
 0x2c1   : > { %v4012_v27 = vmax.f32 %v3980_v12, 0.0  ;;  %v15108_v29 = vadd.f32 %v3896_v25, %v2335_v59  ;;  %v17677_v24 = vld [vmem:[#allocation3 + $0x190] sm:$0xff]  ;;  %v14881_v0 = vpack.c.bf16 %v4876_v48, %v4875_v33  ;;  %v17733_v12 = vld [vmem:[#allocation3 + $0x67] sm:$0xff] }
 0x2c2   : > { %4120 = vst.msk [vmem:[#allocation3 + $0x1d0] sm:$0xff] %vm4018_vm3, %v4013_v20  ;;  %v3983_v38 = vadd.f32 %v15107_v22, %v17520_v58  ;;  %v17671_v40 = vld [vmem:[#allocation3 + $0x188] sm:$0xff]  ;;  %19633 = vst [vmem:[#allocation47_spill] sm:$0xff] %v17677_v24 }
 0x2c3   : > { %4119 = vst.msk [vmem:[#allocation3 + $0x1c8] sm:$0xff] %vm4018_vm3, %v4012_v27  ;;  %v3982_v42 = vadd.f32 %v15108_v29, %v17520_v58  ;;  %v13780_v57 = vpop.f32.mrb[30].mxu0  ;;  %13825 = vmatprep.mubr.msk.f32.mxu1 %vm4018_vm3, %v17671_v40  ;;  %v5264_v59 = vld [vmem:[#allocation9 + $0x68] sm:$0xff] }
 0x2c4   : > { %v4015_v63 = vmax.f32 %v3983_v38, 0.0  ;;  %v15109_v56 = vadd.f32 %v13780_v57, %v13580_v13  ;;  %v3906_v60 = vpop.f32.mrb[31].mxu0  ;;  %13826 = vmatmul.mubr.msk.f32.gmra.mrb[56].mxu1 %vm4018_vm3, %v17677_v24  ;;  %v17718_v3 = vpack.c.bf16 %v5264_v59, %v5263_v55  ;;  %v17737_v13 = vld [vmem:[#allocation3 + $0x6f] sm:$0xff]  ;;  %v17741_v15 = vld [vmem:[#allocation3 + $0x87] sm:$0xff] }
 0x2c5   : > { %v4014_v31 = vmax.f32 %v3982_v42, 0.0  ;;  %v15110_v45 = vadd.f32 %v3906_v60, %v2345_v23  ;;  %v17689_v2 = vld [vmem:[#allocation3 + $0x1b0] sm:$0xff]  ;;  %v17749_v22 = vld [vmem:[#allocation3 + $0xa7] sm:$0xff] }
 0x2c6   : > { %4122 = vst.msk [vmem:[#allocation3 + $0x1f0] sm:$0xff] %vm4018_vm3, %v4015_v63  ;;  %v3985_v39 = vadd.f32 %v15109_v56, %v17520_v58  ;;  %v17683_v47 = vld [vmem:[#allocation3 + $0x1a8] sm:$0xff]  ;;  %19635 = vst [vmem:[#allocation34_spill] sm:$0xff] %v17689_v2  ;;  %v5265_v59 = vld [vmem:[#allocation9 + $0x70] sm:$0xff] }
 0x2c7   : > { %19634 = vst [vmem:[#allocation19_spill] sm:$0xff] %v17683_v47  ;;  %4121 = vst.msk [vmem:[#allocation3 + $0x1e8] sm:$0xff] %vm4018_vm3, %v4014_v31  ;;  %v3984_v50 = vadd.f32 %v15110_v45, %v17520_v58  ;;  %13828 = vmatprep.mubr.msk.f32.mxu1 %vm4018_vm3, %v17683_v47  ;;  %v17745_v20 = vld [vmem:[#allocation3 + $0x8f] sm:$0xff]  ;;  %v17757_v25 = vld [vmem:[#allocation3 + $0xc7] sm:$0xff] }
 0x2c8   : > { %v4017_v16 = vmax.f32 %v3985_v39, 0.0  ;;  %13829 = vmatmul.mubr.msk.f32.gmra.mrb[58].mxu1 %vm4018_vm3, %v17689_v2  ;;  %v17753_v23 = vld [vmem:[#allocation3 + $0xaf] sm:$0xff]  ;;  %v17765_v29 = vld [vmem:[#allocation3 + $0xe7] sm:$0xff] }
 0x2c9   : > { %v4016_v46 = vmax.f32 %v3984_v50, 0.0  ;;  %v17699_v58 = vld [vmem:[#allocation3 + $0x1d0] sm:$0xff]  ;;  %v17773_v42 = vld [vmem:[#allocation3 + $0x107] sm:$0xff] }
 0x2ca   : > { %4124 = vst.msk [vmem:[#allocation3 + $0x210] sm:$0xff] %vm4018_vm3, %v4017_v16  ;;  %v17694_v41 = vld [vmem:[#allocation3 + $0x1c8] sm:$0xff]  ;;  %19637 = vst [vmem:[#allocation35_spill] sm:$0xff] %v17699_v58  ;;  %v17846_v24 = vld [vmem:[#allocation3 + $0x31] sm:$0xff] }
 0x2cb   : > { %19636 = vst [vmem:[#allocation20_spill] sm:$0xff] %v17694_v41  ;;  %4123 = vst.msk [vmem:[#allocation3 + $0x208] sm:$0xff] %vm4018_vm3, %v4016_v46  ;;  %13831 = vmatprep.mubr.msk.f32.mxu1 %vm4018_vm3, %v17694_v41  ;;  %v17761_v27 = vld [vmem:[#allocation3 + $0xcf] sm:$0xff]  ;;  %v17781_v63 = vld [vmem:[#allocation3 + $0x127] sm:$0xff] }
 0x2cc   : > { %13832 = vmatmul.mubr.msk.f32.gmra.mrb[60].mxu1 %vm4018_vm3, %v17699_v58  ;;  %v17769_v38 = vld [vmem:[#allocation3 + $0xef] sm:$0xff]  ;;  %v17789_v60 = vld [vmem:[#allocation3 + $0x147] sm:$0xff] }
 0x2cd   : > { %v17707_v30 = vld [vmem:[#allocation3 + $0x1f0] sm:$0xff]  ;;  %v17797_v45 = vld [vmem:[#allocation3 + $0x167] sm:$0xff] }
 0x2ce   : > { %v17703_v51 = vld [vmem:[#allocation3 + $0x1e8] sm:$0xff]  ;;  %19639 = vst [vmem:[#allocation36_spill] sm:$0xff] %v17707_v30 }
 0x2cf   : > { %19638 = vst [vmem:[#allocation21_spill] sm:$0xff] %v17703_v51  ;;  %13834 = vmatprep.mubr.msk.f32.mxu1 %vm4018_vm3, %v17703_v51  ;;  %v17777_v57 = vld [vmem:[#allocation3 + $0x10f] sm:$0xff]  ;;  %v17805_v50 = vld [vmem:[#allocation3 + $0x187] sm:$0xff]  ;;  %v14889_v51 = vpack.c.bf16 %v5266_v9, %v5265_v59 }
 0x2d0   : > { %13835 = vmatmul.mubr.msk.f32.gmra.mrb[62].mxu1 %vm4018_vm3, %v17707_v30  ;;  %v17785_v56 = vld [vmem:[#allocation3 + $0x12f] sm:$0xff]  ;;  %v17813_v46 = vld [vmem:[#allocation3 + $0x1a7] sm:$0xff] }
 0x2d1   : > { %13845 = vmatprep.mubr.msk.f32.mxu1 %vm4018_vm3, %v4125_v49  ;;  %v17793_v31 = vld [vmem:[#allocation3 + $0x14f] sm:$0xff]  ;;  %v17821_v33 = vld [vmem:[#allocation3 + $0x1c7] sm:$0xff] }
 0x2d2   : > { %v17801_v39 = vld [vmem:[#allocation3 + $0x16f] sm:$0xff]  ;;  %v5653_v58 = vld [vmem:[#allocation9 + $0x80] sm:$0xff] }
 0x2d3   : > { %v17809_v16 = vld [vmem:[#allocation3 + $0x18f] sm:$0xff] }
 0x2d4   : > { %13846 = vmatmul.mubr.msk.f32.vlgmr.msra.gmra.mrb[32].mxu1 %vm4018_vm3, %v4126_v8  ;;  %v17817_v49 = vld [vmem:[#allocation3 + $0x1af] sm:$0xff]  ;;  %v17829_v8 = vld [vmem:[#allocation3 + $0x1e7] sm:$0xff] }
 0x2d5   : > { %14880 = vmatpush3.bf16.msra.mxu1 %v17507_v21  ;;  %13848 = vmatprep.mubr.msk.f32.mxu1 %vm4018_vm3, %v17713_v62  ;;  %v17729_v21 = vld [vmem:[#allocation3 + $0x4f] sm:$0xff] }
 0x2d6   : > { %14882 = vmatprep.subr.bf16.mxu1 %v14881_v0  ;;  %v17825_v48 = vld [vmem:[#allocation3 + $0x1cf] sm:$0xff] }
 0x2d7   : > { %v17833_v55 = vld [vmem:[#allocation3 + $0x1ef] sm:$0xff] }
 0x2d8   : > { %13849 = vmatmul.mubr.msk.f32.gmra.mrb[34].mxu1 %vm4018_vm3, %v17720_v6  ;;  %v4841_v30 = vld [vmem:[#allocation3 + $0x11] sm:$0xff]  ;;  %v17839_v2 = vld [vmem:[#allocation3 + $0x29] sm:$0xff] }
 0x2d9   : > { %13851 = vmatprep.mubr.msk.f32.mxu1 %vm4018_vm3, %v17724_v7  ;;  %14884 = vmatpush3.bf16.msra.mxu1 %v14881_v0  ;;  %v4840_v0 = vld [vmem:[#allocation3 + $0x9] sm:$0xff]  ;;  %v17879_v59 = vld [vmem:[#allocation3 + $0xb1] sm:$0xff] }
 0x2da   : > { %14886 = vmatprep.subr.bf16.mxu1 %v17718_v3  ;;  %v5654_v41 = vld [vmem:[#allocation9 + $0x88] sm:$0xff]  ;;  %19647 = vst [vmem:[#allocation40_spill] sm:$0xff] %v17879_v59 }
 0x2db   : > { %v17844_v47 = vpack.c.bf16 %v5654_v41, %v5653_v58  ;;  %v17850_v9 = vld [vmem:[#allocation3 + $0x49] sm:$0xff]  ;;  %v17863_v58 = vld [vmem:[#allocation3 + $0x71] sm:$0xff] }
 0x2dc   : > { %13852 = vmatmul.mubr.msk.f32.gmra.mrb[36].mxu1 %vm4018_vm3, %v17729_v21  ;;  %19640 = vst [vmem:[#allocation22_spill] sm:$0xff] %v17850_v9  ;;  %v17859_v41 = vld [vmem:[#allocation3 + $0x69] sm:$0xff]  ;;  %19643 = vst [vmem:[#allocation38_spill] sm:$0xff] %v17863_v58 }
 0x2dd   : > { %13854 = vmatprep.mubr.msk.f32.mxu1 %vm4018_vm3, %v17733_v12  ;;  %19642 = vst [vmem:[#allocation23_spill] sm:$0xff] %v17859_v41 }
 0x2e0   : > { %13855 = vmatmul.mubr.msk.f32.gmra.mrb[38].mxu1 %vm4018_vm3, %v17737_v13 }
 0x2e1   : > { %13857 = vmatprep.mubr.msk.f32.mxu1 %vm4018_vm3, %v17741_v15 }
 0x2e4   : > { %13858 = vmatmul.mubr.msk.f32.gmra.mrb[40].mxu1 %vm4018_vm3, %v17745_v20 }
 0x2e5   : > { %13860 = vmatprep.mubr.msk.f32.mxu1 %vm4018_vm3, %v17749_v22 }
 0x2e8   : > { %13861 = vmatmul.mubr.msk.f32.gmra.mrb[42].mxu1 %vm4018_vm3, %v17753_v23 }
 0x2e9   : > { %13863 = vmatprep.mubr.msk.f32.mxu1 %vm4018_vm3, %v17757_v25 }
 0x2ec   : > { %13864 = vmatmul.mubr.msk.f32.gmra.mrb[44].mxu1 %vm4018_vm3, %v17761_v27 }
 0x2ed   : > { %13866 = vmatprep.mubr.msk.f32.mxu1 %vm4018_vm3, %v17765_v29 }
 0x2f0   : > { %13867 = vmatmul.mubr.msk.f32.gmra.mrb[46].mxu1 %vm4018_vm3, %v17769_v38 }
 0x2f1   : > { %13869 = vmatprep.mubr.msk.f32.mxu1 %vm4018_vm3, %v17773_v42 }
 0x2f4   : > { %13870 = vmatmul.mubr.msk.f32.gmra.mrb[48].mxu1 %vm4018_vm3, %v17777_v57 }
 0x2f5   : > { %13872 = vmatprep.mubr.msk.f32.mxu1 %vm4018_vm3, %v17781_v63 }
 0x2f8   : > { %13873 = vmatmul.mubr.msk.f32.gmra.mrb[50].mxu1 %vm4018_vm3, %v17785_v56 }
 0x2f9   : > { %13875 = vmatprep.mubr.msk.f32.mxu1 %vm4018_vm3, %v17789_v60 }
 0x2fc   : > { %13876 = vmatmul.mubr.msk.f32.gmra.mrb[52].mxu1 %vm4018_vm3, %v17793_v31 }
 0x2fd   : > { %13878 = vmatprep.mubr.msk.f32.mxu1 %vm4018_vm3, %v17797_v45 }
 0x300   : > { %13879 = vmatmul.mubr.msk.f32.gmra.mrb[54].mxu1 %vm4018_vm3, %v17801_v39 }
 0x301   : > { %13881 = vmatprep.mubr.msk.f32.mxu1 %vm4018_vm3, %v17805_v50 }
 0x304   : > { %13882 = vmatmul.mubr.msk.f32.gmra.mrb[56].mxu1 %vm4018_vm3, %v17809_v16 }
 0x305   : > { %13884 = vmatprep.mubr.msk.f32.mxu1 %vm4018_vm3, %v17813_v46 }
 0x308   : > { %13885 = vmatmul.mubr.msk.f32.gmra.mrb[58].mxu1 %vm4018_vm3, %v17817_v49 }
 0x309   : > { %13887 = vmatprep.mubr.msk.f32.mxu1 %vm4018_vm3, %v17821_v33 }
 0x30c   : > { %13888 = vmatmul.mubr.msk.f32.gmra.mrb[60].mxu1 %vm4018_vm3, %v17825_v48 }
 0x30d   : > { %13890 = vmatprep.mubr.msk.f32.mxu1 %vm4018_vm3, %v17829_v8 }
 0x310   : > { %13891 = vmatmul.mubr.msk.f32.gmra.mrb[62].mxu1 %vm4018_vm3, %v17833_v55 }
 0x311   : > { %13901 = vmatprep.mubr.msk.f32.mxu1 %vm4018_vm3, %v4840_v0  ;;  %v17875_v0 = vld [vmem:[#allocation3 + $0xa9] sm:$0xff] }
 0x312   : > { %19646 = vst [vmem:[#allocation25_spill] sm:$0xff] %v17875_v0 }
 0x314   : > { %13902 = vmatmul.mubr.msk.f32.vlgmr.msra.gmra.mrb[32].mxu1 %vm4018_vm3, %v4841_v30  ;;  %v17855_v30 = vld [vmem:[#allocation3 + $0x51] sm:$0xff] }
 0x315   : > { %14888 = vmatpush3.bf16.msra.mxu1 %v17718_v3  ;;  %13904 = vmatprep.mubr.msk.f32.mxu1 %vm4018_vm3, %v17839_v2  ;;  %19641 = vst [vmem:[#allocation37_spill] sm:$0xff] %v17855_v30  ;;  %v17867_v3 = vld [vmem:[#allocation3 + $0x89] sm:$0xff] }
 0x316   : > { %14890 = vmatprep.subr.bf16.mxu1 %v14889_v51  ;;  %19644 = vst [vmem:[#allocation24_spill] sm:$0xff] %v17867_v3 }
 0x318   : > { %13905 = vmatmul.mubr.msk.f32.gmra.mrb[34].mxu1 %vm4018_vm3, %v17846_v24 }
 0x319   : > { %13907 = vmatprep.mubr.msk.f32.mxu1 %vm4018_vm3, %v17850_v9  ;;  %14892 = vmatpush3.bf16.msra.mxu1 %v14889_v51  ;;  %v17871_v51 = vld [vmem:[#allocation3 + $0x91] sm:$0xff] }
 0x31a   : > { %14894 = vmatprep.subr.bf16.mxu1 %v17844_v47  ;;  %19645 = vst [vmem:[#allocation39_spill] sm:$0xff] %v17871_v51  ;;  %v6044_v9 = vld [vmem:[#allocation9 + $0xa8] sm:$0xff] }
 0x31c   : > { %13908 = vmatmul.mubr.msk.f32.gmra.mrb[36].mxu1 %vm4018_vm3, %v17855_v30  ;;  %v5656_v30 = vld [vmem:[#allocation9 + $0x98] sm:$0xff] }
 0x31d   : > { %13910 = vmatprep.mubr.msk.f32.mxu1 %vm4018_vm3, %v17859_v41  ;;  %v5655_v41 = vld [vmem:[#allocation9 + $0x90] sm:$0xff] }
 0x320   : > { %13911 = vmatmul.mubr.msk.f32.gmra.mrb[38].mxu1 %vm4018_vm3, %v17863_v58  ;;  %v17883_v58 = vld [vmem:[#allocation3 + $0xc9] sm:$0xff] }
 0x321   : > { %13913 = vmatprep.mubr.msk.f32.mxu1 %vm4018_vm3, %v17867_v3  ;;  %19648 = vst [vmem:[#allocation26_spill] sm:$0xff] %v17883_v58  ;;  %v17887_v3 = vld [vmem:[#allocation3 + $0xd1] sm:$0xff] }
 0x322   : > { %19649 = vst [vmem:[#allocation41_spill] sm:$0xff] %v17887_v3 }
 0x324   : > { %13914 = vmatmul.mubr.msk.f32.gmra.mrb[40].mxu1 %vm4018_vm3, %v17871_v51  ;;  %v17891_v51 = vld [vmem:[#allocation3 + $0xe9] sm:$0xff] }
 0x325   : > { %13916 = vmatprep.mubr.msk.f32.mxu1 %vm4018_vm3, %v17875_v0  ;;  %19650 = vst [vmem:[#allocation27_spill] sm:$0xff] %v17891_v51  ;;  %v17895_v0 = vld [vmem:[#allocation3 + $0xf1] sm:$0xff] }
 0x326   : > { %19651 = vst [vmem:[#allocation42_spill] sm:$0xff] %v17895_v0 }
 0x328   : > { %13917 = vmatmul.mubr.msk.f32.gmra.mrb[42].mxu1 %vm4018_vm3, %v17879_v59  ;;  %v17899_v59 = vld [vmem:[#allocation3 + $0x109] sm:$0xff] }
 0x329   : > { %13919 = vmatprep.mubr.msk.f32.mxu1 %vm4018_vm3, %v17883_v58  ;;  %19652 = vst [vmem:[#allocation28_spill] sm:$0xff] %v17899_v59  ;;  %v17903_v58 = vld [vmem:[#allocation3 + $0x111] sm:$0xff] }
 0x32a   : > { %19653 = vst [vmem:[#allocation43_spill] sm:$0xff] %v17903_v58 }
 0x32c   : > { %13920 = vmatmul.mubr.msk.f32.gmra.mrb[44].mxu1 %vm4018_vm3, %v17887_v3  ;;  %v17907_v3 = vld [vmem:[#allocation3 + $0x129] sm:$0xff] }
 0x32d   : > { %13922 = vmatprep.mubr.msk.f32.mxu1 %vm4018_vm3, %v17891_v51  ;;  %19654 = vst [vmem:[#allocation29_spill] sm:$0xff] %v17907_v3  ;;  %v17911_v51 = vld [vmem:[#allocation3 + $0x131] sm:$0xff] }
 0x32e   : > { %19655 = vst [vmem:[#allocation44_spill] sm:$0xff] %v17911_v51 }
 0x330   : > { %13923 = vmatmul.mubr.msk.f32.gmra.mrb[46].mxu1 %vm4018_vm3, %v17895_v0  ;;  %v17915_v0 = vld [vmem:[#allocation3 + $0x149] sm:$0xff] }
 0x331   : > { %13925 = vmatprep.mubr.msk.f32.mxu1 %vm4018_vm3, %v17899_v59  ;;  %19656 = vst [vmem:[#allocation30_spill] sm:$0xff] %v17915_v0  ;;  %v17919_v59 = vld [vmem:[#allocation3 + $0x151] sm:$0xff] }
 0x332   : > { %19657 = vst [vmem:[#allocation45_spill] sm:$0xff] %v17919_v59 }
 0x334   : > { %13926 = vmatmul.mubr.msk.f32.gmra.mrb[48].mxu1 %vm4018_vm3, %v17903_v58  ;;  %v17923_v58 = vld [vmem:[#allocation3 + $0x169] sm:$0xff] }
 0x335   : > { %13928 = vmatprep.mubr.msk.f32.mxu1 %vm4018_vm3, %v17907_v3  ;;  %19658 = vst [vmem:[#allocation31_spill] sm:$0xff] %v17923_v58  ;;  %v17927_v3 = vld [vmem:[#allocation3 + $0x171] sm:$0xff] }
 0x336   : > { %19659 = vst [vmem:[#allocation32_spill] sm:$0xff] %v17927_v3 }
 0x338   : > { %13929 = vmatmul.mubr.msk.f32.gmra.mrb[50].mxu1 %vm4018_vm3, %v17911_v51  ;;  %v17931_v51 = vld [vmem:[#allocation3 + $0x189] sm:$0xff] }
 0x339   : > { %13931 = vmatprep.mubr.msk.f32.mxu1 %vm4018_vm3, %v17915_v0  ;;  %19660 = vst [vmem:[#allocation46_spill] sm:$0xff] %v17931_v51  ;;  %v17935_v0 = vld [vmem:[#allocation3 + $0x191] sm:$0xff] }
 0x33a   : > { %19661 = vst [vmem:[#allocation33_spill] sm:$0xff] %v17935_v0 }
 0x33c   : > { %13932 = vmatmul.mubr.msk.f32.gmra.mrb[52].mxu1 %vm4018_vm3, %v17919_v59  ;;  %v17939_v59 = vld [vmem:[#allocation3 + $0x1a9] sm:$0xff] }
 0x33d   : > { %13934 = vmatprep.mubr.msk.f32.mxu1 %vm4018_vm3, %v17923_v58  ;;  %19662 = vst [vmem:[#allocation48_spill] sm:$0xff] %v17939_v59  ;;  %v17943_v58 = vld [vmem:[#allocation3 + $0x1b1] sm:$0xff] }
 0x33e   : > { %19663 = vst [vmem:[#allocation49_spill] sm:$0xff] %v17943_v58 }
 0x340   : > { %13935 = vmatmul.mubr.msk.f32.gmra.mrb[54].mxu1 %vm4018_vm3, %v17927_v3  ;;  %v17947_v3 = vld [vmem:[#allocation3 + $0x1c9] sm:$0xff] }
 0x341   : > { %13937 = vmatprep.mubr.msk.f32.mxu1 %vm4018_vm3, %v17931_v51  ;;  %19664 = vst [vmem:[#allocation50_spill] sm:$0xff] %v17947_v3  ;;  %v17951_v51 = vld [vmem:[#allocation3 + $0x1d1] sm:$0xff] }
 0x342   : > { %19665 = vst [vmem:[#allocation51_spill] sm:$0xff] %v17951_v51 }
 0x344   : > { %13938 = vmatmul.mubr.msk.f32.gmra.mrb[56].mxu1 %vm4018_vm3, %v17935_v0  ;;  %v17955_v0 = vld [vmem:[#allocation3 + $0x1e9] sm:$0xff] }
 0x345   : > { %13940 = vmatprep.mubr.msk.f32.mxu1 %vm4018_vm3, %v17939_v59  ;;  %19666 = vst [vmem:[#allocation52_spill] sm:$0xff] %v17955_v0  ;;  %v17959_v59 = vld [vmem:[#allocation3 + $0x1f1] sm:$0xff] }
 0x348   : > { %13941 = vmatmul.mubr.msk.f32.gmra.mrb[58].mxu1 %vm4018_vm3, %v17943_v58  ;;  %v6043_v58 = vld [vmem:[#allocation9 + $0xa0] sm:$0xff] }
 0x349   : > { %13943 = vmatprep.mubr.msk.f32.mxu1 %vm4018_vm3, %v17947_v3  ;;  %v14897_v3 = vpack.c.bf16 %v5656_v30, %v5655_v41  ;;  %v6434_v41 = vld [vmem:[#allocation9 + $0xc0] sm:$0xff] }
 0x34c   : > { %13944 = vmatmul.mubr.msk.f32.gmra.mrb[60].mxu1 %vm4018_vm3, %v17951_v51 }
 0x34d   : > { %13946 = vmatprep.mubr.msk.f32.mxu1 %vm4018_vm3, %v17955_v0  ;;  %v14901_v0 = vpack.c.bf16 %v6044_v9, %v6043_v58  ;;  %v6046_v9 = vld [vmem:[#allocation9 + $0xb8] sm:$0xff]  ;;  %v6435_v58 = vld [vmem:[#allocation9 + $0xc8] sm:$0xff] }
 0x350   : > { %13947 = vmatmul.mubr.msk.f32.gmra.mrb[62].mxu1 %vm4018_vm3, %v17959_v59 }
 0x351   : > { %13957 = vmatprep.mubr.msk.f32.mxu1 %vm4018_vm3, %v17713_v62  ;;  %v18028_v62 = vld [vmem:[#allocation3 + $0x20f] sm:$0xff] }
 0x354   : > { %13958 = vmatmul.mubr.msk.f32.vlgmr.msra.gmra.mrb[32].mxu1 %vm4018_vm3, %v17720_v6  ;;  %v6045_v6 = vld [vmem:[#allocation9 + $0xb0] sm:$0xff] }
 0x355   : > { %14896 = vmatpush3.bf16.msra.mxu1 %v17844_v47  ;;  %13960 = vmatprep.mubr.msk.f32.mxu1 %vm4018_vm3, %v17724_v7  ;;  %v18024_v47 = vld [vmem:[#allocation3 + $0x207] sm:$0xff]  ;;  %v14905_v30 = vpack.c.bf16 %v6046_v9, %v6045_v6  ;;  %v19686_v9 = vld [vmem:[#allocation28_spill] sm:$0xff] }
 0x356   : > { %14898 = vmatprep.subr.bf16.mxu1 %v14897_v3  ;;  %v19685_v6 = vld [vmem:[#allocation42_spill] sm:$0xff] }
 0x358   : > { %13961 = vmatmul.mubr.msk.f32.gmra.mrb[34].mxu1 %vm4018_vm3, %v17729_v21 }
 0x359   : > { %13963 = vmatprep.mubr.msk.f32.mxu1 %vm4018_vm3, %v17733_v12  ;;  %14900 = vmatpush3.bf16.msra.mxu1 %v14897_v3  ;;  %v14909_v3 = vpack.c.bf16 %v6435_v58, %v6434_v41  ;;  %v19688_v41 = vld [vmem:[#allocation29_spill] sm:$0xff]  ;;  %v19689_v58 = vld [vmem:[#allocation44_spill] sm:$0xff] }
 0x35a   : > { %14902 = vmatprep.subr.bf16.mxu1 %v14901_v0 }
 0x35c   : > { %13964 = vmatmul.mubr.msk.f32.gmra.mrb[36].mxu1 %vm4018_vm3, %v17737_v13 }
 0x35d   : > { %13966 = vmatprep.mubr.msk.f32.mxu1 %vm4018_vm3, %v17741_v15 }
 0x360   : > { %13967 = vmatmul.mubr.msk.f32.gmra.mrb[38].mxu1 %vm4018_vm3, %v17745_v20 }
 0x361   : > { %13969 = vmatprep.mubr.msk.f32.mxu1 %vm4018_vm3, %v17749_v22 }
 0x364   : > { %13970 = vmatmul.mubr.msk.f32.gmra.mrb[40].mxu1 %vm4018_vm3, %v17753_v23 }
 0x365   : > { %13972 = vmatprep.mubr.msk.f32.mxu1 %vm4018_vm3, %v17757_v25 }
 0x368   : > { %13973 = vmatmul.mubr.msk.f32.gmra.mrb[42].mxu1 %vm4018_vm3, %v17761_v27 }
 0x369   : > { %13975 = vmatprep.mubr.msk.f32.mxu1 %vm4018_vm3, %v17765_v29 }
 0x36c   : > { %13976 = vmatmul.mubr.msk.f32.gmra.mrb[44].mxu1 %vm4018_vm3, %v17769_v38 }
 0x36d   : > { %13978 = vmatprep.mubr.msk.f32.mxu1 %vm4018_vm3, %v17773_v42 }
 0x370   : > { %13979 = vmatmul.mubr.msk.f32.gmra.mrb[46].mxu1 %vm4018_vm3, %v17777_v57 }
 0x371   : > { %13981 = vmatprep.mubr.msk.f32.mxu1 %vm4018_vm3, %v17781_v63 }
 0x374   : > { %13982 = vmatmul.mubr.msk.f32.gmra.mrb[48].mxu1 %vm4018_vm3, %v17785_v56 }
 0x375   : > { %13984 = vmatprep.mubr.msk.f32.mxu1 %vm4018_vm3, %v17789_v60 }
 0x378   : > { %13985 = vmatmul.mubr.msk.f32.gmra.mrb[50].mxu1 %vm4018_vm3, %v17793_v31 }
 0x379   : > { %13987 = vmatprep.mubr.msk.f32.mxu1 %vm4018_vm3, %v17797_v45 }
 0x37c   : > { %13988 = vmatmul.mubr.msk.f32.gmra.mrb[52].mxu1 %vm4018_vm3, %v17801_v39 }
 0x37d   : > { %13990 = vmatprep.mubr.msk.f32.mxu1 %vm4018_vm3, %v17805_v50 }
 0x380   : > { %13991 = vmatmul.mubr.msk.f32.gmra.mrb[54].mxu1 %vm4018_vm3, %v17809_v16 }
 0x381   : > { %13993 = vmatprep.mubr.msk.f32.mxu1 %vm4018_vm3, %v17813_v46 }
 0x384   : > { %13994 = vmatmul.mubr.msk.f32.gmra.mrb[56].mxu1 %vm4018_vm3, %v17817_v49 }
 0x385   : > { %13996 = vmatprep.mubr.msk.f32.mxu1 %vm4018_vm3, %v17821_v33 }
 0x388   : > { %13997 = vmatmul.mubr.msk.f32.gmra.mrb[58].mxu1 %vm4018_vm3, %v17825_v48 }
 0x389   : > { %13999 = vmatprep.mubr.msk.f32.mxu1 %vm4018_vm3, %v17829_v8 }
 0x38c   : > { %14000 = vmatmul.mubr.msk.f32.gmra.mrb[60].mxu1 %vm4018_vm3, %v17833_v55 }
 0x38d   : > { %14002 = vmatprep.mubr.msk.f32.mxu1 %vm4018_vm3, %v18024_v47 }
 0x390   : > { %14003 = vmatmul.mubr.msk.f32.gmra.mrb[62].mxu1 %vm4018_vm3, %v18028_v62 }
 0x391   : > { %14013 = vmatprep.mubr.msk.f32.mxu1 %vm4018_vm3, %v17534_v61  ;;  %v19667_v61 = vld [vmem:[#allocation47_spill] sm:$0xff] }
 0x394   : > { %14014 = vmatmul.mubr.msk.f32.vlgmr.msra.gmra.mrb[32].mxu1 %vm4018_vm3, %v17540_v5  ;;  %v19668_v5 = vld [vmem:[#allocation19_spill] sm:$0xff] }
 0x395   : > { %14904 = vmatpush3.bf16.msra.mxu1 %v14901_v0  ;;  %14016 = vmatprep.mubr.msk.f32.mxu1 %vm4018_vm3, %v17546_v14  ;;  %v19669_v14 = vld [vmem:[#allocation34_spill] sm:$0xff]  ;;  %v19684_v0 = vld [vmem:[#allocation27_spill] sm:$0xff] }
 0x396   : > { %14906 = vmatprep.subr.bf16.mxu1 %v14905_v30 }
 0x398   : > { %14017 = vmatmul.mubr.msk.f32.gmra.mrb[34].mxu1 %vm4018_vm3, %v17552_v18  ;;  %v19670_v18 = vld [vmem:[#allocation20_spill] sm:$0xff] }
 0x399   : > { %14019 = vmatprep.mubr.msk.f32.mxu1 %vm4018_vm3, %v17559_v28  ;;  %14908 = vmatpush3.bf16.msra.mxu1 %v14905_v30  ;;  %v19671_v28 = vld [vmem:[#allocation35_spill] sm:$0xff] }
 0x39a   : > { %14910 = vmatprep.subr.bf16.mxu1 %v14909_v3  ;;  %v19687_v30 = vld [vmem:[#allocation43_spill] sm:$0xff] }
 0x39c   : > { %14020 = vmatmul.mubr.msk.f32.gmra.mrb[36].mxu1 %vm4018_vm3, %v17565_v37  ;;  %v19672_v37 = vld [vmem:[#allocation21_spill] sm:$0xff] }
 0x39d   : > { %14022 = vmatprep.mubr.msk.f32.mxu1 %vm4018_vm3, %v17573_v26  ;;  %v19673_v26 = vld [vmem:[#allocation36_spill] sm:$0xff] }
 0x3a0   : > { %14023 = vmatmul.mubr.msk.f32.gmra.mrb[38].mxu1 %vm4018_vm3, %v17579_v44  ;;  %v18092_v44 = vld [vmem:[#allocation3 + $0x208] sm:$0xff] }
 0x3a1   : > { %14025 = vmatprep.mubr.msk.f32.mxu1 %vm4018_vm3, %v17587_v1  ;;  %v18096_v1 = vld [vmem:[#allocation3 + $0x210] sm:$0xff] }
 0x3a4   : > { %14026 = vmatmul.mubr.msk.f32.gmra.mrb[40].mxu1 %vm4018_vm3, %v17593_v34  ;;  %v6436_v34 = vld [vmem:[#allocation9 + $0xd0] sm:$0xff] }
 0x3a5   : > { %14028 = vmatprep.mubr.msk.f32.mxu1 %vm4018_vm3, %v17599_v53  ;;  %v6437_v53 = vld [vmem:[#allocation9 + $0xd8] sm:$0xff] }
 0x3a8   : > { %14029 = vmatmul.mubr.msk.f32.gmra.mrb[42].mxu1 %vm4018_vm3, %v17605_v54  ;;  %v14913_v54 = vpack.c.bf16 %v6437_v53, %v6436_v34  ;;  %v19698_v34 = vld [vmem:[#allocation50_spill] sm:$0xff]  ;;  %v19699_v53 = vld [vmem:[#allocation52_spill] sm:$0xff] }
 0x3a9   : > { %14031 = vmatprep.mubr.msk.f32.mxu1 %vm4018_vm3, %v17611_v11  ;;  %v6824_v11 = vld [vmem:[#allocation9 + $0xe0] sm:$0xff] }
 0x3ac   : > { %14032 = vmatmul.mubr.msk.f32.gmra.mrb[44].mxu1 %vm4018_vm3, %v17617_v17  ;;  %v6825_v17 = vld [vmem:[#allocation9 + $0xe8] sm:$0xff] }
 0x3ad   : > { %14034 = vmatprep.mubr.msk.f32.mxu1 %vm4018_vm3, %v17623_v32  ;;  %v19674_v32 = vld [vmem:[#allocation22_spill] sm:$0xff] }
 0x3b0   : > { %14035 = vmatmul.mubr.msk.f32.gmra.mrb[46].mxu1 %vm4018_vm3, %v17629_v43  ;;  %v14917_v43 = vpack.c.bf16 %v6825_v17, %v6824_v11  ;;  %v18164_v11 = vld [vmem:[#allocation3 + $0x211] sm:$0xff] }
 0x3b1   : > { %14037 = vmatprep.mubr.msk.f32.mxu1 %vm4018_vm3, %v17635_v35  ;;  %v19675_v35 = vld [vmem:[#allocation37_spill] sm:$0xff] }
 0x3b2   : > { %v6826_v17 = vld [vmem:[#allocation9 + $0xf0] sm:$0xff] }
 0x3b4   : > { %14038 = vmatmul.mubr.msk.f32.gmra.mrb[48].mxu1 %vm4018_vm3, %v17641_v52  ;;  %v19676_v52 = vld [vmem:[#allocation23_spill] sm:$0xff] }
 0x3b5   : > { %14040 = vmatprep.mubr.msk.f32.mxu1 %vm4018_vm3, %v17647_v4  ;;  %v19677_v4 = vld [vmem:[#allocation38_spill] sm:$0xff] }
 0x3b8   : > { %14041 = vmatmul.mubr.msk.f32.gmra.mrb[50].mxu1 %vm4018_vm3, %v17653_v36  ;;  %v19678_v36 = vld [vmem:[#allocation24_spill] sm:$0xff] }
 0x3b9   : > { %14043 = vmatprep.mubr.msk.f32.mxu1 %vm4018_vm3, %v17659_v10  ;;  %v19679_v10 = vld [vmem:[#allocation39_spill] sm:$0xff] }
 0x3bc   : > { %14044 = vmatmul.mubr.msk.f32.gmra.mrb[52].mxu1 %vm4018_vm3, %v17665_v19  ;;  %v19680_v19 = vld [vmem:[#allocation25_spill] sm:$0xff] }
 0x3bd   : > { %14046 = vmatprep.mubr.msk.f32.mxu1 %vm4018_vm3, %v17671_v40  ;;  %v19681_v40 = vld [vmem:[#allocation40_spill] sm:$0xff] }
 0x3c0   : > { %14047 = vmatmul.mubr.msk.f32.gmra.mrb[54].mxu1 %vm4018_vm3, %v19667_v61  ;;  %v19691_v61 = vld [vmem:[#allocation45_spill] sm:$0xff] }
 0x3c1   : > { %14049 = vmatprep.mubr.msk.f32.mxu1 %vm4018_vm3, %v19668_v5  ;;  %v19692_v5 = vld [vmem:[#allocation31_spill] sm:$0xff] }
 0x3c4   : > { %14050 = vmatmul.mubr.msk.f32.gmra.mrb[56].mxu1 %vm4018_vm3, %v19669_v14  ;;  %v19693_v14 = vld [vmem:[#allocation32_spill] sm:$0xff] }
 0x3c5   : > { %14052 = vmatprep.mubr.msk.f32.mxu1 %vm4018_vm3, %v19670_v18  ;;  %v19694_v18 = vld [vmem:[#allocation46_spill] sm:$0xff] }
 0x3c8   : > { %14053 = vmatmul.mubr.msk.f32.gmra.mrb[58].mxu1 %vm4018_vm3, %v19671_v28  ;;  %v19695_v28 = vld [vmem:[#allocation33_spill] sm:$0xff] }
 0x3c9   : > { %14055 = vmatprep.mubr.msk.f32.mxu1 %vm4018_vm3, %v19672_v37  ;;  %v19696_v37 = vld [vmem:[#allocation48_spill] sm:$0xff] }
 0x3cc   : > { %14056 = vmatmul.mubr.msk.f32.gmra.mrb[60].mxu1 %vm4018_vm3, %v19673_v26  ;;  %v19697_v26 = vld [vmem:[#allocation49_spill] sm:$0xff] }
 0x3cd   : > { %14058 = vmatprep.mubr.msk.f32.mxu1 %vm4018_vm3, %v18092_v44 }
 0x3d0   : > { %14059 = vmatmul.mubr.msk.f32.gmra.mrb[62].mxu1 %vm4018_vm3, %v18096_v1 }
 0x3d1   : > { %14069 = vmatprep.mubr.msk.f32.mxu1 %vm4018_vm3, %v17839_v2  ;;  %v19683_v2 = vld [vmem:[#allocation41_spill] sm:$0xff] }
 0x3d4   : > { %14070 = vmatmul.mubr.msk.f32.vlgmr.msra.gmra.mrb[32].mxu1 %vm4018_vm3, %v17846_v24  ;;  %v19682_v24 = vld [vmem:[#allocation26_spill] sm:$0xff] }
 0x3d5   : > { %14912 = vmatpush3.bf16.msra.mxu1 %v14909_v3  ;;  %14072 = vmatprep.mubr.msk.f32.mxu1 %vm4018_vm3, %v19674_v32  ;;  %v19690_v3 = vld [vmem:[#allocation30_spill] sm:$0xff] }
 0x3d6   : > { %14914 = vmatprep.subr.bf16.mxu1 %v14913_v54 }
 0x3d8   : > { %14073 = vmatmul.mubr.msk.f32.gmra.mrb[34].mxu1 %vm4018_vm3, %v19675_v35 }
 0x3d9   : > { %14075 = vmatprep.mubr.msk.f32.mxu1 %vm4018_vm3, %v19676_v52  ;;  %14916 = vmatpush3.bf16.msra.mxu1 %v14913_v54  ;;  %v18160_v54 = vld [vmem:[#allocation3 + $0x209] sm:$0xff] }
 0x3da   : > { %14918 = vmatprep.subr.bf16.mxu1 %v14917_v43  ;;  %19700 = vst [vmem:[#allocation47_spill] sm:$0xff] %v18160_v54 }
 0x3dc   : > { %14076 = vmatmul.mubr.msk.f32.gmra.mrb[36].mxu1 %vm4018_vm3, %v19677_v4 }
 0x3dd   : > { %14078 = vmatprep.mubr.msk.f32.mxu1 %vm4018_vm3, %v19678_v36 }
 0x3e0   : > { %14079 = vmatmul.mubr.msk.f32.gmra.mrb[38].mxu1 %vm4018_vm3, %v19679_v10 }
 0x3e1   : > { %14081 = vmatprep.mubr.msk.f32.mxu1 %vm4018_vm3, %v19680_v19 }
 0x3e4   : > { %14082 = vmatmul.mubr.msk.f32.gmra.mrb[40].mxu1 %vm4018_vm3, %v19681_v40 }
 0x3e5   : > { %14084 = vmatprep.mubr.msk.f32.mxu1 %vm4018_vm3, %v19682_v24 }
 0x3e8   : > { %14085 = vmatmul.mubr.msk.f32.gmra.mrb[42].mxu1 %vm4018_vm3, %v19683_v2 }
 0x3e9   : > { %14087 = vmatprep.mubr.msk.f32.mxu1 %vm4018_vm3, %v19684_v0 }
 0x3ec   : > { %14088 = vmatmul.mubr.msk.f32.gmra.mrb[44].mxu1 %vm4018_vm3, %v19685_v6 }
 0x3ed   : > { %14090 = vmatprep.mubr.msk.f32.mxu1 %vm4018_vm3, %v19686_v9 }
 0x3f0   : > { %14091 = vmatmul.mubr.msk.f32.gmra.mrb[46].mxu1 %vm4018_vm3, %v19687_v30 }
 0x3f1   : > { %14093 = vmatprep.mubr.msk.f32.mxu1 %vm4018_vm3, %v19688_v41 }
 0x3f4   : > { %14094 = vmatmul.mubr.msk.f32.gmra.mrb[48].mxu1 %vm4018_vm3, %v19689_v58 }
 0x3f5   : > { %14096 = vmatprep.mubr.msk.f32.mxu1 %vm4018_vm3, %v19690_v3 }
 0x3f8   : > { %14097 = vmatmul.mubr.msk.f32.gmra.mrb[50].mxu1 %vm4018_vm3, %v19691_v61 }
 0x3f9   : > { %14099 = vmatprep.mubr.msk.f32.mxu1 %vm4018_vm3, %v19692_v5 }
 0x3fc   : > { %14100 = vmatmul.mubr.msk.f32.gmra.mrb[52].mxu1 %vm4018_vm3, %v19693_v14 }
 0x3fd   : > { %14102 = vmatprep.mubr.msk.f32.mxu1 %vm4018_vm3, %v19694_v18 }
 0x400   : > { %14103 = vmatmul.mubr.msk.f32.gmra.mrb[54].mxu1 %vm4018_vm3, %v19695_v28 }
 0x401   : > { %14105 = vmatprep.mubr.msk.f32.mxu1 %vm4018_vm3, %v19696_v37 }
 0x404   : > { %14106 = vmatmul.mubr.msk.f32.gmra.mrb[56].mxu1 %vm4018_vm3, %v19697_v26  ;;  %v6827_v26 = vld [vmem:[#allocation9 + $0xf8] sm:$0xff] }
 0x405   : > { %14108 = vmatprep.mubr.msk.f32.mxu1 %vm4018_vm3, %v19698_v34  ;;  %v7215_v34 = vld [vmem:[#allocation9 + $0x108] sm:$0xff] }
 0x408   : > { %14109 = vmatmul.mubr.msk.f32.gmra.mrb[58].mxu1 %vm4018_vm3, %v17951_v51  ;;  %v14921_v51 = vpack.c.bf16 %v6827_v26, %v6826_v17  ;;  %v6806_v26 = vld [vmem:[#allocation3 + $0x130] sm:$0xff] }
 0x409   : > { %14111 = vmatprep.mubr.msk.f32.mxu1 %vm4018_vm3, %v19699_v53  ;;  %v7214_v53 = vld [vmem:[#allocation9 + $0x100] sm:$0xff]  ;;  %v6810_v17 = vld [vmem:[#allocation3 + $0x170] sm:$0xff] }
 0x40c   : > { %14112 = vmatmul.mubr.msk.f32.gmra.mrb[60].mxu1 %vm4018_vm3, %v17959_v59 }
 0x40d   : > { %14114 = vmatprep.mubr.msk.f32.mxu1 %vm4018_vm3, %v18160_v54  ;;  %v14925_v54 = vpack.c.bf16 %v7215_v34, %v7214_v53  ;;  %v6807_v34 = vld [vmem:[#allocation3 + $0x148] sm:$0xff]  ;;  %v6808_v53 = vld [vmem:[#allocation3 + $0x150] sm:$0xff] }
 0x410   : > { %14115 = vmatmul.mubr.msk.f32.gmra.mrb[62].mxu1 %vm4018_vm3, %v18164_v11 }
 0x411   : > { %14125 = vmatprep.mubr.msk.f32.mxu1 %vm4018_vm3, %v17724_v7  ;;  %v6431_v7 = vld [vmem:[#allocation3 + $0x227] sm:$0xff] }
 0x414   : > { %14126 = vmatmul.mubr.msk.f32.vlgmr.msra.gmra.mrb[32].mxu1 %vm4018_vm3, %v17729_v21  ;;  %v6432_v21 = vld [vmem:[#allocation3 + $0x22f] sm:$0xff] }
 0x415   : > { %14920 = vmatpush3.bf16.msra.mxu1 %v14917_v43  ;;  %14128 = vmatprep.mubr.msk.f32.mxu1 %vm4018_vm3, %v17733_v12  ;;  %v6791_v12 = vld [vmem:[#allocation3 + $0x48] sm:$0xff] }
 0x416   : > { %14922 = vmatprep.subr.bf16.mxu1 %v14921_v51  ;;  %v6805_v43 = vld [vmem:[#allocation3 + $0x128] sm:$0xff] }
 0x418   : > { %14129 = vmatmul.mubr.msk.f32.gmra.mrb[34].mxu1 %vm4018_vm3, %v17737_v13  ;;  %v7216_v13 = vld [vmem:[#allocation9 + $0x110] sm:$0xff] }
 0x419   : > { %14131 = vmatprep.mubr.msk.f32.mxu1 %vm4018_vm3, %v17741_v15  ;;  %14924 = vmatpush3.bf16.msra.mxu1 %v14921_v51  ;;  %v7217_v15 = vld [vmem:[#allocation9 + $0x118] sm:$0xff]  ;;  %v6802_v51 = vld [vmem:[#allocation3 + $0xf0] sm:$0xff] }
 0x41a   : > { %14926 = vmatprep.subr.bf16.mxu1 %v14925_v54 }
 0x41c   : > { %14132 = vmatmul.mubr.msk.f32.gmra.mrb[36].mxu1 %vm4018_vm3, %v17745_v20  ;;  %v7822_v20 = vld [vmem:[#allocation12 + $0x40] sm:$0xff] }
 0x41d   : > { %14134 = vmatprep.mubr.msk.f32.mxu1 %vm4018_vm3, %v17749_v22  ;;  %v7823_v22 = vld [vmem:[#allocation12 + $0x48] sm:$0xff] }
 0x420   : > { %14135 = vmatmul.mubr.msk.f32.gmra.mrb[38].mxu1 %vm4018_vm3, %v17753_v23  ;;  %v7824_v23 = vld [vmem:[#allocation12 + $0x50] sm:$0xff] }
 0x421   : > { %14137 = vmatprep.mubr.msk.f32.mxu1 %vm4018_vm3, %v17757_v25  ;;  %v14933_v25 = vpack.c.bf16 %v7823_v22, %v7822_v20  ;;  %v6816_v20 = vld [vmem:[#allocation3 + $0x1d0] sm:$0xff]  ;;  %v6817_v22 = vld [vmem:[#allocation3 + $0x1e8] sm:$0xff] }
 0x423   : > { %14934 = vmatprep.subr.bf16.mxu0 %v14933_v25 }
 0x424   : > { %14138 = vmatmul.mubr.msk.f32.gmra.mrb[40].mxu1 %vm4018_vm3, %v17761_v27  ;;  %v7825_v27 = vld [vmem:[#allocation12 + $0x58] sm:$0xff]  ;;  %14936 = vmatpush3.bf16.msra.mxu0 %v14933_v25  ;;  %v6821_v25 = vld [vmem:[#allocation3 + $0x228] sm:$0xff] }
 0x425   : > { %14140 = vmatprep.mubr.msk.f32.mxu1 %vm4018_vm3, %v17765_v29  ;;  %v14929_v29 = vpack.c.bf16 %v7217_v15, %v7216_v13  ;;  %v6814_v13 = vld [vmem:[#allocation3 + $0x1b0] sm:$0xff]  ;;  %v6815_v15 = vld [vmem:[#allocation3 + $0x1c8] sm:$0xff] }
 0x428   : > { %14141 = vmatmul.mubr.msk.f32.gmra.mrb[42].mxu1 %vm4018_vm3, %v17769_v38  ;;  %v14937_v38 = vpack.c.bf16 %v7825_v27, %v7824_v23  ;;  %v6818_v23 = vld [vmem:[#allocation3 + $0x1f0] sm:$0xff] }
 0x429   : > { %14143 = vmatprep.mubr.msk.f32.mxu1 %vm4018_vm3, %v17773_v42  ;;  %v6792_v42 = vld [vmem:[#allocation3 + $0x50] sm:$0xff] }
 0x42a   : > { %14938 = vmatprep.subr.bf16.mxu0 %v14937_v38  ;;  %v6822_v27 = vld [vmem:[#allocation3 + $0x230] sm:$0xff] }
 0x42b   : > { %14940 = vmatpush3.bf16.msra.mxu0 %v14937_v38 }
 0x42c   : > { %14144 = vmatmul.mubr.msk.f32.gmra.mrb[44].mxu1 %vm4018_vm3, %v17777_v57  ;;  %v7826_v57 = vld [vmem:[#allocation12 + $0x60] sm:$0xff] }
 0x42d   : > { %14146 = vmatprep.mubr.msk.f32.mxu1 %vm4018_vm3, %v17781_v63  ;;  %v7827_v63 = vld [vmem:[#allocation12 + $0x68] sm:$0xff] }
 0x430   : > { %14147 = vmatmul.mubr.msk.f32.gmra.mrb[46].mxu1 %vm4018_vm3, %v17785_v56  ;;  %v6793_v56 = vld [vmem:[#allocation3 + $0x68] sm:$0xff] }
 0x431   : > { %14149 = vmatprep.mubr.msk.f32.mxu1 %vm4018_vm3, %v17789_v60  ;;  %v14941_v60 = vpack.c.bf16 %v7827_v63, %v7826_v57 }
 0x433   : > { %14942 = vmatprep.subr.bf16.mxu0 %v14941_v60 }
 0x434   : > { %14150 = vmatmul.mubr.msk.f32.gmra.mrb[48].mxu1 %vm4018_vm3, %v17793_v31  ;;  %v7828_v31 = vld [vmem:[#allocation12 + $0x70] sm:$0xff]  ;;  %14944 = vmatpush3.bf16.msra.mxu0 %v14941_v60 }
 0x435   : > { %14152 = vmatprep.mubr.msk.f32.mxu1 %vm4018_vm3, %v17797_v45  ;;  %v7829_v45 = vld [vmem:[#allocation12 + $0x78] sm:$0xff] }
 0x438   : > { %14153 = vmatmul.mubr.msk.f32.gmra.mrb[50].mxu1 %vm4018_vm3, %v17801_v39  ;;  %v6794_v39 = vld [vmem:[#allocation3 + $0x70] sm:$0xff] }
 0x439   : > { %14155 = vmatprep.mubr.msk.f32.mxu1 %vm4018_vm3, %v17805_v50  ;;  %v6795_v50 = vld [vmem:[#allocation3 + $0x88] sm:$0xff] }
 0x43c   : > { %14156 = vmatmul.mubr.msk.f32.gmra.mrb[52].mxu1 %vm4018_vm3, %v17809_v16  ;;  %v14945_v16 = vpack.c.bf16 %v7829_v45, %v7828_v31 }
 0x43d   : > { %14158 = vmatprep.mubr.msk.f32.mxu1 %vm4018_vm3, %v17813_v46  ;;  %v6796_v46 = vld [vmem:[#allocation3 + $0x90] sm:$0xff] }
 0x43e   : > { %14946 = vmatprep.subr.bf16.mxu0 %v14945_v16 }
 0x43f   : > { %14948 = vmatpush3.bf16.msra.mxu0 %v14945_v16 }
 0x440   : > { %14159 = vmatmul.mubr.msk.f32.gmra.mrb[54].mxu1 %vm4018_vm3, %v17817_v49  ;;  %v6797_v49 = vld [vmem:[#allocation3 + $0xa8] sm:$0xff] }
 0x441   : > { %14161 = vmatprep.mubr.msk.f32.mxu1 %vm4018_vm3, %v17821_v33  ;;  %v6798_v33 = vld [vmem:[#allocation3 + $0xb0] sm:$0xff] }
 0x444   : > { %14162 = vmatmul.mubr.msk.f32.gmra.mrb[56].mxu1 %vm4018_vm3, %v17825_v48  ;;  %v6799_v48 = vld [vmem:[#allocation3 + $0xc8] sm:$0xff] }
 0x445   : > { %14164 = vmatprep.mubr.msk.f32.mxu1 %vm4018_vm3, %v17829_v8  ;;  %v6800_v8 = vld [vmem:[#allocation3 + $0xd0] sm:$0xff] }
 0x448   : > { %14165 = vmatmul.mubr.msk.f32.gmra.mrb[58].mxu1 %vm4018_vm3, %v17833_v55  ;;  %v6801_v55 = vld [vmem:[#allocation3 + $0xe8] sm:$0xff] }
 0x449   : > { %14167 = vmatprep.mubr.msk.f32.mxu1 %vm4018_vm3, %v18024_v47  ;;  %v6803_v47 = vld [vmem:[#allocation3 + $0x108] sm:$0xff] }
 0x44c   : > { %14168 = vmatmul.mubr.msk.f32.gmra.mrb[60].mxu1 %vm4018_vm3, %v18028_v62  ;;  %v6804_v62 = vld [vmem:[#allocation3 + $0x110] sm:$0xff] }
 0x44d   : > { %14170 = vmatprep.mubr.msk.f32.mxu1 %vm4018_vm3, %v6431_v7  ;;  %v6811_v7 = vld [vmem:[#allocation3 + $0x188] sm:$0xff] }
 0x450   : > { %14171 = vmatmul.mubr.msk.f32.gmra.mrb[62].mxu1 %vm4018_vm3, %v6432_v21  ;;  %v6812_v21 = vld [vmem:[#allocation3 + $0x190] sm:$0xff] }
 0x451   : > { %14181 = vmatprep.mubr.msk.f32.mxu1 %vm4018_vm3, %v6791_v12  ;;  %v6813_v12 = vld [vmem:[#allocation3 + $0x1a8] sm:$0xff] }
 0x454   : > { %14182 = vmatmul.mubr.msk.f32.vlgmr.msra.gmra.mrb[32].mxu1 %vm4018_vm3, %v6792_v42 }
 0x455   : > { %14928 = vmatpush3.bf16.msra.mxu1 %v14925_v54  ;;  %14184 = vmatprep.mubr.msk.f32.mxu1 %vm4018_vm3, %v6793_v56  ;;  %v6809_v54 = vld [vmem:[#allocation3 + $0x168] sm:$0xff] }
 0x456   : > { %14930 = vmatprep.subr.bf16.mxu1 %v14929_v29 }
 0x458   : > { %14185 = vmatmul.mubr.msk.f32.gmra.mrb[34].mxu1 %vm4018_vm3, %v6794_v39 }
 0x459   : > { %14187 = vmatprep.mubr.msk.f32.mxu1 %vm4018_vm3, %v6795_v50  ;;  %14932 = vmatpush3.bf16.msra.mxu1 %v14929_v29 }
 0x45c   : > { %14188 = vmatmul.mubr.msk.f32.gmra.mrb[36].mxu1 %vm4018_vm3, %v6796_v46 }
 0x45d   : > { %14190 = vmatprep.mubr.msk.f32.mxu1 %vm4018_vm3, %v6797_v49 }
 0x460   : > { %14191 = vmatmul.mubr.msk.f32.gmra.mrb[38].mxu1 %vm4018_vm3, %v6798_v33 }
 0x461   : > { %14193 = vmatprep.mubr.msk.f32.mxu1 %vm4018_vm3, %v6799_v48 }
 0x464   : > { %14194 = vmatmul.mubr.msk.f32.gmra.mrb[40].mxu1 %vm4018_vm3, %v6800_v8 }
 0x465   : > { %14196 = vmatprep.mubr.msk.f32.mxu1 %vm4018_vm3, %v6801_v55 }
 0x468   : > { %14197 = vmatmul.mubr.msk.f32.gmra.mrb[42].mxu1 %vm4018_vm3, %v6802_v51 }
 0x469   : > { %14199 = vmatprep.mubr.msk.f32.mxu1 %vm4018_vm3, %v6803_v47 }
 0x46c   : > { %14200 = vmatmul.mubr.msk.f32.gmra.mrb[44].mxu1 %vm4018_vm3, %v6804_v62 }
 0x46d   : > { %14202 = vmatprep.mubr.msk.f32.mxu1 %vm4018_vm3, %v6805_v43 }
 0x470   : > { %14203 = vmatmul.mubr.msk.f32.gmra.mrb[46].mxu1 %vm4018_vm3, %v6806_v26 }
 0x471   : > { %14205 = vmatprep.mubr.msk.f32.mxu1 %vm4018_vm3, %v6807_v34 }
 0x474   : > { %14206 = vmatmul.mubr.msk.f32.gmra.mrb[48].mxu1 %vm4018_vm3, %v6808_v53 }
 0x475   : > { %14208 = vmatprep.mubr.msk.f32.mxu1 %vm4018_vm3, %v6809_v54 }
 0x478   : > { %14209 = vmatmul.mubr.msk.f32.gmra.mrb[50].mxu1 %vm4018_vm3, %v6810_v17 }
 0x479   : > { %14211 = vmatprep.mubr.msk.f32.mxu1 %vm4018_vm3, %v6811_v7 }
 0x47c   : > { %14212 = vmatmul.mubr.msk.f32.gmra.mrb[52].mxu1 %vm4018_vm3, %v6812_v21 }
 0x47d   : > { %14214 = vmatprep.mubr.msk.f32.mxu1 %vm4018_vm3, %v6813_v12 }
 0x480   : > { %14215 = vmatmul.mubr.msk.f32.gmra.mrb[54].mxu1 %vm4018_vm3, %v6814_v13 }
 0x481   : > { %14217 = vmatprep.mubr.msk.f32.mxu1 %vm4018_vm3, %v6815_v15 }
 0x484   : > { %14218 = vmatmul.mubr.msk.f32.gmra.mrb[56].mxu1 %vm4018_vm3, %v6816_v20 }
 0x485   : > { %14220 = vmatprep.mubr.msk.f32.mxu1 %vm4018_vm3, %v6817_v22 }
 0x488   : > { %14221 = vmatmul.mubr.msk.f32.gmra.mrb[58].mxu1 %vm4018_vm3, %v6818_v23 }
 0x489   : > { %14223 = vmatprep.mubr.msk.f32.mxu1 %vm4018_vm3, %v18092_v44  ;;  %v19701_v44 = vld [vmem:[#allocation49_spill] sm:$0xff] }
 0x48c   : > { %14224 = vmatmul.mubr.msk.f32.gmra.mrb[60].mxu1 %vm4018_vm3, %v18096_v1  ;;  %v19702_v1 = vld [vmem:[#allocation50_spill] sm:$0xff] }
 0x48d   : > { %14226 = vmatprep.mubr.msk.f32.mxu1 %vm4018_vm3, %v6821_v25 }
 0x490   : > { %14227 = vmatmul.mubr.msk.f32.gmra.mrb[62].mxu1 %vm4018_vm3, %v6822_v27 }
 0x491   : > { %14237 = vmatprep.mubr.msk.f32.mxu1 %vm4018_vm3, %v19674_v32  ;;  %v19703_v32 = vld [vmem:[#allocation51_spill] sm:$0xff] }
 0x494   : > { %14238 = vmatmul.mubr.msk.f32.vlgmr.msra.gmra.mrb[32].mxu1 %vm4018_vm3, %v19675_v35  ;;  %v19704_v35 = vld [vmem:[#allocation52_spill] sm:$0xff] }
 0x495   : > { %14240 = vmatprep.mubr.msk.f32.mxu1 %vm4018_vm3, %v19676_v52  ;;  %v19705_v52 = vld [vmem:[#allocation47_spill] sm:$0xff] }
 0x498   : > { %14241 = vmatmul.mubr.msk.f32.gmra.mrb[34].mxu1 %vm4018_vm3, %v19677_v4  ;;  %v7211_v4 = vld [vmem:[#allocation3 + $0x229] sm:$0xff] }
 0x499   : > { %14243 = vmatprep.mubr.msk.f32.mxu1 %vm4018_vm3, %v19678_v36  ;;  %v7212_v36 = vld [vmem:[#allocation3 + $0x231] sm:$0xff] }
 0x49c   : > { %14244 = vmatmul.mubr.msk.f32.gmra.mrb[36].mxu1 %vm4018_vm3, %v19679_v10  ;;  %v19706_v10 = vmov 0.0  }
 0x49d   : > { %14246 = vmatprep.mubr.msk.f32.mxu1 %vm4018_vm3, %v19680_v19  ;;  %7650 = vst.msk [vmem:[#allocation4 + $0x30] sm:$0xff] %vm7642_vm5, %v19706_v10  ;;  %7643 = vst.msk [vmem:[#allocation4] sm:$0xff] %vm7642_vm5, %v19706_v10 }
 0x49e   : > { %7644 = vst.msk [vmem:[#allocation4 + $0x8] sm:$0xff] %vm7642_vm5, %v19706_v10  ;;  %7645 = vst.msk [vmem:[#allocation4 + $0x10] sm:$0xff] %vm7642_vm5, %v19706_v10 }
 0x49f   : > { %7648 = vst.msk [vmem:[#allocation4 + $0x20] sm:$0xff] %vm7642_vm5, %v19706_v10  ;;  %7649 = vst.msk [vmem:[#allocation4 + $0x28] sm:$0xff] %vm7642_vm5, %v19706_v10 }
 0x4a0   : > { %14247 = vmatmul.mubr.msk.f32.gmra.mrb[38].mxu1 %vm4018_vm3, %v19681_v40  ;;  %7652 = vst.msk [vmem:[#allocation4 + $0x40] sm:$0xff] %vm7642_vm5, %v19706_v10  ;;  %7653 = vst.msk [vmem:[#allocation4 + $0x48] sm:$0xff] %vm7642_vm5, %v19706_v10  ;;  %v7781_v40 = vld [vmem:[#allocation12] sm:$0xff] }
 0x4a1   : > { %14249 = vmatprep.mubr.msk.f32.mxu1 %vm4018_vm3, %v19682_v24  ;;  %7654 = vst.msk [vmem:[#allocation4 + $0x50] sm:$0xff] %vm7642_vm5, %v19706_v10  ;;  %7656 = vst.msk [vmem:[#allocation4 + $0x60] sm:$0xff] %vm7642_vm5, %v19706_v10  ;;  %v7782_v24 = vld [vmem:[#allocation12 + $0x8] sm:$0xff] }
 0x4a2   : > { %7657 = vst.msk [vmem:[#allocation4 + $0x68] sm:$0xff] %vm7642_vm5, %v19706_v10  ;;  %7658 = vst.msk [vmem:[#allocation4 + $0x70] sm:$0xff] %vm7642_vm5, %v19706_v10 }
 0x4a3   : > { %7660 = vst.msk [vmem:[#allocation4 + $0x80] sm:$0xff] %vm7642_vm5, %v19706_v10  ;;  %7661 = vst.msk [vmem:[#allocation4 + $0x88] sm:$0xff] %vm7642_vm5, %v19706_v10 }
 0x4a4   : > { %14250 = vmatmul.mubr.msk.f32.gmra.mrb[40].mxu1 %vm4018_vm3, %v19683_v2  ;;  %7662 = vst.msk [vmem:[#allocation4 + $0x90] sm:$0xff] %vm7642_vm5, %v19706_v10  ;;  %7664 = vst.msk [vmem:[#allocation4 + $0xa0] sm:$0xff] %vm7642_vm5, %v19706_v10  ;;  %v14949_v2 = vpack.c.bf16 %v7782_v24, %v7781_v40 }
 0x4a5   : > { %14252 = vmatprep.mubr.msk.f32.mxu1 %vm4018_vm3, %v19684_v0  ;;  %7665 = vst.msk [vmem:[#allocation4 + $0xa8] sm:$0xff] %vm7642_vm5, %v19706_v10  ;;  %7666 = vst.msk [vmem:[#allocation4 + $0xb0] sm:$0xff] %vm7642_vm5, %v19706_v10  ;;  %v7790_v19 = vld [vmem:[#allocation4 + $0x10] sm:$0xff]  ;;  %v7783_v0 = vld [vmem:[#allocation12 + $0x10] sm:$0xff] }
 0x4a6   : > { %7668 = vst.msk [vmem:[#allocation4 + $0xc0] sm:$0xff] %vm7642_vm5, %v19706_v10  ;;  %7669 = vst.msk [vmem:[#allocation4 + $0xc8] sm:$0xff] %vm7642_vm5, %v19706_v10  ;;  %14950 = vmatprep.subr.bf16.mxu0 %v14949_v2 }
 0x4a7   : > { %7670 = vst.msk [vmem:[#allocation4 + $0xd0] sm:$0xff] %vm7642_vm5, %v19706_v10  ;;  %7672 = vst.msk [vmem:[#allocation4 + $0xe0] sm:$0xff] %vm7642_vm5, %v19706_v10 }
 0x4a8   : > { %14253 = vmatmul.mubr.msk.f32.gmra.mrb[42].mxu1 %vm4018_vm3, %v19685_v6  ;;  %7673 = vst.msk [vmem:[#allocation4 + $0xe8] sm:$0xff] %vm7642_vm5, %v19706_v10  ;;  %7674 = vst.msk [vmem:[#allocation4 + $0xf0] sm:$0xff] %vm7642_vm5, %v19706_v10  ;;  %v7784_v6 = vld [vmem:[#allocation12 + $0x18] sm:$0xff] }
 0x4a9   : > { %14255 = vmatprep.mubr.msk.f32.mxu1 %vm4018_vm3, %v19686_v9  ;;  %7676 = vst.msk [vmem:[#allocation4 + $0x100] sm:$0xff] %vm7642_vm5, %v19706_v10  ;;  %7677 = vst.msk [vmem:[#allocation4 + $0x108] sm:$0xff] %vm7642_vm5, %v19706_v10  ;;  %v14953_v9 = vpack.c.bf16 %v7784_v6, %v7783_v0 }
 0x4aa   : > { %7678 = vst.msk [vmem:[#allocation4 + $0x110] sm:$0xff] %vm7642_vm5, %v19706_v10  ;;  %7680 = vst.msk [vmem:[#allocation4 + $0x120] sm:$0xff] %vm7642_vm5, %v19706_v10 }
 0x4ab   : > { %7681 = vst.msk [vmem:[#allocation4 + $0x128] sm:$0xff] %vm7642_vm5, %v19706_v10  ;;  %7682 = vst.msk [vmem:[#allocation4 + $0x130] sm:$0xff] %vm7642_vm5, %v19706_v10 }
 0x4ac   : > { %14256 = vmatmul.mubr.msk.f32.gmra.mrb[44].mxu1 %vm4018_vm3, %v19687_v30  ;;  %7684 = vst.msk [vmem:[#allocation4 + $0x140] sm:$0xff] %vm7642_vm5, %v19706_v10  ;;  %7685 = vst.msk [vmem:[#allocation4 + $0x148] sm:$0xff] %vm7642_vm5, %v19706_v10  ;;  %v7785_v30 = vld [vmem:[#allocation12 + $0x20] sm:$0xff] }
 0x4ad   : > { %14258 = vmatprep.mubr.msk.f32.mxu1 %vm4018_vm3, %v19688_v41  ;;  %7686 = vst.msk [vmem:[#allocation4 + $0x150] sm:$0xff] %vm7642_vm5, %v19706_v10  ;;  %7688 = vst.msk [vmem:[#allocation4 + $0x160] sm:$0xff] %vm7642_vm5, %v19706_v10  ;;  %v7786_v41 = vld [vmem:[#allocation12 + $0x28] sm:$0xff] }
 0x4ae   : > { %7689 = vst.msk [vmem:[#allocation4 + $0x168] sm:$0xff] %vm7642_vm5, %v19706_v10  ;;  %7690 = vst.msk [vmem:[#allocation4 + $0x170] sm:$0xff] %vm7642_vm5, %v19706_v10 }
 0x4af   : > { %7692 = vst.msk [vmem:[#allocation4 + $0x180] sm:$0xff] %vm7642_vm5, %v19706_v10  ;;  %7693 = vst.msk [vmem:[#allocation4 + $0x188] sm:$0xff] %vm7642_vm5, %v19706_v10 }
 0x4b0   : > { %14259 = vmatmul.mubr.msk.f32.gmra.mrb[46].mxu1 %vm4018_vm3, %v19689_v58  ;;  %7694 = vst.msk [vmem:[#allocation4 + $0x190] sm:$0xff] %vm7642_vm5, %v19706_v10  ;;  %7696 = vst.msk [vmem:[#allocation4 + $0x1a0] sm:$0xff] %vm7642_vm5, %v19706_v10  ;;  %v14957_v58 = vpack.c.bf16 %v7786_v41, %v7785_v30 }
 0x4b1   : > { %14261 = vmatprep.mubr.msk.f32.mxu1 %vm4018_vm3, %v19690_v3  ;;  %7697 = vst.msk [vmem:[#allocation4 + $0x1a8] sm:$0xff] %vm7642_vm5, %v19706_v10  ;;  %7698 = vst.msk [vmem:[#allocation4 + $0x1b0] sm:$0xff] %vm7642_vm5, %v19706_v10  ;;  %v7787_v3 = vld [vmem:[#allocation12 + $0x30] sm:$0xff] }
 0x4b2   : > { %7700 = vst.msk [vmem:[#allocation4 + $0x1c0] sm:$0xff] %vm7642_vm5, %v19706_v10  ;;  %7701 = vst.msk [vmem:[#allocation4 + $0x1c8] sm:$0xff] %vm7642_vm5, %v19706_v10 }
 0x4b3   : > { %7702 = vst.msk [vmem:[#allocation4 + $0x1d0] sm:$0xff] %vm7642_vm5, %v19706_v10  ;;  %7704 = vst.msk [vmem:[#allocation4 + $0x1e0] sm:$0xff] %vm7642_vm5, %v19706_v10 }
 0x4b4   : > { %14262 = vmatmul.mubr.msk.f32.gmra.mrb[48].mxu1 %vm4018_vm3, %v19691_v61  ;;  %7705 = vst.msk [vmem:[#allocation4 + $0x1e8] sm:$0xff] %vm7642_vm5, %v19706_v10  ;;  %7706 = vst.msk [vmem:[#allocation4 + $0x1f0] sm:$0xff] %vm7642_vm5, %v19706_v10  ;;  %v7788_v61 = vld [vmem:[#allocation12 + $0x38] sm:$0xff] }
 0x4b5   : > { %14264 = vmatprep.mubr.msk.f32.mxu1 %vm4018_vm3, %v19692_v5  ;;  %7708 = vst.msk [vmem:[#allocation4 + $0x200] sm:$0xff] %vm7642_vm5, %v19706_v10  ;;  %7709 = vst.msk [vmem:[#allocation4 + $0x208] sm:$0xff] %vm7642_vm5, %v19706_v10  ;;  %v14961_v5 = vpack.c.bf16 %v7788_v61, %v7787_v3 }
 0x4b6   : > { %7710 = vst.msk [vmem:[#allocation4 + $0x210] sm:$0xff] %vm7642_vm5, %v19706_v10  ;;  %7712 = vst.msk [vmem:[#allocation4 + $0x220] sm:$0xff] %vm7642_vm5, %v19706_v10 }
 0x4b7   : > { %7713 = vst.msk [vmem:[#allocation4 + $0x228] sm:$0xff] %vm7642_vm5, %v19706_v10  ;;  %7714 = vst.msk [vmem:[#allocation4 + $0x230] sm:$0xff] %vm7642_vm5, %v19706_v10 }
 0x4b8   : > { %14265 = vmatmul.mubr.msk.f32.gmra.mrb[50].mxu1 %vm4018_vm3, %v19693_v14  ;;  %7647 = vst.msk [vmem:[#allocation4 + $0x18] sm:$0x1] %vm7646_vm6, %v19706_v10  ;;  %7651 = vst.msk [vmem:[#allocation4 + $0x38] sm:$0x1] %vm7646_vm6, %v19706_v10  ;;  %v8505_v14 = vld [vmem:[#allocation12 + $0x80] sm:$0xff] }
 0x4b9   : > { %14267 = vmatprep.mubr.msk.f32.mxu1 %vm4018_vm3, %v19694_v18  ;;  %7655 = vst.msk [vmem:[#allocation4 + $0x58] sm:$0x1] %vm7646_vm6, %v19706_v10  ;;  %7659 = vst.msk [vmem:[#allocation4 + $0x78] sm:$0x1] %vm7646_vm6, %v19706_v10  ;;  %v8506_v18 = vld [vmem:[#allocation12 + $0x88] sm:$0xff] }
 0x4ba   : > { %7663 = vst.msk [vmem:[#allocation4 + $0x98] sm:$0x1] %vm7646_vm6, %v19706_v10  ;;  %7667 = vst.msk [vmem:[#allocation4 + $0xb8] sm:$0x1] %vm7646_vm6, %v19706_v10 }
 0x4bb   : > { %7671 = vst.msk [vmem:[#allocation4 + $0xd8] sm:$0x1] %vm7646_vm6, %v19706_v10  ;;  %7675 = vst.msk [vmem:[#allocation4 + $0xf8] sm:$0x1] %vm7646_vm6, %v19706_v10 }
 0x4bc   : > { %14268 = vmatmul.mubr.msk.f32.gmra.mrb[52].mxu1 %vm4018_vm3, %v19695_v28  ;;  %7679 = vst.msk [vmem:[#allocation4 + $0x118] sm:$0x1] %vm7646_vm6, %v19706_v10  ;;  %7683 = vst.msk [vmem:[#allocation4 + $0x138] sm:$0x1] %vm7646_vm6, %v19706_v10  ;;  %v18472_v28 = vpack.c.bf16 %v8506_v18, %v8505_v14 }
 0x4bd   : > { %14270 = vmatprep.mubr.msk.f32.mxu1 %vm4018_vm3, %v19696_v37  ;;  %7687 = vst.msk [vmem:[#allocation4 + $0x158] sm:$0x1] %vm7646_vm6, %v19706_v10  ;;  %7691 = vst.msk [vmem:[#allocation4 + $0x178] sm:$0x1] %vm7646_vm6, %v19706_v10  ;;  %v18475_v37 = vld [vmem:[#allocation10] ss:$0 sm:$0xff] }
 0x4be   : > { %7695 = vst.msk [vmem:[#allocation4 + $0x198] sm:$0x1] %vm7646_vm6, %v19706_v10  ;;  %7699 = vst.msk [vmem:[#allocation4 + $0x1b8] sm:$0x1] %vm7646_vm6, %v19706_v10 }
 0x4bf   : > { %7703 = vst.msk [vmem:[#allocation4 + $0x1d8] sm:$0x1] %vm7646_vm6, %v19706_v10  ;;  %7707 = vst.msk [vmem:[#allocation4 + $0x1f8] sm:$0x1] %vm7646_vm6, %v19706_v10 }
 0x4c0   : > { %14271 = vmatmul.mubr.msk.f32.gmra.mrb[54].mxu1 %vm4018_vm3, %v19701_v44  ;;  %7711 = vst.msk [vmem:[#allocation4 + $0x218] sm:$0x1] %vm7646_vm6, %v19706_v10  ;;  %7715 = vst.msk [vmem:[#allocation4 + $0x238] sm:$0x1] %vm7646_vm6, %v19706_v10 }
 0x4c1   : > { %14273 = vmatprep.mubr.msk.f32.mxu1 %vm4018_vm3, %v19702_v1 }
 0x4c4   : > { %14274 = vmatmul.mubr.msk.f32.gmra.mrb[56].mxu1 %vm4018_vm3, %v19703_v32 }
 0x4c5   : > { %14276 = vmatprep.mubr.msk.f32.mxu1 %vm4018_vm3, %v19704_v35 }
 0x4c8   : > { %14277 = vmatmul.mubr.msk.f32.gmra.mrb[58].mxu1 %vm4018_vm3, %v17959_v59  ;;  %v7789_v59 = vld [vmem:[#allocation4 + $0x8] sm:$0xff] }
 0x4c9   : > { %14279 = vmatprep.mubr.msk.f32.mxu1 %vm4018_vm3, %v19705_v52  ;;  %14301 = vmatprep.mubr.msk.f32.mxu0 %vm7642_vm5, %v7789_v59 }
 0x4ca   : > { %14302 = vmatmul.mubr.msk.f32.vlgmr.msra.gmra.mrb[32].mxu0 %vm7642_vm5, %v7790_v19 }
 0x4cb   : > { %14952 = vmatpush3.bf16.msra.mxu0 %v14949_v2 }
 0x4cc   : > { %14280 = vmatmul.mubr.msk.f32.gmra.mrb[60].mxu1 %vm4018_vm3, %v18164_v11  ;;  %14954 = vmatprep.subr.bf16.mxu0 %v14953_v9 }
 0x4cd   : > { %14282 = vmatprep.mubr.msk.f32.mxu1 %vm4018_vm3, %v7211_v4 }
 0x4cf   : > { %14956 = vmatpush3.bf16.msra.mxu0 %v14953_v9 }
 0x4d0   : > { %14283 = vmatmul.mubr.msk.f32.gmra.mrb[62].mxu1 %vm4018_vm3, %v7212_v36  ;;  %14958 = vmatprep.subr.bf16.mxu0 %v14957_v58 }
 0x4d3   : > { %14960 = vmatpush3.bf16.msra.mxu0 %v14957_v58 }
 0x4d4   : > { %14962 = vmatprep.subr.bf16.mxu0 %v14961_v5 }
 0x4d7   : > { %14964 = vmatpush3.bf16.msra.mxu0 %v14961_v5 }
 0x4d8   : > { %14966 = vmatprep.subr.bf16.mxu0 %v18472_v28 }
 0x567   : > { %v14239_v11 = vpop.f32.mrb[32].mxu1 }
 0x568   : > { %v7579_v29 = vadd.f32 %v14239_v11, %v18475_v37  ;;  %v7380_v38 = vpop.f32.mrb[33].mxu1 }
 0x569   : > { %v7578_v42 = vadd.f32 %v18475_v37, %v7380_v38 }
 0x56a   : > { %v7611_v57 = vmax.f32 %v7579_v29, 0.0 }
 0x56b   : > { %v7610_v63 = vmax.f32 %v7578_v42, 0.0  ;;  %v14242_v56 = vpop.f32.mrb[34].mxu1 }
 0x56c   : > { %7718 = vst.msk [vmem:[#allocation4 + $0x30] sm:$0xff] %vm7642_vm5, %v7611_v57  ;;  %v7581_v60 = vadd.f32 %v14242_v56, %v18475_v37  ;;  %v7390_v31 = vpop.f32.mrb[35].mxu1 }
 0x56d   : > { %7717 = vst.msk [vmem:[#allocation4 + $0x28] sm:$0xff] %vm7642_vm5, %v7610_v63  ;;  %v7580_v45 = vadd.f32 %v18475_v37, %v7390_v31 }
 0x56e   : > { %v7613_v39 = vmax.f32 %v7581_v60, 0.0 }
 0x56f   : > { %v7612_v50 = vmax.f32 %v7580_v45, 0.0  ;;  %v14245_v16 = vpop.f32.mrb[36].mxu1 }
 0x570   : > { %7720 = vst.msk [vmem:[#allocation4 + $0x50] sm:$0xff] %vm7642_vm5, %v7613_v39  ;;  %v7583_v46 = vadd.f32 %v14245_v16, %v18475_v37  ;;  %v7400_v49 = vpop.f32.mrb[37].mxu1 }
 0x571   : > { %7719 = vst.msk [vmem:[#allocation4 + $0x48] sm:$0xff] %vm7642_vm5, %v7612_v50  ;;  %v7582_v33 = vadd.f32 %v18475_v37, %v7400_v49 }
 0x572   : > { %v7615_v48 = vmax.f32 %v7583_v46, 0.0 }
 0x573   : > { %v7614_v8 = vmax.f32 %v7582_v33, 0.0  ;;  %v14248_v55 = vpop.f32.mrb[38].mxu1  ;;  %v18495_v26 = vld [vmem:[#allocation4 + $0x30] sm:$0xff] }
 0x574   : > { %7722 = vst.msk [vmem:[#allocation4 + $0x70] sm:$0xff] %vm7642_vm5, %v7615_v48  ;;  %v7585_v51 = vadd.f32 %v14248_v55, %v18475_v37  ;;  %v7410_v47 = vpop.f32.mrb[39].mxu1  ;;  %v18489_v62 = vld [vmem:[#allocation4 + $0x28] sm:$0xff] }
 0x575   : > { %7721 = vst.msk [vmem:[#allocation4 + $0x68] sm:$0xff] %vm7642_vm5, %v7614_v8  ;;  %v7584_v43 = vadd.f32 %v18475_v37, %v7410_v47  ;;  %14304 = vmatprep.mubr.msk.f32.mxu0 %vm7642_vm5, %v18489_v62 }
 0x576   : > { %v7617_v34 = vmax.f32 %v7585_v51, 0.0  ;;  %14305 = vmatmul.mubr.msk.f32.gmra.mrb[34].mxu0 %vm7642_vm5, %v18495_v26 }
 0x577   : > { %v7616_v53 = vmax.f32 %v7584_v43, 0.0  ;;  %v14251_v54 = vpop.f32.mrb[40].mxu1  ;;  %v18507_v13 = vld [vmem:[#allocation4 + $0x50] sm:$0xff] }
 0x578   : > { %7724 = vst.msk [vmem:[#allocation4 + $0x90] sm:$0xff] %vm7642_vm5, %v7617_v34  ;;  %v7587_v17 = vadd.f32 %v14251_v54, %v18475_v37  ;;  %v7420_v7 = vpop.f32.mrb[41].mxu1  ;;  %v18501_v21 = vld [vmem:[#allocation4 + $0x48] sm:$0xff] }
 0x579   : > { %7723 = vst.msk [vmem:[#allocation4 + $0x88] sm:$0xff] %vm7642_vm5, %v7616_v53  ;;  %v7586_v12 = vadd.f32 %v18475_v37, %v7420_v7  ;;  %14307 = vmatprep.mubr.msk.f32.mxu0 %vm7642_vm5, %v18501_v21 }
 0x57a   : > { %v7619_v15 = vmax.f32 %v7587_v17, 0.0  ;;  %14308 = vmatmul.mubr.msk.f32.gmra.mrb[36].mxu0 %vm7642_vm5, %v18507_v13 }
 0x57b   : > { %v7618_v20 = vmax.f32 %v7586_v12, 0.0  ;;  %v14254_v22 = vpop.f32.mrb[42].mxu1  ;;  %v18519_v1 = vld [vmem:[#allocation4 + $0x70] sm:$0xff] }
 0x57c   : > { %7726 = vst.msk [vmem:[#allocation4 + $0xb0] sm:$0xff] %vm7642_vm5, %v7619_v15  ;;  %v7589_v23 = vadd.f32 %v14254_v22, %v18475_v37  ;;  %v7430_v25 = vpop.f32.mrb[43].mxu1  ;;  %v18513_v27 = vld [vmem:[#allocation4 + $0x68] sm:$0xff] }
 0x57d   : > { %7725 = vst.msk [vmem:[#allocation4 + $0xa8] sm:$0xff] %vm7642_vm5, %v7618_v20  ;;  %v7588_v44 = vadd.f32 %v18475_v37, %v7430_v25  ;;  %14310 = vmatprep.mubr.msk.f32.mxu0 %vm7642_vm5, %v18513_v27 }
 0x57e   : > { %v7621_v32 = vmax.f32 %v7589_v23, 0.0  ;;  %14311 = vmatmul.mubr.msk.f32.gmra.mrb[38].mxu0 %vm7642_vm5, %v18519_v1 }
 0x57f   : > { %v7620_v35 = vmax.f32 %v7588_v44, 0.0  ;;  %v14257_v52 = vpop.f32.mrb[44].mxu1  ;;  %v18531_v19 = vld [vmem:[#allocation4 + $0x90] sm:$0xff] }
 0x580   : > { %7728 = vst.msk [vmem:[#allocation4 + $0xd0] sm:$0xff] %vm7642_vm5, %v7621_v32  ;;  %v7591_v4 = vadd.f32 %v14257_v52, %v18475_v37  ;;  %v7440_v36 = vpop.f32.mrb[45].mxu1  ;;  %v18525_v10 = vld [vmem:[#allocation4 + $0x88] sm:$0xff] }
 0x581   : > { %7727 = vst.msk [vmem:[#allocation4 + $0xc8] sm:$0xff] %vm7642_vm5, %v7620_v35  ;;  %v7590_v59 = vadd.f32 %v18475_v37, %v7440_v36  ;;  %14313 = vmatprep.mubr.msk.f32.mxu0 %vm7642_vm5, %v18525_v10 }
 0x582   : > { %v7623_v40 = vmax.f32 %v7591_v4, 0.0  ;;  %14314 = vmatmul.mubr.msk.f32.gmra.mrb[40].mxu0 %vm7642_vm5, %v18531_v19 }
 0x583   : > { %v7622_v24 = vmax.f32 %v7590_v59, 0.0  ;;  %v14260_v2 = vpop.f32.mrb[46].mxu1  ;;  %v18543_v41 = vld [vmem:[#allocation4 + $0xb0] sm:$0xff] }
 0x584   : > { %7730 = vst.msk [vmem:[#allocation4 + $0xf0] sm:$0xff] %vm7642_vm5, %v7623_v40  ;;  %v7593_v0 = vadd.f32 %v14260_v2, %v18475_v37  ;;  %v7450_v6 = vpop.f32.mrb[47].mxu1  ;;  %v18537_v9 = vld [vmem:[#allocation4 + $0xa8] sm:$0xff] }
 0x585   : > { %7729 = vst.msk [vmem:[#allocation4 + $0xe8] sm:$0xff] %vm7642_vm5, %v7622_v24  ;;  %v7592_v30 = vadd.f32 %v18475_v37, %v7450_v6  ;;  %14316 = vmatprep.mubr.msk.f32.mxu0 %vm7642_vm5, %v18537_v9 }
 0x586   : > { %v7625_v58 = vmax.f32 %v7593_v0, 0.0  ;;  %14317 = vmatmul.mubr.msk.f32.gmra.mrb[42].mxu0 %vm7642_vm5, %v18543_v41 }
 0x587   : > { %v7624_v3 = vmax.f32 %v7592_v30, 0.0  ;;  %v14263_v61 = vpop.f32.mrb[48].mxu1  ;;  %v18555_v29 = vld [vmem:[#allocation4 + $0xd0] sm:$0xff] }
 0x588   : > { %7732 = vst.msk [vmem:[#allocation4 + $0x110] sm:$0xff] %vm7642_vm5, %v7625_v58  ;;  %v7595_v5 = vadd.f32 %v14263_v61, %v18475_v37  ;;  %v7460_v14 = vpop.f32.mrb[49].mxu1  ;;  %v18549_v18 = vld [vmem:[#allocation4 + $0xc8] sm:$0xff] }
 0x589   : > { %7731 = vst.msk [vmem:[#allocation4 + $0x108] sm:$0xff] %vm7642_vm5, %v7624_v3  ;;  %v7594_v11 = vadd.f32 %v18475_v37, %v7460_v14  ;;  %14319 = vmatprep.mubr.msk.f32.mxu0 %vm7642_vm5, %v18549_v18 }
 0x58a   : > { %v7627_v38 = vmax.f32 %v7595_v5, 0.0  ;;  %14320 = vmatmul.mubr.msk.f32.gmra.mrb[44].mxu0 %vm7642_vm5, %v18555_v29 }
 0x58b   : > { %v7626_v42 = vmax.f32 %v7594_v11, 0.0  ;;  %v14266_v57 = vpop.f32.mrb[50].mxu1  ;;  %v18567_v45 = vld [vmem:[#allocation4 + $0xf0] sm:$0xff] }
 0x58c   : > { %7734 = vst.msk [vmem:[#allocation4 + $0x130] sm:$0xff] %vm7642_vm5, %v7627_v38  ;;  %v7597_v63 = vadd.f32 %v14266_v57, %v18475_v37  ;;  %v7470_v56 = vpop.f32.mrb[51].mxu1  ;;  %v18561_v60 = vld [vmem:[#allocation4 + $0xe8] sm:$0xff] }
 0x58d   : > { %7733 = vst.msk [vmem:[#allocation4 + $0x128] sm:$0xff] %vm7642_vm5, %v7626_v42  ;;  %v7596_v31 = vadd.f32 %v18475_v37, %v7470_v56  ;;  %14322 = vmatprep.mubr.msk.f32.mxu0 %vm7642_vm5, %v18561_v60 }
 0x58e   : > { %v7629_v39 = vmax.f32 %v7597_v63, 0.0  ;;  %14323 = vmatmul.mubr.msk.f32.gmra.mrb[46].mxu0 %vm7642_vm5, %v18567_v45 }
 0x58f   : > { %v7628_v50 = vmax.f32 %v7596_v31, 0.0  ;;  %v14269_v16 = vpop.f32.mrb[52].mxu1  ;;  %v18579_v8 = vld [vmem:[#allocation4 + $0x110] sm:$0xff] }
 0x590   : > { %7736 = vst.msk [vmem:[#allocation4 + $0x150] sm:$0xff] %vm7642_vm5, %v7629_v39  ;;  %v7599_v46 = vadd.f32 %v14269_v16, %v18475_v37  ;;  %v7480_v49 = vpop.f32.mrb[53].mxu1  ;;  %v18573_v33 = vld [vmem:[#allocation4 + $0x108] sm:$0xff] }
 0x591   : > { %7735 = vst.msk [vmem:[#allocation4 + $0x148] sm:$0xff] %vm7642_vm5, %v7628_v50  ;;  %v7598_v48 = vadd.f32 %v18475_v37, %v7480_v49  ;;  %14325 = vmatprep.mubr.msk.f32.mxu0 %vm7642_vm5, %v18573_v33  ;;  %v7749_v49 = vld [vmem:[#allocation4 + $0x7] sm:$0xff] }
 0x592   : > { %v7631_v55 = vmax.f32 %v7599_v46, 0.0  ;;  %14326 = vmatmul.mubr.msk.f32.gmra.mrb[48].mxu0 %vm7642_vm5, %v18579_v8 }
 0x593   : > { %v7630_v51 = vmax.f32 %v7598_v48, 0.0  ;;  %v14272_v47 = vpop.f32.mrb[54].mxu1  ;;  %v18591_v17 = vld [vmem:[#allocation4 + $0x130] sm:$0xff] }
 0x594   : > { %7738 = vst.msk [vmem:[#allocation4 + $0x170] sm:$0xff] %vm7642_vm5, %v7631_v55  ;;  %v7601_v43 = vadd.f32 %v14272_v47, %v18475_v37  ;;  %v7490_v34 = vpop.f32.mrb[55].mxu1  ;;  %v18585_v53 = vld [vmem:[#allocation4 + $0x128] sm:$0xff]  ;;  %v8507_v55 = vld [vmem:[#allocation12 + $0x90] sm:$0xff] }
 0x595   : > { %7737 = vst.msk [vmem:[#allocation4 + $0x168] sm:$0xff] %vm7642_vm5, %v7630_v51  ;;  %v7600_v54 = vadd.f32 %v18475_v37, %v7490_v34  ;;  %14328 = vmatprep.mubr.msk.f32.mxu0 %vm7642_vm5, %v18585_v53  ;;  %v8508_v51 = vld [vmem:[#allocation12 + $0x98] sm:$0xff]  ;;  %v7750_v47 = vld [vmem:[#allocation4 + $0xf] sm:$0xff] }
 0x596   : > { %v7633_v7 = vmax.f32 %v7601_v43, 0.0  ;;  %14329 = vmatmul.mubr.msk.f32.gmra.mrb[50].mxu0 %vm7642_vm5, %v18591_v17  ;;  %v14969_v43 = vpack.c.bf16 %v8508_v51, %v8507_v55  ;;  %v8509_v34 = vld [vmem:[#allocation12 + $0xa0] sm:$0xff] }
 0x597   : > { %v7632_v12 = vmax.f32 %v7600_v54, 0.0  ;;  %v14275_v15 = vpop.f32.mrb[56].mxu1  ;;  %v18603_v44 = vld [vmem:[#allocation4 + $0x150] sm:$0xff] }
 0x598   : > { %7740 = vst.msk [vmem:[#allocation4 + $0x190] sm:$0xff] %vm7642_vm5, %v7633_v7  ;;  %v7603_v20 = vadd.f32 %v14275_v15, %v18475_v37  ;;  %v7500_v22 = vpop.f32.mrb[57].mxu1  ;;  %v18597_v23 = vld [vmem:[#allocation4 + $0x148] sm:$0xff]  ;;  %v8510_v54 = vld [vmem:[#allocation12 + $0xa8] sm:$0xff] }
 0x599   : > { %7739 = vst.msk [vmem:[#allocation4 + $0x188] sm:$0xff] %vm7642_vm5, %v7632_v12  ;;  %v7602_v25 = vadd.f32 %v18475_v37, %v7500_v22  ;;  %14331 = vmatprep.mubr.msk.f32.mxu0 %vm7642_vm5, %v18597_v23  ;;  %v18663_v7 = vld [vmem:[#allocation4 + $0x27] sm:$0xff]  ;;  %v14973_v12 = vpack.c.bf16 %v8510_v54, %v8509_v34  ;;  %v18668_v15 = vld [vmem:[#allocation4 + $0x2f] sm:$0xff] }
 0x59a   : > { %v7635_v32 = vmax.f32 %v7603_v20, 0.0  ;;  %14332 = vmatmul.mubr.msk.f32.gmra.mrb[52].mxu0 %vm7642_vm5, %v18603_v44  ;;  %v8511_v20 = vld [vmem:[#allocation12 + $0xb0] sm:$0xff]  ;;  %v8512_v22 = vld [vmem:[#allocation12 + $0xb8] sm:$0xff] }
 0x59b   : > { %v7634_v35 = vmax.f32 %v7602_v25, 0.0  ;;  %v14278_v52 = vpop.f32.mrb[58].mxu1  ;;  %v18615_v24 = vld [vmem:[#allocation4 + $0x170] sm:$0xff]  ;;  %v18672_v25 = vld [vmem:[#allocation4 + $0x47] sm:$0xff] }
 0x59c   : > { %7742 = vst.msk [vmem:[#allocation4 + $0x1b0] sm:$0xff] %vm7642_vm5, %v7635_v32  ;;  %v7605_v4 = vadd.f32 %v14278_v52, %v18475_v37  ;;  %v7510_v36 = vpop.f32.mrb[59].mxu1  ;;  %v18609_v59 = vld [vmem:[#allocation4 + $0x168] sm:$0xff]  ;;  %19707 = vst [vmem:[#allocation19_spill] sm:$0xff] %v18615_v24  ;;  %v8900_v52 = vld [vmem:[#allocation12 + $0xc8] sm:$0xff] }
 0x59d   : > { %7741 = vst.msk [vmem:[#allocation4 + $0x1a8] sm:$0xff] %vm7642_vm5, %v7634_v35  ;;  %v7604_v40 = vadd.f32 %v18475_v37, %v7510_v36  ;;  %14334 = vmatprep.mubr.msk.f32.mxu0 %vm7642_vm5, %v18609_v59  ;;  %v18676_v32 = vld [vmem:[#allocation4 + $0x4f] sm:$0xff] }
 0x59e   : > { %v7637_v2 = vmax.f32 %v7605_v4, 0.0  ;;  %14335 = vmatmul.mubr.msk.f32.gmra.mrb[54].mxu0 %vm7642_vm5, %v18615_v24  ;;  %v8899_v35 = vld [vmem:[#allocation12 + $0xc0] sm:$0xff]  ;;  %v8906_v24 = vld [vmem:[#allocation12 + $0xf8] sm:$0xff] }
 0x59f   : > { %v7636_v0 = vmax.f32 %v7604_v40, 0.0  ;;  %v14281_v6 = vpop.f32.mrb[60].mxu1  ;;  %v18627_v5 = vld [vmem:[#allocation4 + $0x190] sm:$0xff]  ;;  %v18680_v4 = vld [vmem:[#allocation4 + $0x67] sm:$0xff]  ;;  %v14981_v36 = vpack.c.bf16 %v8900_v52, %v8899_v35  ;;  %v8901_v35 = vld [vmem:[#allocation12 + $0xd0] sm:$0xff] }
 0x5a0   : > { %7744 = vst.msk [vmem:[#allocation4 + $0x1d0] sm:$0xff] %vm7642_vm5, %v7637_v2  ;;  %v7607_v30 = vadd.f32 %v14281_v6, %v18475_v37  ;;  %v7520_v58 = vpop.f32.mrb[61].mxu1  ;;  %v18621_v3 = vld [vmem:[#allocation4 + $0x188] sm:$0xff]  ;;  %19709 = vst [vmem:[#allocation20_spill] sm:$0xff] %v18627_v5  ;;  %v8902_v52 = vld [vmem:[#allocation12 + $0xd8] sm:$0xff] }
 0x5a1   : > { %19708 = vst [vmem:[#allocation34_spill] sm:$0xff] %v18621_v3  ;;  %7743 = vst.msk [vmem:[#allocation4 + $0x1c8] sm:$0xff] %vm7642_vm5, %v7636_v0  ;;  %v7606_v61 = vadd.f32 %v18475_v37, %v7520_v58  ;;  %14337 = vmatprep.mubr.msk.f32.mxu0 %vm7642_vm5, %v18621_v3  ;;  %v18684_v40 = vld [vmem:[#allocation4 + $0x6f] sm:$0xff]  ;;  %v18688_v2 = vld [vmem:[#allocation4 + $0x87] sm:$0xff] }
 0x5a2   : > { %v7639_v14 = vmax.f32 %v7607_v30, 0.0  ;;  %14338 = vmatmul.mubr.msk.f32.gmra.mrb[56].mxu0 %vm7642_vm5, %v18627_v5  ;;  %v18692_v0 = vld [vmem:[#allocation4 + $0x8f] sm:$0xff]  ;;  %v18696_v6 = vld [vmem:[#allocation4 + $0xa7] sm:$0xff]  ;;  %v8905_v3 = vld [vmem:[#allocation12 + $0xf0] sm:$0xff] }
 0x5a3   : > { %v7638_v11 = vmax.f32 %v7606_v61, 0.0  ;;  %v14284_v38 = vpop.f32.mrb[62].mxu1  ;;  %v18639_v31 = vld [vmem:[#allocation4 + $0x1b0] sm:$0xff]  ;;  %v18704_v58 = vld [vmem:[#allocation4 + $0xc7] sm:$0xff] }
 0x5a4   : > { %7746 = vst.msk [vmem:[#allocation4 + $0x1f0] sm:$0xff] %vm7642_vm5, %v7639_v14  ;;  %v7609_v42 = vadd.f32 %v14284_v38, %v18475_v37  ;;  %v7530_v57 = vpop.f32.mrb[63].mxu1  ;;  %v18633_v63 = vld [vmem:[#allocation4 + $0x1a8] sm:$0xff]  ;;  %19711 = vst [vmem:[#allocation21_spill] sm:$0xff] %v18639_v31  ;;  %v18790_v5 = vld [vmem:[#allocation4 + $0x31] sm:$0xff] }
 0x5a5   : > { %19710 = vst [vmem:[#allocation35_spill] sm:$0xff] %v18633_v63  ;;  %7745 = vst.msk [vmem:[#allocation4 + $0x1e8] sm:$0xff] %vm7642_vm5, %v7638_v11  ;;  %v7608_v56 = vadd.f32 %v18475_v37, %v7530_v57  ;;  %14340 = vmatprep.mubr.msk.f32.mxu0 %vm7642_vm5, %v18633_v63  ;;  %v18700_v30 = vld [vmem:[#allocation4 + $0xaf] sm:$0xff]  ;;  %v18712_v14 = vld [vmem:[#allocation4 + $0xe7] sm:$0xff] }
 0x5a6   : > { %v7641_v39 = vmax.f32 %v7609_v42, 0.0  ;;  %14341 = vmatmul.mubr.msk.f32.gmra.mrb[58].mxu0 %vm7642_vm5, %v18639_v31  ;;  %v18708_v61 = vld [vmem:[#allocation4 + $0xcf] sm:$0xff]  ;;  %v18720_v38 = vld [vmem:[#allocation4 + $0x107] sm:$0xff]  ;;  %19716 = vst [vmem:[#allocation38_spill] sm:$0xff] %v18790_v5 }
 0x5a7   : > { %v7640_v50 = vmax.f32 %v7608_v56, 0.0  ;;  %v18649_v37 = vld [vmem:[#allocation4 + $0x1d0] sm:$0xff]  ;;  %v18728_v57 = vld [vmem:[#allocation4 + $0x127] sm:$0xff] }
 0x5a8   : > { %7748 = vst.msk [vmem:[#allocation4 + $0x210] sm:$0xff] %vm7642_vm5, %v7641_v39  ;;  %v18644_v16 = vld [vmem:[#allocation4 + $0x1c8] sm:$0xff]  ;;  %19713 = vst [vmem:[#allocation22_spill] sm:$0xff] %v18649_v37 }
 0x5a9   : > { %19712 = vst [vmem:[#allocation36_spill] sm:$0xff] %v18644_v16  ;;  %7747 = vst.msk [vmem:[#allocation4 + $0x208] sm:$0xff] %vm7642_vm5, %v7640_v50  ;;  %14343 = vmatprep.mubr.msk.f32.mxu0 %vm7642_vm5, %v18644_v16  ;;  %v18716_v11 = vld [vmem:[#allocation4 + $0xef] sm:$0xff]  ;;  %v18736_v39 = vld [vmem:[#allocation4 + $0x147] sm:$0xff] }
 0x5aa   : > { %14344 = vmatmul.mubr.msk.f32.gmra.mrb[60].mxu0 %vm7642_vm5, %v18649_v37  ;;  %v18724_v42 = vld [vmem:[#allocation4 + $0x10f] sm:$0xff]  ;;  %v18752_v51 = vld [vmem:[#allocation4 + $0x187] sm:$0xff] }
 0x5ab   : > { %v18657_v48 = vld [vmem:[#allocation4 + $0x1f0] sm:$0xff]  ;;  %v18768_v54 = vld [vmem:[#allocation4 + $0x1c7] sm:$0xff] }
 0x5ac   : > { %v18653_v46 = vld [vmem:[#allocation4 + $0x1e8] sm:$0xff]  ;;  %19715 = vst [vmem:[#allocation23_spill] sm:$0xff] %v18657_v48  ;;  %v8904_v16 = vld [vmem:[#allocation12 + $0xe8] sm:$0xff] }
 0x5ad   : > { %19714 = vst [vmem:[#allocation37_spill] sm:$0xff] %v18653_v46  ;;  %14346 = vmatprep.mubr.msk.f32.mxu0 %vm7642_vm5, %v18653_v46  ;;  %v18732_v56 = vld [vmem:[#allocation4 + $0x12f] sm:$0xff]  ;;  %v14985_v46 = vpack.c.bf16 %v8902_v52, %v8901_v35 }
 0x5ae   : > { %14347 = vmatmul.mubr.msk.f32.gmra.mrb[62].mxu0 %vm7642_vm5, %v18657_v48  ;;  %v18740_v50 = vld [vmem:[#allocation4 + $0x14f] sm:$0xff] }
 0x5af   : > { %14365 = vmatprep.mubr.msk.f32.mxu0 %vm7642_vm5, %v7749_v49  ;;  %v18744_v49 = vld [vmem:[#allocation4 + $0x167] sm:$0xff]  ;;  %v18748_v55 = vld [vmem:[#allocation4 + $0x16f] sm:$0xff] }
 0x5b0   : > { %v18764_v34 = vld [vmem:[#allocation4 + $0x1af] sm:$0xff] }
 0x5b1   : > { %v8473_v48 = vld [vmem:[#allocation4 + $0x11] sm:$0xff]  ;;  %v8903_v37 = vld [vmem:[#allocation12 + $0xe0] sm:$0xff] }
 0x5b2   : > { %14366 = vmatmul.mubr.msk.f32.vlgmr.msra.gmra.mrb[32].mxu0 %vm7642_vm5, %v7750_v47  ;;  %v18756_v47 = vld [vmem:[#allocation4 + $0x18f] sm:$0xff]  ;;  %v14989_v63 = vpack.c.bf16 %v8904_v16, %v8903_v37 }
 0x5b3   : > { %14968 = vmatpush3.bf16.msra.mxu0 %v18472_v28  ;;  %14368 = vmatprep.mubr.msk.f32.mxu0 %vm7642_vm5, %v18663_v7  ;;  %v14977_v28 = vpack.c.bf16 %v8512_v22, %v8511_v20  ;;  %v18776_v20 = vld [vmem:[#allocation4 + $0x1e7] sm:$0xff]  ;;  %v9294_v52 = vld [vmem:[#allocation12 + $0x108] sm:$0xff] }
 0x5b4   : > { %14970 = vmatprep.subr.bf16.mxu0 %v14969_v43  ;;  %v8472_v22 = vld [vmem:[#allocation4 + $0x9] sm:$0xff] }
 0x5b5   : > { %v18786_v31 = vld [vmem:[#allocation4 + $0x29] sm:$0xff] }
 0x5b6   : > { %14369 = vmatmul.mubr.msk.f32.gmra.mrb[34].mxu0 %vm7642_vm5, %v18668_v15  ;;  %v9293_v35 = vld [vmem:[#allocation12 + $0x100] sm:$0xff] }
 0x5b7   : > { %14371 = vmatprep.mubr.msk.f32.mxu0 %vm7642_vm5, %v18672_v25  ;;  %14972 = vmatpush3.bf16.msra.mxu0 %v14969_v43  ;;  %v18760_v43 = vld [vmem:[#allocation4 + $0x1a7] sm:$0xff]  ;;  %v14997_v37 = vpack.c.bf16 %v9294_v52, %v9293_v35 }
 0x5b8   : > { %14974 = vmatprep.subr.bf16.mxu0 %v14973_v12  ;;  %v18802_v16 = vld [vmem:[#allocation4 + $0x69] sm:$0xff] }
 0x5b9   : > { %19717 = vst [vmem:[#allocation24_spill] sm:$0xff] %v18802_v16  ;;  %v18826_v35 = vld [vmem:[#allocation4 + $0xc9] sm:$0xff] }
 0x5ba   : > { %14372 = vmatmul.mubr.msk.f32.gmra.mrb[36].mxu0 %vm7642_vm5, %v18676_v32  ;;  %19723 = vst [vmem:[#allocation27_spill] sm:$0xff] %v18826_v35  ;;  %v18834_v52 = vld [vmem:[#allocation4 + $0xe9] sm:$0xff] }
 0x5bb   : > { %14374 = vmatprep.mubr.msk.f32.mxu0 %vm7642_vm5, %v18680_v4  ;;  %14976 = vmatpush3.bf16.msra.mxu0 %v14973_v12  ;;  %v18772_v12 = vld [vmem:[#allocation4 + $0x1cf] sm:$0xff]  ;;  %19725 = vst [vmem:[#allocation28_spill] sm:$0xff] %v18834_v52 }
 0x5bc   : > { %14978 = vmatprep.subr.bf16.mxu0 %v14977_v28 }
 0x5be   : > { %14375 = vmatmul.mubr.msk.f32.gmra.mrb[38].mxu0 %vm7642_vm5, %v18684_v40 }
 0x5bf   : > { %14377 = vmatprep.mubr.msk.f32.mxu0 %vm7642_vm5, %v18688_v2  ;;  %14980 = vmatpush3.bf16.msra.mxu0 %v14977_v28  ;;  %v18780_v28 = vld [vmem:[#allocation4 + $0x1ef] sm:$0xff] }
 0x5c0   : > { %14982 = vmatprep.subr.bf16.mxu0 %v14981_v36 }
 0x5c2   : > { %14378 = vmatmul.mubr.msk.f32.gmra.mrb[40].mxu0 %vm7642_vm5, %v18692_v0 }
 0x5c3   : > { %14380 = vmatprep.mubr.msk.f32.mxu0 %vm7642_vm5, %v18696_v6 }
 0x5c6   : > { %14381 = vmatmul.mubr.msk.f32.gmra.mrb[42].mxu0 %vm7642_vm5, %v18700_v30 }
 0x5c7   : > { %14383 = vmatprep.mubr.msk.f32.mxu0 %vm7642_vm5, %v18704_v58 }
 0x5ca   : > { %14384 = vmatmul.mubr.msk.f32.gmra.mrb[44].mxu0 %vm7642_vm5, %v18708_v61 }
 0x5cb   : > { %14386 = vmatprep.mubr.msk.f32.mxu0 %vm7642_vm5, %v18712_v14 }
 0x5ce   : > { %14387 = vmatmul.mubr.msk.f32.gmra.mrb[46].mxu0 %vm7642_vm5, %v18716_v11 }
 0x5cf   : > { %14389 = vmatprep.mubr.msk.f32.mxu0 %vm7642_vm5, %v18720_v38 }
 0x5d2   : > { %14390 = vmatmul.mubr.msk.f32.gmra.mrb[48].mxu0 %vm7642_vm5, %v18724_v42 }
 0x5d3   : > { %14392 = vmatprep.mubr.msk.f32.mxu0 %vm7642_vm5, %v18728_v57 }
 0x5d6   : > { %14393 = vmatmul.mubr.msk.f32.gmra.mrb[50].mxu0 %vm7642_vm5, %v18732_v56 }
 0x5d7   : > { %14395 = vmatprep.mubr.msk.f32.mxu0 %vm7642_vm5, %v18736_v39 }
 0x5da   : > { %14396 = vmatmul.mubr.msk.f32.gmra.mrb[52].mxu0 %vm7642_vm5, %v18740_v50 }
 0x5db   : > { %14398 = vmatprep.mubr.msk.f32.mxu0 %vm7642_vm5, %v18744_v49 }
 0x5de   : > { %14399 = vmatmul.mubr.msk.f32.gmra.mrb[54].mxu0 %vm7642_vm5, %v18748_v55 }
 0x5df   : > { %14401 = vmatprep.mubr.msk.f32.mxu0 %vm7642_vm5, %v18752_v51 }
 0x5e2   : > { %14402 = vmatmul.mubr.msk.f32.gmra.mrb[56].mxu0 %vm7642_vm5, %v18756_v47 }
 0x5e3   : > { %14404 = vmatprep.mubr.msk.f32.mxu0 %vm7642_vm5, %v18760_v43 }
 0x5e6   : > { %14405 = vmatmul.mubr.msk.f32.gmra.mrb[58].mxu0 %vm7642_vm5, %v18764_v34 }
 0x5e7   : > { %14407 = vmatprep.mubr.msk.f32.mxu0 %vm7642_vm5, %v18768_v54 }
 0x5ea   : > { %14408 = vmatmul.mubr.msk.f32.gmra.mrb[60].mxu0 %vm7642_vm5, %v18772_v12 }
 0x5eb   : > { %14410 = vmatprep.mubr.msk.f32.mxu0 %vm7642_vm5, %v18776_v20 }
 0x5ee   : > { %14411 = vmatmul.mubr.msk.f32.gmra.mrb[62].mxu0 %vm7642_vm5, %v18780_v28 }
 0x5ef   : > { %14429 = vmatprep.mubr.msk.f32.mxu0 %vm7642_vm5, %v8472_v22  ;;  %v18794_v22 = vld [vmem:[#allocation4 + $0x49] sm:$0xff] }
 0x5f2   : > { %14430 = vmatmul.mubr.msk.f32.vlgmr.msra.gmra.mrb[32].mxu0 %vm7642_vm5, %v8473_v48  ;;  %v14993_v48 = vpack.c.bf16 %v8906_v24, %v8905_v3  ;;  %v18810_v24 = vld [vmem:[#allocation4 + $0x89] sm:$0xff]  ;;  %v18814_v3 = vld [vmem:[#allocation4 + $0x91] sm:$0xff] }
 0x5f3   : > { %14984 = vmatpush3.bf16.msra.mxu0 %v14981_v36  ;;  %14432 = vmatprep.mubr.msk.f32.mxu0 %vm7642_vm5, %v18786_v31  ;;  %v18798_v36 = vld [vmem:[#allocation4 + $0x51] sm:$0xff]  ;;  %19719 = vst [vmem:[#allocation25_spill] sm:$0xff] %v18810_v24  ;;  %19720 = vst [vmem:[#allocation40_spill] sm:$0xff] %v18814_v3 }
 0x5f4   : > { %14986 = vmatprep.subr.bf16.mxu0 %v14985_v46 }
 0x5f6   : > { %14433 = vmatmul.mubr.msk.f32.gmra.mrb[34].mxu0 %vm7642_vm5, %v18790_v5  ;;  %v18806_v5 = vld [vmem:[#allocation4 + $0x71] sm:$0xff] }
 0x5f7   : > { %14435 = vmatprep.mubr.msk.f32.mxu0 %vm7642_vm5, %v18794_v22  ;;  %14988 = vmatpush3.bf16.msra.mxu0 %v14985_v46  ;;  %19718 = vst [vmem:[#allocation39_spill] sm:$0xff] %v18806_v5  ;;  %v18822_v46 = vld [vmem:[#allocation4 + $0xb1] sm:$0xff] }
 0x5f8   : > { %14990 = vmatprep.subr.bf16.mxu0 %v14989_v63  ;;  %19722 = vst [vmem:[#allocation41_spill] sm:$0xff] %v18822_v46 }
 0x5fa   : > { %14436 = vmatmul.mubr.msk.f32.gmra.mrb[36].mxu0 %vm7642_vm5, %v18798_v36 }
 0x5fb   : > { %14438 = vmatprep.mubr.msk.f32.mxu0 %vm7642_vm5, %v18802_v16  ;;  %14992 = vmatpush3.bf16.msra.mxu0 %v14989_v63  ;;  %v18818_v63 = vld [vmem:[#allocation4 + $0xa9] sm:$0xff]  ;;  %v9300_v16 = vld [vmem:[#allocation12 + $0x138] sm:$0xff] }
 0x5fc   : > { %14994 = vmatprep.subr.bf16.mxu0 %v14993_v48  ;;  %19721 = vst [vmem:[#allocation26_spill] sm:$0xff] %v18818_v63 }
 0x5fe   : > { %14439 = vmatmul.mubr.msk.f32.gmra.mrb[38].mxu0 %vm7642_vm5, %v18806_v5  ;;  %v9298_v5 = vld [vmem:[#allocation12 + $0x128] sm:$0xff] }
 0x5ff   : > { %14441 = vmatprep.mubr.msk.f32.mxu0 %vm7642_vm5, %v18810_v24  ;;  %14996 = vmatpush3.bf16.msra.mxu0 %v14993_v48  ;;  %v18830_v48 = vld [vmem:[#allocation4 + $0xd1] sm:$0xff]  ;;  %v9296_v24 = vld [vmem:[#allocation12 + $0x118] sm:$0xff] }
 0x600   : > { %14998 = vmatprep.subr.bf16.mxu0 %v14997_v37  ;;  %19724 = vst [vmem:[#allocation42_spill] sm:$0xff] %v18830_v48 }
 0x602   : > { %14442 = vmatmul.mubr.msk.f32.gmra.mrb[40].mxu0 %vm7642_vm5, %v18814_v3  ;;  %v9295_v3 = vld [vmem:[#allocation12 + $0x110] sm:$0xff] }
 0x603   : > { %14444 = vmatprep.mubr.msk.f32.mxu0 %vm7642_vm5, %v18818_v63  ;;  %v18838_v63 = vld [vmem:[#allocation4 + $0xf1] sm:$0xff] }
 0x604   : > { %19726 = vst [vmem:[#allocation43_spill] sm:$0xff] %v18838_v63 }
 0x606   : > { %14445 = vmatmul.mubr.msk.f32.gmra.mrb[42].mxu0 %vm7642_vm5, %v18822_v46  ;;  %v18842_v46 = vld [vmem:[#allocation4 + $0x109] sm:$0xff] }
 0x607   : > { %14447 = vmatprep.mubr.msk.f32.mxu0 %vm7642_vm5, %v18826_v35  ;;  %19727 = vst [vmem:[#allocation29_spill] sm:$0xff] %v18842_v46  ;;  %v18846_v35 = vld [vmem:[#allocation4 + $0x111] sm:$0xff] }
 0x608   : > { %19728 = vst [vmem:[#allocation44_spill] sm:$0xff] %v18846_v35 }
 0x60a   : > { %14448 = vmatmul.mubr.msk.f32.gmra.mrb[44].mxu0 %vm7642_vm5, %v18830_v48  ;;  %v18850_v48 = vld [vmem:[#allocation4 + $0x129] sm:$0xff] }
 0x60b   : > { %14450 = vmatprep.mubr.msk.f32.mxu0 %vm7642_vm5, %v18834_v52  ;;  %19729 = vst [vmem:[#allocation30_spill] sm:$0xff] %v18850_v48  ;;  %v18854_v52 = vld [vmem:[#allocation4 + $0x131] sm:$0xff] }
 0x60c   : > { %19730 = vst [vmem:[#allocation45_spill] sm:$0xff] %v18854_v52 }
 0x60e   : > { %14451 = vmatmul.mubr.msk.f32.gmra.mrb[46].mxu0 %vm7642_vm5, %v18838_v63  ;;  %v18858_v63 = vld [vmem:[#allocation4 + $0x149] sm:$0xff] }
 0x60f   : > { %14453 = vmatprep.mubr.msk.f32.mxu0 %vm7642_vm5, %v18842_v46  ;;  %19731 = vst [vmem:[#allocation31_spill] sm:$0xff] %v18858_v63  ;;  %v18862_v46 = vld [vmem:[#allocation4 + $0x151] sm:$0xff] }
 0x610   : > { %19732 = vst [vmem:[#allocation32_spill] sm:$0xff] %v18862_v46 }
 0x612   : > { %14454 = vmatmul.mubr.msk.f32.gmra.mrb[48].mxu0 %vm7642_vm5, %v18846_v35  ;;  %v18866_v35 = vld [vmem:[#allocation4 + $0x169] sm:$0xff] }
 0x613   : > { %14456 = vmatprep.mubr.msk.f32.mxu0 %vm7642_vm5, %v18850_v48  ;;  %19733 = vst [vmem:[#allocation46_spill] sm:$0xff] %v18866_v35  ;;  %v18870_v48 = vld [vmem:[#allocation4 + $0x171] sm:$0xff] }
 0x614   : > { %19734 = vst [vmem:[#allocation33_spill] sm:$0xff] %v18870_v48 }
 0x616   : > { %14457 = vmatmul.mubr.msk.f32.gmra.mrb[50].mxu0 %vm7642_vm5, %v18854_v52  ;;  %v18874_v52 = vld [vmem:[#allocation4 + $0x189] sm:$0xff] }
 0x617   : > { %14459 = vmatprep.mubr.msk.f32.mxu0 %vm7642_vm5, %v18858_v63  ;;  %19735 = vst [vmem:[#allocation48_spill] sm:$0xff] %v18874_v52  ;;  %v18878_v63 = vld [vmem:[#allocation4 + $0x191] sm:$0xff] }
 0x618   : > { %19736 = vst [vmem:[#allocation49_spill] sm:$0xff] %v18878_v63 }
 0x61a   : > { %14460 = vmatmul.mubr.msk.f32.gmra.mrb[52].mxu0 %vm7642_vm5, %v18862_v46  ;;  %v18882_v46 = vld [vmem:[#allocation4 + $0x1a9] sm:$0xff] }
 0x61b   : > { %14462 = vmatprep.mubr.msk.f32.mxu0 %vm7642_vm5, %v18866_v35  ;;  %19737 = vst [vmem:[#allocation50_spill] sm:$0xff] %v18882_v46  ;;  %v18886_v35 = vld [vmem:[#allocation4 + $0x1b1] sm:$0xff] }
 0x61c   : > { %19738 = vst [vmem:[#allocation51_spill] sm:$0xff] %v18886_v35 }
 0x61e   : > { %14463 = vmatmul.mubr.msk.f32.gmra.mrb[54].mxu0 %vm7642_vm5, %v18870_v48  ;;  %v18890_v48 = vld [vmem:[#allocation4 + $0x1c9] sm:$0xff] }
 0x61f   : > { %14465 = vmatprep.mubr.msk.f32.mxu0 %vm7642_vm5, %v18874_v52  ;;  %19739 = vst [vmem:[#allocation52_spill] sm:$0xff] %v18890_v48  ;;  %v18894_v52 = vld [vmem:[#allocation4 + $0x1d1] sm:$0xff] }
 0x620   : > { %19740 = vst [vmem:[#allocation47_spill] sm:$0xff] %v18894_v52 }
 0x622   : > { %14466 = vmatmul.mubr.msk.f32.gmra.mrb[56].mxu0 %vm7642_vm5, %v18878_v63  ;;  %v18898_v63 = vld [vmem:[#allocation4 + $0x1e9] sm:$0xff] }
 0x623   : > { %14468 = vmatprep.mubr.msk.f32.mxu0 %vm7642_vm5, %v18882_v46  ;;  %19741 = vst [vmem:[#allocation53_spill] sm:$0xff] %v18898_v63  ;;  %v18902_v46 = vld [vmem:[#allocation4 + $0x1f1] sm:$0xff] }
 0x624   : > { %19742 = vst [vmem:[#allocation54_spill] sm:$0xff] %v18902_v46 }
 0x626   : > { %14469 = vmatmul.mubr.msk.f32.gmra.mrb[58].mxu0 %vm7642_vm5, %v18886_v35  ;;  %v9297_v35 = vld [vmem:[#allocation12 + $0x120] sm:$0xff] }
 0x627   : > { %14471 = vmatprep.mubr.msk.f32.mxu0 %vm7642_vm5, %v18890_v48  ;;  %v15001_v48 = vpack.c.bf16 %v9296_v24, %v9295_v3  ;;  %v9687_v24 = vld [vmem:[#allocation12 + $0x140] sm:$0xff]  ;;  %v9688_v3 = vld [vmem:[#allocation12 + $0x148] sm:$0xff] }
 0x62a   : > { %14472 = vmatmul.mubr.msk.f32.gmra.mrb[60].mxu0 %vm7642_vm5, %v18894_v52  ;;  %v9299_v52 = vld [vmem:[#allocation12 + $0x130] sm:$0xff] }
 0x62b   : > { %14474 = vmatprep.mubr.msk.f32.mxu0 %vm7642_vm5, %v18898_v63  ;;  %v15005_v63 = vpack.c.bf16 %v9298_v5, %v9297_v35  ;;  %v15013_v5 = vpack.c.bf16 %v9688_v3, %v9687_v24  ;;  %v9693_v24 = vld [vmem:[#allocation12 + $0x170] sm:$0xff]  ;;  %v9694_v3 = vld [vmem:[#allocation12 + $0x178] sm:$0xff] }
 0x62e   : > { %14475 = vmatmul.mubr.msk.f32.gmra.mrb[62].mxu0 %vm7642_vm5, %v18902_v46 }
 0x62f   : > { %14493 = vmatprep.mubr.msk.f32.mxu0 %vm7642_vm5, %v18663_v7  ;;  %v15009_v7 = vpack.c.bf16 %v9300_v16, %v9299_v52  ;;  %v18970_v16 = vld [vmem:[#allocation4 + $0x20f] sm:$0xff] }
 0x630   : > { %v9692_v52 = vld [vmem:[#allocation12 + $0x168] sm:$0xff] }
 0x632   : > { %14494 = vmatmul.mubr.msk.f32.vlgmr.msra.gmra.mrb[32].mxu0 %vm7642_vm5, %v18668_v15  ;;  %v18966_v15 = vld [vmem:[#allocation4 + $0x207] sm:$0xff] }
 0x633   : > { %15000 = vmatpush3.bf16.msra.mxu0 %v14997_v37  ;;  %14496 = vmatprep.mubr.msk.f32.mxu0 %vm7642_vm5, %v18672_v25  ;;  %v9689_v37 = vld [vmem:[#allocation12 + $0x150] sm:$0xff] }
 0x634   : > { %15002 = vmatprep.subr.bf16.mxu0 %v15001_v48 }
 0x636   : > { %14497 = vmatmul.mubr.msk.f32.gmra.mrb[34].mxu0 %vm7642_vm5, %v18676_v32 }
 0x637   : > { %14499 = vmatprep.mubr.msk.f32.mxu0 %vm7642_vm5, %v18680_v4  ;;  %15004 = vmatpush3.bf16.msra.mxu0 %v15001_v48  ;;  %v9691_v48 = vld [vmem:[#allocation12 + $0x160] sm:$0xff] }
 0x638   : > { %15006 = vmatprep.subr.bf16.mxu0 %v15005_v63 }
 0x63a   : > { %14500 = vmatmul.mubr.msk.f32.gmra.mrb[36].mxu0 %vm7642_vm5, %v18684_v40 }
 0x63b   : > { %14502 = vmatprep.mubr.msk.f32.mxu0 %vm7642_vm5, %v18688_v2  ;;  %15008 = vmatpush3.bf16.msra.mxu0 %v15005_v63  ;;  %v9690_v63 = vld [vmem:[#allocation12 + $0x158] sm:$0xff] }
 0x63c   : > { %15010 = vmatprep.subr.bf16.mxu0 %v15009_v7  ;;  %v15017_v35 = vpack.c.bf16 %v9690_v63, %v9689_v37  ;;  %v10082_v37 = vld [vmem:[#allocation12 + $0x180] sm:$0xff]  ;;  %v10083_v63 = vld [vmem:[#allocation12 + $0x188] sm:$0xff] }
 0x63e   : > { %14503 = vmatmul.mubr.msk.f32.gmra.mrb[38].mxu0 %vm7642_vm5, %v18692_v0 }
 0x63f   : > { %14505 = vmatprep.mubr.msk.f32.mxu0 %vm7642_vm5, %v18696_v6  ;;  %15012 = vmatpush3.bf16.msra.mxu0 %v15009_v7  ;;  %v15021_v7 = vpack.c.bf16 %v9692_v52, %v9691_v48  ;;  %v10476_v48 = vld [vmem:[#allocation12 + $0x1c0] sm:$0xff]  ;;  %v10477_v52 = vld [vmem:[#allocation12 + $0x1c8] sm:$0xff] }
 0x640   : > { %15014 = vmatprep.subr.bf16.mxu0 %v15013_v5 }
 0x642   : > { %14506 = vmatmul.mubr.msk.f32.gmra.mrb[40].mxu0 %vm7642_vm5, %v18700_v30 }
 0x643   : > { %14508 = vmatprep.mubr.msk.f32.mxu0 %vm7642_vm5, %v18704_v58 }
 0x646   : > { %14509 = vmatmul.mubr.msk.f32.gmra.mrb[42].mxu0 %vm7642_vm5, %v18708_v61 }
 0x647   : > { %14511 = vmatprep.mubr.msk.f32.mxu0 %vm7642_vm5, %v18712_v14 }
 0x64a   : > { %14512 = vmatmul.mubr.msk.f32.gmra.mrb[44].mxu0 %vm7642_vm5, %v18716_v11 }
 0x64b   : > { %14514 = vmatprep.mubr.msk.f32.mxu0 %vm7642_vm5, %v18720_v38 }
 0x64e   : > { %14515 = vmatmul.mubr.msk.f32.gmra.mrb[46].mxu0 %vm7642_vm5, %v18724_v42 }
 0x64f   : > { %14517 = vmatprep.mubr.msk.f32.mxu0 %vm7642_vm5, %v18728_v57 }
 0x652   : > { %14518 = vmatmul.mubr.msk.f32.gmra.mrb[48].mxu0 %vm7642_vm5, %v18732_v56 }
 0x653   : > { %14520 = vmatprep.mubr.msk.f32.mxu0 %vm7642_vm5, %v18736_v39 }
 0x656   : > { %14521 = vmatmul.mubr.msk.f32.gmra.mrb[50].mxu0 %vm7642_vm5, %v18740_v50 }
 0x657   : > { %14523 = vmatprep.mubr.msk.f32.mxu0 %vm7642_vm5, %v18744_v49 }
 0x65a   : > { %14524 = vmatmul.mubr.msk.f32.gmra.mrb[52].mxu0 %vm7642_vm5, %v18748_v55 }
 0x65b   : > { %14526 = vmatprep.mubr.msk.f32.mxu0 %vm7642_vm5, %v18752_v51 }
 0x65e   : > { %14527 = vmatmul.mubr.msk.f32.gmra.mrb[54].mxu0 %vm7642_vm5, %v18756_v47 }
 0x65f   : > { %14529 = vmatprep.mubr.msk.f32.mxu0 %vm7642_vm5, %v18760_v43 }
 0x662   : > { %14530 = vmatmul.mubr.msk.f32.gmra.mrb[56].mxu0 %vm7642_vm5, %v18764_v34 }
 0x663   : > { %14532 = vmatprep.mubr.msk.f32.mxu0 %vm7642_vm5, %v18768_v54 }
 0x666   : > { %14533 = vmatmul.mubr.msk.f32.gmra.mrb[58].mxu0 %vm7642_vm5, %v18772_v12 }
 0x667   : > { %14535 = vmatprep.mubr.msk.f32.mxu0 %vm7642_vm5, %v18776_v20 }
 0x66a   : > { %14536 = vmatmul.mubr.msk.f32.gmra.mrb[60].mxu0 %vm7642_vm5, %v18780_v28 }
 0x66b   : > { %14538 = vmatprep.mubr.msk.f32.mxu0 %vm7642_vm5, %v18966_v15 }
 0x66e   : > { %14539 = vmatmul.mubr.msk.f32.gmra.mrb[62].mxu0 %vm7642_vm5, %v18970_v16 }
 0x66f   : > { %14557 = vmatprep.mubr.msk.f32.mxu0 %vm7642_vm5, %v18489_v62  ;;  %v15025_v62 = vpack.c.bf16 %v9694_v3, %v9693_v24  ;;  %v19755_v24 = vld [vmem:[#allocation25_spill] sm:$0xff]  ;;  %v15045_v3 = vpack.c.bf16 %v10477_v52, %v10476_v48  ;;  %v19106_v48 = vld [vmem:[#allocation4 + $0x211] sm:$0xff] }
 0x670   : > { %v10478_v52 = vld [vmem:[#allocation12 + $0x1d0] sm:$0xff] }
 0x672   : > { %14558 = vmatmul.mubr.msk.f32.vlgmr.msra.gmra.mrb[32].mxu0 %vm7642_vm5, %v18495_v26  ;;  %v15029_v26 = vpack.c.bf16 %v10083_v63, %v10082_v37  ;;  %v19757_v37 = vld [vmem:[#allocation26_spill] sm:$0xff]  ;;  %v19758_v63 = vld [vmem:[#allocation41_spill] sm:$0xff] }
 0x673   : > { %15016 = vmatpush3.bf16.msra.mxu0 %v15013_v5  ;;  %14560 = vmatprep.mubr.msk.f32.mxu0 %vm7642_vm5, %v18501_v21  ;;  %v19743_v21 = vld [vmem:[#allocation19_spill] sm:$0xff]  ;;  %v10089_v5 = vld [vmem:[#allocation12 + $0x1b8] sm:$0xff] }
 0x674   : > { %15018 = vmatprep.subr.bf16.mxu0 %v15017_v35 }
 0x676   : > { %14561 = vmatmul.mubr.msk.f32.gmra.mrb[34].mxu0 %vm7642_vm5, %v18507_v13  ;;  %v19744_v13 = vld [vmem:[#allocation34_spill] sm:$0xff] }
 0x677   : > { %14563 = vmatprep.mubr.msk.f32.mxu0 %vm7642_vm5, %v18513_v27  ;;  %15020 = vmatpush3.bf16.msra.mxu0 %v15017_v35  ;;  %v19745_v27 = vld [vmem:[#allocation20_spill] sm:$0xff] }
 0x678   : > { %15022 = vmatprep.subr.bf16.mxu0 %v15021_v7  ;;  %v19753_v35 = vld [vmem:[#allocation24_spill] sm:$0xff] }
 0x67a   : > { %14564 = vmatmul.mubr.msk.f32.gmra.mrb[36].mxu0 %vm7642_vm5, %v18519_v1  ;;  %v19746_v1 = vld [vmem:[#allocation35_spill] sm:$0xff] }
 0x67b   : > { %14566 = vmatprep.mubr.msk.f32.mxu0 %vm7642_vm5, %v18525_v10  ;;  %15024 = vmatpush3.bf16.msra.mxu0 %v15021_v7  ;;  %v19747_v10 = vld [vmem:[#allocation21_spill] sm:$0xff]  ;;  %v19754_v7 = vld [vmem:[#allocation39_spill] sm:$0xff] }
 0x67c   : > { %15026 = vmatprep.subr.bf16.mxu0 %v15025_v62 }
 0x67e   : > { %14567 = vmatmul.mubr.msk.f32.gmra.mrb[38].mxu0 %vm7642_vm5, %v18531_v19  ;;  %v19748_v19 = vld [vmem:[#allocation36_spill] sm:$0xff] }
 0x67f   : > { %14569 = vmatprep.mubr.msk.f32.mxu0 %vm7642_vm5, %v18537_v9  ;;  %15028 = vmatpush3.bf16.msra.mxu0 %v15025_v62  ;;  %v19749_v9 = vld [vmem:[#allocation22_spill] sm:$0xff]  ;;  %v19756_v62 = vld [vmem:[#allocation40_spill] sm:$0xff] }
 0x680   : > { %15030 = vmatprep.subr.bf16.mxu0 %v15029_v26 }
 0x682   : > { %14570 = vmatmul.mubr.msk.f32.gmra.mrb[40].mxu0 %vm7642_vm5, %v18543_v41  ;;  %v19750_v41 = vld [vmem:[#allocation37_spill] sm:$0xff] }
 0x683   : > { %14572 = vmatprep.mubr.msk.f32.mxu0 %vm7642_vm5, %v18549_v18  ;;  %v19751_v18 = vld [vmem:[#allocation23_spill] sm:$0xff] }
 0x686   : > { %14573 = vmatmul.mubr.msk.f32.gmra.mrb[42].mxu0 %vm7642_vm5, %v18555_v29  ;;  %v19034_v29 = vld [vmem:[#allocation4 + $0x208] sm:$0xff] }
 0x687   : > { %14575 = vmatprep.mubr.msk.f32.mxu0 %vm7642_vm5, %v18561_v60  ;;  %v19038_v60 = vld [vmem:[#allocation4 + $0x210] sm:$0xff] }
 0x68a   : > { %14576 = vmatmul.mubr.msk.f32.gmra.mrb[44].mxu0 %vm7642_vm5, %v18567_v45  ;;  %v10084_v45 = vld [vmem:[#allocation12 + $0x190] sm:$0xff] }
 0x68b   : > { %14578 = vmatprep.mubr.msk.f32.mxu0 %vm7642_vm5, %v18573_v33  ;;  %v10085_v33 = vld [vmem:[#allocation12 + $0x198] sm:$0xff] }
 0x68e   : > { %14579 = vmatmul.mubr.msk.f32.gmra.mrb[46].mxu0 %vm7642_vm5, %v18579_v8  ;;  %v15033_v8 = vpack.c.bf16 %v10085_v33, %v10084_v45  ;;  %v19769_v45 = vld [vmem:[#allocation46_spill] sm:$0xff]  ;;  %v19770_v33 = vld [vmem:[#allocation33_spill] sm:$0xff] }
 0x68f   : > { %14581 = vmatprep.mubr.msk.f32.mxu0 %vm7642_vm5, %v18585_v53  ;;  %v10086_v53 = vld [vmem:[#allocation12 + $0x1a0] sm:$0xff] }
 0x692   : > { %14582 = vmatmul.mubr.msk.f32.gmra.mrb[48].mxu0 %vm7642_vm5, %v18591_v17  ;;  %v10087_v17 = vld [vmem:[#allocation12 + $0x1a8] sm:$0xff] }
 0x693   : > { %14584 = vmatprep.mubr.msk.f32.mxu0 %vm7642_vm5, %v18597_v23  ;;  %v19752_v23 = vld [vmem:[#allocation38_spill] sm:$0xff] }
 0x696   : > { %14585 = vmatmul.mubr.msk.f32.gmra.mrb[50].mxu0 %vm7642_vm5, %v18603_v44  ;;  %v15037_v44 = vpack.c.bf16 %v10087_v17, %v10086_v53  ;;  %v19772_v53 = vld [vmem:[#allocation49_spill] sm:$0xff]  ;;  %v19773_v17 = vld [vmem:[#allocation50_spill] sm:$0xff] }
 0x697   : > { %14587 = vmatprep.mubr.msk.f32.mxu0 %vm7642_vm5, %v18609_v59  ;;  %v10088_v59 = vld [vmem:[#allocation12 + $0x1b0] sm:$0xff] }
 0x69a   : > { %14588 = vmatmul.mubr.msk.f32.gmra.mrb[52].mxu0 %vm7642_vm5, %v19743_v21  ;;  %v19760_v21 = vld [vmem:[#allocation42_spill] sm:$0xff] }
 0x69b   : > { %14590 = vmatprep.mubr.msk.f32.mxu0 %vm7642_vm5, %v19744_v13  ;;  %v19761_v13 = vld [vmem:[#allocation28_spill] sm:$0xff] }
 0x69e   : > { %14591 = vmatmul.mubr.msk.f32.gmra.mrb[54].mxu0 %vm7642_vm5, %v19745_v27  ;;  %v19762_v27 = vld [vmem:[#allocation43_spill] sm:$0xff] }
 0x69f   : > { %14593 = vmatprep.mubr.msk.f32.mxu0 %vm7642_vm5, %v19746_v1  ;;  %v19763_v1 = vld [vmem:[#allocation29_spill] sm:$0xff] }
 0x6a2   : > { %14594 = vmatmul.mubr.msk.f32.gmra.mrb[56].mxu0 %vm7642_vm5, %v19747_v10  ;;  %v19764_v10 = vld [vmem:[#allocation44_spill] sm:$0xff] }
 0x6a3   : > { %14596 = vmatprep.mubr.msk.f32.mxu0 %vm7642_vm5, %v19748_v19  ;;  %v19765_v19 = vld [vmem:[#allocation30_spill] sm:$0xff] }
 0x6a6   : > { %14597 = vmatmul.mubr.msk.f32.gmra.mrb[58].mxu0 %vm7642_vm5, %v19749_v9  ;;  %v19766_v9 = vld [vmem:[#allocation45_spill] sm:$0xff] }
 0x6a7   : > { %14599 = vmatprep.mubr.msk.f32.mxu0 %vm7642_vm5, %v19750_v41  ;;  %v19767_v41 = vld [vmem:[#allocation31_spill] sm:$0xff] }
 0x6aa   : > { %14600 = vmatmul.mubr.msk.f32.gmra.mrb[60].mxu0 %vm7642_vm5, %v19751_v18  ;;  %v19768_v18 = vld [vmem:[#allocation32_spill] sm:$0xff] }
 0x6ab   : > { %14602 = vmatprep.mubr.msk.f32.mxu0 %vm7642_vm5, %v19034_v29 }
 0x6ae   : > { %14603 = vmatmul.mubr.msk.f32.gmra.mrb[62].mxu0 %vm7642_vm5, %v19038_v60 }
 0x6af   : > { %14621 = vmatprep.mubr.msk.f32.mxu0 %vm7642_vm5, %v18786_v31  ;;  %v15041_v31 = vpack.c.bf16 %v10089_v5, %v10088_v59  ;;  %v19776_v59 = vld [vmem:[#allocation47_spill] sm:$0xff]  ;;  %v19777_v5 = vld [vmem:[#allocation53_spill] sm:$0xff] }
 0x6b2   : > { %14622 = vmatmul.mubr.msk.f32.vlgmr.msra.gmra.mrb[32].mxu0 %vm7642_vm5, %v19752_v23  ;;  %v19774_v23 = vld [vmem:[#allocation51_spill] sm:$0xff] }
 0x6b3   : > { %15032 = vmatpush3.bf16.msra.mxu0 %v15029_v26  ;;  %14624 = vmatprep.mubr.msk.f32.mxu0 %vm7642_vm5, %v18794_v22  ;;  %v19759_v26 = vld [vmem:[#allocation27_spill] sm:$0xff] }
 0x6b4   : > { %15034 = vmatprep.subr.bf16.mxu0 %v15033_v8 }
 0x6b6   : > { %14625 = vmatmul.mubr.msk.f32.gmra.mrb[34].mxu0 %vm7642_vm5, %v18798_v36 }
 0x6b7   : > { %14627 = vmatprep.mubr.msk.f32.mxu0 %vm7642_vm5, %v19753_v35  ;;  %15036 = vmatpush3.bf16.msra.mxu0 %v15033_v8  ;;  %v19771_v8 = vld [vmem:[#allocation48_spill] sm:$0xff] }
 0x6b8   : > { %15038 = vmatprep.subr.bf16.mxu0 %v15037_v44 }
 0x6ba   : > { %14628 = vmatmul.mubr.msk.f32.gmra.mrb[36].mxu0 %vm7642_vm5, %v19754_v7 }
 0x6bb   : > { %14630 = vmatprep.mubr.msk.f32.mxu0 %vm7642_vm5, %v19755_v24  ;;  %15040 = vmatpush3.bf16.msra.mxu0 %v15037_v44  ;;  %v19775_v44 = vld [vmem:[#allocation52_spill] sm:$0xff] }
 0x6bc   : > { %15042 = vmatprep.subr.bf16.mxu0 %v15041_v31 }
 0x6be   : > { %14631 = vmatmul.mubr.msk.f32.gmra.mrb[38].mxu0 %vm7642_vm5, %v19756_v62 }
 0x6bf   : > { %14633 = vmatprep.mubr.msk.f32.mxu0 %vm7642_vm5, %v19757_v37  ;;  %15044 = vmatpush3.bf16.msra.mxu0 %v15041_v31  ;;  %v19102_v31 = vld [vmem:[#allocation4 + $0x209] sm:$0xff] }
 0x6c0   : > { %15046 = vmatprep.subr.bf16.mxu0 %v15045_v3  ;;  %19778 = vst [vmem:[#allocation19_spill] sm:$0xff] %v19102_v31 }
 0x6c2   : > { %14634 = vmatmul.mubr.msk.f32.gmra.mrb[40].mxu0 %vm7642_vm5, %v19758_v63 }
 0x6c3   : > { %14636 = vmatprep.mubr.msk.f32.mxu0 %vm7642_vm5, %v19759_v26 }
 0x6c6   : > { %14637 = vmatmul.mubr.msk.f32.gmra.mrb[42].mxu0 %vm7642_vm5, %v19760_v21 }
 0x6c7   : > { %14639 = vmatprep.mubr.msk.f32.mxu0 %vm7642_vm5, %v19761_v13 }
 0x6ca   : > { %14640 = vmatmul.mubr.msk.f32.gmra.mrb[44].mxu0 %vm7642_vm5, %v19762_v27 }
 0x6cb   : > { %14642 = vmatprep.mubr.msk.f32.mxu0 %vm7642_vm5, %v19763_v1 }
 0x6ce   : > { %14643 = vmatmul.mubr.msk.f32.gmra.mrb[46].mxu0 %vm7642_vm5, %v19764_v10 }
 0x6cf   : > { %14645 = vmatprep.mubr.msk.f32.mxu0 %vm7642_vm5, %v19765_v19 }
 0x6d2   : > { %14646 = vmatmul.mubr.msk.f32.gmra.mrb[48].mxu0 %vm7642_vm5, %v19766_v9 }
 0x6d3   : > { %14648 = vmatprep.mubr.msk.f32.mxu0 %vm7642_vm5, %v19767_v41 }
 0x6d6   : > { %14649 = vmatmul.mubr.msk.f32.gmra.mrb[50].mxu0 %vm7642_vm5, %v19768_v18 }
 0x6d7   : > { %14651 = vmatprep.mubr.msk.f32.mxu0 %vm7642_vm5, %v19769_v45 }
 0x6da   : > { %14652 = vmatmul.mubr.msk.f32.gmra.mrb[52].mxu0 %vm7642_vm5, %v19770_v33 }
 0x6db   : > { %14654 = vmatprep.mubr.msk.f32.mxu0 %vm7642_vm5, %v19771_v8 }
 0x6de   : > { %14655 = vmatmul.mubr.msk.f32.gmra.mrb[54].mxu0 %vm7642_vm5, %v19772_v53 }
 0x6df   : > { %14657 = vmatprep.mubr.msk.f32.mxu0 %vm7642_vm5, %v19773_v17  ;;  %v10483_v17 = vld [vmem:[#allocation12 + $0x1f8] sm:$0xff] }
 0x6e2   : > { %14658 = vmatmul.mubr.msk.f32.gmra.mrb[56].mxu0 %vm7642_vm5, %v19774_v23  ;;  %v10479_v23 = vld [vmem:[#allocation12 + $0x1d8] sm:$0xff] }
 0x6e3   : > { %14660 = vmatprep.mubr.msk.f32.mxu0 %vm7642_vm5, %v19775_v44  ;;  %v10481_v44 = vld [vmem:[#allocation12 + $0x1e8] sm:$0xff] }
 0x6e6   : > { %14661 = vmatmul.mubr.msk.f32.gmra.mrb[58].mxu0 %vm7642_vm5, %v19776_v59  ;;  %v15049_v59 = vpack.c.bf16 %v10479_v23, %v10478_v52  ;;  %v10870_v23 = vld [vmem:[#allocation12 + $0x200] sm:$0xff]  ;;  %v10871_v52 = vld [vmem:[#allocation12 + $0x208] sm:$0xff] }
 0x6e7   : > { %14663 = vmatprep.mubr.msk.f32.mxu0 %vm7642_vm5, %v19777_v5  ;;  %v10480_v5 = vld [vmem:[#allocation12 + $0x1e0] sm:$0xff] }
 0x6ea   : > { %14664 = vmatmul.mubr.msk.f32.gmra.mrb[60].mxu0 %vm7642_vm5, %v18902_v46  ;;  %v10482_v46 = vld [vmem:[#allocation12 + $0x1f0] sm:$0xff] }
 0x6eb   : > { %14666 = vmatprep.mubr.msk.f32.mxu0 %vm7642_vm5, %v19102_v31  ;;  %v15053_v31 = vpack.c.bf16 %v10481_v44, %v10480_v5  ;;  %v10463_v44 = vld [vmem:[#allocation4 + $0x188] sm:$0xff] }
 0x6ec   : > { %v10465_v5 = vld [vmem:[#allocation4 + $0x1a8] sm:$0xff] }
 0x6ee   : > { %14667 = vmatmul.mubr.msk.f32.gmra.mrb[62].mxu0 %vm7642_vm5, %v19106_v48 }
 0x6ef   : > { %14685 = vmatprep.mubr.msk.f32.mxu0 %vm7642_vm5, %v18672_v25  ;;  %v15057_v25 = vpack.c.bf16 %v10483_v17, %v10482_v46  ;;  %v10458_v46 = vld [vmem:[#allocation4 + $0x130] sm:$0xff] }
 0x6f0   : > { %v10462_v17 = vld [vmem:[#allocation4 + $0x170] sm:$0xff] }
 0x6f2   : > { %14686 = vmatmul.mubr.msk.f32.vlgmr.msra.gmra.mrb[32].mxu0 %vm7642_vm5, %v18676_v32  ;;  %v15061_v32 = vpack.c.bf16 %v10871_v52, %v10870_v23  ;;  %v10468_v23 = vld [vmem:[#allocation4 + $0x1d0] sm:$0xff]  ;;  %v10469_v52 = vld [vmem:[#allocation4 + $0x1e8] sm:$0xff] }
 0x6f3   : > { %15048 = vmatpush3.bf16.msra.mxu0 %v15045_v3  ;;  %14688 = vmatprep.mubr.msk.f32.mxu0 %vm7642_vm5, %v18680_v4  ;;  %v10079_v4 = vld [vmem:[#allocation4 + $0x227] sm:$0xff] }
 0x6f4   : > { %15050 = vmatprep.subr.bf16.mxu0 %v15049_v59  ;;  %v10461_v3 = vld [vmem:[#allocation4 + $0x168] sm:$0xff] }
 0x6f6   : > { %14689 = vmatmul.mubr.msk.f32.gmra.mrb[34].mxu0 %vm7642_vm5, %v18684_v40  ;;  %v10080_v40 = vld [vmem:[#allocation4 + $0x22f] sm:$0xff] }
 0x6f7   : > { %14691 = vmatprep.mubr.msk.f32.mxu0 %vm7642_vm5, %v18688_v2  ;;  %15052 = vmatpush3.bf16.msra.mxu0 %v15049_v59  ;;  %v10872_v2 = vld [vmem:[#allocation12 + $0x210] sm:$0xff]  ;;  %v10464_v59 = vld [vmem:[#allocation4 + $0x190] sm:$0xff] }
 0x6f8   : > { %15054 = vmatprep.subr.bf16.mxu0 %v15053_v31 }
 0x6fa   : > { %14692 = vmatmul.mubr.msk.f32.gmra.mrb[36].mxu0 %vm7642_vm5, %v18692_v0  ;;  %v10873_v0 = vld [vmem:[#allocation12 + $0x218] sm:$0xff] }
 0x6fb   : > { %14694 = vmatprep.mubr.msk.f32.mxu0 %vm7642_vm5, %v18696_v6  ;;  %15056 = vmatpush3.bf16.msra.mxu0 %v15053_v31  ;;  %v10443_v6 = vld [vmem:[#allocation4 + $0x48] sm:$0xff]  ;;  %v10466_v31 = vld [vmem:[#allocation4 + $0x1b0] sm:$0xff] }
 0x6fc   : > { %15058 = vmatprep.subr.bf16.mxu0 %v15057_v25 }
 0x6fe   : > { %14695 = vmatmul.mubr.msk.f32.gmra.mrb[38].mxu0 %vm7642_vm5, %v18700_v30  ;;  %v15065_v30 = vpack.c.bf16 %v10873_v0, %v10872_v2 }
 0x6ff   : > { %14697 = vmatprep.mubr.msk.f32.mxu0 %vm7642_vm5, %v18704_v58  ;;  %15060 = vmatpush3.bf16.msra.mxu0 %v15057_v25  ;;  %v10444_v58 = vld [vmem:[#allocation4 + $0x50] sm:$0xff]  ;;  %v10467_v25 = vld [vmem:[#allocation4 + $0x1c8] sm:$0xff] }
 0x700   : > { %15062 = vmatprep.subr.bf16.mxu0 %v15061_v32 }
 0x702   : > { %14698 = vmatmul.mubr.msk.f32.gmra.mrb[40].mxu0 %vm7642_vm5, %v18708_v61  ;;  %v10874_v61 = vld [vmem:[#allocation12 + $0x220] sm:$0xff] }
 0x703   : > { %14700 = vmatprep.mubr.msk.f32.mxu0 %vm7642_vm5, %v18712_v14  ;;  %v10875_v14 = vld [vmem:[#allocation12 + $0x228] sm:$0xff] }
 0x706   : > { %14701 = vmatmul.mubr.msk.f32.gmra.mrb[42].mxu0 %vm7642_vm5, %v18716_v11  ;;  %v10445_v11 = vld [vmem:[#allocation4 + $0x68] sm:$0xff] }
 0x707   : > { %14703 = vmatprep.mubr.msk.f32.mxu0 %vm7642_vm5, %v18720_v38  ;;  %v15069_v38 = vpack.c.bf16 %v10875_v14, %v10874_v61 }
 0x70a   : > { %14704 = vmatmul.mubr.msk.f32.gmra.mrb[44].mxu0 %vm7642_vm5, %v18724_v42  ;;  %v10446_v42 = vld [vmem:[#allocation4 + $0x70] sm:$0xff] }
 0x70b   : > { %14706 = vmatprep.mubr.msk.f32.mxu0 %vm7642_vm5, %v18728_v57  ;;  %v10876_v57 = vld [vmem:[#allocation12 + $0x230] sm:$0xff] }
 0x70e   : > { %14707 = vmatmul.mubr.msk.f32.gmra.mrb[46].mxu0 %vm7642_vm5, %v18732_v56  ;;  %v10877_v56 = vld [vmem:[#allocation12 + $0x238] sm:$0xff] }
 0x70f   : > { %14709 = vmatprep.mubr.msk.f32.mxu0 %vm7642_vm5, %v18736_v39  ;;  %v10447_v39 = vld [vmem:[#allocation4 + $0x88] sm:$0xff] }
 0x712   : > { %14710 = vmatmul.mubr.msk.f32.gmra.mrb[48].mxu0 %vm7642_vm5, %v18740_v50  ;;  %v15073_v50 = vpack.c.bf16 %v10877_v56, %v10876_v57 }
 0x713   : > { %14712 = vmatprep.mubr.msk.f32.mxu0 %vm7642_vm5, %v18744_v49  ;;  %v10448_v49 = vld [vmem:[#allocation4 + $0x90] sm:$0xff] }
 0x716   : > { %14713 = vmatmul.mubr.msk.f32.gmra.mrb[50].mxu0 %vm7642_vm5, %v18748_v55  ;;  %v10449_v55 = vld [vmem:[#allocation4 + $0xa8] sm:$0xff] }
 0x717   : > { %14715 = vmatprep.mubr.msk.f32.mxu0 %vm7642_vm5, %v18752_v51  ;;  %v10450_v51 = vld [vmem:[#allocation4 + $0xb0] sm:$0xff] }
 0x71a   : > { %14716 = vmatmul.mubr.msk.f32.gmra.mrb[52].mxu0 %vm7642_vm5, %v18756_v47  ;;  %v10451_v47 = vld [vmem:[#allocation4 + $0xc8] sm:$0xff] }
 0x71b   : > { %14718 = vmatprep.mubr.msk.f32.mxu0 %vm7642_vm5, %v18760_v43  ;;  %v10452_v43 = vld [vmem:[#allocation4 + $0xd0] sm:$0xff] }
 0x71e   : > { %14719 = vmatmul.mubr.msk.f32.gmra.mrb[54].mxu0 %vm7642_vm5, %v18764_v34  ;;  %v10453_v34 = vld [vmem:[#allocation4 + $0xe8] sm:$0xff] }
 0x71f   : > { %14721 = vmatprep.mubr.msk.f32.mxu0 %vm7642_vm5, %v18768_v54  ;;  %v10454_v54 = vld [vmem:[#allocation4 + $0xf0] sm:$0xff] }
 0x722   : > { %14722 = vmatmul.mubr.msk.f32.gmra.mrb[56].mxu0 %vm7642_vm5, %v18772_v12  ;;  %v10455_v12 = vld [vmem:[#allocation4 + $0x108] sm:$0xff] }
 0x723   : > { %14724 = vmatprep.mubr.msk.f32.mxu0 %vm7642_vm5, %v18776_v20  ;;  %v10456_v20 = vld [vmem:[#allocation4 + $0x110] sm:$0xff] }
 0x726   : > { %14725 = vmatmul.mubr.msk.f32.gmra.mrb[58].mxu0 %vm7642_vm5, %v18780_v28  ;;  %v10457_v28 = vld [vmem:[#allocation4 + $0x128] sm:$0xff] }
 0x727   : > { %14727 = vmatprep.mubr.msk.f32.mxu0 %vm7642_vm5, %v18966_v15  ;;  %v10459_v15 = vld [vmem:[#allocation4 + $0x148] sm:$0xff] }
 0x72a   : > { %14728 = vmatmul.mubr.msk.f32.gmra.mrb[60].mxu0 %vm7642_vm5, %v18970_v16  ;;  %v10460_v16 = vld [vmem:[#allocation4 + $0x150] sm:$0xff] }
 0x72b   : > { %14730 = vmatprep.mubr.msk.f32.mxu0 %vm7642_vm5, %v10079_v4  ;;  %v10473_v4 = vld [vmem:[#allocation4 + $0x228] sm:$0xff] }
 0x72e   : > { %14731 = vmatmul.mubr.msk.f32.gmra.mrb[62].mxu0 %vm7642_vm5, %v10080_v40  ;;  %v10474_v40 = vld [vmem:[#allocation4 + $0x230] sm:$0xff] }
 0x72f   : > { %14749 = vmatprep.mubr.msk.f32.mxu0 %vm7642_vm5, %v10443_v6 }
 0x732   : > { %14750 = vmatmul.mubr.msk.f32.vlgmr.msra.gmra.mrb[32].mxu0 %vm7642_vm5, %v10444_v58 }
 0x733   : > { %15064 = vmatpush3.bf16.msra.mxu0 %v15061_v32  ;;  %14752 = vmatprep.mubr.msk.f32.mxu0 %vm7642_vm5, %v10445_v11  ;;  %v10470_v32 = vld [vmem:[#allocation4 + $0x1f0] sm:$0xff] }
 0x734   : > { %15066 = vmatprep.subr.bf16.mxu0 %v15065_v30 }
 0x736   : > { %14753 = vmatmul.mubr.msk.f32.gmra.mrb[34].mxu0 %vm7642_vm5, %v10446_v42 }
 0x737   : > { %14755 = vmatprep.mubr.msk.f32.mxu0 %vm7642_vm5, %v10447_v39  ;;  %15068 = vmatpush3.bf16.msra.mxu0 %v15065_v30 }
 0x738   : > { %15070 = vmatprep.subr.bf16.mxu0 %v15069_v38 }
 0x73a   : > { %14756 = vmatmul.mubr.msk.f32.gmra.mrb[36].mxu0 %vm7642_vm5, %v10448_v49 }
 0x73b   : > { %14758 = vmatprep.mubr.msk.f32.mxu0 %vm7642_vm5, %v10449_v55  ;;  %15072 = vmatpush3.bf16.msra.mxu0 %v15069_v38 }
 0x73c   : > { %15074 = vmatprep.subr.bf16.mxu0 %v15073_v50 }
 0x73e   : > { %14759 = vmatmul.mubr.msk.f32.gmra.mrb[38].mxu0 %vm7642_vm5, %v10450_v51 }
 0x73f   : > { %14761 = vmatprep.mubr.msk.f32.mxu0 %vm7642_vm5, %v10451_v47  ;;  %15076 = vmatpush3.bf16.msra.mxu0 %v15073_v50 }
 0x742   : > { %14762 = vmatmul.mubr.msk.f32.gmra.mrb[40].mxu0 %vm7642_vm5, %v10452_v43 }
 0x743   : > { %14764 = vmatprep.mubr.msk.f32.mxu0 %vm7642_vm5, %v10453_v34 }
 0x746   : > { %14765 = vmatmul.mubr.msk.f32.gmra.mrb[42].mxu0 %vm7642_vm5, %v10454_v54 }
 0x747   : > { %14767 = vmatprep.mubr.msk.f32.mxu0 %vm7642_vm5, %v10455_v12 }
 0x74a   : > { %14768 = vmatmul.mubr.msk.f32.gmra.mrb[44].mxu0 %vm7642_vm5, %v10456_v20 }
 0x74b   : > { %14770 = vmatprep.mubr.msk.f32.mxu0 %vm7642_vm5, %v10457_v28 }
 0x74e   : > { %14771 = vmatmul.mubr.msk.f32.gmra.mrb[46].mxu0 %vm7642_vm5, %v10458_v46 }
 0x74f   : > { %14773 = vmatprep.mubr.msk.f32.mxu0 %vm7642_vm5, %v10459_v15 }
 0x752   : > { %14774 = vmatmul.mubr.msk.f32.gmra.mrb[48].mxu0 %vm7642_vm5, %v10460_v16 }
 0x753   : > { %14776 = vmatprep.mubr.msk.f32.mxu0 %vm7642_vm5, %v10461_v3 }
 0x756   : > { %14777 = vmatmul.mubr.msk.f32.gmra.mrb[50].mxu0 %vm7642_vm5, %v10462_v17 }
 0x757   : > { %14779 = vmatprep.mubr.msk.f32.mxu0 %vm7642_vm5, %v10463_v44 }
 0x75a   : > { %14780 = vmatmul.mubr.msk.f32.gmra.mrb[52].mxu0 %vm7642_vm5, %v10464_v59 }
 0x75b   : > { %14782 = vmatprep.mubr.msk.f32.mxu0 %vm7642_vm5, %v10465_v5 }
 0x75e   : > { %14783 = vmatmul.mubr.msk.f32.gmra.mrb[54].mxu0 %vm7642_vm5, %v10466_v31 }
 0x75f   : > { %14785 = vmatprep.mubr.msk.f32.mxu0 %vm7642_vm5, %v10467_v25 }
 0x762   : > { %14786 = vmatmul.mubr.msk.f32.gmra.mrb[56].mxu0 %vm7642_vm5, %v10468_v23 }
 0x763   : > { %14788 = vmatprep.mubr.msk.f32.mxu0 %vm7642_vm5, %v10469_v52 }
 0x766   : > { %14789 = vmatmul.mubr.msk.f32.gmra.mrb[58].mxu0 %vm7642_vm5, %v10470_v32 }
 0x767   : > { %14791 = vmatprep.mubr.msk.f32.mxu0 %vm7642_vm5, %v19034_v29  ;;  %v19781_v29 = vld [vmem:[#allocation52_spill] sm:$0xff] }
 0x76a   : > { %14792 = vmatmul.mubr.msk.f32.gmra.mrb[60].mxu0 %vm7642_vm5, %v19038_v60  ;;  %v19782_v60 = vld [vmem:[#allocation47_spill] sm:$0xff] }
 0x76b   : > { %14794 = vmatprep.mubr.msk.f32.mxu0 %vm7642_vm5, %v10473_v4 }
 0x76e   : > { %14795 = vmatmul.mubr.msk.f32.gmra.mrb[62].mxu0 %vm7642_vm5, %v10474_v40 }
 0x76f   : > { %14813 = vmatprep.mubr.msk.f32.mxu0 %vm7642_vm5, %v18794_v22  ;;  %v19779_v22 = vld [vmem:[#allocation50_spill] sm:$0xff] }
 0x772   : > { %14814 = vmatmul.mubr.msk.f32.vlgmr.msra.gmra.mrb[32].mxu0 %vm7642_vm5, %v18798_v36  ;;  %v19780_v36 = vld [vmem:[#allocation51_spill] sm:$0xff] }
 0x773   : > { %14816 = vmatprep.mubr.msk.f32.mxu0 %vm7642_vm5, %v19753_v35  ;;  %v19783_v35 = vld [vmem:[#allocation53_spill] sm:$0xff] }
 0x776   : > { %14817 = vmatmul.mubr.msk.f32.gmra.mrb[34].mxu0 %vm7642_vm5, %v19754_v7  ;;  %v19784_v7 = vld [vmem:[#allocation54_spill] sm:$0xff] }
 0x777   : > { %14819 = vmatprep.mubr.msk.f32.mxu0 %vm7642_vm5, %v19755_v24  ;;  %v19785_v24 = vld [vmem:[#allocation19_spill] sm:$0xff] }
 0x77a   : > { %14820 = vmatmul.mubr.msk.f32.gmra.mrb[36].mxu0 %vm7642_vm5, %v19756_v62  ;;  %v10867_v62 = vld [vmem:[#allocation4 + $0x229] sm:$0xff] }
 0x77b   : > { %14822 = vmatprep.mubr.msk.f32.mxu0 %vm7642_vm5, %v19757_v37  ;;  %v10868_v37 = vld [vmem:[#allocation4 + $0x231] sm:$0xff] }
 0x77e   : > { %14823 = vmatmul.mubr.msk.f32.gmra.mrb[38].mxu0 %vm7642_vm5, %v19758_v63  ;;  %v19268_v63 = vld [vmem:[#allocation13] ss:$0 sm:$0xff] }
 0x77f   : > { %14825 = vmatprep.mubr.msk.f32.mxu0 %vm7642_vm5, %v19759_v26 }
 0x782   : > { %14826 = vmatmul.mubr.msk.f32.gmra.mrb[40].mxu0 %vm7642_vm5, %v19760_v21 }
 0x783   : > { %14828 = vmatprep.mubr.msk.f32.mxu0 %vm7642_vm5, %v19761_v13 }
 0x786   : > { %14829 = vmatmul.mubr.msk.f32.gmra.mrb[42].mxu0 %vm7642_vm5, %v19762_v27 }
 0x787   : > { %14831 = vmatprep.mubr.msk.f32.mxu0 %vm7642_vm5, %v19763_v1 }
 0x78a   : > { %14832 = vmatmul.mubr.msk.f32.gmra.mrb[44].mxu0 %vm7642_vm5, %v19764_v10 }
 0x78b   : > { %14834 = vmatprep.mubr.msk.f32.mxu0 %vm7642_vm5, %v19765_v19 }
 0x78e   : > { %14835 = vmatmul.mubr.msk.f32.gmra.mrb[46].mxu0 %vm7642_vm5, %v19766_v9 }
 0x78f   : > { %14837 = vmatprep.mubr.msk.f32.mxu0 %vm7642_vm5, %v19767_v41 }
 0x792   : > { %14838 = vmatmul.mubr.msk.f32.gmra.mrb[48].mxu0 %vm7642_vm5, %v19768_v18 }
 0x793   : > { %14840 = vmatprep.mubr.msk.f32.mxu0 %vm7642_vm5, %v19769_v45 }
 0x796   : > { %14841 = vmatmul.mubr.msk.f32.gmra.mrb[50].mxu0 %vm7642_vm5, %v19770_v33 }
 0x797   : > { %14843 = vmatprep.mubr.msk.f32.mxu0 %vm7642_vm5, %v19771_v8 }
 0x79a   : > { %14844 = vmatmul.mubr.msk.f32.gmra.mrb[52].mxu0 %vm7642_vm5, %v19772_v53 }
 0x79b   : > { %14846 = vmatprep.mubr.msk.f32.mxu0 %vm7642_vm5, %v19779_v22 }
 0x79e   : > { %14847 = vmatmul.mubr.msk.f32.gmra.mrb[54].mxu0 %vm7642_vm5, %v19780_v36 }
 0x79f   : > { %14849 = vmatprep.mubr.msk.f32.mxu0 %vm7642_vm5, %v19781_v29 }
 0x7a2   : > { %14850 = vmatmul.mubr.msk.f32.gmra.mrb[56].mxu0 %vm7642_vm5, %v19782_v60 }
 0x7a3   : > { %14852 = vmatprep.mubr.msk.f32.mxu0 %vm7642_vm5, %v19783_v35 }
 0x7a6   : > { %14853 = vmatmul.mubr.msk.f32.gmra.mrb[58].mxu0 %vm7642_vm5, %v19784_v7 }
 0x7a7   : > { %14855 = vmatprep.mubr.msk.f32.mxu0 %vm7642_vm5, %v19785_v24 }
 0x7aa   : > { %14856 = vmatmul.mubr.msk.f32.gmra.mrb[60].mxu0 %vm7642_vm5, %v19106_v48 }
 0x7ab   : > { %14858 = vmatprep.mubr.msk.f32.mxu0 %vm7642_vm5, %v10867_v62 }
 0x7ae   : > { %14859 = vmatmul.mubr.msk.f32.gmra.mrb[62].mxu0 %vm7642_vm5, %v10868_v37 }
 0x845   : > { %v14815_v26 = vpop.f32.mrb[32].mxu0 }
 0x846   : > { %v11239_v21 = vadd.f32 %v14815_v26, %v19268_v63  ;;  %v11040_v13 = vpop.f32.mrb[33].mxu0 }
 0x847   : > { %v11238_v27 = vadd.f32 %v19268_v63, %v11040_v13 }
 0x848   : > { %v11271_v1 = vmax.f32 %v11239_v21, 0.0 }
 0x849   : > { %v11270_v10 = vmax.f32 %v11238_v27, 0.0  ;;  %v14818_v19 = vpop.f32.mrb[34].mxu0 }
 0x84a   : > { %11303 = vst.msk [vmem:[%s19276_s22 + $0x8] sm:$0xff] %vm7642_vm5, %v11271_v1  ;;  %v11241_v9 = vadd.f32 %v14818_v19, %v19268_v63  ;;  %v11050_v41 = vpop.f32.mrb[35].mxu0 }
 0x84b   : > { %11302 = vst.msk [vmem:[%s19276_s22] sm:$0xff] %vm7642_vm5, %v11270_v10  ;;  %v11240_v18 = vadd.f32 %v19268_v63, %v11050_v41 }
 0x84c   : > { %v11273_v45 = vmax.f32 %v11241_v9, 0.0 }
 0x84d   : > { %v11272_v33 = vmax.f32 %v11240_v18, 0.0  ;;  %v14821_v8 = vpop.f32.mrb[36].mxu0 }
 0x84e   : > { %11305 = vst.msk [vmem:[%s19276_s22 + $0x18] sm:$0xff] %vm7642_vm5, %v11273_v45  ;;  %v11243_v53 = vadd.f32 %v14821_v8, %v19268_v63  ;;  %v11060_v48 = vpop.f32.mrb[37].mxu0 }
 0x84f   : > { %11304 = vst.msk [vmem:[%s19276_s22 + $0x10] sm:$0xff] %vm7642_vm5, %v11272_v33  ;;  %v11242_v2 = vadd.f32 %v19268_v63, %v11060_v48 }
 0x850   : > { %v11275_v0 = vmax.f32 %v11243_v53, 0.0 }
 0x851   : > { %v11274_v6 = vmax.f32 %v11242_v2, 0.0  ;;  %v14824_v30 = vpop.f32.mrb[38].mxu0 }
 0x852   : > { %11307 = vst.msk [vmem:[%s19276_s22 + $0x28] sm:$0xff] %vm7642_vm5, %v11275_v0  ;;  %v11245_v58 = vadd.f32 %v14824_v30, %v19268_v63  ;;  %v11070_v61 = vpop.f32.mrb[39].mxu0 }
 0x853   : > { %11306 = vst.msk [vmem:[%s19276_s22 + $0x20] sm:$0xff] %vm7642_vm5, %v11274_v6  ;;  %v11244_v14 = vadd.f32 %v19268_v63, %v11070_v61 }
 0x854   : > { %v11277_v11 = vmax.f32 %v11245_v58, 0.0 }
 0x855   : > { %v11276_v38 = vmax.f32 %v11244_v14, 0.0  ;;  %v14827_v42 = vpop.f32.mrb[40].mxu0 }
 0x856   : > { %11309 = vst.msk [vmem:[%s19276_s22 + $0x38] sm:$0xff] %vm7642_vm5, %v11277_v11  ;;  %v11247_v57 = vadd.f32 %v14827_v42, %v19268_v63  ;;  %v11080_v56 = vpop.f32.mrb[41].mxu0 }
 0x857   : > { %11308 = vst.msk [vmem:[%s19276_s22 + $0x30] sm:$0xff] %vm7642_vm5, %v11276_v38  ;;  %v11246_v39 = vadd.f32 %v19268_v63, %v11080_v56 }
 0x858   : > { %v11279_v50 = vmax.f32 %v11247_v57, 0.0 }
 0x859   : > { %v11278_v49 = vmax.f32 %v11246_v39, 0.0  ;;  %v14830_v55 = vpop.f32.mrb[42].mxu0 }
 0x85a   : > { %11311 = vst.msk [vmem:[%s19276_s22 + $0x48] sm:$0xff] %vm7642_vm5, %v11279_v50  ;;  %v11249_v51 = vadd.f32 %v14830_v55, %v19268_v63  ;;  %v11090_v47 = vpop.f32.mrb[43].mxu0 }
 0x85b   : > { %11310 = vst.msk [vmem:[%s19276_s22 + $0x40] sm:$0xff] %vm7642_vm5, %v11278_v49  ;;  %v11248_v43 = vadd.f32 %v19268_v63, %v11090_v47 }
 0x85c   : > { %v11281_v34 = vmax.f32 %v11249_v51, 0.0 }
 0x85d   : > { %v11280_v54 = vmax.f32 %v11248_v43, 0.0  ;;  %v14833_v12 = vpop.f32.mrb[44].mxu0 }
 0x85e   : > { %11313 = vst.msk [vmem:[%s19276_s22 + $0x58] sm:$0xff] %vm7642_vm5, %v11281_v34  ;;  %v11251_v20 = vadd.f32 %v14833_v12, %v19268_v63  ;;  %v11100_v28 = vpop.f32.mrb[45].mxu0 }
 0x85f   : > { %11312 = vst.msk [vmem:[%s19276_s22 + $0x50] sm:$0xff] %vm7642_vm5, %v11280_v54  ;;  %v11250_v46 = vadd.f32 %v19268_v63, %v11100_v28 }
 0x860   : > { %v11283_v15 = vmax.f32 %v11251_v20, 0.0 }
 0x861   : > { %v11282_v16 = vmax.f32 %v11250_v46, 0.0  ;;  %v14836_v3 = vpop.f32.mrb[46].mxu0 }
 0x862   : > { %11315 = vst.msk [vmem:[%s19276_s22 + $0x68] sm:$0xff] %vm7642_vm5, %v11283_v15  ;;  %v11253_v17 = vadd.f32 %v14836_v3, %v19268_v63  ;;  %v11110_v44 = vpop.f32.mrb[47].mxu0 }
 0x863   : > { %11314 = vst.msk [vmem:[%s19276_s22 + $0x60] sm:$0xff] %vm7642_vm5, %v11282_v16  ;;  %v11252_v59 = vadd.f32 %v19268_v63, %v11110_v44 }
 0x864   : > { %v11285_v5 = vmax.f32 %v11253_v17, 0.0 }
 0x865   : > { %v11284_v31 = vmax.f32 %v11252_v59, 0.0  ;;  %v14839_v25 = vpop.f32.mrb[48].mxu0 }
 0x866   : > { %11317 = vst.msk [vmem:[%s19276_s22 + $0x78] sm:$0xff] %vm7642_vm5, %v11285_v5  ;;  %v11255_v23 = vadd.f32 %v14839_v25, %v19268_v63  ;;  %v11120_v52 = vpop.f32.mrb[49].mxu0 }
 0x867   : > { %11316 = vst.msk [vmem:[%s19276_s22 + $0x70] sm:$0xff] %vm7642_vm5, %v11284_v31  ;;  %v11254_v32 = vadd.f32 %v19268_v63, %v11120_v52 }
 0x868   : > { %v11287_v4 = vmax.f32 %v11255_v23, 0.0 }
 0x869   : > { %v11286_v40 = vmax.f32 %v11254_v32, 0.0  ;;  %v14842_v22 = vpop.f32.mrb[50].mxu0 }
 0x86a   : > { %11319 = vst.msk [vmem:[%s19276_s22 + $0x88] sm:$0xff] %vm7642_vm5, %v11287_v4  ;;  %v11257_v36 = vadd.f32 %v14842_v22, %v19268_v63  ;;  %v11130_v29 = vpop.f32.mrb[51].mxu0 }
 0x86b   : > { %11318 = vst.msk [vmem:[%s19276_s22 + $0x80] sm:$0xff] %vm7642_vm5, %v11286_v40  ;;  %v11256_v60 = vadd.f32 %v19268_v63, %v11130_v29 }
 0x86c   : > { %v11289_v35 = vmax.f32 %v11257_v36, 0.0 }
 0x86d   : > { %v11288_v7 = vmax.f32 %v11256_v60, 0.0  ;;  %v14845_v24 = vpop.f32.mrb[52].mxu0 }
 0x86e   : > { %11321 = vst.msk [vmem:[%s19276_s22 + $0x98] sm:$0xff] %vm7642_vm5, %v11289_v35  ;;  %v11259_v62 = vadd.f32 %v14845_v24, %v19268_v63  ;;  %v11140_v37 = vpop.f32.mrb[53].mxu0 }
 0x86f   : > { %11320 = vst.msk [vmem:[%s19276_s22 + $0x90] sm:$0xff] %vm7642_vm5, %v11288_v7  ;;  %v11258_v26 = vadd.f32 %v19268_v63, %v11140_v37 }
 0x870   : > { %v11291_v21 = vmax.f32 %v11259_v62, 0.0 }
 0x871   : > { %v11290_v13 = vmax.f32 %v11258_v26, 0.0  ;;  %v14848_v27 = vpop.f32.mrb[54].mxu0 }
 0x872   : > { %11323 = vst.msk [vmem:[%s19276_s22 + $0xa8] sm:$0xff] %vm7642_vm5, %v11291_v21  ;;  %v11261_v1 = vadd.f32 %v14848_v27, %v19268_v63  ;;  %v11150_v10 = vpop.f32.mrb[55].mxu0 }
 0x873   : > { %11322 = vst.msk [vmem:[%s19276_s22 + $0xa0] sm:$0xff] %vm7642_vm5, %v11290_v13  ;;  %v11260_v19 = vadd.f32 %v19268_v63, %v11150_v10 }
 0x874   : > { %v11293_v9 = vmax.f32 %v11261_v1, 0.0 }
 0x875   : > { %v11292_v41 = vmax.f32 %v11260_v19, 0.0  ;;  %v14851_v18 = vpop.f32.mrb[56].mxu0 }
 0x876   : > { %11325 = vst.msk [vmem:[%s19276_s22 + $0xb8] sm:$0xff] %vm7642_vm5, %v11293_v9  ;;  %v11263_v45 = vadd.f32 %v14851_v18, %v19268_v63  ;;  %v11160_v33 = vpop.f32.mrb[57].mxu0 }
 0x877   : > { %11324 = vst.msk [vmem:[%s19276_s22 + $0xb0] sm:$0xff] %vm7642_vm5, %v11292_v41  ;;  %v11262_v8 = vadd.f32 %v19268_v63, %v11160_v33 }
 0x878   : > { %v11295_v53 = vmax.f32 %v11263_v45, 0.0 }
 0x879   : > { %v11294_v48 = vmax.f32 %v11262_v8, 0.0  ;;  %v14854_v2 = vpop.f32.mrb[58].mxu0 }
 0x87a   : > { %11327 = vst.msk [vmem:[%s19276_s22 + $0xc8] sm:$0xff] %vm7642_vm5, %v11295_v53  ;;  %v11265_v0 = vadd.f32 %v14854_v2, %v19268_v63  ;;  %v11170_v6 = vpop.f32.mrb[59].mxu0 }
 0x87b   : > { %11326 = vst.msk [vmem:[%s19276_s22 + $0xc0] sm:$0xff] %vm7642_vm5, %v11294_v48  ;;  %v11264_v30 = vadd.f32 %v19268_v63, %v11170_v6 }
 0x87c   : > { %v11297_v58 = vmax.f32 %v11265_v0, 0.0 }
 0x87d   : > { %v11296_v61 = vmax.f32 %v11264_v30, 0.0  ;;  %v14857_v14 = vpop.f32.mrb[60].mxu0 }
 0x87e   : > { %11329 = vst.msk [vmem:[%s19276_s22 + $0xd8] sm:$0xff] %vm7642_vm5, %v11297_v58  ;;  %v11267_v11 = vadd.f32 %v14857_v14, %v19268_v63  ;;  %v11180_v38 = vpop.f32.mrb[61].mxu0 }
 0x87f   : > { %11328 = vst.msk [vmem:[%s19276_s22 + $0xd0] sm:$0xff] %vm7642_vm5, %v11296_v61  ;;  %v11266_v42 = vadd.f32 %v19268_v63, %v11180_v38 }
 0x880   : > { %v11299_v57 = vmax.f32 %v11267_v11, 0.0 }
 0x881   : > { %v11298_v56 = vmax.f32 %v11266_v42, 0.0  ;;  %v14860_v39 = vpop.f32.mrb[62].mxu0 }
 0x882   : > { %11331 = vst.msk [vmem:[%s19276_s22 + $0xe8] sm:$0xff] %vm7642_vm5, %v11299_v57  ;;  %v11269_v50 = vadd.f32 %v14860_v39, %v19268_v63  ;;  %v11190_v49 = vpop.f32.mrb[63].mxu0 }
 0x883   : > { %11330 = vst.msk [vmem:[%s19276_s22 + $0xe0] sm:$0xff] %vm7642_vm5, %v11298_v56  ;;  %v11268_v55 = vadd.f32 %v19268_v63, %v11190_v49 }
 0x884   : > { %v11301_v51 = vmax.f32 %v11269_v50, 0.0 }
 0x885   : > { %v11300_v47 = vmax.f32 %v11268_v55, 0.0 }
 0x886   : > { %11333 = vst.msk [vmem:[%s19276_s22 + $0xf8] sm:$0xff] %vm7642_vm5, %v11301_v51 }
 0x887   : > { %11332 = vst.msk [vmem:[%s19276_s22 + $0xf0] sm:$0xff] %vm7642_vm5, %v11300_v47 }
 0x888 PF: > { %s21_s24 = sadd.s32 1, %s16111_s24  }
 0x889   : > { %p18_p9 = scmp.ge.s32.totalorder %s21_s24, 4  }
 0x88b   :  { %20 = sbr.rel (!%p18_p9) target bundleno = 4 (0x4), region = 133 }
 0x892   :  { %11355 = vsyncpa [#allocation6], 1 }
 0x893   :  { %11357 = vsyncpa [#allocation6 + $0x1], 1 }
 0x894   :  { %11358 = vsyncpa [#allocation8], 1 }
 0x895   :  { %11359 = vsyncpa [#allocation11], 1 }
 0x896   :  { %11360 = vsyncpa [#allocation14], 1 }

</bundles_post_ra>
